<compile_context>
chip_gen: v7x
topology: tpu7x:2x2x1
jax: 0.10.0
libtpu: 0.0.40
codegen_flags: <defaults>
</compile_context>

<pallas_src>
import jax
import jax.numpy as jnp
from jax.experimental import pallas as pl
from jax.experimental.pallas import tpu as pltpu

EPS = 1e-5  # nn.BatchNorm3d default
_VMEM_LIMIT = 32 * 1024 * 1024  # safe scoped-VMEM budget on v5e/v6e/v7x


def _row_tile(m, row_bytes, budget=18 * 1024 * 1024, max_rows=2048):
    """Largest multiple-of-8 divisor of m whose double-buffered tile fits budget."""
    budget_rows = (budget // max(1, 2 * row_bytes)) // 8 * 8
    cap = min(max_rows, m, max(8, budget_rows))
    for t in range(cap, 7, -1):
        if t % 8 == 0 and m % t == 0:
            return t
    return m


# ----------------------------- Pallas kernels -------------------------------

def _conv1x1_stats_kernel(x_ref, w_ref, y_ref, st_ref):
    # f32 rows -> bf16 in VMEM -> MXU matmul -> f32 pre-BN activation
    # + per-tile (sum, sum_sq) partials for BN1.
    a = x_ref[...].astype(jnp.bfloat16)
    y = jnp.dot(a, w_ref[...], preferred_element_type=jnp.float32)
    y_ref[...] = y
    st_ref[0] = jnp.concatenate(
        [jnp.sum(y, axis=0, keepdims=True),
         jnp.sum(y * y, axis=0, keepdims=True)], axis=0)


def _make_conv2_kernel(H, W, P, D):
    """3x3x3 conv (stride=1, pad=1) for one output depth plane, with BN1-apply
    + ReLU fused on the three (pre-BN, spatially zero-padded) input planes.

    The 27 taps are constant row-shifts of the three padded depth planes; the
    patch matrix is built entirely in VMEM.  Output lives on the padded spatial
    grid; halo rows are garbage, masked out of the BN2 stats and discarded by
    the wrapper.
    """
    Hp, Wp = H + 2, W + 2
    R = Hp * Wp
    G = Wp + 1  # guard rows covering the largest negative/positive shift

    def kernel(p0_ref, p1_ref, p2_ref, m_ref, s_ref, t_ref, w_ref, y_ref, st_ref):
        d = pl.program_id(1)
        mask = m_ref[...]                       # (R, 1) interior-position mask
        s = s_ref[...]                          # (1, P) folded BN1 scale
        t = t_ref[...]                          # (1, P) folded BN1 shift
        # Depth-pad validity of the three input planes (padded depth d+kd).
        v0 = (d >= 1).astype(jnp.float32)
        v2 = (d <= D - 2).astype(jnp.float32)

        def act(p_ref, v):
            a = jnp.maximum(p_ref[0] * s + t, 0.0)   # BN1-apply + ReLU (f32)
            return a * (mask * v)                    # zero spatial + depth padding

        a0 = act(p0_ref, v0)
        a1 = act(p1_ref, jnp.float32(1.0))
        a2 = act(p2_ref, v2)

        z = jnp.zeros((G, P), jnp.float32)
        stacked = jnp.concatenate([z, a0, a1, a2, z], axis=0)  # (3R + 2G, P)
        cols = []
        for kd in range(3):
            for kh in range(3):
                for kw in range(3):
                    off = G + kd * R + (kh - 1) * Wp + (kw - 1)
                    cols.append(stacked[off:off + R, :])
        patches = jnp.concatenate(cols, axis=1).astype(jnp.bfloat16)   # (R, 27P)
        y = jnp.dot(patches, w_ref[...], preferred_element_type=jnp.float32)
        y_ref[0, 0] = y
        ym = y * mask                                                  # mask halo
        st_ref[0, 0] = jnp.concatenate(
            [jnp.sum(ym, axis=0, keepdims=True),
             jnp.sum(ym * y, axis=0, keepdims=True)], axis=0)

    return kernel


def _bn_relu_matmul_stats_kernel(y_ref, s_ref, t_ref, w_ref, o_ref, st_ref):
    # Folded BN2 + ReLU fused with the conv3 (1x1x1) matmul + BN3 partials.
    a = jnp.maximum(y_ref[...] * s_ref[...] + t_ref[...], 0.0).astype(jnp.bfloat16)
    y = jnp.dot(a, w_ref[...], preferred_element_type=jnp.float32)
    o_ref[...] = y
    st_ref[0] = jnp.concatenate(
        [jnp.sum(y, axis=0, keepdims=True),
         jnp.sum(y * y, axis=0, keepdims=True)], axis=0)


def _bn_add_relu_kernel(y_ref, s_ref, t_ref, r_ref, o_ref):
    # Folded BN3 + residual add + ReLU.
    o_ref[...] = jnp.maximum(y_ref[...] * s_ref[...] + t_ref[...] + r_ref[...], 0.0)


# ----------------------------- wrapper helpers -------------------------------

def _fold_bn(stats, count, gamma, beta):
    """(sum, sum_sq) -> per-channel scale/shift so BN is a single FMA."""
    mean = stats[0] / count
    var = jnp.maximum(stats[1] / count - mean * mean, 0.0)
    scale = gamma.astype(jnp.float32) * jax.lax.rsqrt(var + EPS)
    shift = beta.astype(jnp.float32) - mean * scale
    return scale.reshape(1, -1), shift.reshape(1, -1)


def _conv1x1_with_stats(x_f32, w_bf16):
    M, K = x_f32.shape
    C = w_bf16.shape[1]
    tm = _row_tile(M, 4 * K + 4 * C)
    nt = M // tm
    y, st = pl.pallas_call(
        _conv1x1_stats_kernel,
        grid=(nt,),
        in_specs=[pl.BlockSpec((tm, K), lambda i: (i, 0)),
                  pl.BlockSpec((K, C), lambda i: (0, 0))],
        out_specs=(pl.BlockSpec((tm, C), lambda i: (i, 0)),
                   pl.BlockSpec((1, 2, C), lambda i: (i, 0, 0))),
        out_shape=(jax.ShapeDtypeStruct((M, C), jnp.float32),
                   jax.ShapeDtypeStruct((nt, 2, C), jnp.float32)),
        compiler_params=pltpu.CompilerParams(
            dimension_semantics=("parallel",), vmem_limit_bytes=_VMEM_LIMIT),
        cost_estimate=pl.CostEstimate(
            flops=2 * M * K * C, transcendentals=0,
            bytes_accessed=4 * M * K + 2 * K * C + 4 * M * C),
    )(x_f32, w_bf16)
    return y, jnp.sum(st, axis=0)


def _conv2_with_stats(plane_stack, mask, s1, t1, w2_bf16, N, D, H, W, P):
    Dp, Hp, Wp = D + 2, H + 2, W + 2
    R = Hp * Wp
    kernel = _make_conv2_kernel(H, W, P, D)

    def plane_map(kd):
        # output plane (n, d) reads padded depth d + kd of sample n.
        return lambda n, d: (n * Dp + d + kd, 0, 0)

    y, st = pl.pallas_call(
        kernel,
        grid=(N, D),
        in_specs=[pl.BlockSpec((1, R, P), plane_map(0)),
                  pl.BlockSpec((1, R, P), plane_map(1)),
                  pl.BlockSpec((1, R, P), plane_map(2)),
                  pl.BlockSpec((R, 1), lambda n, d: (0, 0)),
                  pl.BlockSpec((1, P), lambda n, d: (0, 0)),
                  pl.BlockSpec((1, P), lambda n, d: (0, 0)),
                  pl.BlockSpec((27 * P, P), lambda n, d: (0, 0))],
        out_specs=(pl.BlockSpec((1, 1, R, P), lambda n, d: (n, d, 0, 0)),
                   pl.BlockSpec((1, 1, 2, P), lambda n, d: (n, d, 0, 0))),
        out_shape=(jax.ShapeDtypeStruct((N, D, R, P), jnp.float32),
                   jax.ShapeDtypeStruct((N, D, 2, P), jnp.float32)),
        compiler_params=pltpu.CompilerParams(
            dimension_semantics=("parallel", "parallel"),
            vmem_limit_bytes=_VMEM_LIMIT),
        cost_estimate=pl.CostEstimate(
            flops=2 * N * D * R * 27 * P * P, transcendentals=0,
            bytes_accessed=(4 * N * D * 3 * R * P + 4 * N * D * R * P
                            + 2 * 27 * P * P + 4 * R)),
    )(plane_stack, plane_stack, plane_stack, mask, s1, t1, w2_bf16)
    return y, jnp.sum(st, axis=(0, 1))


def _bn_relu_matmul_with_stats(y_pre, scale, shift, w_bf16):
    M, K = y_pre.shape
    C = w_bf16.shape[1]
    tm = _row_tile(M, 4 * K + 4 * C)
    nt = M // tm
    y, st = pl.pallas_call(
        _bn_relu_matmul_stats_kernel,
        grid=(nt,),
        in_specs=[pl.BlockSpec((tm, K), lambda i: (i, 0)),
                  pl.BlockSpec((1, K), lambda i: (0, 0)),
                  pl.BlockSpec((1, K), lambda i: (0, 0)),
                  pl.BlockSpec((K, C), lambda i: (0, 0))],
        out_specs=(pl.BlockSpec((tm, C), lambda i: (i, 0)),
                   pl.BlockSpec((1, 2, C), lambda i: (i, 0, 0))),
        out_shape=(jax.ShapeDtypeStruct((M, C), jnp.float32),
                   jax.ShapeDtypeStruct((nt, 2, C), jnp.float32)),
        compiler_params=pltpu.CompilerParams(
            dimension_semantics=("parallel",), vmem_limit_bytes=_VMEM_LIMIT),
        cost_estimate=pl.CostEstimate(
            flops=2 * M * K * C + 3 * M * K, transcendentals=0,
            bytes_accessed=4 * M * K + 2 * K * C + 4 * M * C),
    )(y_pre, scale, shift, w_bf16)
    return y, jnp.sum(st, axis=0)


def _bn_add_relu_apply(y_pre, scale, shift, residual):
    M, C = y_pre.shape
    tm = _row_tile(M, 3 * 4 * C)
    nt = M // tm
    return pl.pallas_call(
        _bn_add_relu_kernel,
        grid=(nt,),
        in_specs=[pl.BlockSpec((tm, C), lambda i: (i, 0)),
                  pl.BlockSpec((1, C), lambda i: (0, 0)),
                  pl.BlockSpec((1, C), lambda i: (0, 0)),
                  pl.BlockSpec((tm, C), lambda i: (i, 0))],
        out_specs=pl.BlockSpec((tm, C), lambda i: (i, 0)),
        out_shape=jax.ShapeDtypeStruct((M, C), jnp.float32),
        compiler_params=pltpu.CompilerParams(
            dimension_semantics=("parallel",), vmem_limit_bytes=_VMEM_LIMIT),
        cost_estimate=pl.CostEstimate(
            flops=3 * M * C, transcendentals=0, bytes_accessed=12 * M * C),
    )(y_pre, scale, shift, residual)


# ------------------------------- forward --------------------------------------

def init_params(key, inplanes, planes, expansion=4):
    """Deterministic synthetic parameters (shapes match Bottleneck.__init__)."""
    ks = jax.random.split(key, 9)
    w1 = 0.1 * jax.random.normal(ks[0], (planes, inplanes, 1, 1, 1), jnp.float32)
    w2 = 0.1 * jax.random.normal(ks[1], (planes, planes, 3, 3, 3), jnp.float32)
    w3 = 0.1 * jax.random.normal(ks[2], (planes * expansion, planes, 1, 1, 1),
                                 jnp.float32)
    g1 = 1.0 + 0.1 * jax.random.normal(ks[3], (planes,), jnp.float32)
    b1 = 0.1 * jax.random.normal(ks[4], (planes,), jnp.float32)
    g2 = 1.0 + 0.1 * jax.random.normal(ks[5], (planes,), jnp.float32)
    b2 = 0.1 * jax.random.normal(ks[6], (planes,), jnp.float32)
    g3 = 1.0 + 0.1 * jax.random.normal(ks[7], (planes * expansion,), jnp.float32)
    b3 = 0.1 * jax.random.normal(ks[8], (planes * expansion,), jnp.float32)
    return dict(w1=w1, w2=w2, w3=w3, g1=g1, b1=b1, g2=g2, b2=b2, g3=g3, b3=b3)


def bottleneck_forward(x_ncdhw, params):
    """Bottleneck forward (stride=1, dilation=1, downsample=None)."""
    N, Cin, D, H, W = x_ncdhw.shape
    P = params["w1"].shape[0]
    Cout = params["w3"].shape[0]
    assert Cin == Cout, "identity path requires inplanes == planes*expansion"
    M = N * D * H * W

    x2d = jnp.transpose(x_ncdhw, (0, 2, 3, 4, 1)).reshape(M, Cin)   # NDHWC rows
    w1 = params["w1"].reshape(P, Cin).T.astype(jnp.bfloat16)
    w2 = jnp.transpose(params["w2"], (2, 3, 4, 1, 0)).reshape(27 * P, P)
    w2 = w2.astype(jnp.bfloat16)
    w3 = params["w3"].reshape(Cout, P).T.astype(jnp.bfloat16)

    # conv1 (1x1x1) + BN1 stats.
    y1_pre, st1 = _conv1x1_with_stats(x2d, w1)
    s1, t1 = _fold_bn(st1, M, params["g1"], params["b1"])

    # conv2 (3x3x3, padding=1): zero-pad the *pre-BN* activation spatially and
    # in depth; BN1-apply + ReLU happen inside the conv2 kernel (padding
    # positions forced to zero via mask / depth-validity) together with the
    # in-VMEM 27-tap patch construction and BN2 stats.
    Dp, Hp, Wp = D + 2, H + 2, W + 2
    y1p = jnp.pad(y1_pre.reshape(N, D, H, W, P),
                  ((0, 0), (1, 1), (1, 1), (1, 1), (0, 0)))
    plane_stack = y1p.reshape(N * Dp, Hp * Wp, P)
    hh = jnp.arange(Hp).reshape(Hp, 1)
    ww = jnp.arange(Wp).reshape(1, Wp)
    mask = ((hh >= 1) & (hh <= H) & (ww >= 1) & (ww <= W))
    mask = mask.astype(jnp.float32).reshape(Hp * Wp, 1)
    y2_pre_pl, st2 = _conv2_with_stats(plane_stack, mask, s1, t1, w2,
                                       N, D, H, W, P)
    s2, t2 = _fold_bn(st2, M, params["g2"], params["b2"])

    # Interior rows back to (M, P).
    y2_pre = y2_pre_pl.reshape(N, D, Hp, Wp, P)[:, :, 1:1 + H, 1:1 + W, :]
    y2_pre = y2_pre.reshape(M, P)

    # BN2 apply + ReLU fused with conv3 (1x1x1) + BN3 stats.
    y3_pre, st3 = _bn_relu_matmul_with_stats(y2_pre, s2, t2, w3)
    s3, t3 = _fold_bn(st3, M, params["g3"], params["b3"])

    # BN3 apply + residual add + ReLU.
    out2d = _bn_add_relu_apply(y3_pre, s3, t3, x2d)
    out = out2d.reshape(N, D, H, W, Cout)
    return jnp.transpose(out, (0, 4, 1, 2, 3))                # back to NCDHW


# --------------------------- numerics-matched reference ----------------------

def _im2col_3x3x3(y_ndhwc):
    N, D, H, W, C = y_ndhwc.shape
    yp = jnp.pad(y_ndhwc, ((0, 0), (1, 1), (1, 1), (1, 1), (0, 0)))
    cols = []
    for kd in range(3):
        for kh in range(3):
            for kw in range(3):
                cols.append(yp[:, kd:kd + D, kh:kh + H, kw:kw + W, :])
    return jnp.concatenate(cols, axis=-1).reshape(N * D * H * W, 27 * C)


def _bn_fold_ref(y, g, b):
    mean = jnp.mean(y, axis=0)
    var = jnp.maximum(jnp.mean(y * y, axis=0) - mean * mean, 0.0)
    s = g * jax.lax.rsqrt(var + EPS)
    t = b - mean * s
    return s.reshape(1, -1), t.reshape(1, -1)


def bottleneck_ref(x_ncdhw, params):
    N, Cin, D, H, W = x_ncdhw.shape
    P = params["w1"].shape[0]
    Cout = params["w3"].shape[0]
    M = N * D * H * W
    bf = jnp.bfloat16
    x2d = jnp.transpose(x_ncdhw, (0, 2, 3, 4, 1)).reshape(M, Cin)
    w1 = params["w1"].reshape(P, Cin).T
    w2 = jnp.transpose(params["w2"], (2, 3, 4, 1, 0)).reshape(27 * P, P)
    w3 = params["w3"].reshape(Cout, P).T

    y1_pre = jnp.dot(x2d.astype(bf), w1.astype(bf),
                     preferred_element_type=jnp.float32)
    s1, t1 = _bn_fold_ref(y1_pre, params["g1"], params["b1"])
    y1 = jnp.maximum(y1_pre * s1 + t1, 0.0)

    patches = _im2col_3x3x3(y1.reshape(N, D, H, W, P))
    y2_pre = jnp.dot(patches.astype(bf), w2.astype(bf),
                     preferred_element_type=jnp.float32)
    s2, t2 = _bn_fold_ref(y2_pre, params["g2"], params["b2"])
    y2 = jnp.maximum(y2_pre * s2 + t2, 0.0).astype(bf)

    y3_pre = jnp.dot(y2, w3.astype(bf), preferred_element_type=jnp.float32)
    s3, t3 = _bn_fold_ref(y3_pre, params["g3"], params["b3"])
    out2d = jnp.maximum(y3_pre * s3 + t3 + x2d, 0.0)
    return jnp.transpose(out2d.reshape(N, D, H, W, Cout), (0, 4, 1, 2, 3))


# ---------------------------------- main --------------------------------------

if __name__ == "__main__":
    key = jax.random.PRNGKey(0)
    kx, kp = jax.random.split(key)

    # inplanes = planes * expansion so the identity path (downsample=None) holds.
    N, D, H, W = 2, 8, 8, 8
    planes_ch = 4
    inplanes = planes_ch * 4  # 16

    x = jax.random.normal(kx, (N, inplanes, D, H, W), jnp.float32)  # NCDHW
    params = init_params(kp, inplanes, planes_ch)

    fwd = jax.jit(bottleneck_forward)
    out = jax.block_until_ready(fwd(x, params))
    ref = jax.block_until_ready(bottleneck_ref(x, params))

    assert out.shape == (N, inplanes, D, H, W), out.shape
    max_err = float(jnp.max(jnp.abs(out - ref)))
    if not (max_err < 2e-2):
        raise AssertionError(f"Pallas/JAX mismatch: max abs err = {max_err}")

    print("KERNEL_OK")
</pallas_src>

<mosaic_0001>
module attributes {stable_mosaic.version = 11 : i64} {
  func.func @_conv1x1_stats_kernel(%arg0: i32, %arg1: memref<1024x16xf32, #tpu.memory_space<vmem>>, %arg2: memref<16x4xbf16, #tpu.memory_space<vmem>>, %arg3: memref<1024x4xf32, #tpu.memory_space<vmem>>, %arg4: memref<1x2x4xf32, #tpu.memory_space<vmem>>) attributes {dimension_semantics = [#tpu.dimension_semantics<parallel>], iteration_bounds = array<i64: 1>, scalar_prefetch = 0 : i64, scratch_operands = 0 : i64, tpu.core_type = #tpu.core_type<tc>, window_params = [{transform_indices = @transform_0, window_bounds = array<i64: 1024, 16>}, {pipeline_mode = #tpu.pipeline_mode<synchronous>, transform_indices = @transform_1, window_bounds = array<i64: 16, 4>}, {transform_indices = @transform_2, window_bounds = array<i64: 1024, 4>}, {transform_indices = @transform_3, window_bounds = array<i64: 1, 2, 4>}]} {
    %c0 = arith.constant 0 : index
    %c0_0 = arith.constant 0 : index
    %0 = vector.load %arg1[%c0, %c0_0] : memref<1024x16xf32, #tpu.memory_space<vmem>>, vector<1024x16xf32>
    %1 = arith.truncf %0 : vector<1024x16xf32> to vector<1024x16xbf16>
    %c0_1 = arith.constant 0 : index
    %c0_2 = arith.constant 0 : index
    %2 = vector.load %arg2[%c0_1, %c0_2] : memref<16x4xbf16, #tpu.memory_space<vmem>>, vector<16x4xbf16>
    %cst = arith.constant dense<0.000000e+00> : vector<1024x4xf32>
    %3 = tpu.matmul %1, %2, %cst {dimension_numbers = #tpu.dot_dimension_numbers<[1], [0], [0], [1], [0, 0, 1, 1], [], []>} : vector<1024x16xbf16>, vector<16x4xbf16>, vector<1024x4xf32> -> vector<1024x4xf32>
    %c0_3 = arith.constant 0 : index
    %c0_4 = arith.constant 0 : index
    %4 = vector.load %arg3[%c0_3, %c0_4] : memref<1024x4xf32, #tpu.memory_space<vmem>>, vector<1024x4xf32>
    tpu.vector_store %arg3[%c0_3, %c0_4], %3 {strides = array<i32>} : memref<1024x4xf32, #tpu.memory_space<vmem>>, vector<1024x4xf32>,
    %cst_5 = arith.constant dense<0.000000e+00> : vector<4xf32>
    %5 = vector.multi_reduction <add>, %3, %cst_5 [0] : vector<1024x4xf32> to vector<4xf32>
    %6 = vector.shape_cast %5 : vector<4xf32> to vector<1x4xf32>
    %7 = arith.mulf %3, %3 : vector<1024x4xf32>
    %cst_6 = arith.constant dense<0.000000e+00> : vector<4xf32>
    %8 = vector.multi_reduction <add>, %7, %cst_6 [0] : vector<1024x4xf32> to vector<4xf32>
    %9 = vector.shape_cast %8 : vector<4xf32> to vector<1x4xf32>
    %10 = tpu.concatenate %6, %9 in 0 : vector<1x4xf32>, vector<1x4xf32> -> vector<2x4xf32>
    %c0_7 = arith.constant 0 : index
    %c0_8 = arith.constant 0 : index
    %c0_9 = arith.constant 0 : index
    %11 = vector.load %arg4[%c0_7, %c0_8, %c0_9] : memref<1x2x4xf32, #tpu.memory_space<vmem>>, vector<1x2x4xf32>
    %12 = vector.shape_cast %11 : vector<1x2x4xf32> to vector<2x4xf32>
    %13 = vector.shape_cast %10 : vector<2x4xf32> to vector<1x2x4xf32>
    tpu.vector_store %arg4[%c0_7, %c0_8, %c0_9], %13 {strides = array<i32>} : memref<1x2x4xf32, #tpu.memory_space<vmem>>, vector<1x2x4xf32>,
    return
  }
  func.func @transform_0(%arg0: i32) -> (i32, i32) {
    %c0_i32 = arith.constant 0 : i32
    %c0_i32_0 = arith.constant 0 : i32
    return %arg0, %c0_i32 : i32, i32
  }
  func.func @transform_1(%arg0: i32) -> (i32, i32) {
    %c0_i32 = arith.constant 0 : i32
    %c0_i32_0 = arith.constant 0 : i32
    %c0_i32_1 = arith.constant 0 : i32
    return %c0_i32, %c0_i32_0 : i32, i32
  }
  func.func @transform_2(%arg0: i32) -> (i32, i32) {
    %c0_i32 = arith.constant 0 : i32
    %c0_i32_0 = arith.constant 0 : i32
    return %arg0, %c0_i32 : i32, i32
  }
  func.func @transform_3(%arg0: i32) -> (i32, i32, i32) {
    %c0_i32 = arith.constant 0 : i32
    %c0_i32_0 = arith.constant 0 : i32
    %c0_i32_1 = arith.constant 0 : i32
    return %arg0, %c0_i32, %c0_i32_0 : i32, i32, i32
  }
}

module attributes {stable_mosaic.version = 11 : i64} {
  func.func @kernel(%arg0: i32, %arg1: i32, %arg2: memref<1x100x4xf32, #tpu.memory_space<vmem>>, %arg3: memref<1x100x4xf32, #tpu.memory_space<vmem>>, %arg4: memref<1x100x4xf32, #tpu.memory_space<vmem>>, %arg5: memref<100x1xf32, #tpu.memory_space<vmem>>, %arg6: memref<1x4xf32, #tpu.memory_space<vmem>>, %arg7: memref<1x4xf32, #tpu.memory_space<vmem>>, %arg8: memref<108x4xbf16, #tpu.memory_space<vmem>>, %arg9: memref<1x1x100x4xf32, #tpu.memory_space<vmem>>, %arg10: memref<1x1x2x4xf32, #tpu.memory_space<vmem>>) attributes {dimension_semantics = [#tpu.dimension_semantics<parallel>, #tpu.dimension_semantics<parallel>], iteration_bounds = array<i64: 2, 8>, scalar_prefetch = 0 : i64, scratch_operands = 0 : i64, tpu.core_type = #tpu.core_type<tc>, window_params = [{transform_indices = @transform_0, window_bounds = array<i64: 1, 100, 4>}, {transform_indices = @transform_1, window_bounds = array<i64: 1, 100, 4>}, {transform_indices = @transform_2, window_bounds = array<i64: 1, 100, 4>}, {pipeline_mode = #tpu.pipeline_mode<synchronous>, transform_indices = @transform_3, window_bounds = array<i64: 100, 1>}, {pipeline_mode = #tpu.pipeline_mode<synchronous>, transform_indices = @transform_4, window_bounds = array<i64: 1, 4>}, {pipeline_mode = #tpu.pipeline_mode<synchronous>, transform_indices = @transform_5, window_bounds = array<i64: 1, 4>}, {pipeline_mode = #tpu.pipeline_mode<synchronous>, transform_indices = @transform_6, window_bounds = array<i64: 108, 4>}, {transform_indices = @transform_7, window_bounds = array<i64: 1, 1, 100, 4>}, {transform_indices = @transform_8, window_bounds = array<i64: 1, 1, 2, 4>}]} {
    %c0 = arith.constant 0 : index
    %c0_0 = arith.constant 0 : index
    %0 = vector.load %arg5[%c0, %c0_0] : memref<100x1xf32, #tpu.memory_space<vmem>>, vector<100x1xf32>
    %c0_1 = arith.constant 0 : index
    %c0_2 = arith.constant 0 : index
    %1 = vector.load %arg6[%c0_1, %c0_2] : memref<1x4xf32, #tpu.memory_space<vmem>>, vector<1x4xf32>
    %c0_3 = arith.constant 0 : index
    %c0_4 = arith.constant 0 : index
    %2 = vector.load %arg7[%c0_3, %c0_4] : memref<1x4xf32, #tpu.memory_space<vmem>>, vector<1x4xf32>
    %c1_i32 = arith.constant 1 : i32
    %3 = arith.cmpi sge, %arg1, %c1_i32 : i32
    %4 = arith.extui %3 : i1 to i32
    %5 = arith.sitofp %4 : i32 to f32
    %c6_i32 = arith.constant 6 : i32
    %6 = arith.cmpi sle, %arg1, %c6_i32 : i32
    %7 = arith.extui %6 : i1 to i32
    %8 = arith.sitofp %7 : i32 to f32
    %c0_5 = arith.constant 0 : index
    %c0_6 = arith.constant 0 : index
    %c0_7 = arith.constant 0 : index
    %9 = vector.load %arg2[%c0_5, %c0_6, %c0_7] : memref<1x100x4xf32, #tpu.memory_space<vmem>>, vector<1x100x4xf32>
    %10 = vector.shape_cast %9 : vector<1x100x4xf32> to vector<100x4xf32>
    %11 = vector.broadcast %1 : vector<1x4xf32> to vector<100x4xf32>
    %12 = arith.mulf %10, %11 : vector<100x4xf32>
    %13 = vector.broadcast %2 : vector<1x4xf32> to vector<100x4xf32>
    %14 = arith.addf %12, %13 : vector<100x4xf32>
    %cst = arith.constant 0.000000e+00 : f32
    %15 = vector.broadcast %cst : f32 to vector<100x4xf32>
    %16 = arith.maximumf %14, %15 : vector<100x4xf32>
    %17 = vector.broadcast %5 : f32 to vector<100x1xf32>
    %18 = arith.mulf %0, %17 : vector<100x1xf32>
    %19 = vector.broadcast %18 : vector<100x1xf32> to vector<100x4xf32>
    %20 = arith.mulf %16, %19 : vector<100x4xf32>
    %c0_8 = arith.constant 0 : index
    %c0_9 = arith.constant 0 : index
    %c0_10 = arith.constant 0 : index
    %21 = vector.load %arg3[%c0_8, %c0_9, %c0_10] : memref<1x100x4xf32, #tpu.memory_space<vmem>>, vector<1x100x4xf32>
    %22 = vector.shape_cast %21 : vector<1x100x4xf32> to vector<100x4xf32>
    %23 = vector.broadcast %1 : vector<1x4xf32> to vector<100x4xf32>
    %24 = arith.mulf %22, %23 : vector<100x4xf32>
    %25 = vector.broadcast %2 : vector<1x4xf32> to vector<100x4xf32>
    %26 = arith.addf %24, %25 : vector<100x4xf32>
    %cst_11 = arith.constant 0.000000e+00 : f32
    %27 = vector.broadcast %cst_11 : f32 to vector<100x4xf32>
    %28 = arith.maximumf %26, %27 : vector<100x4xf32>
    %cst_12 = arith.constant 1.000000e+00 : f32
    %29 = vector.broadcast %cst_12 : f32 to vector<100x1xf32>
    %30 = arith.mulf %0, %29 : vector<100x1xf32>
    %31 = vector.broadcast %30 : vector<100x1xf32> to vector<100x4xf32>
    %32 = arith.mulf %28, %31 : vector<100x4xf32>
    %c0_13 = arith.constant 0 : index
    %c0_14 = arith.constant 0 : index
    %c0_15 = arith.constant 0 : index
    %33 = vector.load %arg4[%c0_13, %c0_14, %c0_15] : memref<1x100x4xf32, #tpu.memory_space<vmem>>, vector<1x100x4xf32>
    %34 = vector.shape_cast %33 : vector<1x100x4xf32> to vector<100x4xf32>
    %35 = vector.broadcast %1 : vector<1x4xf32> to vector<100x4xf32>
    %36 = arith.mulf %34, %35 : vector<100x4xf32>
    %37 = vector.broadcast %2 : vector<1x4xf32> to vector<100x4xf32>
    %38 = arith.addf %36, %37 : vector<100x4xf32>
    %cst_16 = arith.constant 0.000000e+00 : f32
    %39 = vector.broadcast %cst_16 : f32 to vector<100x4xf32>
    %40 = arith.maximumf %38, %39 : vector<100x4xf32>
    %41 = vector.broadcast %8 : f32 to vector<100x1xf32>
    %42 = arith.mulf %0, %41 : vector<100x1xf32>
    %43 = vector.broadcast %42 : vector<100x1xf32> to vector<100x4xf32>
    %44 = arith.mulf %40, %43 : vector<100x4xf32>
    %cst_17 = arith.constant 0.000000e+00 : f32
    %45 = vector.broadcast %cst_17 : f32 to vector<11x4xf32>
    %46 = tpu.concatenate %45, %20, %32, %44, %45 in 0 : vector<11x4xf32>, vector<100x4xf32>, vector<100x4xf32>, vector<100x4xf32>, vector<11x4xf32> -> vector<322x4xf32>
    %47 = vector.extract_strided_slice %46 {offsets = [0, 0], sizes = [100, 4], strides = [1, 1]} : vector<322x4xf32> to vector<100x4xf32>
    %48 = vector.extract_strided_slice %46 {offsets = [1, 0], sizes = [100, 4], strides = [1, 1]} : vector<322x4xf32> to vector<100x4xf32>
    %49 = vector.extract_strided_slice %46 {offsets = [2, 0], sizes = [100, 4], strides = [1, 1]} : vector<322x4xf32> to vector<100x4xf32>
    %50 = vector.extract_strided_slice %46 {offsets = [10, 0], sizes = [100, 4], strides = [1, 1]} : vector<322x4xf32> to vector<100x4xf32>
    %51 = vector.extract_strided_slice %46 {offsets = [11, 0], sizes = [100, 4], strides = [1, 1]} : vector<322x4xf32> to vector<100x4xf32>
    %52 = vector.extract_strided_slice %46 {offsets = [12, 0], sizes = [100, 4], strides = [1, 1]} : vector<322x4xf32> to vector<100x4xf32>
    %53 = vector.extract_strided_slice %46 {offsets = [20, 0], sizes = [100, 4], strides = [1, 1]} : vector<322x4xf32> to vector<100x4xf32>
    %54 = vector.extract_strided_slice %46 {offsets = [21, 0], sizes = [100, 4], strides = [1, 1]} : vector<322x4xf32> to vector<100x4xf32>
    %55 = vector.extract_strided_slice %46 {offsets = [22, 0], sizes = [100, 4], strides = [1, 1]} : vector<322x4xf32> to vector<100x4xf32>
    %56 = vector.extract_strided_slice %46 {offsets = [100, 0], sizes = [100, 4], strides = [1, 1]} : vector<322x4xf32> to vector<100x4xf32>
    %57 = vector.extract_strided_slice %46 {offsets = [101, 0], sizes = [100, 4], strides = [1, 1]} : vector<322x4xf32> to vector<100x4xf32>
    %58 = vector.extract_strided_slice %46 {offsets = [102, 0], sizes = [100, 4], strides = [1, 1]} : vector<322x4xf32> to vector<100x4xf32>
    %59 = vector.extract_strided_slice %46 {offsets = [110, 0], sizes = [100, 4], strides = [1, 1]} : vector<322x4xf32> to vector<100x4xf32>
    %60 = vector.extract_strided_slice %46 {offsets = [111, 0], sizes = [100, 4], strides = [1, 1]} : vector<322x4xf32> to vector<100x4xf32>
    %61 = vector.extract_strided_slice %46 {offsets = [112, 0], sizes = [100, 4], strides = [1, 1]} : vector<322x4xf32> to vector<100x4xf32>
    %62 = vector.extract_strided_slice %46 {offsets = [120, 0], sizes = [100, 4], strides = [1, 1]} : vector<322x4xf32> to vector<100x4xf32>
    %63 = vector.extract_strided_slice %46 {offsets = [121, 0], sizes = [100, 4], strides = [1, 1]} : vector<322x4xf32> to vector<100x4xf32>
    %64 = vector.extract_strided_slice %46 {offsets = [122, 0], sizes = [100, 4], strides = [1, 1]} : vector<322x4xf32> to vector<100x4xf32>
    %65 = vector.extract_strided_slice %46 {offsets = [200, 0], sizes = [100, 4], strides = [1, 1]} : vector<322x4xf32> to vector<100x4xf32>
    %66 = vector.extract_strided_slice %46 {offsets = [201, 0], sizes = [100, 4], strides = [1, 1]} : vector<322x4xf32> to vector<100x4xf32>
    %67 = vector.extract_strided_slice %46 {offsets = [202, 0], sizes = [100, 4], strides = [1, 1]} : vector<322x4xf32> to vector<100x4xf32>
    %68 = vector.extract_strided_slice %46 {offsets = [210, 0], sizes = [100, 4], strides = [1, 1]} : vector<322x4xf32> to vector<100x4xf32>
    %69 = vector.extract_strided_slice %46 {offsets = [211, 0], sizes = [100, 4], strides = [1, 1]} : vector<322x4xf32> to vector<100x4xf32>
    %70 = vector.extract_strided_slice %46 {offsets = [212, 0], sizes = [100, 4], strides = [1, 1]} : vector<322x4xf32> to vector<100x4xf32>
    %71 = vector.extract_strided_slice %46 {offsets = [220, 0], sizes = [100, 4], strides = [1, 1]} : vector<322x4xf32> to vector<100x4xf32>
    %72 = vector.extract_strided_slice %46 {offsets = [221, 0], sizes = [100, 4], strides = [1, 1]} : vector<322x4xf32> to vector<100x4xf32>
    %73 = vector.extract_strided_slice %46 {offsets = [222, 0], sizes = [100, 4], strides = [1, 1]} : vector<322x4xf32> to vector<100x4xf32>
    %74 = tpu.concatenate %47, %48, %49, %50, %51, %52, %53, %54, %55, %56, %57, %58, %59, %60, %61, %62 in 1 : vector<100x4xf32>, vector<100x4xf32>, vector<100x4xf32>, vector<100x4xf32>, vector<100x4xf32>, vector<100x4xf32>, vector<100x4xf32>, vector<100x4xf32>, vector<100x4xf32>, vector<100x4xf32>, vector<100x4xf32>, vector<100x4xf32>, vector<100x4xf32>, vector<100x4xf32>, vector<100x4xf32>, vector<100x4xf32> -> vector<100x64xf32>
    %75 = tpu.concatenate %63, %64, %65, %66, %67, %68, %69, %70, %71, %72, %73 in 1 : vector<100x4xf32>, vector<100x4xf32>, vector<100x4xf32>, vector<100x4xf32>, vector<100x4xf32>, vector<100x4xf32>, vector<100x4xf32>, vector<100x4xf32>, vector<100x4xf32>, vector<100x4xf32>, vector<100x4xf32> -> vector<100x44xf32>
    %76 = tpu.concatenate %74, %75 in 1 : vector<100x64xf32>, vector<100x44xf32> -> vector<100x108xf32>
    %77 = arith.truncf %76 : vector<100x108xf32> to vector<100x108xbf16>
    %c0_18 = arith.constant 0 : index
    %c0_19 = arith.constant 0 : index
    %78 = vector.load %arg8[%c0_18, %c0_19] : memref<108x4xbf16, #tpu.memory_space<vmem>>, vector<108x4xbf16>
    %cst_20 = arith.constant dense<0.000000e+00> : vector<100x4xf32>
    %79 = tpu.matmul %77, %78, %cst_20 {dimension_numbers = #tpu.dot_dimension_numbers<[1], [0], [0], [1], [0, 0, 1, 1], [], []>} : vector<100x108xbf16>, vector<108x4xbf16>, vector<100x4xf32> -> vector<100x4xf32>
    %c0_21 = arith.constant 0 : index
    %c0_22 = arith.constant 0 : index
    %c0_23 = arith.constant 0 : index
    %c0_24 = arith.constant 0 : index
    %80 = vector.load %arg9[%c0_21, %c0_22, %c0_23, %c0_24] : memref<1x1x100x4xf32, #tpu.memory_space<vmem>>, vector<1x1x100x4xf32>
    %81 = vector.shape_cast %80 : vector<1x1x100x4xf32> to vector<100x4xf32>
    %82 = vector.shape_cast %79 : vector<100x4xf32> to vector<1x1x100x4xf32>
    tpu.vector_store %arg9[%c0_21, %c0_22, %c0_23, %c0_24], %82 {strides = array<i32>} : memref<1x1x100x4xf32, #tpu.memory_space<vmem>>, vector<1x1x100x4xf32>,
    %83 = vector.broadcast %0 : vector<100x1xf32> to vector<100x4xf32>
    %84 = arith.mulf %79, %83 : vector<100x4xf32>
    %cst_25 = arith.constant dense<0.000000e+00> : vector<4xf32>
    %85 = vector.multi_reduction <add>, %84, %cst_25 [0] : vector<100x4xf32> to vector<4xf32>
    %86 = vector.shape_cast %85 : vector<4xf32> to vector<1x4xf32>
    %87 = arith.mulf %84, %79 : vector<100x4xf32>
    %cst_26 = arith.constant dense<0.000000e+00> : vector<4xf32>
    %88 = vector.multi_reduction <add>, %87, %cst_26 [0] : vector<100x4xf32> to vector<4xf32>
    %89 = vector.shape_cast %88 : vector<4xf32> to vector<1x4xf32>
    %90 = tpu.concatenate %86, %89 in 0 : vector<1x4xf32>, vector<1x4xf32> -> vector<2x4xf32>
    %c0_27 = arith.constant 0 : index
    %c0_28 = arith.constant 0 : index
    %c0_29 = arith.constant 0 : index
    %c0_30 = arith.constant 0 : index
    %91 = vector.load %arg10[%c0_27, %c0_28, %c0_29, %c0_30] : memref<1x1x2x4xf32, #tpu.memory_space<vmem>>, vector<1x1x2x4xf32>
    %92 = vector.shape_cast %91 : vector<1x1x2x4xf32> to vector<2x4xf32>
    %93 = vector.shape_cast %90 : vector<2x4xf32> to vector<1x1x2x4xf32>
    tpu.vector_store %arg10[%c0_27, %c0_28, %c0_29, %c0_30], %93 {strides = array<i32>} : memref<1x1x2x4xf32, #tpu.memory_space<vmem>>, vector<1x1x2x4xf32>,
    return
  }
  func.func @transform_0(%arg0: i32, %arg1: i32) -> (i32, i32, i32) {
    %c10_i32 = arith.constant 10 : i32
    %0 = arith.muli %arg0, %c10_i32 : i32
    %1 = arith.addi %0, %arg1 : i32
    %c0_i32 = arith.constant 0 : i32
    %2 = arith.addi %1, %c0_i32 : i32
    %c0_i32_0 = arith.constant 0 : i32
    %c0_i32_1 = arith.constant 0 : i32
    %c0_i32_2 = arith.constant 0 : i32
    return %2, %c0_i32_0, %c0_i32_1 : i32, i32, i32
  }
  func.func @transform_1(%arg0: i32, %arg1: i32) -> (i32, i32, i32) {
    %c10_i32 = arith.constant 10 : i32
    %0 = arith.muli %arg0, %c10_i32 : i32
    %1 = arith.addi %0, %arg1 : i32
    %c1_i32 = arith.constant 1 : i32
    %2 = arith.addi %1, %c1_i32 : i32
    %c0_i32 = arith.constant 0 : i32
    %c0_i32_0 = arith.constant 0 : i32
    %c0_i32_1 = arith.constant 0 : i32
    return %2, %c0_i32, %c0_i32_0 : i32, i32, i32
  }
  func.func @transform_2(%arg0: i32, %arg1: i32) -> (i32, i32, i32) {
    %c10_i32 = arith.constant 10 : i32
    %0 = arith.muli %arg0, %c10_i32 : i32
    %1 = arith.addi %0, %arg1 : i32
    %c2_i32 = arith.constant 2 : i32
    %2 = arith.addi %1, %c2_i32 : i32
    %c0_i32 = arith.constant 0 : i32
    %c0_i32_0 = arith.constant 0 : i32
    %c0_i32_1 = arith.constant 0 : i32
    return %2, %c0_i32, %c0_i32_0 : i32, i32, i32
  }
  func.func @transform_3(%arg0: i32, %arg1: i32) -> (i32, i32) {
    %c0_i32 = arith.constant 0 : i32
    %c0_i32_0 = arith.constant 0 : i32
    %c0_i32_1 = arith.constant 0 : i32
    return %c0_i32, %c0_i32_0 : i32, i32
  }
  func.func @transform_4(%arg0: i32, %arg1: i32) -> (i32, i32) {
    %c0_i32 = arith.constant 0 : i32
    %c0_i32_0 = arith.constant 0 : i32
    %c0_i32_1 = arith.constant 0 : i32
    return %c0_i32, %c0_i32_0 : i32, i32
  }
  func.func @transform_5(%arg0: i32, %arg1: i32) -> (i32, i32) {
    %c0_i32 = arith.constant 0 : i32
    %c0_i32_0 = arith.constant 0 : i32
    %c0_i32_1 = arith.constant 0 : i32
    return %c0_i32, %c0_i32_0 : i32, i32
  }
  func.func @transform_6(%arg0: i32, %arg1: i32) -> (i32, i32) {
    %c0_i32 = arith.constant 0 : i32
    %c0_i32_0 = arith.constant 0 : i32
    %c0_i32_1 = arith.constant 0 : i32
    return %c0_i32, %c0_i32_0 : i32, i32
  }
  func.func @transform_7(%arg0: i32, %arg1: i32) -> (i32, i32, i32, i32) {
    %c0_i32 = arith.constant 0 : i32
    %c0_i32_0 = arith.constant 0 : i32
    %c0_i32_1 = arith.constant 0 : i32
    return %arg0, %arg1, %c0_i32, %c0_i32_0 : i32, i32, i32, i32
  }
  func.func @transform_8(%arg0: i32, %arg1: i32) -> (i32, i32, i32, i32) {
    %c0_i32 = arith.constant 0 : i32
    %c0_i32_0 = arith.constant 0 : i32
    %c0_i32_1 = arith.constant 0 : i32
    return %arg0, %arg1, %c0_i32, %c0_i32_0 : i32, i32, i32, i32
  }
}

module attributes {stable_mosaic.version = 11 : i64} {
  func.func @_bn_relu_matmul_stats_kernel(%arg0: i32, %arg1: memref<1024x4xf32, #tpu.memory_space<vmem>>, %arg2: memref<1x4xf32, #tpu.memory_space<vmem>>, %arg3: memref<1x4xf32, #tpu.memory_space<vmem>>, %arg4: memref<4x16xbf16, #tpu.memory_space<vmem>>, %arg5: memref<1024x16xf32, #tpu.memory_space<vmem>>, %arg6: memref<1x2x16xf32, #tpu.memory_space<vmem>>) attributes {dimension_semantics = [#tpu.dimension_semantics<parallel>], iteration_bounds = array<i64: 1>, scalar_prefetch = 0 : i64, scratch_operands = 0 : i64, tpu.core_type = #tpu.core_type<tc>, window_params = [{transform_indices = @transform_0, window_bounds = array<i64: 1024, 4>}, {pipeline_mode = #tpu.pipeline_mode<synchronous>, transform_indices = @transform_1, window_bounds = array<i64: 1, 4>}, {pipeline_mode = #tpu.pipeline_mode<synchronous>, transform_indices = @transform_2, window_bounds = array<i64: 1, 4>}, {pipeline_mode = #tpu.pipeline_mode<synchronous>, transform_indices = @transform_3, window_bounds = array<i64: 4, 16>}, {transform_indices = @transform_4, window_bounds = array<i64: 1024, 16>}, {transform_indices = @transform_5, window_bounds = array<i64: 1, 2, 16>}]} {
    %c0 = arith.constant 0 : index
    %c0_0 = arith.constant 0 : index
    %0 = vector.load %arg1[%c0, %c0_0] : memref<1024x4xf32, #tpu.memory_space<vmem>>, vector<1024x4xf32>
    %c0_1 = arith.constant 0 : index
    %c0_2 = arith.constant 0 : index
    %1 = vector.load %arg2[%c0_1, %c0_2] : memref<1x4xf32, #tpu.memory_space<vmem>>, vector<1x4xf32>
    %2 = vector.broadcast %1 : vector<1x4xf32> to vector<1024x4xf32>
    %3 = arith.mulf %0, %2 : vector<1024x4xf32>
    %c0_3 = arith.constant 0 : index
    %c0_4 = arith.constant 0 : index
    %4 = vector.load %arg3[%c0_3, %c0_4] : memref<1x4xf32, #tpu.memory_space<vmem>>, vector<1x4xf32>
    %5 = vector.broadcast %4 : vector<1x4xf32> to vector<1024x4xf32>
    %6 = arith.addf %3, %5 : vector<1024x4xf32>
    %cst = arith.constant 0.000000e+00 : f32
    %7 = vector.broadcast %cst : f32 to vector<1024x4xf32>
    %8 = arith.maximumf %6, %7 : vector<1024x4xf32>
    %9 = arith.truncf %8 : vector<1024x4xf32> to vector<1024x4xbf16>
    %c0_5 = arith.constant 0 : index
    %c0_6 = arith.constant 0 : index
    %10 = vector.load %arg4[%c0_5, %c0_6] : memref<4x16xbf16, #tpu.memory_space<vmem>>, vector<4x16xbf16>
    %cst_7 = arith.constant dense<0.000000e+00> : vector<1024x16xf32>
    %11 = tpu.matmul %9, %10, %cst_7 {dimension_numbers = #tpu.dot_dimension_numbers<[1], [0], [0], [1], [0, 0, 1, 1], [], []>} : vector<1024x4xbf16>, vector<4x16xbf16>, vector<1024x16xf32> -> vector<1024x16xf32>
    %c0_8 = arith.constant 0 : index
    %c0_9 = arith.constant 0 : index
    %12 = vector.load %arg5[%c0_8, %c0_9] : memref<1024x16xf32, #tpu.memory_space<vmem>>, vector<1024x16xf32>
    tpu.vector_store %arg5[%c0_8, %c0_9], %11 {strides = array<i32>} : memref<1024x16xf32, #tpu.memory_space<vmem>>, vector<1024x16xf32>,
    %cst_10 = arith.constant dense<0.000000e+00> : vector<16xf32>
    %13 = vector.multi_reduction <add>, %11, %cst_10 [0] : vector<1024x16xf32> to vector<16xf32>
    %14 = vector.shape_cast %13 : vector<16xf32> to vector<1x16xf32>
    %15 = arith.mulf %11, %11 : vector<1024x16xf32>
    %cst_11 = arith.constant dense<0.000000e+00> : vector<16xf32>
    %16 = vector.multi_reduction <add>, %15, %cst_11 [0] : vector<1024x16xf32> to vector<16xf32>
    %17 = vector.shape_cast %16 : vector<16xf32> to vector<1x16xf32>
    %18 = tpu.concatenate %14, %17 in 0 : vector<1x16xf32>, vector<1x16xf32> -> vector<2x16xf32>
    %c0_12 = arith.constant 0 : index
    %c0_13 = arith.constant 0 : index
    %c0_14 = arith.constant 0 : index
    %19 = vector.load %arg6[%c0_12, %c0_13, %c0_14] : memref<1x2x16xf32, #tpu.memory_space<vmem>>, vector<1x2x16xf32>
    %20 = vector.shape_cast %19 : vector<1x2x16xf32> to vector<2x16xf32>
    %21 = vector.shape_cast %18 : vector<2x16xf32> to vector<1x2x16xf32>
    tpu.vector_store %arg6[%c0_12, %c0_13, %c0_14], %21 {strides = array<i32>} : memref<1x2x16xf32, #tpu.memory_space<vmem>>, vector<1x2x16xf32>,
    return
  }
  func.func @transform_0(%arg0: i32) -> (i32, i32) {
    %c0_i32 = arith.constant 0 : i32
    %c0_i32_0 = arith.constant 0 : i32
    return %arg0, %c0_i32 : i32, i32
  }
  func.func @transform_1(%arg0: i32) -> (i32, i32) {
    %c0_i32 = arith.constant 0 : i32
    %c0_i32_0 = arith.constant 0 : i32
    %c0_i32_1 = arith.constant 0 : i32
    return %c0_i32, %c0_i32_0 : i32, i32
  }
  func.func @transform_2(%arg0: i32) -> (i32, i32) {
    %c0_i32 = arith.constant 0 : i32
    %c0_i32_0 = arith.constant 0 : i32
    %c0_i32_1 = arith.constant 0 : i32
    return %c0_i32, %c0_i32_0 : i32, i32
  }
  func.func @transform_3(%arg0: i32) -> (i32, i32) {
    %c0_i32 = arith.constant 0 : i32
    %c0_i32_0 = arith.constant 0 : i32
    %c0_i32_1 = arith.constant 0 : i32
    return %c0_i32, %c0_i32_0 : i32, i32
  }
  func.func @transform_4(%arg0: i32) -> (i32, i32) {
    %c0_i32 = arith.constant 0 : i32
    %c0_i32_0 = arith.constant 0 : i32
    return %arg0, %c0_i32 : i32, i32
  }
  func.func @transform_5(%arg0: i32) -> (i32, i32, i32) {
    %c0_i32 = arith.constant 0 : i32
    %c0_i32_0 = arith.constant 0 : i32
    %c0_i32_1 = arith.constant 0 : i32
    return %arg0, %c0_i32, %c0_i32_0 : i32, i32, i32
  }
}

module attributes {stable_mosaic.version = 11 : i64} {
  func.func @_bn_add_relu_kernel(%arg0: i32, %arg1: memref<1024x16xf32, #tpu.memory_space<vmem>>, %arg2: memref<1x16xf32, #tpu.memory_space<vmem>>, %arg3: memref<1x16xf32, #tpu.memory_space<vmem>>, %arg4: memref<1024x16xf32, #tpu.memory_space<vmem>>, %arg5: memref<1024x16xf32, #tpu.memory_space<vmem>>) attributes {dimension_semantics = [#tpu.dimension_semantics<parallel>], iteration_bounds = array<i64: 1>, scalar_prefetch = 0 : i64, scratch_operands = 0 : i64, tpu.core_type = #tpu.core_type<tc>, window_params = [{transform_indices = @transform_0, window_bounds = array<i64: 1024, 16>}, {pipeline_mode = #tpu.pipeline_mode<synchronous>, transform_indices = @transform_1, window_bounds = array<i64: 1, 16>}, {pipeline_mode = #tpu.pipeline_mode<synchronous>, transform_indices = @transform_2, window_bounds = array<i64: 1, 16>}, {transform_indices = @transform_3, window_bounds = array<i64: 1024, 16>}, {transform_indices = @transform_4, window_bounds = array<i64: 1024, 16>}]} {
    %c0 = arith.constant 0 : index
    %c0_0 = arith.constant 0 : index
    %0 = vector.load %arg1[%c0, %c0_0] : memref<1024x16xf32, #tpu.memory_space<vmem>>, vector<1024x16xf32>
    %c0_1 = arith.constant 0 : index
    %c0_2 = arith.constant 0 : index
    %1 = vector.load %arg2[%c0_1, %c0_2] : memref<1x16xf32, #tpu.memory_space<vmem>>, vector<1x16xf32>
    %2 = vector.broadcast %1 : vector<1x16xf32> to vector<1024x16xf32>
    %3 = arith.mulf %0, %2 : vector<1024x16xf32>
    %c0_3 = arith.constant 0 : index
    %c0_4 = arith.constant 0 : index
    %4 = vector.load %arg3[%c0_3, %c0_4] : memref<1x16xf32, #tpu.memory_space<vmem>>, vector<1x16xf32>
    %5 = vector.broadcast %4 : vector<1x16xf32> to vector<1024x16xf32>
    %6 = arith.addf %3, %5 : vector<1024x16xf32>
    %c0_5 = arith.constant 0 : index
    %c0_6 = arith.constant 0 : index
    %7 = vector.load %arg4[%c0_5, %c0_6] : memref<1024x16xf32, #tpu.memory_space<vmem>>, vector<1024x16xf32>
    %8 = arith.addf %6, %7 : vector<1024x16xf32>
    %cst = arith.constant 0.000000e+00 : f32
    %9 = vector.broadcast %cst : f32 to vector<1024x16xf32>
    %10 = arith.maximumf %8, %9 : vector<1024x16xf32>
    %c0_7 = arith.constant 0 : index
    %c0_8 = arith.constant 0 : index
    %11 = vector.load %arg5[%c0_7, %c0_8] : memref<1024x16xf32, #tpu.memory_space<vmem>>, vector<1024x16xf32>
    tpu.vector_store %arg5[%c0_7, %c0_8], %10 {strides = array<i32>} : memref<1024x16xf32, #tpu.memory_space<vmem>>, vector<1024x16xf32>,
    return
  }
  func.func @transform_0(%arg0: i32) -> (i32, i32) {
    %c0_i32 = arith.constant 0 : i32
    %c0_i32_0 = arith.constant 0 : i32
    return %arg0, %c0_i32 : i32, i32
  }
  func.func @transform_1(%arg0: i32) -> (i32, i32) {
    %c0_i32 = arith.constant 0 : i32
    %c0_i32_0 = arith.constant 0 : i32
    %c0_i32_1 = arith.constant 0 : i32
    return %c0_i32, %c0_i32_0 : i32, i32
  }
  func.func @transform_2(%arg0: i32) -> (i32, i32) {
    %c0_i32 = arith.constant 0 : i32
    %c0_i32_0 = arith.constant 0 : i32
    %c0_i32_1 = arith.constant 0 : i32
    return %c0_i32, %c0_i32_0 : i32, i32
  }
  func.func @transform_3(%arg0: i32) -> (i32, i32) {
    %c0_i32 = arith.constant 0 : i32
    %c0_i32_0 = arith.constant 0 : i32
    return %arg0, %c0_i32 : i32, i32
  }
  func.func @transform_4(%arg0: i32) -> (i32, i32) {
    %c0_i32 = arith.constant 0 : i32
    %c0_i32_0 = arith.constant 0 : i32
    return %arg0, %c0_i32 : i32, i32
  }
}

</mosaic_0001>

<bundles_post_ra>
// kernel: bottleneck_forward.4
= control target key start
LH: loop header
LB: loop body
LE: loop exit
PB: predicated region body
PF: predicated region fallthrough
CT: control target
= control target key end

     0   :  { %9 = vsyncpa [#allocation3], 0  ;;  %s2048_s12 = smov [#allocation2]   ;;  %s3305_s0 = inlined_call_operand.hbm [shape: f32[1024,16], index: 0, kind: input, shape index: {}]   ;;  %s3306_s1 = inlined_call_operand.vmem [shape: bf16[16,4], index: 1, kind: input, shape index: {}]   ;;  %s3307_s2 = inlined_call_operand.vmem [shape: f32[1024,4], index: 2, kind: output, shape index: {0}]   ;;  %s3308_s3 = inlined_call_operand.vmem [shape: f32[1,2,4], index: 3, kind: output, shape index: {1}]  }
   0x1   :  { %s15_s13 = sshll.u32 %s2048_s12, 4  ;;  %s2024_s16 = scalar_lea.hbm %s3305_s0, 16384  ;;  %s16_s13 = int_to_ptr.vmem [resolvable:$true] %s15_s13 }
   0x2   :  { %p2025_p0 = scmp.ne.s32.totalorder %s3305_s0, %s2024_s16  ;;  %p2028_p1 = scmp.lt.u32.totalorder %s2024_s16, %s3305_s0 }
   0x4   :  { %p2030_p2 = pnand %p2028_p1, %p2025_p0 }
   0x6   :  { %2033 = shalt.err (!%p2030_p2)
}
   0x7   :  { %s2034_s21 = scalar_lea.vmem %s16_s13, 16384  ;;  %p2039_p4 = scmp.lt.s32.totalorder %s16_s13, %s16_s13 }
   0x8   :  { %p2035_p3 = scmp.ne.s32.totalorder %s16_s13, %s2034_s21  ;;  %p2040_p5 = scmp.lt.s32.totalorder %s2034_s21, %s2034_s21 }
   0xa   :  { %p2041_p6 = por %p2040_p5, %p2039_p4 }
   0xc   :  { %p2042_p7 = pnand %p2041_p6, %p2035_p3 }
   0xe   :  { %2045 = shalt.err (!%p2042_p7)
}
   0xf   :  { %s2049_s22 = smov 128   ;;  %s2050_s23 = smov 8  }
  0x10   :  { %21 = dma.hbm_to_vmem [thread:$0]  %s3305_s0, 16384, %s16_s13, [#allocation3], %s2049_s22, %s2049_s22, %s2050_s23  }
  0x11   :  { %2046 = dma.done.wait [#allocation3], 16384  }
  0x12   :  { %2047 = vsyncadd [#allocation3], 4294950912  ;;  %v2023_v0 = vld [vmem:[%s3306_s1] sm:$0xff]   ;;  %v29_v2 = vld [vmem:[#allocation2 + $0x8] sm:$0xff]  ;;  %vm228_vm0 = vcmask 130048   ;;  %vm966_vm1 = vcmask 31744  }
  0x13   :  { %v28_v1 = vld [vmem:[#allocation2] sm:$0xff]  ;;  %v30_v3 = vld [vmem:[#allocation2 + $0x10] sm:$0xff]  ;;  %1888 = vmatprep.subr.bf16.mxu0 %v2023_v0  ;;  %v31_v5 = vld [vmem:[#allocation2 + $0x18] sm:$0xff]  ;;  %2018 = vmatprep.subr.bf16.mxu1 %v2023_v0  ;;  %vm1745_vm2 = vcmask 1040384   ;;  %vm1747_vm3 = vcmask 25600  }
  0x14   :  { %v156_v4 = vpack.c.bf16 %v29_v2, %v28_v1  ;;  %v32_v6 = vld [vmem:[#allocation2 + $0x20] sm:$0xff]  ;;  %v33_v7 = vld [vmem:[#allocation2 + $0x28] sm:$0xff]  ;;  %1889 = vmatpush3.bf16.msra.mxu0 %v2023_v0  ;;  %v157_v8 = vpack.c.bf16 %v31_v5, %v30_v3  ;;  %2019 = vmatpush3.bf16.msra.mxu1 %v2023_v0  ;;  %v34_v10 = vld [vmem:[#allocation2 + $0x30] sm:$0xff] }
  0x15   :  { %v158_v9 = vpack.c.bf16 %v33_v7, %v32_v6  ;;  %v35_v11 = vld [vmem:[#allocation2 + $0x38] sm:$0xff]  ;;  %v36_v12 = vld [vmem:[#allocation2 + $0x40] sm:$0xff]  ;;  %v37_v13 = vld [vmem:[#allocation2 + $0x48] sm:$0xff] }
  0x16   :  { %1890 = vmatprep.mubr.msk.bf16.mxu0 %vm228_vm0, %v156_v4  ;;  %v159_v14 = vpack.c.bf16 %v35_v11, %v34_v10  ;;  %v160_v15 = vpack.c.bf16 %v37_v13, %v36_v12  ;;  %v38_v16 = vld [vmem:[#allocation2 + $0x50] sm:$0xff]  ;;  %v39_v17 = vld [vmem:[#allocation2 + $0x58] sm:$0xff]  ;;  %v40_v18 = vld [vmem:[#allocation2 + $0x60] sm:$0xff] }
  0x17   :  { %1891 = vmatmul.mubr.msk.bf16.vlgmr.msra.gmra.mrb[0].mxu0 %vm228_vm0, %v157_v8  ;;  %v41_v19 = vld [vmem:[#allocation2 + $0x68] sm:$0xff]  ;;  %v161_v20 = vpack.c.bf16 %v39_v17, %v38_v16  ;;  %v42_v22 = vld [vmem:[#allocation2 + $0x70] sm:$0xff]  ;;  %v43_v23 = vld [vmem:[#allocation2 + $0x78] sm:$0xff] }
  0x18   :  { %1894 = vmatprep.mubr.msk.bf16.mxu0 %vm228_vm0, %v158_v9  ;;  %v162_v21 = vpack.c.bf16 %v41_v19, %v40_v18  ;;  %v92_v24 = vld [vmem:[#allocation2 + $0x200] sm:$0xff]  ;;  %v93_v25 = vld [vmem:[#allocation2 + $0x208] sm:$0xff]  ;;  %v94_v27 = vld [vmem:[#allocation2 + $0x210] sm:$0xff]  ;;  %v163_v35 = vpack.c.bf16 %v43_v23, %v42_v22 }
  0x19   :  { %v188_v26 = vpack.c.bf16 %v93_v25, %v92_v24  ;;  %v95_v28 = vld [vmem:[#allocation2 + $0x218] sm:$0xff]  ;;  %v96_v29 = vld [vmem:[#allocation2 + $0x220] sm:$0xff]  ;;  %v45_v31 = vld [vmem:[#allocation2 + $0x88] sm:$0xff] }
  0x1a   :  { %v44_v30 = vld [vmem:[#allocation2 + $0x80] sm:$0xff]  ;;  %v189_v32 = vpack.c.bf16 %v95_v28, %v94_v27  ;;  %v97_v33 = vld [vmem:[#allocation2 + $0x228] sm:$0xff]  ;;  %v98_v37 = vld [vmem:[#allocation2 + $0x230] sm:$0xff] }
  0x1b   :  { %1954 = vmatprep.mubr.msk.bf16.mxu1 %vm228_vm0, %v188_v26  ;;  %v190_v34 = vpack.c.bf16 %v97_v33, %v96_v29  ;;  %v164_v36 = vpack.c.bf16 %v45_v31, %v44_v30  ;;  %v99_v38 = vld [vmem:[#allocation2 + $0x238] sm:$0xff]  ;;  %v100_v39 = vld [vmem:[#allocation2 + $0x240] sm:$0xff]  ;;  %v101_v40 = vld [vmem:[#allocation2 + $0x248] sm:$0xff] }
  0x1c   :  { %1955 = vmatmul.mubr.msk.bf16.vlgmr.msra.gmra.mrb[0].mxu1 %vm228_vm0, %v189_v32  ;;  %v191_v41 = vpack.c.bf16 %v99_v38, %v98_v37  ;;  %v46_v42 = vld [vmem:[#allocation2 + $0x90] sm:$0xff]  ;;  %v47_v43 = vld [vmem:[#allocation2 + $0x98] sm:$0xff]  ;;  %v192_v44 = vpack.c.bf16 %v101_v40, %v100_v39  ;;  %v48_v45 = vld [vmem:[#allocation2 + $0xa0] sm:$0xff] }
  0x1d   :  { %1958 = vmatprep.mubr.msk.bf16.mxu1 %vm228_vm0, %v190_v34  ;;  %v49_v46 = vld [vmem:[#allocation2 + $0xa8] sm:$0xff]  ;;  %v165_v47 = vpack.c.bf16 %v47_v43, %v46_v42  ;;  %v102_v49 = vld [vmem:[#allocation2 + $0x250] sm:$0xff]  ;;  %v103_v50 = vld [vmem:[#allocation2 + $0x258] sm:$0xff] }
  0x1e   :  { %v166_v48 = vpack.c.bf16 %v49_v46, %v48_v45  ;;  %v104_v51 = vld [vmem:[#allocation2 + $0x260] sm:$0xff]  ;;  %v105_v52 = vld [vmem:[#allocation2 + $0x268] sm:$0xff]  ;;  %v193_v53 = vpack.c.bf16 %v103_v50, %v102_v49  ;;  %v50_v54 = vld [vmem:[#allocation2 + $0xb0] sm:$0xff] }
  0x1f   :  { %1895 = vmatmul.mubr.msk.bf16.gmra.mrb[4].mxu0 %vm228_vm0, %v159_v14  ;;  %v51_v55 = vld [vmem:[#allocation2 + $0xb8] sm:$0xff]  ;;  %v194_v56 = vpack.c.bf16 %v105_v52, %v104_v51  ;;  %v52_v57 = vld [vmem:[#allocation2 + $0xc0] sm:$0xff]  ;;  %v53_v58 = vld [vmem:[#allocation2 + $0xc8] sm:$0xff] }
  0x20   :  { %1898 = vmatprep.mubr.msk.bf16.mxu0 %vm228_vm0, %v160_v15  ;;  %v167_v59 = vpack.c.bf16 %v51_v55, %v50_v54  ;;  %v168_v60 = vpack.c.bf16 %v53_v58, %v52_v57  ;;  %v106_v61 = vld [vmem:[#allocation2 + $0x270] sm:$0xff]  ;;  %v107_v62 = vld [vmem:[#allocation2 + $0x278] sm:$0xff]  ;;  %v108_v63 = vld [vmem:[#allocation2 + $0x280] sm:$0xff] }
  0x21   :  { %v109_v0 = vld [vmem:[#allocation2 + $0x288] sm:$0xff]  ;;  %v195_v1 = vpack.c.bf16 %v107_v62, %v106_v61  ;;  %v54_v2 = vld [vmem:[#allocation2 + $0xd0] sm:$0xff]  ;;  %v55_v3 = vld [vmem:[#allocation2 + $0xd8] sm:$0xff] }
  0x22   :  { %v196_v4 = vpack.c.bf16 %v109_v0, %v108_v63  ;;  %v56_v5 = vld [vmem:[#allocation2 + $0xe0] sm:$0xff]  ;;  %v57_v6 = vld [vmem:[#allocation2 + $0xe8] sm:$0xff]  ;;  %v169_v7 = vpack.c.bf16 %v55_v3, %v54_v2  ;;  %v110_v9 = vld [vmem:[#allocation2 + $0x290] sm:$0xff] }
  0x23   :  { %v170_v8 = vpack.c.bf16 %v57_v6, %v56_v5  ;;  %v111_v10 = vld [vmem:[#allocation2 + $0x298] sm:$0xff]  ;;  %v112_v11 = vld [vmem:[#allocation2 + $0x2a0] sm:$0xff]  ;;  %v113_v12 = vld [vmem:[#allocation2 + $0x2a8] sm:$0xff] }
  0x24   :  { %1959 = vmatmul.mubr.msk.bf16.gmra.mrb[4].mxu1 %vm228_vm0, %v191_v41  ;;  %v197_v13 = vpack.c.bf16 %v111_v10, %v110_v9  ;;  %v58_v14 = vld [vmem:[#allocation2 + $0xf0] sm:$0xff]  ;;  %v59_v15 = vld [vmem:[#allocation2 + $0xf8] sm:$0xff]  ;;  %v198_v16 = vpack.c.bf16 %v113_v12, %v112_v11  ;;  %v60_v17 = vld [vmem:[#allocation2 + $0x100] sm:$0xff] }
  0x25   :  { %1962 = vmatprep.mubr.msk.bf16.mxu1 %vm228_vm0, %v192_v44  ;;  %v61_v18 = vld [vmem:[#allocation2 + $0x108] sm:$0xff]  ;;  %v171_v19 = vpack.c.bf16 %v59_v15, %v58_v14  ;;  %v115_v22 = vld [vmem:[#allocation2 + $0x2b8] sm:$0xff]  ;;  %v116_v23 = vld [vmem:[#allocation2 + $0x2c0] sm:$0xff] }
  0x26   :  { %v117_v24 = vld [vmem:[#allocation2 + $0x2c8] sm:$0xff]  ;;  %v62_v26 = vld [vmem:[#allocation2 + $0x110] sm:$0xff]  ;;  %v63_v27 = vld [vmem:[#allocation2 + $0x118] sm:$0xff] }
  0x27   :  { %1899 = vmatmul.mubr.msk.bf16.gmra.mrb[8].mxu0 %vm228_vm0, %v161_v20  ;;  %v172_v20 = vpack.c.bf16 %v61_v18, %v60_v17  ;;  %v200_v28 = vpack.c.bf16 %v117_v24, %v116_v23  ;;  %v64_v29 = vld [vmem:[#allocation2 + $0x120] sm:$0xff]  ;;  %v65_v30 = vld [vmem:[#allocation2 + $0x128] sm:$0xff]  ;;  %v173_v31 = vpack.c.bf16 %v63_v27, %v62_v26  ;;  %v118_v33 = vld [vmem:[#allocation2 + $0x2d0] sm:$0xff] }
  0x28   :  { %1902 = vmatprep.mubr.msk.bf16.mxu0 %vm228_vm0, %v162_v21  ;;  %v114_v21 = vld [vmem:[#allocation2 + $0x2b0] sm:$0xff]  ;;  %v174_v32 = vpack.c.bf16 %v65_v30, %v64_v29  ;;  %v119_v34 = vld [vmem:[#allocation2 + $0x2d8] sm:$0xff]  ;;  %v68_v41 = vld [vmem:[#allocation2 + $0x140] sm:$0xff] }
  0x29   :  { %v199_v25 = vpack.c.bf16 %v115_v22, %v114_v21  ;;  %v201_v37 = vpack.c.bf16 %v119_v34, %v118_v33  ;;  %v66_v38 = vld [vmem:[#allocation2 + $0x130] sm:$0xff]  ;;  %v67_v39 = vld [vmem:[#allocation2 + $0x138] sm:$0xff]  ;;  %v69_v42 = vld [vmem:[#allocation2 + $0x148] sm:$0xff] }
  0x2a   :  { %v175_v43 = vpack.c.bf16 %v67_v39, %v66_v38  ;;  %v176_v44 = vpack.c.bf16 %v69_v42, %v68_v41  ;;  %v122_v45 = vld [vmem:[#allocation2 + $0x2f0] sm:$0xff]  ;;  %v123_v46 = vld [vmem:[#allocation2 + $0x2f8] sm:$0xff]  ;;  %v73_v54 = vld [vmem:[#allocation2 + $0x168] sm:$0xff] }
  0x2b   :  { %v203_v49 = vpack.c.bf16 %v123_v46, %v122_v45  ;;  %v70_v50 = vld [vmem:[#allocation2 + $0x150] sm:$0xff]  ;;  %v71_v51 = vld [vmem:[#allocation2 + $0x158] sm:$0xff]  ;;  %v77_v2 = vld [vmem:[#allocation2 + $0x188] sm:$0xff] }
  0x2c   :  { %1963 = vmatmul.mubr.msk.bf16.gmra.mrb[8].mxu1 %vm228_vm0, %v193_v53  ;;  %v72_v53 = vld [vmem:[#allocation2 + $0x160] sm:$0xff]  ;;  %v177_v55 = vpack.c.bf16 %v71_v51, %v70_v50  ;;  %v126_v57 = vld [vmem:[#allocation2 + $0x310] sm:$0xff]  ;;  %v127_v58 = vld [vmem:[#allocation2 + $0x318] sm:$0xff] }
  0x2d   :  { %1966 = vmatprep.mubr.msk.bf16.mxu1 %vm228_vm0, %v194_v56  ;;  %v178_v56 = vpack.c.bf16 %v73_v54, %v72_v53  ;;  %v205_v61 = vpack.c.bf16 %v127_v58, %v126_v57  ;;  %v74_v62 = vld [vmem:[#allocation2 + $0x170] sm:$0xff]  ;;  %v75_v63 = vld [vmem:[#allocation2 + $0x178] sm:$0xff]  ;;  %v81_v14 = vld [vmem:[#allocation2 + $0x1a8] sm:$0xff] }
  0x2e   :  { %v179_v3 = vpack.c.bf16 %v75_v63, %v74_v62  ;;  %v130_v5 = vld [vmem:[#allocation2 + $0x330] sm:$0xff]  ;;  %v131_v6 = vld [vmem:[#allocation2 + $0x338] sm:$0xff]  ;;  %v85_v26 = vld [vmem:[#allocation2 + $0x1c8] sm:$0xff] }
  0x2f   :  { %1903 = vmatmul.mubr.msk.bf16.gmra.mrb[12].mxu0 %vm228_vm0, %v163_v35  ;;  %v120_v35 = vld [vmem:[#allocation2 + $0x2e0] sm:$0xff]  ;;  %v207_v9 = vpack.c.bf16 %v131_v6, %v130_v5  ;;  %v78_v10 = vld [vmem:[#allocation2 + $0x190] sm:$0xff]  ;;  %v79_v11 = vld [vmem:[#allocation2 + $0x198] sm:$0xff] }
  0x30   :  { %1906 = vmatprep.mubr.msk.bf16.mxu0 %vm228_vm0, %v164_v36  ;;  %v121_v36 = vld [vmem:[#allocation2 + $0x2e8] sm:$0xff]  ;;  %v181_v15 = vpack.c.bf16 %v79_v11, %v78_v10  ;;  %v134_v17 = vld [vmem:[#allocation2 + $0x350] sm:$0xff]  ;;  %v135_v18 = vld [vmem:[#allocation2 + $0x358] sm:$0xff] }
  0x31   :  { %v202_v40 = vpack.c.bf16 %v121_v36, %v120_v35  ;;  %v209_v21 = vpack.c.bf16 %v135_v18, %v134_v17  ;;  %v82_v22 = vld [vmem:[#allocation2 + $0x1b0] sm:$0xff]  ;;  %v83_v23 = vld [vmem:[#allocation2 + $0x1b8] sm:$0xff]  ;;  %v89_v38 = vld [vmem:[#allocation2 + $0x1e8] sm:$0xff] }
  0x32   :  { %v183_v27 = vpack.c.bf16 %v83_v23, %v82_v22  ;;  %v138_v29 = vld [vmem:[#allocation2 + $0x370] sm:$0xff]  ;;  %v139_v30 = vld [vmem:[#allocation2 + $0x378] sm:$0xff]  ;;  %v149_v53 = vld [vmem:[#allocation2 + $0x3c8] sm:$0xff] }
  0x33   :  { %v211_v33 = vpack.c.bf16 %v139_v30, %v138_v29  ;;  %v86_v34 = vld [vmem:[#allocation2 + $0x1d0] sm:$0xff]  ;;  %v87_v35 = vld [vmem:[#allocation2 + $0x1d8] sm:$0xff]  ;;  %v152_v58 = vld [vmem:[#allocation2 + $0x3e0] sm:$0xff] }
  0x34   :  { %1967 = vmatmul.mubr.msk.bf16.gmra.mrb[12].mxu1 %vm228_vm0, %v195_v1  ;;  %v76_v1 = vld [vmem:[#allocation2 + $0x180] sm:$0xff]  ;;  %v185_v39 = vpack.c.bf16 %v87_v35, %v86_v34  ;;  %v142_v41 = vld [vmem:[#allocation2 + $0x390] sm:$0xff]  ;;  %v143_v42 = vld [vmem:[#allocation2 + $0x398] sm:$0xff] }
  0x35   :  { %1970 = vmatprep.mubr.msk.bf16.mxu1 %vm228_vm0, %v196_v4  ;;  %v180_v4 = vpack.c.bf16 %v77_v2, %v76_v1  ;;  %v213_v45 = vpack.c.bf16 %v143_v42, %v142_v41  ;;  %v90_v46 = vld [vmem:[#allocation2 + $0x1f0] sm:$0xff]  ;;  %v147_v51 = vld [vmem:[#allocation2 + $0x3b8] sm:$0xff] }
  0x36   :  { %v146_v50 = vld [vmem:[#allocation2 + $0x3b0] sm:$0xff]  ;;  %v151_v57 = vld [vmem:[#allocation2 + $0x3d8] sm:$0xff] }
  0x37   :  { %1907 = vmatmul.mubr.msk.bf16.gmra.mrb[16].mxu0 %vm228_vm0, %v165_v47  ;;  %v124_v47 = vld [vmem:[#allocation2 + $0x300] sm:$0xff]  ;;  %v215_v54 = vpack.c.bf16 %v147_v51, %v146_v50  ;;  %v154_v62 = vld [vmem:[#allocation2 + $0x3f0] sm:$0xff]  ;;  %v155_v63 = vld [vmem:[#allocation2 + $0x3f8] sm:$0xff] }
  0x38   :  { %1910 = vmatprep.mubr.msk.bf16.mxu0 %vm228_vm0, %v166_v48  ;;  %v125_v48 = vld [vmem:[#allocation2 + $0x308] sm:$0xff] }
  0x39   :  { %v204_v52 = vpack.c.bf16 %v125_v48, %v124_v47  ;;  %v91_v47 = vld [vmem:[#allocation2 + $0x1f8] sm:$0xff] }
  0x3c   :  { %1971 = vmatmul.mubr.msk.bf16.gmra.mrb[16].mxu1 %vm228_vm0, %v197_v13  ;;  %v80_v13 = vld [vmem:[#allocation2 + $0x1a0] sm:$0xff] }
  0x3d   :  { %1974 = vmatprep.mubr.msk.bf16.mxu1 %vm228_vm0, %v198_v16  ;;  %v182_v16 = vpack.c.bf16 %v81_v14, %v80_v13 }
  0x3f   :  { %1911 = vmatmul.mubr.msk.bf16.gmra.mrb[20].mxu0 %vm228_vm0, %v167_v59  ;;  %v128_v59 = vld [vmem:[#allocation2 + $0x320] sm:$0xff] }
  0x40   :  { %1914 = vmatprep.mubr.msk.bf16.mxu0 %vm228_vm0, %v168_v60  ;;  %v129_v60 = vld [vmem:[#allocation2 + $0x328] sm:$0xff] }
  0x41   :  { %v206_v0 = vpack.c.bf16 %v129_v60, %v128_v59  ;;  %v153_v59 = vld [vmem:[#allocation2 + $0x3e8] sm:$0xff] }
  0x44   :  { %1975 = vmatmul.mubr.msk.bf16.gmra.mrb[20].mxu1 %vm228_vm0, %v199_v25  ;;  %v84_v25 = vld [vmem:[#allocation2 + $0x1c0] sm:$0xff] }
  0x45   :  { %1978 = vmatprep.mubr.msk.bf16.mxu1 %vm228_vm0, %v200_v28  ;;  %v184_v28 = vpack.c.bf16 %v85_v26, %v84_v25 }
  0x47   :  { %1915 = vmatmul.mubr.msk.bf16.gmra.mrb[24].mxu0 %vm228_vm0, %v169_v7  ;;  %v132_v7 = vld [vmem:[#allocation2 + $0x340] sm:$0xff] }
  0x48   :  { %1918 = vmatprep.mubr.msk.bf16.mxu0 %vm228_vm0, %v170_v8  ;;  %v133_v8 = vld [vmem:[#allocation2 + $0x348] sm:$0xff] }
  0x49   :  { %v208_v12 = vpack.c.bf16 %v133_v8, %v132_v7 }
  0x4c   :  { %1979 = vmatmul.mubr.msk.bf16.gmra.mrb[24].mxu1 %vm228_vm0, %v201_v37  ;;  %v88_v37 = vld [vmem:[#allocation2 + $0x1e0] sm:$0xff] }
  0x4d   :  { %1982 = vmatprep.mubr.msk.bf16.mxu1 %vm228_vm0, %v202_v40  ;;  %v186_v40 = vpack.c.bf16 %v89_v38, %v88_v37 }
  0x4f   :  { %1919 = vmatmul.mubr.msk.bf16.gmra.mrb[28].mxu0 %vm228_vm0, %v171_v19  ;;  %v136_v19 = vld [vmem:[#allocation2 + $0x360] sm:$0xff] }
  0x50   :  { %1922 = vmatprep.mubr.msk.bf16.mxu0 %vm228_vm0, %v172_v20  ;;  %v137_v20 = vld [vmem:[#allocation2 + $0x368] sm:$0xff] }
  0x51   :  { %v210_v24 = vpack.c.bf16 %v137_v20, %v136_v19 }
  0x54   :  { %1983 = vmatmul.mubr.msk.bf16.gmra.mrb[28].mxu1 %vm228_vm0, %v203_v49  ;;  %v187_v49 = vpack.c.bf16 %v91_v47, %v90_v46 }
  0x55   :  { %1986 = vmatprep.mubr.msk.bf16.mxu1 %vm228_vm0, %v204_v52  ;;  %v148_v52 = vld [vmem:[#allocation2 + $0x3c0] sm:$0xff] }
  0x57   :  { %1923 = vmatmul.mubr.msk.bf16.gmra.mrb[32].mxu0 %vm228_vm0, %v173_v31  ;;  %v140_v31 = vld [vmem:[#allocation2 + $0x380] sm:$0xff] }
  0x58   :  { %1926 = vmatprep.mubr.msk.bf16.mxu0 %vm228_vm0, %v174_v32  ;;  %v141_v32 = vld [vmem:[#allocation2 + $0x388] sm:$0xff] }
  0x59   :  { %v212_v36 = vpack.c.bf16 %v141_v32, %v140_v31 }
  0x5c   :  { %1987 = vmatmul.mubr.msk.bf16.gmra.mrb[32].mxu1 %vm228_vm0, %v205_v61  ;;  %v218_v61 = vpack.c.bf16 %v153_v59, %v152_v58 }
  0x5d   :  { %1990 = vmatprep.mubr.msk.bf16.mxu1 %vm228_vm0, %v206_v0  ;;  %v219_v0 = vpack.c.bf16 %v155_v63, %v154_v62 }
  0x5f   :  { %1927 = vmatmul.mubr.msk.bf16.gmra.mrb[36].mxu0 %vm228_vm0, %v175_v43  ;;  %v144_v43 = vld [vmem:[#allocation2 + $0x3a0] sm:$0xff] }
  0x60   :  { %1930 = vmatprep.mubr.msk.bf16.mxu0 %vm228_vm0, %v176_v44  ;;  %v145_v44 = vld [vmem:[#allocation2 + $0x3a8] sm:$0xff] }
  0x61   :  { %v214_v48 = vpack.c.bf16 %v145_v44, %v144_v43 }
  0x64   :  { %1991 = vmatmul.mubr.msk.bf16.gmra.mrb[36].mxu1 %vm228_vm0, %v207_v9 }
  0x65   :  { %1994 = vmatprep.mubr.msk.bf16.mxu1 %vm228_vm0, %v208_v12 }
  0x67   :  { %1931 = vmatmul.mubr.msk.bf16.gmra.mrb[40].mxu0 %vm228_vm0, %v177_v55  ;;  %v216_v55 = vpack.c.bf16 %v149_v53, %v148_v52 }
  0x68   :  { %1934 = vmatprep.mubr.msk.bf16.mxu0 %vm228_vm0, %v178_v56  ;;  %v150_v56 = vld [vmem:[#allocation2 + $0x3d0] sm:$0xff] }
  0x69   :  { %v217_v60 = vpack.c.bf16 %v151_v57, %v150_v56 }
  0x6c   :  { %1995 = vmatmul.mubr.msk.bf16.gmra.mrb[40].mxu1 %vm228_vm0, %v209_v21 }
  0x6d   :  { %1998 = vmatprep.mubr.msk.bf16.mxu1 %vm228_vm0, %v210_v24 }
  0x6f   :  { %1935 = vmatmul.mubr.msk.bf16.gmra.mrb[44].mxu0 %vm228_vm0, %v179_v3 }
  0x70   :  { %1938 = vmatprep.mubr.msk.bf16.mxu0 %vm228_vm0, %v180_v4 }
  0x74   :  { %1999 = vmatmul.mubr.msk.bf16.gmra.mrb[44].mxu1 %vm228_vm0, %v211_v33 }
  0x75   :  { %2002 = vmatprep.mubr.msk.bf16.mxu1 %vm228_vm0, %v212_v36 }
  0x77   :  { %1939 = vmatmul.mubr.msk.bf16.gmra.mrb[48].mxu0 %vm228_vm0, %v181_v15 }
  0x78   :  { %1942 = vmatprep.mubr.msk.bf16.mxu0 %vm228_vm0, %v182_v16 }
  0x7c   :  { %2003 = vmatmul.mubr.msk.bf16.gmra.mrb[48].mxu1 %vm228_vm0, %v213_v45 }
  0x7d   :  { %2006 = vmatprep.mubr.msk.bf16.mxu1 %vm228_vm0, %v214_v48 }
  0x7f   :  { %1943 = vmatmul.mubr.msk.bf16.gmra.mrb[52].mxu0 %vm228_vm0, %v183_v27 }
  0x80   :  { %1946 = vmatprep.mubr.msk.bf16.mxu0 %vm228_vm0, %v184_v28 }
  0x84   :  { %2007 = vmatmul.mubr.msk.bf16.gmra.mrb[52].mxu1 %vm228_vm0, %v215_v54 }
  0x85   :  { %2010 = vmatprep.mubr.msk.bf16.mxu1 %vm228_vm0, %v216_v55 }
  0x87   :  { %1947 = vmatmul.mubr.msk.bf16.gmra.mrb[56].mxu0 %vm228_vm0, %v185_v39 }
  0x88   :  { %1950 = vmatprep.mubr.msk.bf16.mxu0 %vm228_vm0, %v186_v40 }
  0x8c   :  { %2011 = vmatmul.mubr.msk.bf16.gmra.mrb[56].mxu1 %vm228_vm0, %v217_v60 }
  0x8d   :  { %2014 = vmatprep.mubr.msk.bf16.mxu1 %vm228_vm0, %v218_v61 }
  0x8f   :  { %1951 = vmatmul.mubr.msk.bf16.gmra.mrb[60].mxu0 %vm228_vm0, %v187_v49 }
  0x94   :  { %2015 = vmatmul.mubr.msk.bf16.gmra.mrb[60].mxu1 %vm228_vm0, %v219_v0 }
  0xea   :  { %v1892_v1 = vpop.f32.mrb[0].mxu0 }
  0xeb   :  { %969 = vst.msk [vmem:[%s3307_s2 + $0x10] sm:$0xff] %vm966_vm1, %v1892_v1  ;;  %v455_v2 = vpop.f32.mrb[1].mxu0  ;;  %v1358_v6 = vmul.f32 %v1892_v1, %v1892_v1  ;;  %v1098_v11 = vsel %vm966_vm1, %v1892_v1, 0.0 }
  0xec   :  { %967 = vst.msk [vmem:[%s3307_s2] sm:$0xff] %vm966_vm1, %v455_v2  ;;  %v1356_v3 = vmul.f32 %v455_v2, %v455_v2  ;;  %v1893_v4 = vpop.f32.mrb[2].mxu0  ;;  %v1095_v7 = vsel %vm966_vm1, %v455_v2, 0.0 }
  0xed   :  { %970 = vst.msk [vmem:[%s3307_s2 + $0x18] sm:$0xff] %vm966_vm1, %v1893_v4  ;;  %v458_v5 = vpop.f32.mrb[3].mxu0  ;;  %v1359_v13 = vmul.f32 %v1893_v4, %v1893_v4  ;;  %v1487_v17 = vsel %vm966_vm1, %v1358_v6, 0.0  ;;  %v1100_v18 = vsel %vm966_vm1, %v1893_v4, 0.0 }
  0xee   :  { %968 = vst.msk [vmem:[%s3307_s2 + $0x8] sm:$0xff] %vm966_vm1, %v458_v5  ;;  %v1096_v8 = vsel %vm966_vm1, %v458_v5, 0.0  ;;  %v1357_v9 = vmul.f32 %v458_v5, %v458_v5  ;;  %v1484_v12 = vsel %vm966_vm1, %v1356_v3, 0.0 }
  0xef   :  { %v1097_v10 = vadd.f32 %v1096_v8, %v1095_v7  ;;  %v1489_v23 = vsel %vm966_vm1, %v1359_v13, 0.0  ;;  %v2217_v58 = vpop.f32.mrb[0].mxu1 }
  0xf0   :  { %v1485_v14 = vsel %vm966_vm1, %v1357_v9, 0.0  ;;  %1033 = vst.msk [vmem:[%s3307_s2 + $0x210] sm:$0xff] %vm966_vm1, %v2217_v58  ;;  %v2224_v61 = vpop.f32.mrb[1].mxu1 }
  0xf1   :  { %v1099_v15 = vadd.f32 %v1098_v11, %v1097_v10  ;;  %v1486_v16 = vadd.f32 %v1485_v14, %v1484_v12  ;;  %1031 = vst.msk [vmem:[%s3307_s2 + $0x200] sm:$0xff] %vm966_vm1, %v2224_v61  ;;  %v2233_v1 = vpop.f32.mrb[2].mxu1 }
  0xf2   :  { %v1896_v19 = vpop.f32.mrb[4].mxu0  ;;  %1034 = vst.msk [vmem:[%s3307_s2 + $0x218] sm:$0xff] %vm966_vm1, %v2233_v1  ;;  %v2240_v4 = vpop.f32.mrb[3].mxu1 }
  0xf3   :  { %v1488_v20 = vadd.f32 %v1487_v17, %v1486_v16  ;;  %973 = vst.msk [vmem:[%s3307_s2 + $0x30] sm:$0xff] %vm966_vm1, %v1896_v19  ;;  %v471_v21 = vpop.f32.mrb[5].mxu0  ;;  %v1101_v22 = vadd.f32 %v1100_v18, %v1099_v15  ;;  %v1362_v30 = vmul.f32 %v1896_v19, %v1896_v19  ;;  %v1106_v36 = vsel %vm966_vm1, %v1896_v19, 0.0  ;;  %1032 = vst.msk [vmem:[%s3307_s2 + $0x208] sm:$0xff] %vm966_vm1, %v2240_v4 }
  0xf4   :  { %971 = vst.msk [vmem:[%s3307_s2 + $0x20] sm:$0xff] %vm966_vm1, %v471_v21  ;;  %v1102_v24 = vsel %vm966_vm1, %v471_v21, 0.0  ;;  %v1360_v25 = vmul.f32 %v471_v21, %v471_v21  ;;  %v1897_v26 = vpop.f32.mrb[6].mxu0 }
  0xf5   :  { %v1103_v27 = vadd.f32 %v1102_v24, %v1101_v22  ;;  %v1490_v28 = vadd.f32 %v1489_v23, %v1488_v20  ;;  %974 = vst.msk [vmem:[%s3307_s2 + $0x38] sm:$0xff] %vm966_vm1, %v1897_v26  ;;  %v474_v29 = vpop.f32.mrb[7].mxu0  ;;  %v1363_v37 = vmul.f32 %v1897_v26, %v1897_v26  ;;  %v1495_v41 = vsel %vm966_vm1, %v1362_v30, 0.0 }
  0xf6   :  { %v1491_v31 = vsel %vm966_vm1, %v1360_v25, 0.0  ;;  %972 = vst.msk [vmem:[%s3307_s2 + $0x28] sm:$0xff] %vm966_vm1, %v474_v29  ;;  %v1104_v32 = vsel %vm966_vm1, %v474_v29, 0.0  ;;  %v1361_v33 = vmul.f32 %v474_v29, %v474_v29  ;;  %v1108_v42 = vsel %vm966_vm1, %v1897_v26, 0.0 }
  0xf7   :  { %v1492_v34 = vadd.f32 %v1491_v31, %v1490_v28  ;;  %v1105_v35 = vadd.f32 %v1104_v32, %v1103_v27  ;;  %v1497_v47 = vsel %vm966_vm1, %v1363_v37, 0.0  ;;  %v2269_v22 = vpop.f32.mrb[4].mxu1 }
  0xf8   :  { %v1493_v38 = vsel %vm966_vm1, %v1361_v33, 0.0  ;;  %1037 = vst.msk [vmem:[%s3307_s2 + $0x230] sm:$0xff] %vm966_vm1, %v2269_v22  ;;  %v2276_v25 = vpop.f32.mrb[5].mxu1 }
  0xf9   :  { %v1107_v39 = vadd.f32 %v1106_v36, %v1105_v35  ;;  %v1494_v40 = vadd.f32 %v1493_v38, %v1492_v34  ;;  %1035 = vst.msk [vmem:[%s3307_s2 + $0x220] sm:$0xff] %vm966_vm1, %v2276_v25  ;;  %v2285_v29 = vpop.f32.mrb[6].mxu1 }
  0xfa   :  { %v1900_v43 = vpop.f32.mrb[8].mxu0  ;;  %1038 = vst.msk [vmem:[%s3307_s2 + $0x238] sm:$0xff] %vm966_vm1, %v2285_v29  ;;  %v2292_v32 = vpop.f32.mrb[7].mxu1 }
  0xfb   :  { %v1496_v44 = vadd.f32 %v1495_v41, %v1494_v40  ;;  %977 = vst.msk [vmem:[%s3307_s2 + $0x50] sm:$0xff] %vm966_vm1, %v1900_v43  ;;  %v487_v45 = vpop.f32.mrb[9].mxu0  ;;  %v1109_v46 = vadd.f32 %v1108_v42, %v1107_v39  ;;  %v1366_v54 = vmul.f32 %v1900_v43, %v1900_v43  ;;  %v1114_v62 = vsel %vm966_vm1, %v1900_v43, 0.0  ;;  %1036 = vst.msk [vmem:[%s3307_s2 + $0x228] sm:$0xff] %vm966_vm1, %v2292_v32 }
  0xfc   :  { %975 = vst.msk [vmem:[%s3307_s2 + $0x40] sm:$0xff] %vm966_vm1, %v487_v45  ;;  %v1110_v48 = vsel %vm966_vm1, %v487_v45, 0.0  ;;  %v1364_v49 = vmul.f32 %v487_v45, %v487_v45  ;;  %v1901_v50 = vpop.f32.mrb[10].mxu0 }
  0xfd   :  { %v1111_v51 = vadd.f32 %v1110_v48, %v1109_v46  ;;  %v1498_v52 = vadd.f32 %v1497_v47, %v1496_v44  ;;  %978 = vst.msk [vmem:[%s3307_s2 + $0x58] sm:$0xff] %vm966_vm1, %v1901_v50  ;;  %v490_v53 = vpop.f32.mrb[11].mxu0  ;;  %v1367_v63 = vmul.f32 %v1901_v50, %v1901_v50  ;;  %v1503_v5 = vsel %vm966_vm1, %v1366_v54, 0.0 }
  0xfe   :  { %v1499_v55 = vsel %vm966_vm1, %v1364_v49, 0.0  ;;  %976 = vst.msk [vmem:[%s3307_s2 + $0x48] sm:$0xff] %vm966_vm1, %v490_v53  ;;  %v1112_v56 = vsel %vm966_vm1, %v490_v53, 0.0  ;;  %v1365_v57 = vmul.f32 %v490_v53, %v490_v53  ;;  %v1116_v6 = vsel %vm966_vm1, %v1901_v50, 0.0 }
  0xff   :  { %v1500_v59 = vadd.f32 %v1499_v55, %v1498_v52  ;;  %v1113_v60 = vadd.f32 %v1112_v56, %v1111_v51  ;;  %v1505_v11 = vsel %vm966_vm1, %v1367_v63, 0.0  ;;  %v2321_v50 = vpop.f32.mrb[8].mxu1 }
 0x100   :  { %v1501_v0 = vsel %vm966_vm1, %v1365_v57, 0.0  ;;  %1041 = vst.msk [vmem:[%s3307_s2 + $0x250] sm:$0xff] %vm966_vm1, %v2321_v50  ;;  %v2328_v53 = vpop.f32.mrb[9].mxu1 }
 0x101   :  { %v1115_v2 = vadd.f32 %v1114_v62, %v1113_v60  ;;  %v1502_v3 = vadd.f32 %v1501_v0, %v1500_v59  ;;  %1039 = vst.msk [vmem:[%s3307_s2 + $0x240] sm:$0xff] %vm966_vm1, %v2328_v53  ;;  %v2337_v57 = vpop.f32.mrb[10].mxu1 }
 0x102   :  { %v1904_v7 = vpop.f32.mrb[12].mxu0  ;;  %1042 = vst.msk [vmem:[%s3307_s2 + $0x258] sm:$0xff] %vm966_vm1, %v2337_v57  ;;  %v2344_v62 = vpop.f32.mrb[11].mxu1 }
 0x103   :  { %v1504_v8 = vadd.f32 %v1503_v5, %v1502_v3  ;;  %981 = vst.msk [vmem:[%s3307_s2 + $0x70] sm:$0xff] %vm966_vm1, %v1904_v7  ;;  %v503_v9 = vpop.f32.mrb[13].mxu0  ;;  %v1117_v10 = vadd.f32 %v1116_v6, %v1115_v2  ;;  %v1370_v18 = vmul.f32 %v1904_v7, %v1904_v7  ;;  %v1122_v26 = vsel %vm966_vm1, %v1904_v7, 0.0  ;;  %1040 = vst.msk [vmem:[%s3307_s2 + $0x248] sm:$0xff] %vm966_vm1, %v2344_v62 }
 0x104   :  { %979 = vst.msk [vmem:[%s3307_s2 + $0x60] sm:$0xff] %vm966_vm1, %v503_v9  ;;  %v1118_v12 = vsel %vm966_vm1, %v503_v9, 0.0  ;;  %v1368_v13 = vmul.f32 %v503_v9, %v503_v9  ;;  %v1905_v14 = vpop.f32.mrb[14].mxu0 }
 0x105   :  { %v1119_v15 = vadd.f32 %v1118_v12, %v1117_v10  ;;  %v1506_v16 = vadd.f32 %v1505_v11, %v1504_v8  ;;  %982 = vst.msk [vmem:[%s3307_s2 + $0x78] sm:$0xff] %vm966_vm1, %v1905_v14  ;;  %v506_v17 = vpop.f32.mrb[15].mxu0  ;;  %v1371_v27 = vmul.f32 %v1905_v14, %v1905_v14  ;;  %v1511_v33 = vsel %vm966_vm1, %v1370_v18, 0.0 }
 0x106   :  { %v1507_v19 = vsel %vm966_vm1, %v1368_v13, 0.0  ;;  %980 = vst.msk [vmem:[%s3307_s2 + $0x68] sm:$0xff] %vm966_vm1, %v506_v17  ;;  %v1120_v20 = vsel %vm966_vm1, %v506_v17, 0.0  ;;  %v1369_v21 = vmul.f32 %v506_v17, %v506_v17  ;;  %v1124_v34 = vsel %vm966_vm1, %v1905_v14, 0.0 }
 0x107   :  { %v1508_v23 = vadd.f32 %v1507_v19, %v1506_v16  ;;  %v1121_v24 = vadd.f32 %v1120_v20, %v1119_v15  ;;  %v1513_v39 = vsel %vm966_vm1, %v1371_v27, 0.0  ;;  %v2373_v18 = vpop.f32.mrb[12].mxu1 }
 0x108   :  { %v1509_v28 = vsel %vm966_vm1, %v1369_v21, 0.0  ;;  %1045 = vst.msk [vmem:[%s3307_s2 + $0x270] sm:$0xff] %vm966_vm1, %v2373_v18  ;;  %v2380_v21 = vpop.f32.mrb[13].mxu1 }
 0x109   :  { %v1123_v30 = vadd.f32 %v1122_v26, %v1121_v24  ;;  %v1510_v31 = vadd.f32 %v1509_v28, %v1508_v23  ;;  %1043 = vst.msk [vmem:[%s3307_s2 + $0x260] sm:$0xff] %vm966_vm1, %v2380_v21  ;;  %v2389_v27 = vpop.f32.mrb[14].mxu1 }
 0x10a   :  { %v1908_v35 = vpop.f32.mrb[16].mxu0  ;;  %1046 = vst.msk [vmem:[%s3307_s2 + $0x278] sm:$0xff] %vm966_vm1, %v2389_v27 }
 0x10b   :  { %v1512_v36 = vadd.f32 %v1511_v33, %v1510_v31  ;;  %985 = vst.msk [vmem:[%s3307_s2 + $0x90] sm:$0xff] %vm966_vm1, %v1908_v35  ;;  %v519_v37 = vpop.f32.mrb[17].mxu0  ;;  %v1125_v38 = vadd.f32 %v1124_v34, %v1123_v30  ;;  %v1374_v46 = vmul.f32 %v1908_v35, %v1908_v35  ;;  %v1130_v54 = vsel %vm966_vm1, %v1908_v35, 0.0  ;;  %v2396_v31 = vpop.f32.mrb[15].mxu1 }
 0x10c   :  { %983 = vst.msk [vmem:[%s3307_s2 + $0x80] sm:$0xff] %vm966_vm1, %v519_v37  ;;  %v1126_v40 = vsel %vm966_vm1, %v519_v37, 0.0  ;;  %v1372_v41 = vmul.f32 %v519_v37, %v519_v37  ;;  %v1909_v42 = vpop.f32.mrb[18].mxu0  ;;  %1044 = vst.msk [vmem:[%s3307_s2 + $0x268] sm:$0xff] %vm966_vm1, %v2396_v31 }
 0x10d   :  { %v1127_v43 = vadd.f32 %v1126_v40, %v1125_v38  ;;  %v1514_v44 = vadd.f32 %v1513_v39, %v1512_v36  ;;  %986 = vst.msk [vmem:[%s3307_s2 + $0x98] sm:$0xff] %vm966_vm1, %v1909_v42  ;;  %v522_v45 = vpop.f32.mrb[19].mxu0  ;;  %v1375_v55 = vmul.f32 %v1909_v42, %v1909_v42  ;;  %v1519_v63 = vsel %vm966_vm1, %v1374_v46, 0.0 }
 0x10e   :  { %v1515_v47 = vsel %vm966_vm1, %v1372_v41, 0.0  ;;  %984 = vst.msk [vmem:[%s3307_s2 + $0x88] sm:$0xff] %vm966_vm1, %v522_v45  ;;  %v1128_v48 = vsel %vm966_vm1, %v522_v45, 0.0  ;;  %v1373_v49 = vmul.f32 %v522_v45, %v522_v45  ;;  %v1132_v0 = vsel %vm966_vm1, %v1909_v42, 0.0 }
 0x10f   :  { %v1516_v51 = vadd.f32 %v1515_v47, %v1514_v44  ;;  %v1129_v52 = vadd.f32 %v1128_v48, %v1127_v43  ;;  %v1521_v7 = vsel %vm966_vm1, %v1375_v55, 0.0 }
 0x110   :  { %v1517_v56 = vsel %vm966_vm1, %v1373_v49, 0.0 }
 0x111   :  { %v1131_v59 = vadd.f32 %v1130_v54, %v1129_v52  ;;  %v1518_v60 = vadd.f32 %v1517_v56, %v1516_v51  ;;  %v2425_v51 = vpop.f32.mrb[16].mxu1 }
 0x112   :  { %v1912_v2 = vpop.f32.mrb[20].mxu0  ;;  %1049 = vst.msk [vmem:[%s3307_s2 + $0x290] sm:$0xff] %vm966_vm1, %v2425_v51  ;;  %v2432_v55 = vpop.f32.mrb[17].mxu1 }
 0x113   :  { %v1520_v3 = vadd.f32 %v1519_v63, %v1518_v60  ;;  %989 = vst.msk [vmem:[%s3307_s2 + $0xb0] sm:$0xff] %vm966_vm1, %v1912_v2  ;;  %v535_v5 = vpop.f32.mrb[21].mxu0  ;;  %v1133_v6 = vadd.f32 %v1132_v0, %v1131_v59  ;;  %v1378_v14 = vmul.f32 %v1912_v2, %v1912_v2  ;;  %v1138_v23 = vsel %vm966_vm1, %v1912_v2, 0.0  ;;  %1047 = vst.msk [vmem:[%s3307_s2 + $0x280] sm:$0xff] %vm966_vm1, %v2432_v55  ;;  %v2441_v63 = vpop.f32.mrb[18].mxu1 }
 0x114   :  { %987 = vst.msk [vmem:[%s3307_s2 + $0xa0] sm:$0xff] %vm966_vm1, %v535_v5  ;;  %v1134_v8 = vsel %vm966_vm1, %v535_v5, 0.0  ;;  %v1376_v9 = vmul.f32 %v535_v5, %v535_v5  ;;  %v1913_v10 = vpop.f32.mrb[22].mxu0  ;;  %1050 = vst.msk [vmem:[%s3307_s2 + $0x298] sm:$0xff] %vm966_vm1, %v2441_v63 }
 0x115   :  { %v1135_v11 = vadd.f32 %v1134_v8, %v1133_v6  ;;  %v1522_v12 = vadd.f32 %v1521_v7, %v1520_v3  ;;  %990 = vst.msk [vmem:[%s3307_s2 + $0xb8] sm:$0xff] %vm966_vm1, %v1913_v10  ;;  %v538_v13 = vpop.f32.mrb[23].mxu0  ;;  %v1379_v24 = vmul.f32 %v1913_v10, %v1913_v10  ;;  %v1527_v33 = vsel %vm966_vm1, %v1378_v14, 0.0  ;;  %v2448_v3 = vpop.f32.mrb[19].mxu1 }
 0x116   :  { %v1523_v15 = vsel %vm966_vm1, %v1376_v9, 0.0  ;;  %988 = vst.msk [vmem:[%s3307_s2 + $0xa8] sm:$0xff] %vm966_vm1, %v538_v13  ;;  %v1136_v16 = vsel %vm966_vm1, %v538_v13, 0.0  ;;  %v1377_v17 = vmul.f32 %v538_v13, %v538_v13  ;;  %v1140_v34 = vsel %vm966_vm1, %v1913_v10, 0.0  ;;  %1048 = vst.msk [vmem:[%s3307_s2 + $0x288] sm:$0xff] %vm966_vm1, %v2448_v3 }
 0x117   :  { %v1524_v19 = vadd.f32 %v1523_v15, %v1522_v12  ;;  %v1137_v20 = vadd.f32 %v1136_v16, %v1135_v11  ;;  %v1529_v39 = vsel %vm966_vm1, %v1379_v24, 0.0 }
 0x118   :  { %v1525_v26 = vsel %vm966_vm1, %v1377_v17, 0.0 }
 0x119   :  { %v1139_v28 = vadd.f32 %v1138_v23, %v1137_v20  ;;  %v1526_v30 = vadd.f32 %v1525_v26, %v1524_v19  ;;  %v2477_v26 = vpop.f32.mrb[20].mxu1 }
 0x11a   :  { %v1916_v35 = vpop.f32.mrb[24].mxu0  ;;  %1053 = vst.msk [vmem:[%s3307_s2 + $0x2b0] sm:$0xff] %vm966_vm1, %v2477_v26 }
 0x11b   :  { %v1528_v36 = vadd.f32 %v1527_v33, %v1526_v30  ;;  %993 = vst.msk [vmem:[%s3307_s2 + $0xd0] sm:$0xff] %vm966_vm1, %v1916_v35  ;;  %v551_v37 = vpop.f32.mrb[25].mxu0  ;;  %v1141_v38 = vadd.f32 %v1140_v34, %v1139_v28  ;;  %v1382_v46 = vmul.f32 %v1916_v35, %v1916_v35  ;;  %v1146_v56 = vsel %vm966_vm1, %v1916_v35, 0.0  ;;  %v2484_v33 = vpop.f32.mrb[21].mxu1 }
 0x11c   :  { %991 = vst.msk [vmem:[%s3307_s2 + $0xc0] sm:$0xff] %vm966_vm1, %v551_v37  ;;  %v1142_v40 = vsel %vm966_vm1, %v551_v37, 0.0  ;;  %v1380_v41 = vmul.f32 %v551_v37, %v551_v37  ;;  %v1917_v42 = vpop.f32.mrb[26].mxu0  ;;  %1051 = vst.msk [vmem:[%s3307_s2 + $0x2a0] sm:$0xff] %vm966_vm1, %v2484_v33  ;;  %v2493_v37 = vpop.f32.mrb[22].mxu1 }
 0x11d   :  { %v1143_v43 = vadd.f32 %v1142_v40, %v1141_v38  ;;  %v1530_v44 = vadd.f32 %v1529_v39, %v1528_v36  ;;  %994 = vst.msk [vmem:[%s3307_s2 + $0xd8] sm:$0xff] %vm966_vm1, %v1917_v42  ;;  %v554_v45 = vpop.f32.mrb[27].mxu0  ;;  %v1383_v59 = vmul.f32 %v1917_v42, %v1917_v42  ;;  %v1535_v5 = vsel %vm966_vm1, %v1382_v46, 0.0  ;;  %1054 = vst.msk [vmem:[%s3307_s2 + $0x2b8] sm:$0xff] %vm966_vm1, %v2493_v37  ;;  %v2500_v40 = vpop.f32.mrb[23].mxu1 }
 0x11e   :  { %v1531_v47 = vsel %vm966_vm1, %v1380_v41, 0.0  ;;  %992 = vst.msk [vmem:[%s3307_s2 + $0xc8] sm:$0xff] %vm966_vm1, %v554_v45  ;;  %v1144_v48 = vsel %vm966_vm1, %v554_v45, 0.0  ;;  %v1381_v49 = vmul.f32 %v554_v45, %v554_v45  ;;  %v1148_v6 = vsel %vm966_vm1, %v1917_v42, 0.0  ;;  %1052 = vst.msk [vmem:[%s3307_s2 + $0x2a8] sm:$0xff] %vm966_vm1, %v2500_v40 }
 0x11f   :  { %v1532_v52 = vadd.f32 %v1531_v47, %v1530_v44  ;;  %v1145_v54 = vadd.f32 %v1144_v48, %v1143_v43  ;;  %v1537_v11 = vsel %vm966_vm1, %v1383_v59, 0.0 }
 0x120   :  { %v1533_v60 = vsel %vm966_vm1, %v1381_v49, 0.0 }
 0x121   :  { %v1147_v0 = vadd.f32 %v1146_v56, %v1145_v54  ;;  %v1534_v2 = vadd.f32 %v1533_v60, %v1532_v52 }
 0x122   :  { %v1920_v7 = vpop.f32.mrb[28].mxu0 }
 0x123   :  { %v1536_v8 = vadd.f32 %v1535_v5, %v1534_v2  ;;  %997 = vst.msk [vmem:[%s3307_s2 + $0xf0] sm:$0xff] %vm966_vm1, %v1920_v7  ;;  %v567_v9 = vpop.f32.mrb[29].mxu0  ;;  %v1149_v10 = vadd.f32 %v1148_v6, %v1147_v0  ;;  %v1386_v19 = vmul.f32 %v1920_v7, %v1920_v7  ;;  %v1154_v34 = vsel %vm966_vm1, %v1920_v7, 0.0  ;;  %v2529_v6 = vpop.f32.mrb[24].mxu1 }
 0x124   :  { %995 = vst.msk [vmem:[%s3307_s2 + $0xe0] sm:$0xff] %vm966_vm1, %v567_v9  ;;  %v1150_v12 = vsel %vm966_vm1, %v567_v9, 0.0  ;;  %v1384_v13 = vmul.f32 %v567_v9, %v567_v9  ;;  %v1921_v14 = vpop.f32.mrb[30].mxu0  ;;  %1057 = vst.msk [vmem:[%s3307_s2 + $0x2d0] sm:$0xff] %vm966_vm1, %v2529_v6  ;;  %v2536_v9 = vpop.f32.mrb[25].mxu1 }
 0x125   :  { %v1151_v15 = vadd.f32 %v1150_v12, %v1149_v10  ;;  %v1538_v16 = vadd.f32 %v1537_v11, %v1536_v8  ;;  %998 = vst.msk [vmem:[%s3307_s2 + $0xf8] sm:$0xff] %vm966_vm1, %v1921_v14  ;;  %v570_v17 = vpop.f32.mrb[31].mxu0  ;;  %v1387_v35 = vmul.f32 %v1921_v14, %v1921_v14  ;;  %v1543_v41 = vsel %vm966_vm1, %v1386_v19, 0.0  ;;  %1055 = vst.msk [vmem:[%s3307_s2 + $0x2c0] sm:$0xff] %vm966_vm1, %v2536_v9 }
 0x126   :  { %v1539_v20 = vsel %vm966_vm1, %v1384_v13, 0.0  ;;  %996 = vst.msk [vmem:[%s3307_s2 + $0xe8] sm:$0xff] %vm966_vm1, %v570_v17  ;;  %v1152_v23 = vsel %vm966_vm1, %v570_v17, 0.0  ;;  %v1385_v24 = vmul.f32 %v570_v17, %v570_v17  ;;  %v1156_v42 = vsel %vm966_vm1, %v1921_v14, 0.0  ;;  %v2545_v13 = vpop.f32.mrb[26].mxu1 }
 0x127   :  { %v1540_v28 = vadd.f32 %v1539_v20, %v1538_v16  ;;  %v1153_v30 = vadd.f32 %v1152_v23, %v1151_v15  ;;  %v1545_v47 = vsel %vm966_vm1, %v1387_v35, 0.0  ;;  %1058 = vst.msk [vmem:[%s3307_s2 + $0x2d8] sm:$0xff] %vm966_vm1, %v2545_v13  ;;  %v2552_v16 = vpop.f32.mrb[27].mxu1 }
 0x128   :  { %v1541_v36 = vsel %vm966_vm1, %v1385_v24, 0.0  ;;  %1056 = vst.msk [vmem:[%s3307_s2 + $0x2c8] sm:$0xff] %vm966_vm1, %v2552_v16 }
 0x129   :  { %v1155_v38 = vadd.f32 %v1154_v34, %v1153_v30  ;;  %v1542_v39 = vadd.f32 %v1541_v36, %v1540_v28 }
 0x12a   :  { %v1924_v43 = vpop.f32.mrb[32].mxu0 }
 0x12b   :  { %v1544_v44 = vadd.f32 %v1543_v41, %v1542_v39  ;;  %1001 = vst.msk [vmem:[%s3307_s2 + $0x110] sm:$0xff] %vm966_vm1, %v1924_v43  ;;  %v583_v45 = vpop.f32.mrb[33].mxu0  ;;  %v1157_v46 = vadd.f32 %v1156_v42, %v1155_v38  ;;  %v1390_v60 = vmul.f32 %v1924_v43, %v1924_v43  ;;  %v1162_v10 = vsel %vm966_vm1, %v1924_v43, 0.0 }
 0x12c   :  { %999 = vst.msk [vmem:[%s3307_s2 + $0x100] sm:$0xff] %vm966_vm1, %v583_v45  ;;  %v1158_v48 = vsel %vm966_vm1, %v583_v45, 0.0  ;;  %v1388_v49 = vmul.f32 %v583_v45, %v583_v45  ;;  %v1925_v52 = vpop.f32.mrb[34].mxu0 }
 0x12d   :  { %v1159_v54 = vadd.f32 %v1158_v48, %v1157_v46  ;;  %v1546_v56 = vadd.f32 %v1545_v47, %v1544_v44  ;;  %1002 = vst.msk [vmem:[%s3307_s2 + $0x118] sm:$0xff] %vm966_vm1, %v1925_v52  ;;  %v586_v59 = vpop.f32.mrb[35].mxu0  ;;  %v1391_v11 = vmul.f32 %v1925_v52, %v1925_v52  ;;  %v1551_v17 = vsel %vm966_vm1, %v1390_v60, 0.0  ;;  %v2581_v46 = vpop.f32.mrb[28].mxu1 }
 0x12e   :  { %v1547_v0 = vsel %vm966_vm1, %v1388_v49, 0.0  ;;  %1000 = vst.msk [vmem:[%s3307_s2 + $0x108] sm:$0xff] %vm966_vm1, %v586_v59  ;;  %v1160_v2 = vsel %vm966_vm1, %v586_v59, 0.0  ;;  %v1389_v5 = vmul.f32 %v586_v59, %v586_v59  ;;  %v1164_v19 = vsel %vm966_vm1, %v1925_v52, 0.0  ;;  %1061 = vst.msk [vmem:[%s3307_s2 + $0x2f0] sm:$0xff] %vm966_vm1, %v2581_v46  ;;  %v2588_v49 = vpop.f32.mrb[29].mxu1 }
 0x12f   :  { %v1548_v7 = vadd.f32 %v1547_v0, %v1546_v56  ;;  %v1161_v8 = vadd.f32 %v1160_v2, %v1159_v54  ;;  %v1553_v30 = vsel %vm966_vm1, %v1391_v11, 0.0  ;;  %1059 = vst.msk [vmem:[%s3307_s2 + $0x2e0] sm:$0xff] %vm966_vm1, %v2588_v49  ;;  %v2597_v59 = vpop.f32.mrb[30].mxu1 }
 0x130   :  { %v1549_v12 = vsel %vm966_vm1, %v1389_v5, 0.0  ;;  %1062 = vst.msk [vmem:[%s3307_s2 + $0x2f8] sm:$0xff] %vm966_vm1, %v2597_v59  ;;  %v2604_v2 = vpop.f32.mrb[31].mxu1 }
 0x131   :  { %v1163_v14 = vadd.f32 %v1162_v10, %v1161_v8  ;;  %v1550_v15 = vadd.f32 %v1549_v12, %v1548_v7  ;;  %1060 = vst.msk [vmem:[%s3307_s2 + $0x2e8] sm:$0xff] %vm966_vm1, %v2604_v2 }
 0x132   :  { %v1928_v20 = vpop.f32.mrb[36].mxu0 }
 0x133   :  { %v1552_v23 = vadd.f32 %v1551_v17, %v1550_v15  ;;  %1005 = vst.msk [vmem:[%s3307_s2 + $0x130] sm:$0xff] %vm966_vm1, %v1928_v20  ;;  %v599_v24 = vpop.f32.mrb[37].mxu0  ;;  %v1165_v28 = vadd.f32 %v1164_v19, %v1163_v14  ;;  %v1394_v42 = vmul.f32 %v1928_v20, %v1928_v20  ;;  %v1170_v52 = vsel %vm966_vm1, %v1928_v20, 0.0 }
 0x134   :  { %1003 = vst.msk [vmem:[%s3307_s2 + $0x120] sm:$0xff] %vm966_vm1, %v599_v24  ;;  %v1166_v34 = vsel %vm966_vm1, %v599_v24, 0.0  ;;  %v1392_v35 = vmul.f32 %v599_v24, %v599_v24  ;;  %v1929_v36 = vpop.f32.mrb[38].mxu0 }
 0x135   :  { %v1167_v38 = vadd.f32 %v1166_v34, %v1165_v28  ;;  %v1554_v39 = vadd.f32 %v1553_v30, %v1552_v23  ;;  %1006 = vst.msk [vmem:[%s3307_s2 + $0x138] sm:$0xff] %vm966_vm1, %v1929_v36  ;;  %v602_v41 = vpop.f32.mrb[39].mxu0  ;;  %v1395_v54 = vmul.f32 %v1929_v36, %v1929_v36  ;;  %v1559_v5 = vsel %vm966_vm1, %v1394_v42, 0.0 }
 0x136   :  { %v1555_v43 = vsel %vm966_vm1, %v1392_v35, 0.0  ;;  %1004 = vst.msk [vmem:[%s3307_s2 + $0x128] sm:$0xff] %vm966_vm1, %v602_v41  ;;  %v1168_v44 = vsel %vm966_vm1, %v602_v41, 0.0  ;;  %v1393_v45 = vmul.f32 %v602_v41, %v602_v41  ;;  %v1172_v7 = vsel %vm966_vm1, %v1929_v36, 0.0  ;;  %v2633_v36 = vpop.f32.mrb[32].mxu1 }
 0x137   :  { %v1556_v47 = vadd.f32 %v1555_v43, %v1554_v39  ;;  %v1169_v48 = vadd.f32 %v1168_v44, %v1167_v38  ;;  %v1561_v14 = vsel %vm966_vm1, %v1395_v54, 0.0  ;;  %1065 = vst.msk [vmem:[%s3307_s2 + $0x310] sm:$0xff] %vm966_vm1, %v2633_v36  ;;  %v2640_v41 = vpop.f32.mrb[33].mxu1 }
 0x138   :  { %v1557_v56 = vsel %vm966_vm1, %v1393_v45, 0.0  ;;  %1063 = vst.msk [vmem:[%s3307_s2 + $0x300] sm:$0xff] %vm966_vm1, %v2640_v41  ;;  %v2649_v45 = vpop.f32.mrb[34].mxu1 }
 0x139   :  { %v1171_v60 = vadd.f32 %v1170_v52, %v1169_v48  ;;  %v1558_v0 = vadd.f32 %v1557_v56, %v1556_v47  ;;  %1066 = vst.msk [vmem:[%s3307_s2 + $0x318] sm:$0xff] %vm966_vm1, %v2649_v45  ;;  %v2656_v52 = vpop.f32.mrb[35].mxu1 }
 0x13a   :  { %v1932_v8 = vpop.f32.mrb[40].mxu0  ;;  %1064 = vst.msk [vmem:[%s3307_s2 + $0x308] sm:$0xff] %vm966_vm1, %v2656_v52 }
 0x13b   :  { %v1560_v10 = vadd.f32 %v1559_v5, %v1558_v0  ;;  %1009 = vst.msk [vmem:[%s3307_s2 + $0x150] sm:$0xff] %vm966_vm1, %v1932_v8  ;;  %v615_v11 = vpop.f32.mrb[41].mxu0  ;;  %v1173_v12 = vadd.f32 %v1172_v7, %v1171_v60  ;;  %v1398_v28 = vmul.f32 %v1932_v8, %v1932_v8  ;;  %v1178_v42 = vsel %vm966_vm1, %v1932_v8, 0.0 }
 0x13c   :  { %1007 = vst.msk [vmem:[%s3307_s2 + $0x140] sm:$0xff] %vm966_vm1, %v615_v11  ;;  %v1174_v15 = vsel %vm966_vm1, %v615_v11, 0.0  ;;  %v1396_v17 = vmul.f32 %v615_v11, %v615_v11  ;;  %v1933_v19 = vpop.f32.mrb[42].mxu0 }
 0x13d   :  { %v1175_v20 = vadd.f32 %v1174_v15, %v1173_v12  ;;  %v1562_v23 = vadd.f32 %v1561_v14, %v1560_v10  ;;  %1010 = vst.msk [vmem:[%s3307_s2 + $0x158] sm:$0xff] %vm966_vm1, %v1933_v19  ;;  %v618_v24 = vpop.f32.mrb[43].mxu0  ;;  %v1399_v43 = vmul.f32 %v1933_v19, %v1933_v19  ;;  %v1567_v54 = vsel %vm966_vm1, %v1398_v28, 0.0  ;;  %v2685_v28 = vpop.f32.mrb[36].mxu1 }
 0x13e   :  { %v1563_v30 = vsel %vm966_vm1, %v1396_v17, 0.0  ;;  %1008 = vst.msk [vmem:[%s3307_s2 + $0x148] sm:$0xff] %vm966_vm1, %v618_v24  ;;  %v1176_v34 = vsel %vm966_vm1, %v618_v24, 0.0  ;;  %v1397_v35 = vmul.f32 %v618_v24, %v618_v24  ;;  %v1180_v56 = vsel %vm966_vm1, %v1933_v19, 0.0  ;;  %1069 = vst.msk [vmem:[%s3307_s2 + $0x330] sm:$0xff] %vm966_vm1, %v2685_v28 }
 0x13f   :  { %v1564_v38 = vadd.f32 %v1563_v30, %v1562_v23  ;;  %v1177_v39 = vadd.f32 %v1176_v34, %v1175_v20  ;;  %v1569_v8 = vsel %vm966_vm1, %v1399_v43, 0.0 }
 0x140   :  { %v1565_v44 = vsel %vm966_vm1, %v1397_v35, 0.0  ;;  %v2692_v35 = vpop.f32.mrb[37].mxu1 }
 0x141   :  { %v1179_v47 = vadd.f32 %v1178_v42, %v1177_v39  ;;  %v1566_v48 = vadd.f32 %v1565_v44, %v1564_v38  ;;  %1067 = vst.msk [vmem:[%s3307_s2 + $0x320] sm:$0xff] %vm966_vm1, %v2692_v35  ;;  %v2701_v43 = vpop.f32.mrb[38].mxu1 }
 0x142   :  { %v1936_v60 = vpop.f32.mrb[44].mxu0  ;;  %1070 = vst.msk [vmem:[%s3307_s2 + $0x338] sm:$0xff] %vm966_vm1, %v2701_v43 }
 0x143   :  { %v1568_v0 = vadd.f32 %v1567_v54, %v1566_v48  ;;  %1013 = vst.msk [vmem:[%s3307_s2 + $0x170] sm:$0xff] %vm966_vm1, %v1936_v60  ;;  %v631_v5 = vpop.f32.mrb[45].mxu0  ;;  %v1181_v7 = vadd.f32 %v1180_v56, %v1179_v47  ;;  %v1402_v19 = vmul.f32 %v1936_v60, %v1936_v60  ;;  %v1186_v38 = vsel %vm966_vm1, %v1936_v60, 0.0  ;;  %v2708_v48 = vpop.f32.mrb[39].mxu1 }
 0x144   :  { %1011 = vst.msk [vmem:[%s3307_s2 + $0x160] sm:$0xff] %vm966_vm1, %v631_v5  ;;  %v1182_v10 = vsel %vm966_vm1, %v631_v5, 0.0  ;;  %v1400_v11 = vmul.f32 %v631_v5, %v631_v5  ;;  %v1937_v12 = vpop.f32.mrb[46].mxu0  ;;  %1068 = vst.msk [vmem:[%s3307_s2 + $0x328] sm:$0xff] %vm966_vm1, %v2708_v48 }
 0x145   :  { %v1183_v14 = vadd.f32 %v1182_v10, %v1181_v7  ;;  %v1570_v15 = vadd.f32 %v1569_v8, %v1568_v0  ;;  %1014 = vst.msk [vmem:[%s3307_s2 + $0x178] sm:$0xff] %vm966_vm1, %v1937_v12  ;;  %v634_v17 = vpop.f32.mrb[47].mxu0  ;;  %v1403_v39 = vmul.f32 %v1937_v12, %v1937_v12  ;;  %v1575_v54 = vsel %vm966_vm1, %v1402_v19, 0.0 }
 0x146   :  { %v1571_v20 = vsel %vm966_vm1, %v1400_v11, 0.0  ;;  %1012 = vst.msk [vmem:[%s3307_s2 + $0x168] sm:$0xff] %vm966_vm1, %v634_v17  ;;  %v1184_v23 = vsel %vm966_vm1, %v634_v17, 0.0  ;;  %v1401_v24 = vmul.f32 %v634_v17, %v634_v17  ;;  %v1188_v56 = vsel %vm966_vm1, %v1937_v12, 0.0 }
 0x147   :  { %v1572_v30 = vadd.f32 %v1571_v20, %v1570_v15  ;;  %v1185_v34 = vadd.f32 %v1184_v23, %v1183_v14  ;;  %v1577_v8 = vsel %vm966_vm1, %v1403_v39, 0.0 }
 0x148   :  { %v1573_v42 = vsel %vm966_vm1, %v1401_v24, 0.0 }
 0x149   :  { %v1187_v44 = vadd.f32 %v1186_v38, %v1185_v34  ;;  %v1574_v47 = vadd.f32 %v1573_v42, %v1572_v30  ;;  %v2737_v30 = vpop.f32.mrb[40].mxu1 }
 0x14a   :  { %v1940_v60 = vpop.f32.mrb[48].mxu0  ;;  %1073 = vst.msk [vmem:[%s3307_s2 + $0x350] sm:$0xff] %vm966_vm1, %v2737_v30  ;;  %v2744_v39 = vpop.f32.mrb[41].mxu1 }
 0x14b   :  { %v1576_v0 = vadd.f32 %v1575_v54, %v1574_v47  ;;  %1017 = vst.msk [vmem:[%s3307_s2 + $0x190] sm:$0xff] %vm966_vm1, %v1940_v60  ;;  %v647_v5 = vpop.f32.mrb[49].mxu0  ;;  %v1189_v7 = vadd.f32 %v1188_v56, %v1187_v44  ;;  %v1406_v19 = vmul.f32 %v1940_v60, %v1940_v60  ;;  %v1194_v42 = vsel %vm966_vm1, %v1940_v60, 0.0  ;;  %1071 = vst.msk [vmem:[%s3307_s2 + $0x340] sm:$0xff] %vm966_vm1, %v2744_v39  ;;  %v2753_v54 = vpop.f32.mrb[42].mxu1 }
 0x14c   :  { %1015 = vst.msk [vmem:[%s3307_s2 + $0x180] sm:$0xff] %vm966_vm1, %v647_v5  ;;  %v1190_v10 = vsel %vm966_vm1, %v647_v5, 0.0  ;;  %v1404_v11 = vmul.f32 %v647_v5, %v647_v5  ;;  %v1941_v12 = vpop.f32.mrb[50].mxu0  ;;  %1074 = vst.msk [vmem:[%s3307_s2 + $0x358] sm:$0xff] %vm966_vm1, %v2753_v54  ;;  %v2760_v60 = vpop.f32.mrb[43].mxu1 }
 0x14d   :  { %v1191_v14 = vadd.f32 %v1190_v10, %v1189_v7  ;;  %v1578_v15 = vadd.f32 %v1577_v8, %v1576_v0  ;;  %1018 = vst.msk [vmem:[%s3307_s2 + $0x198] sm:$0xff] %vm966_vm1, %v1941_v12  ;;  %v650_v17 = vpop.f32.mrb[51].mxu0  ;;  %v1407_v44 = vmul.f32 %v1941_v12, %v1941_v12  ;;  %v1583_v5 = vsel %vm966_vm1, %v1406_v19, 0.0  ;;  %1072 = vst.msk [vmem:[%s3307_s2 + $0x348] sm:$0xff] %vm966_vm1, %v2760_v60 }
 0x14e   :  { %v1579_v20 = vsel %vm966_vm1, %v1404_v11, 0.0  ;;  %1016 = vst.msk [vmem:[%s3307_s2 + $0x188] sm:$0xff] %vm966_vm1, %v650_v17  ;;  %v1192_v23 = vsel %vm966_vm1, %v650_v17, 0.0  ;;  %v1405_v24 = vmul.f32 %v650_v17, %v650_v17  ;;  %v1196_v7 = vsel %vm966_vm1, %v1941_v12, 0.0 }
 0x14f   :  { %v1580_v34 = vadd.f32 %v1579_v20, %v1578_v15  ;;  %v1193_v38 = vadd.f32 %v1192_v23, %v1191_v14  ;;  %v1585_v15 = vsel %vm966_vm1, %v1407_v44, 0.0 }
 0x150   :  { %v1581_v47 = vsel %vm966_vm1, %v1405_v24, 0.0 }
 0x151   :  { %v1195_v56 = vadd.f32 %v1194_v42, %v1193_v38  ;;  %v1582_v0 = vadd.f32 %v1581_v47, %v1580_v34  ;;  %v2789_v47 = vpop.f32.mrb[44].mxu1 }
 0x152   :  { %v1944_v8 = vpop.f32.mrb[52].mxu0  ;;  %1077 = vst.msk [vmem:[%s3307_s2 + $0x370] sm:$0xff] %vm966_vm1, %v2789_v47 }
 0x153   :  { %v1584_v10 = vadd.f32 %v1583_v5, %v1582_v0  ;;  %1021 = vst.msk [vmem:[%s3307_s2 + $0x1b0] sm:$0xff] %vm966_vm1, %v1944_v8  ;;  %v663_v11 = vpop.f32.mrb[53].mxu0  ;;  %v1197_v14 = vadd.f32 %v1196_v7, %v1195_v56  ;;  %v1410_v34 = vmul.f32 %v1944_v8, %v1944_v8  ;;  %v2796_v5 = vpop.f32.mrb[45].mxu1  ;;  %v1202_v7 = vsel %vm966_vm1, %v1944_v8, 0.0 }
 0x154   :  { %1019 = vst.msk [vmem:[%s3307_s2 + $0x1a0] sm:$0xff] %vm966_vm1, %v663_v11  ;;  %v1198_v12 = vsel %vm966_vm1, %v663_v11, 0.0  ;;  %v1408_v17 = vmul.f32 %v663_v11, %v663_v11  ;;  %v1945_v19 = vpop.f32.mrb[54].mxu0  ;;  %1075 = vst.msk [vmem:[%s3307_s2 + $0x360] sm:$0xff] %vm966_vm1, %v2796_v5 }
 0x155   :  { %v1199_v20 = vadd.f32 %v1198_v12, %v1197_v14  ;;  %v1586_v23 = vadd.f32 %v1585_v15, %v1584_v10  ;;  %1022 = vst.msk [vmem:[%s3307_s2 + $0x1b8] sm:$0xff] %vm966_vm1, %v1945_v19  ;;  %v666_v24 = vpop.f32.mrb[55].mxu0  ;;  %v1411_v10 = vmul.f32 %v1945_v19, %v1945_v19  ;;  %v2805_v14 = vpop.f32.mrb[46].mxu1 }
 0x156   :  { %v1587_v38 = vsel %vm966_vm1, %v1408_v17, 0.0  ;;  %1020 = vst.msk [vmem:[%s3307_s2 + $0x1a8] sm:$0xff] %vm966_vm1, %v666_v24  ;;  %v1200_v42 = vsel %vm966_vm1, %v666_v24, 0.0  ;;  %v1409_v44 = vmul.f32 %v666_v24, %v666_v24  ;;  %3327 = vst [vmem:[#allocation5_spill] sm:$0xff] %v2805_v14  ;;  %v2812_v8 = vpop.f32.mrb[47].mxu1  ;;  %v1591_v17 = vsel %vm966_vm1, %v1410_v34, 0.0 }
 0x157   :  { %v1588_v56 = vadd.f32 %v1587_v38, %v1586_v23  ;;  %v1201_v0 = vadd.f32 %v1200_v42, %v1199_v20  ;;  %1078 = vst.msk [vmem:[%s3307_s2 + $0x378] sm:$0xff] %vm966_vm1, %v2805_v14  ;;  %v1204_v20 = vsel %vm966_vm1, %v1945_v19, 0.0  ;;  %1076 = vst.msk [vmem:[%s3307_s2 + $0x368] sm:$0xff] %vm966_vm1, %v2812_v8 }
 0x158   :  { %v1589_v11 = vsel %vm966_vm1, %v1409_v44, 0.0  ;;  %v1593_v44 = vsel %vm966_vm1, %v1411_v10, 0.0 }
 0x159   :  { %v1203_v15 = vadd.f32 %v1202_v7, %v1201_v0  ;;  %v1590_v12 = vadd.f32 %v1589_v11, %v1588_v56 }
 0x15a   :  { %v1948_v23 = vpop.f32.mrb[56].mxu0 }
 0x15b   :  { %v1592_v24 = vadd.f32 %v1591_v17, %v1590_v12  ;;  %1025 = vst.msk [vmem:[%s3307_s2 + $0x1d0] sm:$0xff] %vm966_vm1, %v1948_v23  ;;  %v679_v38 = vpop.f32.mrb[57].mxu0  ;;  %v1205_v42 = vadd.f32 %v1204_v20, %v1203_v15  ;;  %v1414_v15 = vmul.f32 %v1948_v23, %v1948_v23  ;;  %v2841_v20 = vpop.f32.mrb[48].mxu1 }
 0x15c   :  { %1023 = vst.msk [vmem:[%s3307_s2 + $0x1c0] sm:$0xff] %vm966_vm1, %v679_v38  ;;  %v1206_v19 = vsel %vm966_vm1, %v679_v38, 0.0  ;;  %v1412_v34 = vmul.f32 %v679_v38, %v679_v38  ;;  %v1949_v56 = vpop.f32.mrb[58].mxu0  ;;  %3328 = vst [vmem:[#allocation6_spill] sm:$0xff] %v2841_v20 }
 0x15d   :  { %v1207_v0 = vadd.f32 %v1206_v19, %v1205_v42  ;;  %v1594_v7 = vadd.f32 %v1593_v44, %v1592_v24  ;;  %1026 = vst.msk [vmem:[%s3307_s2 + $0x1d8] sm:$0xff] %vm966_vm1, %v1949_v56  ;;  %v682_v11 = vpop.f32.mrb[59].mxu0  ;;  %1081 = vst.msk [vmem:[%s3307_s2 + $0x390] sm:$0xff] %vm966_vm1, %v2841_v20  ;;  %v2848_v42 = vpop.f32.mrb[49].mxu1  ;;  %v1210_v44 = vsel %vm966_vm1, %v1948_v23, 0.0  ;;  %v1415_v19 = vmul.f32 %v1949_v56, %v1949_v56 }
 0x15e   :  { %v1595_v10 = vsel %vm966_vm1, %v1412_v34, 0.0  ;;  %1024 = vst.msk [vmem:[%s3307_s2 + $0x1c8] sm:$0xff] %vm966_vm1, %v682_v11  ;;  %v1208_v12 = vsel %vm966_vm1, %v682_v11, 0.0  ;;  %v1413_v17 = vmul.f32 %v682_v11, %v682_v11  ;;  %3329 = vst [vmem:[#allocation7_spill] sm:$0xff] %v2848_v42 }
 0x15f   :  { %v1596_v24 = vadd.f32 %v1595_v10, %v1594_v7  ;;  %v1209_v38 = vadd.f32 %v1208_v12, %v1207_v0  ;;  %1079 = vst.msk [vmem:[%s3307_s2 + $0x380] sm:$0xff] %vm966_vm1, %v2848_v42  ;;  %v2857_v0 = vpop.f32.mrb[50].mxu1  ;;  %v1599_v10 = vsel %vm966_vm1, %v1414_v15, 0.0  ;;  %v1212_v12 = vsel %vm966_vm1, %v1949_v56, 0.0 }
 0x160   :  { %v1597_v34 = vsel %vm966_vm1, %v1413_v17, 0.0  ;;  %3330 = vst [vmem:[#allocation8_spill] sm:$0xff] %v2857_v0  ;;  %1082 = vst.msk [vmem:[%s3307_s2 + $0x398] sm:$0xff] %vm966_vm1, %v2857_v0  ;;  %v2864_v23 = vpop.f32.mrb[51].mxu1 }
 0x161   :  { %v1211_v7 = vadd.f32 %v1210_v44, %v1209_v38  ;;  %v1598_v11 = vadd.f32 %v1597_v34, %v1596_v24  ;;  %3331 = vst [vmem:[#allocation9_spill] sm:$0xff] %v2864_v23  ;;  %1080 = vst.msk [vmem:[%s3307_s2 + $0x388] sm:$0xff] %vm966_vm1, %v2864_v23  ;;  %v1601_v34 = vsel %vm966_vm1, %v1415_v19, 0.0  ;;  %v2893_v23 = vpop.f32.mrb[52].mxu1 }
 0x162   :  { %v1952_v17 = vpop.f32.mrb[60].mxu0  ;;  %3332 = vst [vmem:[#allocation10_spill] sm:$0xff] %v2893_v23  ;;  %1085 = vst.msk [vmem:[%s3307_s2 + $0x3b0] sm:$0xff] %vm966_vm1, %v2893_v23  ;;  %v1222_v23 = vsel %vm966_vm1, %v2224_v61, 0.0 }
 0x163   :  { %v1600_v24 = vadd.f32 %v1599_v10, %v1598_v11  ;;  %1029 = vst.msk [vmem:[%s3307_s2 + $0x1f0] sm:$0xff] %vm966_vm1, %v1952_v17  ;;  %v695_v38 = vpop.f32.mrb[61].mxu0  ;;  %v1213_v44 = vadd.f32 %v1212_v12, %v1211_v7  ;;  %v1418_v7 = vmul.f32 %v1952_v17, %v1952_v17 }
 0x164   :  { %1027 = vst.msk [vmem:[%s3307_s2 + $0x1e0] sm:$0xff] %vm966_vm1, %v695_v38  ;;  %v1214_v56 = vsel %vm966_vm1, %v695_v38, 0.0  ;;  %v1416_v15 = vmul.f32 %v695_v38, %v695_v38  ;;  %v1953_v0 = vpop.f32.mrb[62].mxu0 }
 0x165   :  { %v1215_v20 = vadd.f32 %v1214_v56, %v1213_v44  ;;  %v1602_v11 = vadd.f32 %v1601_v34, %v1600_v24  ;;  %1030 = vst.msk [vmem:[%s3307_s2 + $0x1f8] sm:$0xff] %vm966_vm1, %v1953_v0  ;;  %v698_v10 = vpop.f32.mrb[63].mxu0  ;;  %v2900_v34 = vpop.f32.mrb[53].mxu1  ;;  %v1218_v56 = vsel %vm966_vm1, %v1952_v17, 0.0 }
 0x166   :  { %v1603_v19 = vsel %vm966_vm1, %v1416_v15, 0.0  ;;  %1028 = vst.msk [vmem:[%s3307_s2 + $0x1e8] sm:$0xff] %vm966_vm1, %v698_v10  ;;  %v1216_v12 = vsel %vm966_vm1, %v698_v10, 0.0  ;;  %v1417_v38 = vmul.f32 %v698_v10, %v698_v10  ;;  %3333 = vst [vmem:[#allocation11_spill] sm:$0xff] %v2900_v34  ;;  %v1419_v15 = vmul.f32 %v1953_v0, %v1953_v0 }
 0x167   :  { %v1604_v24 = vadd.f32 %v1603_v19, %v1602_v11  ;;  %v1217_v44 = vadd.f32 %v1216_v12, %v1215_v20  ;;  %v1420_v10 = vmul.f32 %v2224_v61, %v2224_v61  ;;  %1083 = vst.msk [vmem:[%s3307_s2 + $0x3a0] sm:$0xff] %vm966_vm1, %v2900_v34  ;;  %v2911_v20 = vpop.f32.mrb[54].mxu1  ;;  %v1607_v12 = vsel %vm966_vm1, %v1418_v7, 0.0 }
 0x168   :  { %v1605_v42 = vsel %vm966_vm1, %v1417_v38, 0.0  ;;  %3334 = vst [vmem:[#allocation12_spill] sm:$0xff] %v2911_v20  ;;  %1086 = vst.msk [vmem:[%s3307_s2 + $0x3b8] sm:$0xff] %vm966_vm1, %v2911_v20  ;;  %v2918_v17 = vpop.f32.mrb[55].mxu1  ;;  %v1220_v38 = vsel %vm966_vm1, %v1953_v0, 0.0  ;;  %v1421_v7 = vmul.f32 %v2240_v4, %v2240_v4  ;;  %v1422_v61 = vmul.f32 %v2217_v58, %v2217_v58 }
 0x169   :  { %v1219_v11 = vadd.f32 %v1218_v56, %v1217_v44  ;;  %v1606_v19 = vadd.f32 %v1605_v42, %v1604_v24  ;;  %3335 = vst [vmem:[#allocation13_spill] sm:$0xff] %v2918_v17  ;;  %1084 = vst.msk [vmem:[%s3307_s2 + $0x3a8] sm:$0xff] %vm966_vm1, %v2918_v17  ;;  %v1609_v44 = vsel %vm966_vm1, %v1419_v15, 0.0  ;;  %v1611_v56 = vsel %vm966_vm1, %v1420_v10, 0.0  ;;  %v2937_v14 = vpop.f32.mrb[56].mxu1 }
 0x16a   :  { %v1224_v34 = vsel %vm966_vm1, %v2240_v4, 0.0  ;;  %1089 = vst.msk [vmem:[%s3307_s2 + $0x3d0] sm:$0xff] %vm966_vm1, %v2937_v14  ;;  %v2944_v15 = vpop.f32.mrb[57].mxu1  ;;  %v1423_v10 = vmul.f32 %v2233_v1, %v2233_v1  ;;  %v1613_v4 = vsel %vm966_vm1, %v1421_v7, 0.0 }
 0x16b   :  { %v1221_v42 = vadd.f32 %v1220_v38, %v1219_v11  ;;  %v1608_v24 = vadd.f32 %v1607_v12, %v1606_v19  ;;  %1087 = vst.msk [vmem:[%s3307_s2 + $0x3c0] sm:$0xff] %vm966_vm1, %v2944_v15  ;;  %v1615_v38 = vsel %vm966_vm1, %v1422_v61, 0.0 }
 0x16d   :  { %v1610_v20 = vadd.f32 %v1609_v44, %v1608_v24  ;;  %v1223_v0 = vadd.f32 %v1222_v23, %v1221_v42  ;;  %v1226_v23 = vsel %vm966_vm1, %v2217_v58, 0.0  ;;  %v1228_v42 = vsel %vm966_vm1, %v2233_v1, 0.0 }
 0x16e   :  { %v1230_v24 = vsel %vm966_vm1, %v2276_v25, 0.0 }
 0x16f   :  { %v1612_v17 = vadd.f32 %v1611_v56, %v1610_v20  ;;  %v1225_v11 = vadd.f32 %v1224_v34, %v1223_v0  ;;  %v1424_v20 = vmul.f32 %v2276_v25, %v2276_v25  ;;  %v2958_v34 = vpop.f32.mrb[58].mxu1  ;;  %v1617_v56 = vsel %vm966_vm1, %v1423_v10, 0.0 }
 0x170   :  { %1090 = vst.msk [vmem:[%s3307_s2 + $0x3d8] sm:$0xff] %vm966_vm1, %v2958_v34  ;;  %v2965_v58 = vpop.f32.mrb[59].mxu1  ;;  %v1425_v0 = vmul.f32 %v2292_v32, %v2292_v32  ;;  %v1426_v25 = vmul.f32 %v2269_v22, %v2269_v22 }
 0x171   :  { %v1227_v19 = vadd.f32 %v1226_v23, %v1225_v11  ;;  %v1614_v12 = vadd.f32 %v1613_v4, %v1612_v17  ;;  %1088 = vst.msk [vmem:[%s3307_s2 + $0x3c8] sm:$0xff] %vm966_vm1, %v2965_v58  ;;  %v1619_v7 = vsel %vm966_vm1, %v1424_v20, 0.0  ;;  %v1232_v11 = vsel %vm966_vm1, %v2292_v32, 0.0  ;;  %v2985_v23 = vpop.f32.mrb[60].mxu1 }
 0x172   :  { %1093 = vst.msk [vmem:[%s3307_s2 + $0x3f0] sm:$0xff] %vm966_vm1, %v2985_v23  ;;  %v2992_v10 = vpop.f32.mrb[61].mxu1  ;;  %v1234_v20 = vsel %vm966_vm1, %v2269_v22, 0.0  ;;  %v1621_v32 = vsel %vm966_vm1, %v1425_v0, 0.0 }
 0x173   :  { %v1616_v17 = vadd.f32 %v1615_v38, %v1614_v12  ;;  %v1229_v44 = vadd.f32 %v1228_v42, %v1227_v19  ;;  %v1427_v19 = vmul.f32 %v2285_v29, %v2285_v29  ;;  %v1428_v38 = vmul.f32 %v2328_v53, %v2328_v53  ;;  %1091 = vst.msk [vmem:[%s3307_s2 + $0x3e0] sm:$0xff] %vm966_vm1, %v2992_v10  ;;  %v3006_v42 = vpop.f32.mrb[62].mxu1 }
 0x174   :  { %1094 = vst.msk [vmem:[%s3307_s2 + $0x3f8] sm:$0xff] %vm966_vm1, %v3006_v42  ;;  %v3013_v22 = vpop.f32.mrb[63].mxu1 }
 0x175   :  { %v1231_v61 = vadd.f32 %v1230_v24, %v1229_v44  ;;  %v1618_v1 = vadd.f32 %v1617_v56, %v1616_v17  ;;  %v1623_v44 = vsel %vm966_vm1, %v1426_v25, 0.0  ;;  %v1236_v56 = vsel %vm966_vm1, %v2285_v29, 0.0  ;;  %1092 = vst.msk [vmem:[%s3307_s2 + $0x3e8] sm:$0xff] %vm966_vm1, %v3013_v22 }
 0x176   :  { %v1429_v25 = vmul.f32 %v2344_v62, %v2344_v62 }
 0x177   :  { %v1620_v4 = vadd.f32 %v1619_v7, %v1618_v1  ;;  %v1233_v12 = vadd.f32 %v1232_v11, %v1231_v61  ;;  %v1238_v7 = vsel %vm966_vm1, %v2328_v53, 0.0  ;;  %v1625_v1 = vsel %vm966_vm1, %v1427_v19, 0.0 }
 0x178   :  { %v1627_v11 = vsel %vm966_vm1, %v1428_v38, 0.0  ;;  %v1430_v53 = vmul.f32 %v2321_v50, %v2321_v50  ;;  %v1431_v19 = vmul.f32 %v2337_v57, %v2337_v57  ;;  %v1629_v38 = vsel %vm966_vm1, %v1429_v25, 0.0 }
 0x179   :  { %v1235_v24 = vadd.f32 %v1234_v20, %v1233_v12  ;;  %v1622_v17 = vadd.f32 %v1621_v32, %v1620_v4  ;;  %v1240_v12 = vsel %vm966_vm1, %v2344_v62, 0.0  ;;  %v1244_v62 = vsel %vm966_vm1, %v2337_v57, 0.0 }
 0x17a   :  { %v1433_v25 = vmul.f32 %v2396_v31, %v2396_v31  ;;  %v1248_v57 = vsel %vm966_vm1, %v2396_v31, 0.0  ;;  %v1252_v31 = vsel %vm966_vm1, %v2389_v27, 0.0 }
 0x17b   :  { %v1624_v0 = vadd.f32 %v1623_v44, %v1622_v17  ;;  %v1237_v61 = vadd.f32 %v1236_v56, %v1235_v24  ;;  %v1242_v24 = vsel %vm966_vm1, %v2321_v50, 0.0  ;;  %v1432_v17 = vmul.f32 %v2380_v21, %v2380_v21 }
 0x17d   :  { %v1239_v4 = vadd.f32 %v1238_v7, %v1237_v61  ;;  %v1626_v29 = vadd.f32 %v1625_v1, %v1624_v0  ;;  %v1631_v7 = vsel %vm966_vm1, %v1430_v53, 0.0  ;;  %v1246_v0 = vsel %vm966_vm1, %v2380_v21, 0.0 }
 0x17e   :  { %v1633_v1 = vsel %vm966_vm1, %v1431_v19, 0.0  ;;  %v1434_v53 = vmul.f32 %v2373_v18, %v2373_v18  ;;  %v1250_v21 = vsel %vm966_vm1, %v2373_v18, 0.0  ;;  %v1436_v19 = vmul.f32 %v2432_v55, %v2432_v55 }
 0x17f   :  { %v1628_v20 = vadd.f32 %v1627_v11, %v1626_v29  ;;  %v1241_v32 = vadd.f32 %v1240_v12, %v1239_v4  ;;  %v1635_v11 = vsel %vm966_vm1, %v1432_v17, 0.0 }
 0x181   :  { %v1243_v44 = vadd.f32 %v1242_v24, %v1241_v32  ;;  %v1630_v56 = vadd.f32 %v1629_v38, %v1628_v20  ;;  %v1435_v32 = vmul.f32 %v2389_v27, %v2389_v27  ;;  %v1637_v24 = vsel %vm966_vm1, %v1433_v25, 0.0 }
 0x182   :  { %v1256_v27 = vsel %vm966_vm1, %v2448_v3, 0.0 }
 0x183   :  { %v1632_v61 = vadd.f32 %v1631_v7, %v1630_v56  ;;  %v1245_v50 = vadd.f32 %v1244_v62, %v1243_v44  ;;  %v1639_v44 = vsel %vm966_vm1, %v1434_v53, 0.0  ;;  %v1254_v56 = vsel %vm966_vm1, %v2432_v55, 0.0 }
 0x184   :  { %v1641_v62 = vsel %vm966_vm1, %v1435_v32, 0.0  ;;  %v1258_v55 = vsel %vm966_vm1, %v2425_v51, 0.0  ;;  %v1262_v32 = vsel %vm966_vm1, %v2484_v33, 0.0 }
 0x185   :  { %v1247_v4 = vadd.f32 %v1246_v0, %v1245_v50  ;;  %v1634_v29 = vadd.f32 %v1633_v1, %v1632_v61  ;;  %v1643_v0 = vsel %vm966_vm1, %v1436_v19, 0.0  ;;  %v1437_v61 = vmul.f32 %v2448_v3, %v2448_v3 }
 0x186   :  { %v1260_v3 = vsel %vm966_vm1, %v2441_v63, 0.0 }
 0x187   :  { %v1636_v12 = vadd.f32 %v1635_v11, %v1634_v29  ;;  %v1249_v20 = vadd.f32 %v1248_v57, %v1247_v4  ;;  %v1438_v11 = vmul.f32 %v2425_v51, %v2425_v51  ;;  %v1439_v29 = vmul.f32 %v2441_v63, %v2441_v63 }
 0x188   :  { %v1645_v53 = vsel %vm966_vm1, %v1437_v61, 0.0  ;;  %v1440_v57 = vmul.f32 %v2484_v33, %v2484_v33  ;;  %v1264_v63 = vsel %vm966_vm1, %v2500_v40, 0.0  ;;  %v1266_v33 = vsel %vm966_vm1, %v2477_v26, 0.0 }
 0x189   :  { %v1251_v38 = vadd.f32 %v1250_v21, %v1249_v20  ;;  %v1638_v17 = vadd.f32 %v1637_v24, %v1636_v12  ;;  %v1647_v21 = vsel %vm966_vm1, %v1438_v11, 0.0  ;;  %v1649_v19 = vsel %vm966_vm1, %v1439_v29, 0.0 }
 0x18a   :  { %v1444_v61 = vmul.f32 %v2536_v9, %v2536_v9  ;;  %v1445_v29 = vmul.f32 %v2552_v16, %v2552_v16 }
 0x18b   :  { %v1640_v7 = vadd.f32 %v1639_v44, %v1638_v17  ;;  %v1253_v18 = vadd.f32 %v1252_v31, %v1251_v38  ;;  %v1651_v38 = vsel %vm966_vm1, %v1440_v57, 0.0  ;;  %v1441_v17 = vmul.f32 %v2500_v40, %v2500_v40 }
 0x18c   :  { %v1268_v40 = vsel %vm966_vm1, %v2493_v37, 0.0 }
 0x18d   :  { %v1255_v50 = vadd.f32 %v1254_v56, %v1253_v18  ;;  %v1642_v1 = vadd.f32 %v1641_v62, %v1640_v7  ;;  %v1442_v56 = vmul.f32 %v2477_v26, %v2477_v26  ;;  %v1443_v62 = vmul.f32 %v2493_v37, %v2493_v37 }
 0x18e   :  { %v1272_v37 = vsel %vm966_vm1, %v2552_v16, 0.0  ;;  %v1276_v16 = vsel %vm966_vm1, %v2545_v13, 0.0 }
 0x18f   :  { %v1644_v25 = vadd.f32 %v1643_v0, %v1642_v1  ;;  %v1257_v4 = vadd.f32 %v1256_v27, %v1255_v50  ;;  %v1653_v0 = vsel %vm966_vm1, %v1441_v17, 0.0  ;;  %v1655_v11 = vsel %vm966_vm1, %v1442_v56, 0.0 }
 0x190   :  { %v1270_v27 = vsel %vm966_vm1, %v2536_v9, 0.0  ;;  %v1274_v9 = vsel %vm966_vm1, %v2529_v6, 0.0  ;;  %v1278_v17 = vsel %vm966_vm1, %v2588_v49, 0.0 }
 0x191   :  { %v1259_v12 = vadd.f32 %v1258_v55, %v1257_v4  ;;  %v1646_v20 = vadd.f32 %v1645_v53, %v1644_v25  ;;  %v1657_v4 = vsel %vm966_vm1, %v1443_v62, 0.0  ;;  %v1659_v55 = vsel %vm966_vm1, %v1444_v61, 0.0 }
 0x192   :  { %v1451_v61 = vmul.f32 %v2597_v59, %v2597_v59 }
 0x193   :  { %v1648_v24 = vadd.f32 %v1647_v21, %v1646_v20  ;;  %v1261_v51 = vadd.f32 %v1260_v3, %v1259_v12  ;;  %v1446_v12 = vmul.f32 %v2529_v6, %v2529_v6  ;;  %v1447_v3 = vmul.f32 %v2545_v13, %v2545_v13 }
 0x194   :  { %v1280_v13 = vsel %vm966_vm1, %v2604_v2, 0.0 }
 0x195   :  { %v1263_v44 = vadd.f32 %v1262_v32, %v1261_v51  ;;  %v1650_v31 = vadd.f32 %v1649_v19, %v1648_v24  ;;  %v1661_v32 = vsel %vm966_vm1, %v1445_v29, 0.0  ;;  %v1448_v24 = vmul.f32 %v2588_v49, %v2588_v49 }
 0x196   :  { %v1282_v49 = vsel %vm966_vm1, %v2581_v46, 0.0  ;;  %v1453_v29 = vmul.f32 %v2656_v52, %v2656_v52 }
 0x197   :  { %v1652_v7 = vadd.f32 %v1651_v38, %v1650_v31  ;;  %v1265_v18 = vadd.f32 %v1264_v63, %v1263_v44  ;;  %v1663_v38 = vsel %vm966_vm1, %v1446_v12, 0.0  ;;  %v1665_v31 = vsel %vm966_vm1, %v1447_v3, 0.0 }
 0x198   :  { %v1667_v56 = vsel %vm966_vm1, %v1448_v24, 0.0  ;;  %v1449_v63 = vmul.f32 %v2604_v2, %v2604_v2  ;;  %v1284_v2 = vsel %vm966_vm1, %v2597_v59, 0.0  ;;  %v1454_v12 = vmul.f32 %v2633_v36, %v2633_v36 }
 0x199   :  { %v1267_v50 = vadd.f32 %v1266_v33, %v1265_v18  ;;  %v1654_v1 = vadd.f32 %v1653_v0, %v1652_v7  ;;  %v1450_v33 = vmul.f32 %v2581_v46, %v2581_v46  ;;  %v1288_v59 = vsel %vm966_vm1, %v2656_v52, 0.0 }
 0x19a   :  { %v1456_v3 = vmul.f32 %v2692_v35, %v2692_v35  ;;  %v1292_v52 = vsel %vm966_vm1, %v2649_v45, 0.0 }
 0x19b   :  { %v1656_v25 = vadd.f32 %v1655_v11, %v1654_v1  ;;  %v1269_v26 = vadd.f32 %v1268_v40, %v1267_v50  ;;  %v1669_v50 = vsel %vm966_vm1, %v1449_v63, 0.0  ;;  %v1452_v1 = vmul.f32 %v2640_v41, %v2640_v41 }
 0x19d   :  { %v1271_v53 = vadd.f32 %v1270_v27, %v1269_v26  ;;  %v1658_v57 = vadd.f32 %v1657_v4, %v1656_v25  ;;  %v1671_v27 = vsel %vm966_vm1, %v1450_v33, 0.0  ;;  %v1286_v25 = vsel %vm966_vm1, %v2640_v41, 0.0 }
 0x19e   :  { %v1673_v4 = vsel %vm966_vm1, %v1451_v61, 0.0  ;;  %v1290_v41 = vsel %vm966_vm1, %v2633_v36, 0.0  ;;  %v1302_v61 = vsel %vm966_vm1, %v2744_v39, 0.0 }
 0x19f   :  { %v1660_v20 = vadd.f32 %v1659_v55, %v1658_v57  ;;  %v1273_v21 = vadd.f32 %v1272_v37, %v1271_v53  ;;  %v1675_v55 = vsel %vm966_vm1, %v1452_v1, 0.0 }
 0x1a1   :  { %v1275_v51 = vadd.f32 %v1274_v9, %v1273_v21  ;;  %v1662_v19 = vadd.f32 %v1661_v32, %v1660_v20  ;;  %v1455_v21 = vmul.f32 %v2649_v45, %v2649_v45  ;;  %v1677_v9 = vsel %vm966_vm1, %v1453_v29, 0.0 }
 0x1a2   :  { %v1296_v45 = vsel %vm966_vm1, %v2708_v48, 0.0  ;;  %v1464_v29 = vmul.f32 %v2796_v5, %v2796_v5 }
 0x1a3   :  { %v1664_v44 = vadd.f32 %v1663_v38, %v1662_v19  ;;  %v1277_v6 = vadd.f32 %v1276_v16, %v1275_v51  ;;  %v1679_v51 = vsel %vm966_vm1, %v1454_v12, 0.0  ;;  %v1294_v19 = vsel %vm966_vm1, %v2692_v35, 0.0 }
 0x1a4   :  { %v1681_v16 = vsel %vm966_vm1, %v1455_v21, 0.0  ;;  %v1298_v35 = vsel %vm966_vm1, %v2685_v28, 0.0  ;;  %v1465_v21 = vmul.f32 %v2812_v8, %v2812_v8 }
 0x1a5   :  { %v1279_v7 = vadd.f32 %v1278_v17, %v1277_v6  ;;  %v1666_v18 = vadd.f32 %v1665_v31, %v1664_v44  ;;  %v1683_v17 = vsel %vm966_vm1, %v1456_v3, 0.0  ;;  %v1457_v44 = vmul.f32 %v2708_v48, %v2708_v48 }
 0x1a6   :  { %v1300_v48 = vsel %vm966_vm1, %v2701_v43, 0.0 }
 0x1a7   :  { %v1668_v62 = vadd.f32 %v1667_v56, %v1666_v18  ;;  %v1281_v0 = vadd.f32 %v1280_v13, %v1279_v7  ;;  %v1458_v56 = vmul.f32 %v2685_v28, %v2685_v28  ;;  %v1459_v18 = vmul.f32 %v2701_v43, %v2701_v43 }
 0x1a8   :  { %v1685_v33 = vsel %vm966_vm1, %v1457_v44, 0.0  ;;  %v1460_v13 = vmul.f32 %v2744_v39, %v2744_v39  ;;  %v1304_v43 = vsel %vm966_vm1, %v2760_v60, 0.0  ;;  %v1306_v39 = vsel %vm966_vm1, %v2737_v30, 0.0 }
 0x1a9   :  { %v1283_v11 = vadd.f32 %v1282_v49, %v1281_v0  ;;  %v1670_v40 = vadd.f32 %v1669_v50, %v1668_v62  ;;  %v1687_v49 = vsel %vm966_vm1, %v1458_v56, 0.0  ;;  %v1689_v1 = vsel %vm966_vm1, %v1459_v18, 0.0 }
 0x1ab   :  { %v1672_v26 = vadd.f32 %v1671_v27, %v1670_v40  ;;  %v1285_v46 = vadd.f32 %v1284_v2, %v1283_v11  ;;  %v1691_v11 = vsel %vm966_vm1, %v1460_v13, 0.0  ;;  %v1461_v40 = vmul.f32 %v2760_v60, %v2760_v60  ;;  %v3339_v13 = vld [vmem:[#allocation6_spill] sm:$0xff] }
 0x1ac   :  { %v1308_v60 = vsel %vm966_vm1, %v2753_v54, 0.0 }
 0x1ad   :  { %v1287_v53 = vadd.f32 %v1286_v25, %v1285_v46  ;;  %v1674_v57 = vadd.f32 %v1673_v4, %v1672_v26  ;;  %v1462_v25 = vmul.f32 %v2737_v30, %v2737_v30  ;;  %v1463_v4 = vmul.f32 %v2753_v54, %v2753_v54 }
 0x1ae   :  { %v1312_v54 = vsel %vm966_vm1, %v2812_v8, 0.0 }
 0x1af   :  { %v1676_v37 = vadd.f32 %v1675_v55, %v1674_v57  ;;  %v1289_v20 = vadd.f32 %v1288_v59, %v1287_v53  ;;  %v1693_v55 = vsel %vm966_vm1, %v1461_v40, 0.0  ;;  %v1695_v12 = vsel %vm966_vm1, %v1462_v25, 0.0 }
 0x1b0   :  { %v1310_v59 = vsel %vm966_vm1, %v2796_v5, 0.0  ;;  %v1314_v5 = vsel %vm966_vm1, %v2789_v47, 0.0 }
 0x1b1   :  { %v1291_v32 = vadd.f32 %v1290_v41, %v1289_v20  ;;  %v1678_v24 = vadd.f32 %v1677_v9, %v1676_v37  ;;  %v1697_v20 = vsel %vm966_vm1, %v1463_v4, 0.0  ;;  %v1699_v41 = vsel %vm966_vm1, %v1464_v29, 0.0  ;;  %v3342_v29 = vld [vmem:[#allocation13_spill] sm:$0xff] }
 0x1b3   :  { %v1680_v38 = vadd.f32 %v1679_v51, %v1678_v24  ;;  %v1293_v36 = vadd.f32 %v1292_v52, %v1291_v32  ;;  %v1466_v32 = vmul.f32 %v2789_v47, %v2789_v47  ;;  %v3336_v52 = vld [vmem:[#allocation5_spill] sm:$0xff] }
 0x1b4   :  { %v1316_v8 = vsel %vm966_vm1, %v3336_v52, 0.0 }
 0x1b5   :  { %v1295_v6 = vadd.f32 %v1294_v19, %v1293_v36  ;;  %v1682_v31 = vadd.f32 %v1681_v16, %v1680_v38  ;;  %v1467_v19 = vmul.f32 %v3336_v52, %v3336_v52  ;;  %v1701_v38 = vsel %vm966_vm1, %v1465_v21, 0.0  ;;  %v3337_v36 = vld [vmem:[#allocation7_spill] sm:$0xff]  ;;  %v3344_v21 = vld [vmem:[#allocation12_spill] sm:$0xff] }
 0x1b6   :  { %v1468_v16 = vmul.f32 %v3337_v36, %v3337_v36  ;;  %v1334_v52 = vsel %vm966_vm1, %v2944_v15, 0.0 }
 0x1b7   :  { %v1684_v63 = vadd.f32 %v1683_v17, %v1682_v31  ;;  %v1297_v7 = vadd.f32 %v1296_v45, %v1295_v6  ;;  %v1703_v6 = vsel %vm966_vm1, %v1466_v32, 0.0  ;;  %v1318_v31 = vsel %vm966_vm1, %v3337_v36, 0.0 }
 0x1b8   :  { %v1705_v45 = vsel %vm966_vm1, %v1467_v19, 0.0  ;;  %v1476_v32 = vmul.f32 %v2944_v15, %v2944_v15  ;;  %v1338_v15 = vsel %vm966_vm1, %v2937_v14, 0.0 }
 0x1b9   :  { %v1299_v62 = vadd.f32 %v1298_v35, %v1297_v7  ;;  %v1686_v0 = vadd.f32 %v1685_v33, %v1684_v63  ;;  %v1707_v63 = vsel %vm966_vm1, %v1468_v16, 0.0  ;;  %v3338_v7 = vld [vmem:[#allocation9_spill] sm:$0xff] }
 0x1ba   :  { %v1469_v35 = vmul.f32 %v3338_v7, %v3338_v7  ;;  %v1723_v16 = vsel %vm966_vm1, %v1476_v32, 0.0 }
 0x1bb   :  { %v1688_v50 = vadd.f32 %v1687_v49, %v1686_v0  ;;  %v1301_v28 = vadd.f32 %v1300_v48, %v1299_v62  ;;  %v1470_v62 = vmul.f32 %v3339_v13, %v3339_v13  ;;  %v1320_v0 = vsel %vm966_vm1, %v3338_v7, 0.0 }
 0x1bc   :  { %v1480_v7 = vmul.f32 %v2992_v10, %v2992_v10 }
 0x1bd   :  { %v1303_v27 = vadd.f32 %v1302_v61, %v1301_v28  ;;  %v1690_v2 = vadd.f32 %v1689_v1, %v1688_v50  ;;  %v1322_v61 = vsel %vm966_vm1, %v3339_v13, 0.0  ;;  %v3340_v50 = vld [vmem:[#allocation8_spill] sm:$0xff]  ;;  %v1709_v1 = vsel %vm966_vm1, %v1469_v35, 0.0 }
 0x1be   :  { %v1471_v28 = vmul.f32 %v3340_v50, %v3340_v50  ;;  %v1711_v25 = vsel %vm966_vm1, %v1470_v62, 0.0  ;;  %v1342_v13 = vsel %vm966_vm1, %v2992_v10, 0.0  ;;  %v1346_v10 = vsel %vm966_vm1, %v2985_v23, 0.0 }
 0x1bf   :  { %v1692_v26 = vadd.f32 %v1691_v11, %v1690_v2  ;;  %v1305_v46 = vadd.f32 %v1304_v43, %v1303_v27  ;;  %v3341_v11 = vld [vmem:[#allocation11_spill] sm:$0xff]  ;;  %v1324_v43 = vsel %vm966_vm1, %v3340_v50, 0.0 }
 0x1c0   :  { %v1472_v40 = vmul.f32 %v3341_v11, %v3341_v11  ;;  %v1713_v4 = vsel %vm966_vm1, %v1471_v28, 0.0  ;;  %v1482_v28 = vmul.f32 %v2985_v23, %v2985_v23 }
 0x1c1   :  { %v1307_v53 = vadd.f32 %v1306_v39, %v1305_v46  ;;  %v1694_v57 = vadd.f32 %v1693_v55, %v1692_v26  ;;  %v1326_v26 = vsel %vm966_vm1, %v3341_v11, 0.0 }
 0x1c2   :  { %v1715_v55 = vsel %vm966_vm1, %v1472_v40, 0.0  ;;  %v1483_v40 = vmul.f32 %v3006_v42, %v3006_v42 }
 0x1c3   :  { %v1696_v37 = vadd.f32 %v1695_v12, %v1694_v57  ;;  %v1309_v30 = vadd.f32 %v1308_v60, %v1307_v53  ;;  %v1473_v53 = vmul.f32 %v3342_v29, %v3342_v29  ;;  %v3343_v60 = vld [vmem:[#allocation10_spill] sm:$0xff] }
 0x1c5   :  { %v1311_v9 = vadd.f32 %v1310_v59, %v1309_v30  ;;  %v1698_v3 = vadd.f32 %v1697_v20, %v1696_v37  ;;  %v1474_v59 = vmul.f32 %v3343_v60, %v3343_v60  ;;  %v1328_v37 = vsel %vm966_vm1, %v3342_v29, 0.0 }
 0x1c7   :  { %v1700_v24 = vadd.f32 %v1699_v41, %v1698_v3  ;;  %v1313_v51 = vadd.f32 %v1312_v54, %v1311_v9  ;;  %v1330_v41 = vsel %vm966_vm1, %v3343_v60, 0.0  ;;  %v1475_v9 = vmul.f32 %v3344_v21, %v3344_v21 }
 0x1c8   :  { %v1717_v3 = vsel %vm966_vm1, %v1473_v53, 0.0 }
 0x1c9   :  { %v1315_v17 = vadd.f32 %v1314_v5, %v1313_v51  ;;  %v1702_v44 = vadd.f32 %v1701_v38, %v1700_v24  ;;  %v1719_v51 = vsel %vm966_vm1, %v1474_v59, 0.0  ;;  %v1332_v5 = vsel %vm966_vm1, %v3344_v21, 0.0 }
 0x1ca   :  { %v1721_v36 = vsel %vm966_vm1, %v1475_v9, 0.0 }
 0x1cb   :  { %v1704_v56 = vadd.f32 %v1703_v6, %v1702_v44  ;;  %v1317_v47 = vadd.f32 %v1316_v8, %v1315_v17  ;;  %v1477_v17 = vmul.f32 %v2965_v58, %v2965_v58  ;;  %v1478_v8 = vmul.f32 %v2937_v14, %v2937_v14 }
 0x1cd   :  { %v1319_v18 = vadd.f32 %v1318_v31, %v1317_v47  ;;  %v1706_v33 = vadd.f32 %v1705_v45, %v1704_v56  ;;  %v1336_v31 = vsel %vm966_vm1, %v2965_v58, 0.0  ;;  %v1479_v45 = vmul.f32 %v2958_v34, %v2958_v34 }
 0x1ce   :  { %v1340_v58 = vsel %vm966_vm1, %v2958_v34, 0.0  ;;  %v1344_v34 = vsel %vm966_vm1, %v3013_v22, 0.0 }
 0x1cf   :  { %v1708_v49 = vadd.f32 %v1707_v63, %v1706_v33  ;;  %v1321_v48 = vadd.f32 %v1320_v0, %v1319_v18  ;;  %v1725_v63 = vsel %vm966_vm1, %v1477_v17, 0.0  ;;  %v1727_v33 = vsel %vm966_vm1, %v1478_v8, 0.0 }
 0x1d0   :  { %v1729_v0 = vsel %vm966_vm1, %v1479_v45, 0.0 }
 0x1d1   :  { %v1323_v27 = vadd.f32 %v1322_v61, %v1321_v48  ;;  %v1710_v2 = vadd.f32 %v1709_v1, %v1708_v49  ;;  %v1731_v49 = vsel %vm966_vm1, %v1480_v7, 0.0  ;;  %v1481_v48 = vmul.f32 %v3013_v22, %v3013_v22 }
 0x1d2   :  { %v1737_v22 = vsel %vm966_vm1, %v1483_v40, 0.0 }
 0x1d3   :  { %v1712_v46 = vadd.f32 %v1711_v25, %v1710_v2  ;;  %v1325_v39 = vadd.f32 %v1324_v43, %v1323_v27  ;;  %v1733_v27 = vsel %vm966_vm1, %v1481_v48, 0.0  ;;  %v1735_v43 = vsel %vm966_vm1, %v1482_v28, 0.0 }
 0x1d5   :  { %v1327_v57 = vadd.f32 %v1326_v26, %v1325_v39  ;;  %v1714_v12 = vadd.f32 %v1713_v4, %v1712_v46  ;;  %v1348_v26 = vsel %vm966_vm1, %v3006_v42, 0.0 }
 0x1d7   :  { %v1716_v30 = vadd.f32 %v1715_v55, %v1714_v12  ;;  %v1329_v20 = vadd.f32 %v1328_v37, %v1327_v57 }
 0x1d9   :  { %v1331_v54 = vadd.f32 %v1330_v41, %v1329_v20  ;;  %v1718_v24 = vadd.f32 %v1717_v3, %v1716_v30 }
 0x1db   :  { %v1720_v19 = vadd.f32 %v1719_v51, %v1718_v24  ;;  %v1333_v38 = vadd.f32 %v1332_v5, %v1331_v54 }
 0x1dd   :  { %v1335_v44 = vadd.f32 %v1334_v52, %v1333_v38  ;;  %v1722_v6 = vadd.f32 %v1721_v36, %v1720_v19 }
 0x1df   :  { %v1724_v56 = vadd.f32 %v1723_v16, %v1722_v6  ;;  %v1337_v47 = vadd.f32 %v1336_v31, %v1335_v44 }
 0x1e1   :  { %v1339_v35 = vadd.f32 %v1338_v15, %v1337_v47  ;;  %v1726_v18 = vadd.f32 %v1725_v63, %v1724_v56 }
 0x1e3   :  { %v1728_v62 = vadd.f32 %v1727_v33, %v1726_v18  ;;  %v1341_v14 = vadd.f32 %v1340_v58, %v1339_v35 }
 0x1e5   :  { %v1343_v61 = vadd.f32 %v1342_v13, %v1341_v14  ;;  %v1730_v50 = vadd.f32 %v1729_v0, %v1728_v62 }
 0x1e7   :  { %v1732_v1 = vadd.f32 %v1731_v49, %v1730_v50  ;;  %v1345_v11 = vadd.f32 %v1344_v34, %v1343_v61 }
 0x1e9   :  { %v1347_v2 = vadd.f32 %v1346_v10, %v1345_v11  ;;  %v1734_v25 = vadd.f32 %v1733_v27, %v1732_v1 }
 0x1eb   :  { %v1349_v46 = vadd.f32 %v1348_v26, %v1347_v2  ;;  %v1736_v39 = vadd.f32 %v1735_v43, %v1734_v25 }
 0x1ed   :  { %v1350_v4 = vrot.slane %v1349_v46, 4  ;;  %v1738_v55 = vadd.f32 %v1737_v22, %v1736_v39 }
 0x1ef   :  { %v1351_v29 = vadd.f32 %v1350_v4, %v1349_v46  ;;  %v1739_v23 = vrot.slane %v1738_v55, 4 }
 0x1f1   :  { %v1352_v53 = vrot.slane %v1351_v29, 2  ;;  %v1740_v57 = vadd.f32 %v1739_v23, %v1738_v55 }
 0x1f3   :  { %v1353_v12 = vadd.f32 %v1352_v53, %v1351_v29  ;;  %v1741_v60 = vrot.slane %v1740_v57, 2 }
 0x1f5   :  { %v1354_v59 = vrot.slane %v1353_v12, 1  ;;  %v1742_v37 = vadd.f32 %v1741_v60, %v1740_v57 }
 0x1f7   :  { %v1743_v30 = vrot.slane %v1742_v37, 1  ;;  %v1355_v20 = vadd.f32 %v1354_v59, %v1353_v12 }
 0x1f9   :  { %v1744_v41 = vadd.f32 %v1743_v30, %v1742_v37 }
 0x1fb   :  { %v1746_v42 = vsel %vm1745_vm2, %v1355_v20, %v1744_v41 }
 0x1fc   :  { %1748 = vst.msk [vmem:[%s3308_s3] sm:$0x3] %vm1747_vm3, %v1746_v42 }
 0x1fd   :  { %1757 = vsyncpa [#allocation3], 1 }

// kernel: bottleneck_forward.5
= control target key start
LH: loop header
LB: loop body
LE: loop exit
PB: predicated region body
PF: predicated region fallthrough
CT: control target
= control target key end

     0   :  { %s4427_s27 = smov 0   ;;  %s4429_s28 = smov 0   ;;  %s7131_s0 = inlined_call_operand.vmem [shape: f32[20,100,4], index: 0, kind: input, shape index: {}, may-alias: {0,1,2}]   ;;  %s7132_s1 = inlined_call_operand.vmem [shape: f32[20,100,4], index: 1, kind: input, shape index: {}, may-alias: {0,1,2}]   ;;  %s7133_s2 = inlined_call_operand.vmem [shape: f32[20,100,4], index: 2, kind: input, shape index: {}, may-alias: {0,1,2}]   ;;  %s7134_s3 = inlined_call_operand.vmem [shape: f32[100,1], index: 3, kind: input, shape index: {}]   ;;  %s7135_s4 = inlined_call_operand.vmem [shape: f32[1,4], index: 4, kind: input, shape index: {}]   ;;  %s7136_s5 = inlined_call_operand.vmem [shape: f32[1,4], index: 5, kind: input, shape index: {}]   ;;  %s7137_s6 = inlined_call_operand.vmem [shape: bf16[108,4], index: 6, kind: input, shape index: {}]   ;;  %s7138_s7 = inlined_call_operand.vmem [shape: f32[2,8,100,4], index: 7, kind: output, shape index: {0}]   ;;  %s7139_s8 = inlined_call_operand.vmem [shape: f32[2,8,2,4], index: 8, kind: output, shape index: {1}]  }
   0x1   :  { %s4431_s29 = smov 0   ;;  %s4433_s30 = smov 0  }
   0x2   :  { %s4435_s9 = smov 0  }
   0x3 LB: > { %s28_s10 = sadd.s32 1, %s4353_s29  ;;  %s31_s11 = sadd.s32 1, %s4357_s30  ;;  %s4361_s9 = sphi %s4435_s9, %s19_s9   ;;  %s4357_s30 = sphi %s4433_s30, %s7648_s30   ;;  %s4353_s29 = sphi %s4431_s29, %s7647_s29   ;;  %s4349_s28 = sphi %s4429_s28, %s7646_s28   ;;  %s4345_s27 = sphi %s4427_s27, %s7645_s27  }
   0x4   : > { %p29_p0 = scmp.ge.s32.totalorder %s28_s10, 8  ;;  %p3323_p1 = scmp.ge.s32.totalorder %s4361_s9, 1 }
   0x5   : > { %p333_p2 = scmp.lt.s32.totalorder %s4361_s9, 17 }
   0x6   : > { %s7650_s10 = smov (%p29_p0, %s28_s10), 0  ;;  %s7652_s11 = smov (!%p29_p0, %s31_s11), %s4357_s30 }
   0x7   : > { %p334_p3 = pnand %p3323_p1, %p333_p2  ;;  %p33_p4 = scmp.ge.s32.totalorder %s7652_s11, 2 }
   0x9   : > { %s7654_s11 = smov (%p33_p4, %s7652_s11), 0  ;;  %337 = sbr.rel (%p334_p3) target bundleno = 964 (0x3c4), region = 48 }
  0x10   : > { %p461_p5 = scmp.ge.s32.totalorder %s4345_s27, 1  ;;  %v4363_v0 = vmov 0   ;;  %v4465_v1 = vld [vmem:[%s7134_s3 + $0x10] sm:$0xff]  ;;  %v446_v2 = vld [vmem:[%s7134_s3] sm:$0xff]  ;;  %v449_v3 = vld [vmem:[%s7134_s3 + $0x18] sm:$0xff]  ;;  %v7147_v16 = vmov 0.0  }
  0x11   : > { %3483 = vset.pattern.permute.xlu1 %v4363_v0  ;;  %3482 = vset.pattern.permute.xlu0 %v4363_v0  ;;  %v447_v4 = vld [vmem:[%s7134_s3 + $0x8] sm:$0xff]  ;;  %v450_v11 = vld [vmem:[%s7134_s3 + $0x20] sm:$0xff]  ;;  %v453_v14 = vld [vmem:[%s7134_s3 + $0x38] sm:$0xff]  ;;  %p464_p6 = scmp.le.s32.totalorder %s4345_s27, 6  ;;  %vm962_vm0 = vcmask 1046528   ;;  %vm910_vm1 = vcmask 1042432  }
  0x12   : > { %s462_s12 = scalar_select %p461_p5, 1, 0  ;;  %v451_v10 = vld [vmem:[%s7134_s3 + $0x28] sm:$0xff]  ;;  %v452_v15 = vld [vmem:[%s7134_s3 + $0x30] sm:$0xff]  ;;  %3362 = vmatprep.subr.bf16.mxu0 %v7147_v16  ;;  %v454_v20 = vld [vmem:[%s7134_s3 + $0x40] sm:$0xff]  ;;  %3404 = vmatprep.subr.bf16.mxu1 %v7147_v16  ;;  %vm1112_vm2 = vcmask 1045504  }
  0x13   : > { %v455_v19 = vld [vmem:[%s7134_s3 + $0x48] sm:$0xff]  ;;  %v457_v23 = vld [vmem:[%s7134_s3 + $0x58] sm:$0xff]  ;;  %v456_v24 = vld [vmem:[%s7134_s3 + $0x50] sm:$0xff]  ;;  %s465_s25 = scalar_select %p464_p6, 1, 0  ;;  %vm1219_vm3 = vcmask 1044480  }
  0x14   : > { %s463_s15 = scvt.s32.f32 %s462_s12  ;;  %v458_v27 = vld [vmem:[%s7134_s3 + $0x60] sm:$0xf]  ;;  %s397_s12 = smul.u32 10, %s4349_s28  ;;  %vm1284_vm4 = vcmask 1043456   ;;  %vm1456_vm5 = vcmask 1041408   ;;  %vm7277_vm6 = vcmask 1040384  }
  0x15   : > { %s466_s26 = scvt.s32.f32 %s465_s25  ;;  %v4536_v49 = vld [vmem:[%s7135_s4] ss:$0 sm:$0xff]  ;;  %s4367_s21 = smov 12   ;;  %vm7285_vm7 = vcmask 31744   ;;  %vm7278_vm8 = vcmask 64512   ;;  %vm7279_vm9 = vcmask 97280  }
  0x16   : > { %v531_v5 = vstv %s463_s15  ;;  %s4511_s13 = sadd.s32 %s4345_s27, %s397_s12  ;;  %v4562_v0 = vld [vmem:[%s7136_s5] ss:$0 sm:$0xff]  ;;  %s4368_s22 = smov 16   ;;  %vm1929_vm10 = vcmask 130048   ;;  %vm1943_vm11 = vcmask 162816   ;;  %vm7284_vm12 = vcmask 195584  }
  0x17   : > { %v534_v6 = vmul.f32 %v531_v5, %v4465_v1  ;;  %v532_v7 = vmul.f32 %v531_v5, %v446_v2  ;;  %v535_v8 = vmul.f32 %v531_v5, %v449_v3  ;;  %v533_v9 = vmul.f32 %v531_v5, %v447_v4  ;;  %p399_p7 = scmp.lt.s32.totalorder %s4511_s13, 19  ;;  %s408_s14 = sadd.s32 1, %s4511_s13 }
  0x18   : > { %v537_v12 = vmul.f32 %v531_v5, %v451_v10  ;;  %v536_v13 = vmul.f32 %v531_v5, %v450_v11  ;;  %v539_v17 = vmul.f32 %v531_v5, %v453_v14  ;;  %v538_v18 = vmul.f32 %v531_v5, %v452_v15  ;;  %p409_p8 = scmp.lt.s32.totalorder %s408_s14, 19  ;;  %s4369_s23 = smov 20  }
  0x19   : > { %557 = vperm.xlu1 %3483, %v534_v6   ;;  %547 = vperm.xlu0 %3482, %v532_v7   ;;  %v541_v21 = vmul.f32 %v531_v5, %v455_v19  ;;  %v540_v22 = vmul.f32 %v531_v5, %v454_v20  ;;  %v543_v25 = vmul.f32 %v531_v5, %v457_v23  ;;  %v805_v29 = vstv %s466_s26  ;;  %s400_s15 = scalar_select %p399_p7, %s4511_s13, 19 }
  0x1a   : > { %v542_v26 = vmul.f32 %v531_v5, %v456_v24  ;;  %v544_v28 = vmul.f32 %v531_v5, %v458_v27  ;;  %v807_v30 = vmul.f32 %v805_v29, %v447_v4  ;;  %v806_v31 = vmul.f32 %v805_v29, %v446_v2  ;;  %s7656_s14 = smov (!%p409_p8, %s408_s14), 19  ;;  %s4370_s24 = smov 24  }
  0x1b   : > { %v809_v32 = vmul.f32 %v805_v29, %v449_v3  ;;  %v808_v33 = vmul.f32 %v805_v29, %v4465_v1  ;;  %v811_v34 = vmul.f32 %v805_v29, %v451_v10  ;;  %v810_v35 = vmul.f32 %v805_v29, %v450_v11  ;;  %s3418_s16 = smul.u32 104, %s400_s15  ;;  %s419_s15 = sadd.s32 2, %s4511_s13 }
  0x1c   : > { %v813_v36 = vmul.f32 %v805_v29, %v453_v14  ;;  %v812_v37 = vmul.f32 %v805_v29, %v452_v15  ;;  %v815_v38 = vmul.f32 %v805_v29, %v455_v19  ;;  %v814_v39 = vmul.f32 %v805_v29, %v454_v20  ;;  %s3419_s20 = smul.u32 104, %s7656_s14  ;;  %s4365_s14 = smov 4  }
  0x1d   : > { %562 = vperm.xlu1 %3483, %v535_v8   ;;  %552 = vperm.xlu0 %3482, %v533_v9   ;;  %v817_v40 = vmul.f32 %v805_v29, %v457_v23  ;;  %v816_v41 = vmul.f32 %v805_v29, %v456_v24  ;;  %v818_v42 = vmul.f32 %v805_v29, %v458_v27  ;;  %s4531_s19 = scalar_lea.vmem %s7131_s0, %s3418_s16  ;;  %p4837_p9 = scmp.lt.s32.totalorder %s419_s15, 19  ;;  %vm1971_vm13 = vcmask 228352  }
  0x1e   : > { %v469_v50 = vld [vmem:[%s4531_s19 + $0x10] sm:$0xff]  ;;  %v467_v51 = vld [vmem:[%s4531_s19] sm:$0xff]  ;;  %v468_v54 = vld [vmem:[%s4531_s19 + $0x8] sm:$0xff]  ;;  %s4549_s25 = scalar_lea.vmem %s7132_s1, %s3419_s20  ;;  %s4366_s16 = smov 8   ;;  %vm1985_vm14 = vcmask 261120   ;;  %vm1999_vm15 = vcmask 293888  }
  0x1f   : > { %v478_v55 = vld [vmem:[%s4531_s19 + $0x58] sm:$0xff]  ;;  %v477_v56 = vld [vmem:[%s4531_s19 + $0x50] sm:$0xff]  ;;  %v624_v58 = vld [vmem:[%s4549_s25 + $0x8] sm:$0xff]  ;;  %v488_v59 = vmul.f32 %v4536_v49, %v469_v50  ;;  %v486_v60 = vmul.f32 %v4536_v49, %v467_v51  ;;  %s7658_s15 = smov (!%p4837_p9, %s419_s15), 19  ;;  %s4371_s26 = smov 28  }
  0x20   : > { %v625_v57 = vld [vmem:[%s4549_s25 + $0x10] sm:$0xff]  ;;  %v470_v61 = vld [vmem:[%s4531_s19 + $0x18] sm:$0xff]  ;;  %v472_v62 = vld [vmem:[%s4531_s19 + $0x28] sm:$0xff]  ;;  %v497_v6 = vmul.f32 %v4536_v49, %v478_v55  ;;  %v496_v7 = vmul.f32 %v4536_v49, %v477_v56  ;;  %v637_v9 = vmul.f32 %v4536_v49, %v624_v58  ;;  %s3420_s17 = smul.u32 104, %s7658_s15  ;;  %s4373_s12 = smov 36  }
  0x21   : > { %572 = vperm.xlu1 %3483, %v537_v12   ;;  %567 = vperm.xlu0 %3482, %v536_v13   ;;  %v471_v63 = vld [vmem:[%s4531_s19 + $0x20] sm:$0xff]  ;;  %v473_v5 = vld [vmem:[%s4531_s19 + $0x30] sm:$0xff]  ;;  %v638_v8 = vmul.f32 %v4536_v49, %v625_v57  ;;  %v489_v12 = vmul.f32 %v4536_v49, %v470_v61  ;;  %v491_v13 = vmul.f32 %v4536_v49, %v472_v62  ;;  %s4374_s15 = smov 40   ;;  %s4375_s13 = smov 44  }
  0x22   : > { %s4895_s20 = scalar_lea.vmem %s7133_s2, %s3420_s17  ;;  %s4379_s18 = smov 60  }
  0x23   : > { %v651_v29 = vadd.f32 %v4562_v0, %v638_v8  ;;  %p428_p10 = scmp.lt.s32.totalorder %s4349_s28, 1  ;;  %p430_p11 = scmp.lt.s32.totalorder %s4345_s27, 7 }
  0x25   : > { %582 = vperm.xlu1 %3483, %v539_v17   ;;  %577 = vperm.xlu0 %3482, %v538_v18   ;;  %v505_v17 = vadd.f32 %v4562_v0, %v486_v60  ;;  %v664_v57 = vmax.f32 %v651_v29, 0.0  ;;  %s7660_s28 = smov (!%p428_p10, %s4349_s28), 1  ;;  %s7662_s27 = smov (!%p430_p11, %s4345_s27), 7 }
  0x29   : > { %592 = vperm.xlu1 %3483, %v541_v21   ;;  %587 = vperm.xlu0 %3482, %v540_v22   ;;  %v492_v21 = vmul.f32 %v4536_v49, %v473_v5  ;;  %v475_v22 = vld [vmem:[%s4531_s19 + $0x40] sm:$0xff]  ;;  %v4619_v5 = vrot.slane %v7147_v16, 1 }
  0x2d   : > { %602 = vperm.xlu1 %3483, %v543_v25   ;;  %597 = vperm.xlu0 %3482, %v542_v26  }
  0x31   : > { %677 = vperm.xlu1 %3483, %v446_v2   ;;  %607 = vperm.xlu0 %3482, %v544_v28   ;;  %v474_v2 = vld [vmem:[%s4531_s19 + $0x38] sm:$0xff]  ;;  %v515_v28 = vadd.f32 %v4562_v0, %v496_v7 }
  0x32   : > { %v493_v18 = vmul.f32 %v4536_v49, %v474_v2 }
  0x33   : > { %v528_v56 = vmax.f32 %v515_v28, 0.0 }
  0x35   : > { %687 = vperm.xlu1 %3483, %v4465_v1   ;;  %682 = vperm.xlu0 %3482, %v447_v4   ;;  %v487_v1 = vmul.f32 %v4536_v49, %v468_v54  ;;  %v633_v54 = vld [vmem:[%s4549_s25 + $0x50] sm:$0xff] }
  0x36   : > { %v646_v2 = vmul.f32 %v4536_v49, %v633_v54 }
  0x39   : > { %697 = vperm.xlu1 %3483, %v450_v11   ;;  %692 = vperm.xlu0 %3482, %v449_v3   ;;  %v626_v11 = vld [vmem:[%s4549_s25 + $0x18] sm:$0xff] }
  0x3a   : > { %v639_v26 = vmul.f32 %v4536_v49, %v626_v11 }
  0x3c   : > { %v652_v51 = vadd.f32 %v4562_v0, %v639_v26 }
  0x3d   : > { %707 = vperm.xlu1 %3483, %v452_v15   ;;  %702 = vperm.xlu0 %3482, %v451_v10   ;;  %v627_v10 = vld [vmem:[%s4549_s25 + $0x20] sm:$0xff]  ;;  %v4581_v15 = vadd.f32 %v4562_v0, %v488_v59 }
  0x3e   : > { %v640_v25 = vmul.f32 %v4536_v49, %v627_v10  ;;  %v665_v11 = vmax.f32 %v652_v51, 0.0 }
  0x40   : > { %v653_v50 = vadd.f32 %v4562_v0, %v640_v25 }
  0x41   : > { %717 = vperm.xlu1 %3483, %v454_v20   ;;  %712 = vperm.xlu0 %3482, %v453_v14   ;;  %v490_v14 = vmul.f32 %v4536_v49, %v471_v63  ;;  %v506_v20 = vadd.f32 %v4562_v0, %v487_v1 }
  0x42   : > { %v666_v10 = vmax.f32 %v653_v50, 0.0 }
  0x45   : > { %727 = vperm.xlu1 %3483, %v456_v24   ;;  %722 = vperm.xlu0 %3482, %v455_v19   ;;  %v476_v19 = vld [vmem:[%s4531_s19 + $0x48] sm:$0xff] }
  0x49   : > { %737 = vperm.xlu1 %3483, %v458_v27   ;;  %732 = vperm.xlu0 %3482, %v457_v23   ;;  %v516_v27 = vadd.f32 %v4562_v0, %v497_v6 }
  0x4b   : > { %v529_v55 = vmax.f32 %v516_v27, 0.0 }
  0x4d   : > { %826 = vperm.xlu1 %3483, %v807_v30   ;;  %821 = vperm.xlu0 %3482, %v806_v31   ;;  %v650_v30 = vadd.f32 %v4562_v0, %v637_v9  ;;  %v508_v31 = vadd.f32 %v4562_v0, %v489_v12 }
  0x4f   : > { %v663_v58 = vmax.f32 %v650_v30, 0.0  ;;  %v521_v59 = vmax.f32 %v508_v31, 0.0 }
  0x51   : > { %836 = vperm.xlu1 %3483, %v809_v32   ;;  %831 = vperm.xlu0 %3482, %v808_v33   ;;  %v510_v32 = vadd.f32 %v4562_v0, %v491_v13  ;;  %v509_v33 = vadd.f32 %v4562_v0, %v490_v14 }
  0x53   : > { %v523_v60 = vmax.f32 %v510_v32, 0.0  ;;  %v522_v61 = vmax.f32 %v509_v33, 0.0 }
  0x55   : > { %846 = vperm.xlu1 %3483, %v811_v34   ;;  %841 = vperm.xlu0 %3482, %v810_v35   ;;  %v495_v34 = vmul.f32 %v4536_v49, %v476_v19  ;;  %v520_v35 = vmax.f32 %v4581_v15, 0.0 }
  0x57   : > { %v514_v62 = vadd.f32 %v4562_v0, %v495_v34 }
  0x59   : > { %856 = vperm.xlu1 %3483, %v813_v36   ;;  %851 = vperm.xlu0 %3482, %v812_v37   ;;  %v518_v36 = vmax.f32 %v505_v17, 0.0  ;;  %v4601_v37 = vadd.f32 %v4562_v0, %v493_v18  ;;  %v635_v17 = vld [vmem:[%s4549_s25 + $0x60] sm:$0xf] }
  0x5b   : > { %v525_v63 = vmax.f32 %v4601_v37, 0.0 }
  0x5d   : > { %866 = vperm.xlu1 %3483, %v815_v38   ;;  %861 = vperm.xlu0 %3482, %v814_v39   ;;  %v494_v38 = vmul.f32 %v4536_v49, %v475_v22  ;;  %v519_v39 = vmax.f32 %v506_v20, 0.0 }
  0x5f   : > { %v513_v1 = vadd.f32 %v4562_v0, %v494_v38 }
  0x61   : > { %876 = vperm.xlu1 %3483, %v817_v40   ;;  %871 = vperm.xlu0 %3482, %v816_v41   ;;  %v4605_v40 = vadd.f32 %v4562_v0, %v492_v21  ;;  %v527_v21 = vmax.f32 %v514_v62, 0.0  ;;  %v526_v22 = vmax.f32 %v513_v1, 0.0 }
  0x63   : > { %v524_v7 = vmax.f32 %v4605_v40, 0.0 }
  0x65   : > { %881 = vperm.xlu0 %3482, %v818_v42  }
  0x98   : > { %v4515_v43 = vpop.permute.xlu1 %557  ;;  %v4518_v44 = vpop.permute.xlu0 %547 }
  0x99   : > { %v610_v18 = vmul.f32 %v4518_v44, %v518_v36 }
  0x9b   : > { %v911_v33 = vrot.slane %v610_v18, 5 }
  0x9c   : > { %v4520_v45 = vpop.permute.xlu1 %562  ;;  %v4522_v46 = vpop.permute.xlu0 %552 }
  0x9d   : > { %v4622_v6 = vmul.f32 %v4522_v46, %v519_v39  ;;  %v634_v46 = vld [vmem:[%s4549_s25 + $0x58] sm:$0xff]  ;;  %v613_v19 = vmul.f32 %v4520_v45, %v521_v59  ;;  %v648_v45 = vmul.f32 %v4536_v49, %v635_v17 }
  0x9f   : > { %v912_v26 = vrot.slane %v4622_v6, 5  ;;  %v916_v34 = vrot.slane %v613_v19, 5  ;;  %v661_v59 = vadd.f32 %v4562_v0, %v648_v45 }
  0xa0   : > { %v4524_v47 = vpop.permute.xlu1 %572  ;;  %v4526_v48 = vpop.permute.xlu0 %567 }
  0xa1   : > { %v614_v20 = vmul.f32 %v4526_v48, %v522_v61  ;;  %v4648_v27 = vmul.f32 %v4524_v47, %v523_v60  ;;  %v647_v48 = vmul.f32 %v4536_v49, %v634_v46  ;;  %v612_v47 = vmul.f32 %v4515_v43, %v520_v35 }
  0xa2   : > { %v4673_v50 = vsel %vm910_vm1, %v911_v33, %v912_v26 }
  0xa3   : > { %v918_v36 = vrot.slane %v614_v20, 5  ;;  %7292 = vst [vmem:[#allocation7_spill] sm:$0xff] %v4673_v50  ;;  %v920_v43 = vrot.slane %v4648_v27, 5  ;;  %v914_v60 = vrot.slane %v612_v47, 5  ;;  %v660_v19 = vadd.f32 %v4562_v0, %v647_v48 }
  0xa4   : > { %v4540_v52 = vpop.permute.xlu1 %582  ;;  %v4542_v53 = vpop.permute.xlu0 %577 }
  0xa5   : > { %v617_v35 = vmul.f32 %v4540_v52, %v525_v63  ;;  %v4709_v61 = vsel %vm910_vm1, %v916_v34, %v918_v36  ;;  %v1051_v63 = vrot.slane %v4673_v50, 1  ;;  %v4715_v1 = vsel %vm910_vm1, %v918_v36, %v920_v43 }
  0xa6   : > { %7297 = vst [vmem:[#allocation12_spill] sm:$0xff] %v4709_v61  ;;  %7298 = vst [vmem:[#allocation13_spill] sm:$0xff] %v4715_v1  ;;  %v4730_v20 = vsel %vm910_vm1, %v914_v60, %v916_v34  ;;  %v1059_v47 = vrot.slane %v4715_v1, 1  ;;  %v674_v34 = vmax.f32 %v661_v59, 0.0 }
  0xa7   : > { %v924_v17 = vrot.slane %v617_v35, 5  ;;  %7301 = vst [vmem:[#allocation16_spill] sm:$0xff] %v4730_v20  ;;  %v1055_v35 = vrot.slane %v4730_v20, 1 }
  0xa8   : > { %v4566_v3 = vpop.permute.xlu1 %592  ;;  %v4568_v4 = vpop.permute.xlu0 %587 }
  0xa9   : > { %v618_v37 = vmul.f32 %v4568_v4, %v526_v22  ;;  %v4678_v51 = vmul.f32 %v4566_v3, %v527_v21  ;;  %v4703_v3 = vsel %vm910_vm1, 0.0, %v911_v33 }
  0xaa   : > { %7296 = vst [vmem:[#allocation11_spill] sm:$0xff] %v4703_v3  ;;  %v1049_v18 = vrot.slane %v4703_v3, 1 }
  0xab   : > { %v926_v62 = vrot.slane %v618_v37, 5 }
  0xac   : > { %v603_v23 = vpop.permute.xlu1 %602  ;;  %v598_v24 = vpop.permute.xlu0 %597  ;;  %v1052_v45 = vsel %vm962_vm0, %v1049_v18, %v1051_v63  ;;  %v1050_v37 = vsel %vm962_vm0, %v4619_v5, %v1049_v18 }
  0xad   : > { %v4629_v12 = vmul.f32 %v603_v23, %v529_v55  ;;  %v4631_v13 = vmul.f32 %v598_v24, %v528_v56  ;;  %v4644_v24 = vadd.f32 %v4562_v0, %v646_v2  ;;  %v4685_v55 = vmul.f32 %v4542_v53, %v524_v7 }
  0xae   : > { %v928_v2 = vrot.slane %v4678_v51, 5 }
  0xaf   : > { %v7145_v29 = vrot.slane %v4629_v12, 5  ;;  %v930_v30 = vrot.slane %v4631_v13, 5  ;;  %v922_v46 = vrot.slane %v4685_v55, 5  ;;  %v672_v22 = vmax.f32 %v4644_v24, 0.0 }
  0xb0   : > { %v4607_v41 = vpop.permute.xlu1 %677  ;;  %v4609_v42 = vpop.permute.xlu0 %607  ;;  %v4746_v48 = vsel %vm910_vm1, %v926_v62, %v928_v2  ;;  %v4762_v55 = vsel %vm910_vm1, %v912_v26, %v914_v60 }
  0xb1   : > { %7287 = vst [vmem:[#allocation2_spill] sm:$0xff] %v4607_v41  ;;  %v4692_v56 = vsel %vm910_vm1, %v930_v30, %v7145_v29  ;;  %7303 = vst [vmem:[#allocation18_spill] sm:$0xff] %v4746_v48  ;;  %v4754_v36 = vsel %vm910_vm1, %v922_v46, %v924_v17  ;;  %v1053_v27 = vrot.slane %v4762_v55, 1  ;;  %v1132_v16 = vrot.slane %v4746_v48, 2 }
  0xb2   : > { %7295 = vst [vmem:[#allocation10_spill] sm:$0xff] %v4692_v56  ;;  %7306 = vst [vmem:[#allocation21_spill] sm:$0xff] %v4754_v36  ;;  %v1063_v60 = vrot.slane %v4754_v36, 1 }
  0xb3   : > { %7307 = vst [vmem:[#allocation22_spill] sm:$0xff] %v4762_v55  ;;  %v1054_v13 = vsel %vm962_vm0, %v1051_v63, %v1053_v27  ;;  %v1056_v51 = vsel %vm962_vm0, %v1053_v27, %v1055_v35 }
  0xb4   : > { %v4625_v8 = vpop.permute.xlu1 %687  ;;  %v4627_v9 = vpop.permute.xlu0 %682  ;;  %v3499_v27 = vpack.i.bf16 %v1056_v51, %v1054_v13 }
  0xb5   : > { %7288 = vst [vmem:[#allocation3_spill] sm:$0xff] %v4625_v8  ;;  %7289 = vst [vmem:[#allocation4_spill] sm:$0xff] %v4627_v9  ;;  %v742_v14 = vmul.f32 %v4625_v8, %v664_v57  ;;  %v4635_v15 = vmul.f32 %v4627_v9, %v663_v58  ;;  %v7325_v8 = vrot.slane %v4762_v55, 4 }
  0xb7   : > { %v966_v25 = vrot.slane %v742_v14, 1  ;;  %v7142_v23 = vrot.slane %v4635_v15, 1 }
  0xb8   : > { %v4650_v28 = vpop.permute.xlu1 %697  ;;  %v4652_v44 = vpop.permute.xlu0 %692 }
  0xb9   : > { %7290 = vst [vmem:[#allocation5_spill] sm:$0xff] %v4650_v28  ;;  %7291 = vst [vmem:[#allocation6_spill] sm:$0xff] %v4652_v44  ;;  %v4659_v31 = vmul.f32 %v4650_v28, %v666_v10  ;;  %v743_v32 = vmul.f32 %v4652_v44, %v665_v11  ;;  %v4667_v38 = vsel %vm962_vm0, %v7142_v23, %v966_v25  ;;  %v1071_v11 = vrot.slane %v4692_v56, 1 }
  0xba   : > { %v2097_v53 = vrot.slane %v4667_v38, 1  ;;  %v1241_v44 = vrot.slane %v4692_v56, 3 }
  0xbb   : > { %v7141_v39 = vrot.slane %v4659_v31, 1  ;;  %v968_v40 = vrot.slane %v743_v32, 1  ;;  %v1057_v32 = vrot.slane %v4709_v61, 1 }
  0xbc   : > { %v4680_v4 = vpop.permute.xlu1 %707  ;;  %v4682_v54 = vpop.permute.xlu0 %702 }
  0xbd   : > { %7293 = vst [vmem:[#allocation8_spill] sm:$0xff] %v4680_v4  ;;  %7294 = vst [vmem:[#allocation9_spill] sm:$0xff] %v4682_v54  ;;  %v4695_v57 = vsel %vm962_vm0, %v966_v25, %v968_v40  ;;  %v4700_v52 = vsel %vm962_vm0, %v968_v40, %v7141_v39  ;;  %v4736_v25 = vsel %vm910_vm1, %v924_v17, %v926_v62  ;;  %v673_v40 = vmax.f32 %v660_v19, 0.0 }
  0xbe   : > { %v7140_v58 = vrot.slane %v4695_v57, 1  ;;  %7302 = vst [vmem:[#allocation17_spill] sm:$0xff] %v4736_v25  ;;  %v1065_v62 = vrot.slane %v4736_v25, 1  ;;  %v1060_v5 = vsel %vm962_vm0, %v1057_v32, %v1059_v47  ;;  %v1067_v17 = vrot.slane %v4746_v48, 1 }
  0xc0   : > { %v4718_v7 = vpop.permute.xlu1 %717  ;;  %v4720_v10 = vpop.permute.xlu0 %712  ;;  %v2099_v14 = vsel %vm962_vm0, %v2097_v53, %v7140_v58  ;;  %v3494_v53 = vpack.i.bf16 %v1052_v45, %v1050_v37  ;;  %v1066_v45 = vsel %vm962_vm0, %v1063_v60, %v1065_v62  ;;  %v7146_v37 = vrot.slane %v4730_v20, 2 }
  0xc1   : > { %7299 = vst [vmem:[#allocation14_spill] sm:$0xff] %v4718_v7  ;;  %7300 = vst [vmem:[#allocation15_spill] sm:$0xff] %v4720_v10  ;;  %v3484_v21 = vpack.i.bf16 %v2099_v14, %v1071_v11  ;;  %v1058_v14 = vsel %vm962_vm0, %v1055_v35, %v1057_v32  ;;  %v1118_v32 = vrot.slane %v4762_v55, 2 }
  0xc3   : > { %3485 = vrot.lane.b32.xlu1 %v3484_v21, %s4365_s14  ;;  %v7150_v21 = vrot.slane %v4673_v50, 2 }
  0xc4   : > { %v4749_v24 = vpop.permute.xlu1 %727  ;;  %v4751_v33 = vpop.permute.xlu0 %722 }
  0xc5   : > { %7304 = vst [vmem:[#allocation19_spill] sm:$0xff] %v4749_v24  ;;  %7305 = vst [vmem:[#allocation20_spill] sm:$0xff] %v4751_v33  ;;  %v4766_v59 = vmul.f32 %v4749_v24, %v672_v22  ;;  %v3504_v22 = vpack.i.bf16 %v1060_v5, %v1058_v14  ;;  %v623_v14 = vld [vmem:[%s4549_s25] sm:$0xff] }
  0xc7   : > { %3495 = vrot.lane.b32.xlu1 %v3494_v53, %s4365_s14  ;;  %v479_v53 = vld [vmem:[%s4531_s19 + $0x60] sm:$0xf]  ;;  %v7143_v58 = vrot.slane %v4766_v59, 1 }
  0xc8   : > { %v4774_v6 = vpop.permute.xlu1 %737  ;;  %v4776_v26 = vpop.permute.xlu0 %732 }
  0xc9   : > { %7308 = vst [vmem:[#allocation23_spill] sm:$0xff] %v4774_v6  ;;  %7309 = vst [vmem:[#allocation24_spill] sm:$0xff] %v4776_v26  ;;  %v4780_v18 = vmul.f32 %v4774_v6, %v674_v34  ;;  %v751_v19 = vmul.f32 %v4776_v26, %v673_v40  ;;  %v1068_v34 = vsel %vm962_vm0, %v1065_v62, %v1067_v17  ;;  %v4814_v62 = vrot.slane %v4692_v56, 2 }
  0xca   : > { %v4796_v40 = vsel %vm910_vm1, %v920_v43, %v922_v46  ;;  %v498_v43 = vmul.f32 %v4536_v49, %v479_v53  ;;  %v3514_v46 = vpack.i.bf16 %v1068_v34, %v1066_v45  ;;  %v7149_v53 = vrot.slane %v4754_v36, 2 }
  0xcb   : > { %v7144_v39 = vrot.slane %v4780_v18, 1  ;;  %v984_v23 = vrot.slane %v751_v19, 1  ;;  %7310 = vst [vmem:[#allocation25_spill] sm:$0xff] %v4796_v40  ;;  %3505 = vrot.lane.b32.xlu1 %v3504_v22, %s4365_s14  ;;  %v4834_v45 = vsel %vm910_vm1, %v928_v2, %v930_v30  ;;  %v636_v34 = vmul.f32 %v4536_v49, %v623_v14 }
  0xcc   : > { %7312 = vst [vmem:[#allocation27_spill] sm:$0xff] %v4834_v45  ;;  %v1124_v30 = vrot.slane %v4715_v1, 2  ;;  %v1061_v2 = vrot.slane %v4796_v40, 1  ;;  %v517_v14 = vadd.f32 %v4562_v0, %v498_v43  ;;  %v1134_v63 = vrot.slane %v4834_v45, 2 }
  0xcd   : > { %v4803_v5 = vsel %vm962_vm0, %v7143_v58, %v984_v23  ;;  %v4808_v19 = vsel %vm962_vm0, %v984_v23, %v7144_v39  ;;  %v1119_v58 = vsel %vm1112_vm2, %v7150_v21, %v1118_v32  ;;  %v4825_v23 = vsel %vm1112_vm2, %v1118_v32, %v7146_v37 }
  0xce   : > { %v4817_v22 = vrot.slane %v4808_v19, 7  ;;  %v1126_v39 = vrot.slane %v4796_v40, 2  ;;  %v649_v35 = vadd.f32 %v4562_v0, %v636_v34  ;;  %v1062_v43 = vsel %vm962_vm0, %v1059_v47, %v1061_v2 }
  0xcf   : > { %3515 = vrot.lane.b32.xlu1 %v3514_v46, %s4365_s14  ;;  %v3529_v46 = vpack.i.bf16 %v4825_v23, %v1119_v58  ;;  %v1135_v21 = vsel %vm1112_vm2, %v1132_v16, %v1134_v63  ;;  %v4875_v13 = vsel %vm1112_vm2, %v1134_v63, %v4814_v62 }
  0xd0   : > { %7311 = vst [vmem:[#allocation26_spill] sm:$0xff] %v4817_v22  ;;  %v3489_v32 = vpack.i.bf16 %v4817_v22, %v4814_v62  ;;  %v1127_v29 = vsel %vm1112_vm2, %v1124_v30, %v1126_v39  ;;  %v4857_v37 = vsel %vm1112_vm2, %v1126_v39, %v7149_v53  ;;  %v1069_v39 = vrot.slane %v4834_v45, 1 }
  0xd1   : > { %v530_v53 = vmax.f32 %v517_v14, 0.0  ;;  %v3539_v34 = vpack.i.bf16 %v4857_v37, %v1127_v29  ;;  %v1114_v14 = vrot.slane %v4703_v3, 2  ;;  %v3549_v63 = vpack.i.bf16 %v4875_v13, %v1135_v21 }
  0xd2   : > { %3490 = vrot.lane.b32.xlu0 %v3489_v32, %s4366_s16  ;;  %v1064_v32 = vsel %vm962_vm0, %v1061_v2, %v1063_v60  ;;  %v662_v60 = vmax.f32 %v649_v35, 0.0  ;;  %v1070_v51 = vsel %vm962_vm0, %v1067_v17, %v1069_v39  ;;  %v1072_v2 = vsel %vm962_vm0, %v1069_v39, %v1071_v11 }
  0xd3   : > { %3530 = vrot.lane.b32.xlu1 %v3529_v46, %s4366_s16  ;;  %v3509_v47 = vpack.i.bf16 %v1064_v32, %v1062_v43  ;;  %v622_v46 = vmul.f32 %v4609_v42, %v530_v53  ;;  %v7315_v43 = vmov 0.0   ;;  %v3519_v42 = vpack.i.bf16 %v1072_v2, %v1070_v51 }
  0xd4   : > { %v1113_v32 = vrot.slane %v7315_v43, 2  ;;  %v4899_v11 = vmul.f32 %v4607_v41, %v662_v60  ;;  %v1122_v17 = vrot.slane %v4709_v61, 2  ;;  %v7316_v60 = vrot.slane %v4730_v20, 2 }
  0xd5   : > { %v934_v53 = vrot.slane %v622_v46, 5  ;;  %v1130_v46 = vrot.slane %v4736_v25, 2 }
  0xd6   : > { %3500 = vrot.lane.b32.xlu0 %v3499_v27, %s4365_s14  ;;  %v7314_v27 = vrot.slane %v4673_v50, 2  ;;  %v7153_v6 = vrot.slane %v4899_v11, 1  ;;  %v1125_v51 = vsel %vm1112_vm2, %v1122_v17, %v1124_v30  ;;  %v1123_v2 = vsel %vm1112_vm2, %v7316_v60, %v1122_v17 }
  0xd7   : > { %3540 = vrot.lane.b32.xlu1 %v3539_v34, %s4366_s16  ;;  %v753_v34 = vld [vmem:[%s4895_s20] sm:$0xff]  ;;  %v3534_v30 = vpack.i.bf16 %v1125_v51, %v1123_v2  ;;  %v1225_v60 = vrot.slane %v4730_v20, 3 }
  0xd8   : > { %v1117_v35 = vsel %vm1112_vm2, %v1114_v14, %v7314_v27 }
  0xd9   : > { %v3554_v39 = vpack.i.bf16 %v1119_v58, %v1117_v35  ;;  %v7317_v58 = vrot.slane %v4629_v12, 5  ;;  %v7318_v12 = vrot.slane %v4754_v36, 2 }
  0xda   : > { %3510 = vrot.lane.b32.xlu0 %v3509_v47, %s4365_s14  ;;  %v1115_v47 = vsel %vm1112_vm2, %v1113_v32, %v1114_v14  ;;  %v766_v14 = vmul.f32 %v4536_v49, %v753_v34 }
  0xdb   : > { %3550 = vrot.lane.b32.xlu1 %v3549_v63, %s4366_s16  ;;  %v3524_v27 = vpack.i.bf16 %v1117_v35, %v1115_v47  ;;  %v754_v63 = vld [vmem:[%s4895_s20 + $0x8] sm:$0xff]  ;;  %v3564_v35 = vpack.i.bf16 %v1127_v29, %v1125_v51  ;;  %v1227_v47 = vrot.slane %v4709_v61, 3 }
  0xdc   : > { %v767_v32 = vmul.f32 %v4536_v49, %v754_v63  ;;  %v779_v34 = vadd.f32 %v4562_v0, %v766_v14  ;;  %v1235_v14 = vrot.slane %v4736_v25, 3 }
  0xde   : > { %3520 = vrot.lane.b32.xlu0 %v3519_v42, %s4365_s14  ;;  %v935_v42 = vsel %vm910_vm1, %v7317_v58, %v934_v53  ;;  %v1131_v53 = vsel %vm1112_vm2, %v7318_v12, %v1130_v46  ;;  %v792_v58 = vmax.f32 %v779_v34, 0.0  ;;  %v1231_v12 = vrot.slane %v4796_v40, 3 }
  0xdf   : > { %3555 = vrot.lane.b32.xlu1 %v3554_v39, %s4367_s21  ;;  %v4923_v17 = vsel %vm962_vm0, %v935_v42, %v7153_v6  ;;  %v1133_v39 = vsel %vm1112_vm2, %v1130_v46, %v1132_v16  ;;  %v1223_v16 = vrot.slane %v4762_v55, 3  ;;  %v822_v46 = vpop.permute.xlu0 %821  ;;  %v1228_v42 = vsel %vm1219_vm3, %v1225_v60, %v1227_v47 }
  0xe0   : > { %v3574_v29 = vpack.i.bf16 %v1135_v21, %v1133_v39  ;;  %v3544_v63 = vpack.i.bf16 %v1133_v39, %v1131_v53  ;;  %v7152_v51 = vrot.slane %v4923_v17, 2  ;;  %v1233_v34 = vrot.slane %v4754_v36, 3 }
  0xe1   : > { %v1226_v39 = vsel %vm1219_vm3, %v1223_v16, %v1225_v60 }
  0xe2   : > { %3525 = vrot.lane.b32.xlu0 %v3524_v27, %s4366_s16  ;;  %v780_v27 = vadd.f32 %v4562_v0, %v767_v32  ;;  %v3579_v21 = vpack.i.bf16 %v4808_v19, %v7152_v51  ;;  %v3559_v32 = vpack.i.bf16 %v1123_v2, %v4825_v23  ;;  %v3589_v51 = vpack.i.bf16 %v1228_v42, %v1226_v39 }
  0xe3   : > { %3565 = vrot.lane.b32.xlu1 %v3564_v35, %s4367_s21  ;;  %v1236_v6 = vsel %vm1219_vm3, %v1233_v34, %v1235_v14  ;;  %v1286_v23 = vrot.slane %v4673_v50, 4 }
  0xe4   : > { %v793_v35 = vmax.f32 %v780_v27, 0.0  ;;  %v1220_v27 = vrot.slane %v4703_v3, 3 }
  0xe6   : > { %3535 = vrot.lane.b32.xlu0 %v3534_v30, %s4366_s16  ;;  %v827_v30 = vpop.permute.xlu1 %826 }
  0xe7   : > { %3575 = vrot.lane.b32.xlu1 %v3574_v29, %s4367_s21  ;;  %v1221_v29 = vrot.slane %v4673_v50, 3  ;;  %v4954_v60 = vmul.f32 %v827_v30, %v793_v35  ;;  %v756_v30 = vld [vmem:[%s4895_s20 + $0x18] sm:$0xff] }
  0xe9   : > { %v1224_v42 = vsel %vm1219_vm3, %v1221_v29, %v1223_v16  ;;  %v7155_v16 = vrot.slane %v4954_v60, 5 }
  0xea   : > { %3545 = vrot.lane.b32.xlu0 %v3544_v63, %s4366_s16  ;;  %v884_v63 = vmul.f32 %v822_v46, %v792_v58  ;;  %v1234_v58 = vsel %vm1219_vm3, %v1231_v12, %v1233_v34  ;;  %v1222_v46 = vsel %vm1219_vm3, %v1220_v27, %v1221_v29  ;;  %v7154_v34 = vrot.slane %v4796_v40, 4  ;;  %v755_v27 = vld [vmem:[%s4895_s20 + $0x10] sm:$0xff] }
  0xeb   : > { %3580 = vrot.lane.b32.xlu1 %v3579_v21, %s4367_s21  ;;  %v3569_v21 = vpack.i.bf16 %v1131_v53, %v4857_v37  ;;  %v3599_v35 = vpack.i.bf16 %v1236_v6, %v1234_v58  ;;  %v1229_v53 = vrot.slane %v4715_v1, 3  ;;  %v3584_v29 = vpack.i.bf16 %v1224_v42, %v1222_v46 }
  0xec   : > { %v1014_v39 = vrot.slane %v884_v63, 5  ;;  %v1292_v63 = vrot.slane %v4709_v61, 4  ;;  %v1294_v6 = vrot.slane %v4715_v1, 4  ;;  %v1239_v58 = vrot.slane %v4834_v45, 3 }
  0xed   : > { %v1230_v42 = vsel %vm1219_vm3, %v1227_v47, %v1229_v53 }
  0xee   : > { %3560 = vrot.lane.b32.xlu0 %v3559_v32, %s4367_s21  ;;  %v1285_v32 = vrot.slane %v4703_v3, 4  ;;  %v1242_v3 = vsel %vm1219_vm3, %v1239_v58, %v1241_v44 }
  0xef   : > { %3590 = vrot.lane.b32.xlu1 %v3589_v51, %s4368_s22  ;;  %v7319_v51 = vrot.slane %v4762_v55, 4 }
  0xf0   : > { %v1287_v2 = vsel %vm1284_vm4, %v1285_v32, %v1286_v23 }
  0xf1   : > { %v4968_v37 = vsel %vm1284_vm4, %v1286_v23, %v7319_v51  ;;  %v7320_v23 = vrot.slane %v4780_v18, 1  ;;  %v769_v51 = vmul.f32 %v4536_v49, %v756_v30  ;;  %v768_v30 = vmul.f32 %v4536_v49, %v755_v27 }
  0xf2   : > { %3570 = vrot.lane.b32.xlu0 %v3569_v21, %s4367_s21  ;;  %v1232_v21 = vsel %vm1219_vm3, %v1229_v53, %v1231_v12  ;;  %v3614_v46 = vpack.i.bf16 %v4968_v37, %v1287_v2  ;;  %v1237_v12 = vrot.slane %v4746_v48, 3  ;;  %v1295_v2 = vsel %vm1284_vm4, %v1292_v63, %v1294_v6 }
  0xf3   : > { %3600 = vrot.lane.b32.xlu1 %v3599_v35, %s4368_s22  ;;  %v4982_v32 = vsel %vm910_vm1, %v7320_v23, %v1014_v39  ;;  %v4991_v35 = vsel %vm1284_vm4, %v1294_v6, %v7154_v34  ;;  %v4998_v23 = vsel %vm910_vm1, %v1014_v39, %v7155_v16  ;;  %v3594_v47 = vpack.i.bf16 %v1232_v21, %v1230_v42 }
  0xf4   : > { %7321 = vst [vmem:[#allocation28_spill] sm:$0xff] %v4982_v32  ;;  %7322 = vst [vmem:[#allocation29_spill] sm:$0xff] %v4998_v23  ;;  %v1240_v53 = vsel %vm1219_vm3, %v1237_v12, %v1239_v58  ;;  %v1302_v34 = vrot.slane %v4746_v48, 4  ;;  %v2118_v18 = vrot.slane %v4982_v32, 1  ;;  %v3624_v39 = vpack.i.bf16 %v4991_v35, %v1295_v2 }
  0xf5   : > { %v1238_v27 = vsel %vm1219_vm3, %v1235_v14, %v1237_v12  ;;  %v7323_v16 = vrot.slane %v4834_v45, 4  ;;  %v7158_v6 = vrot.slane %v4808_v19, 1  ;;  %v782_v42 = vadd.f32 %v4562_v0, %v769_v51 }
  0xf6   : > { %3585 = vrot.lane.b32.xlu0 %v3584_v29, %s4368_s22  ;;  %v1300_v29 = vrot.slane %v4736_v25, 4  ;;  %v781_v26 = vadd.f32 %v4562_v0, %v768_v30  ;;  %v1243_v12 = vrot.slane %v4923_v17, 3  ;;  %v1290_v30 = vrot.slane %v4730_v20, 4 }
  0xf7   : > { %3615 = vrot.lane.b32.xlu1 %v3614_v46, %s4369_s23  ;;  %v5013_v21 = vsel %vm1284_vm4, %v1302_v34, %v7323_v16  ;;  %v5017_v46 = vrot.slane %v4998_v23, 1  ;;  %v5026_v14 = vsel %vm962_vm0, %v7158_v6, %v2118_v18  ;;  %v837_v6 = vpop.permute.xlu1 %836  ;;  %v7329_v58 = vrot.slane %v4923_v17, 2 }
  0xf8   : > { %v1303_v24 = vsel %vm1284_vm4, %v1300_v29, %v1302_v34  ;;  %7324 = vst [vmem:[#allocation30_spill] sm:$0xff] %v5026_v14  ;;  %v3609_v34 = vpack.i.bf16 %v5026_v14, %v1243_v12  ;;  %v1293_v28 = vsel %vm1284_vm4, %v1290_v30, %v1292_v63  ;;  %v7326_v14 = vrot.slane %v4635_v15, 1 }
  0xf9   : > { %v3634_v16 = vpack.i.bf16 %v5013_v21, %v1303_v24  ;;  %v5033_v51 = vsel %vm962_vm0, %v2118_v18, %v5017_v46  ;;  %v1179_v15 = vsel %vm1112_vm2, %v4814_v62, %v7329_v58  ;;  %v628_v58 = vld [vmem:[%s4549_s25 + $0x28] sm:$0xff] }
  0xfa   : > { %3595 = vrot.lane.b32.xlu0 %v3594_v47, %s4368_s22  ;;  %v3604_v47 = vpack.i.bf16 %v1240_v53, %v1238_v27  ;;  %v795_v53 = vmax.f32 %v782_v42, 0.0  ;;  %v1308_v27 = vrot.slane %v4923_v17, 4  ;;  %v1244_v42 = vsel %vm1219_vm3, %v1241_v44, %v1243_v12 }
  0xfb   : > { %3625 = vrot.lane.b32.xlu1 %v3624_v39, %s4369_s23  ;;  %v794_v39 = vmax.f32 %v781_v26, 0.0  ;;  %v1291_v26 = vsel %vm1284_vm4, %v7325_v8, %v1290_v30  ;;  %v3649_v43 = vpack.i.bf16 %v1244_v42, %v1242_v3  ;;  %v7327_v8 = vrot.slane %v4899_v11, 1 }
  0xfc   : > { %v3639_v18 = vpack.i.bf16 %v5033_v51, %v1308_v27  ;;  %v5048_v9 = vmul.f32 %v837_v6, %v795_v53  ;;  %v3619_v63 = vpack.i.bf16 %v1293_v28, %v1291_v26  ;;  %v7328_v6 = vrot.slane %v4796_v40, 4 }
  0xfd   : > { %v5059_v12 = vsel %vm962_vm0, %v7327_v8, %v7326_v14  ;;  %v3664_v3 = vpack.i.bf16 %v1295_v2, %v1293_v28  ;;  %v1306_v11 = vrot.slane %v4692_v56, 4  ;;  %v7330_v14 = vrot.slane %v4954_v60, 5 }
  0xfe   : > { %3605 = vrot.lane.b32.xlu0 %v3604_v47, %s4368_s22  ;;  %v832_v47 = vpop.permute.xlu0 %831  ;;  %v7167_v53 = vrot.slane %v5048_v9, 5  ;;  %v3644_v28 = vpack.i.bf16 %v1179_v15, %v4875_v13  ;;  %v7331_v60 = vrot.slane %v4834_v45, 4  ;;  %v1390_v42 = vrot.slane %v4673_v50, 5 }
  0xff   : > { %3635 = vrot.lane.b32.xlu1 %v3634_v16, %s4369_s23  ;;  %v1298_v16 = vrot.slane %v4754_v36, 4  ;;  %v886_v41 = vmul.f32 %v832_v47, %v794_v39  ;;  %v1309_v2 = vsel %vm1284_vm4, %v1306_v11, %v1308_v27 }
 0x100   : > { %v1307_v47 = vsel %vm1284_vm4, %v7331_v60, %v1306_v11  ;;  %v1399_v11 = vrot.slane %v4796_v40, 5 }
 0x101   : > { %v1299_v30 = vsel %vm1284_vm4, %v7328_v6, %v1298_v16  ;;  %v1017_v39 = vrot.slane %v886_v41, 5  ;;  %v3654_v8 = vpack.i.bf16 %v1309_v2, %v1307_v47 }
 0x102   : > { %3610 = vrot.lane.b32.xlu0 %v3609_v34, %s4368_s22  ;;  %v1301_v34 = vsel %vm1284_vm4, %v1298_v16, %v1300_v29  ;;  %v5073_v29 = vrot.slane %v5059_v12, 4  ;;  %v1391_v16 = vrot.slane %v4762_v55, 5 }
 0x103   : > { %3640 = vrot.lane.b32.xlu1 %v3639_v18, %s4369_s23  ;;  %v3629_v44 = vpack.i.bf16 %v1301_v34, %v1299_v30  ;;  %v5078_v41 = vsel %vm910_vm1, %v7330_v14, %v1017_v39  ;;  %v3674_v62 = vpack.i.bf16 %v1303_v24, %v1301_v34  ;;  %v2363_v24 = vrot.slane %v4998_v23, 2 }
 0x104   : > { %v1350_v18 = vsel %vm1284_vm4, %v1308_v27, %v5073_v29  ;;  %v2365_v13 = vrot.slane %v5078_v41, 2  ;;  %v1392_v15 = vsel %vm910_vm1, %v1390_v42, %v1391_v16  ;;  %v7168_v14 = vrot.slane %v4754_v36, 5 }
 0x106   : > { %3620 = vrot.lane.b32.xlu0 %v3619_v63, %s4369_s23  ;;  %v7170_v63 = vrot.slane %v4730_v20, 5  ;;  %v5102_v6 = vsel %vm1112_vm2, %v2363_v24, %v2365_v13 }
 0x107   : > { %3650 = vrot.lane.b32.xlu1 %v3649_v43, %s4368_s22  ;;  %v5083_v43 = vsel %vm910_vm1, %v1017_v39, %v7167_v53  ;;  %v5110_v39 = vpack.i.bf16 %v1350_v18, %v1309_v2  ;;  %v641_v2 = vmul.f32 %v4536_v49, %v628_v58  ;;  %v630_v18 = vld [vmem:[%s4549_s25 + $0x38] sm:$0xff]  ;;  %v1405_v58 = vrot.slane %v4746_v48, 5 }
 0x108   : > { %v7166_v34 = vrot.slane %v5083_v43, 2 }
 0x10a   : > { %3630 = vrot.lane.b32.xlu0 %v3629_v44, %s4369_s23  ;;  %v5107_v27 = vsel %vm1112_vm2, %v2365_v13, %v7166_v34  ;;  %v1407_v13 = vrot.slane %v4834_v45, 5  ;;  %v629_v34 = vld [vmem:[%s4549_s25 + $0x30] sm:$0xff]  ;;  %v631_v44 = vld [vmem:[%s4549_s25 + $0x40] sm:$0xff] }
 0x10b   : > { %3665 = vrot.lane.b32.xlu1 %v3664_v3, %s4370_s24  ;;  %v1394_v3 = vsel %vm910_vm1, %v1391_v16, %v7170_v63  ;;  %v1402_v16 = vsel %vm910_vm1, %v1399_v11, %v7168_v14 }
 0x10c   : > { %v3694_v60 = vpack.i.bf16 %v1394_v3, %v1392_v15  ;;  %v2362_v15 = vrot.slane %v4982_v32, 2  ;;  %v654_v3 = vadd.f32 %v4562_v0, %v641_v2  ;;  %v1408_v53 = vsel %vm910_vm1, %v1405_v58, %v1407_v13 }
 0x10d   : > { %v3679_v2 = vpack.i.bf16 %v1307_v47, %v5013_v21  ;;  %v1462_v47 = vrot.slane %v4709_v61, 6 }
 0x10e   : > { %3645 = vrot.lane.b32.xlu0 %v3644_v28, %s4367_s21  ;;  %v3659_v28 = vpack.i.bf16 %v1291_v26, %v4968_v37  ;;  %v7169_v37 = vrot.slane %v4692_v56, 5  ;;  %v3669_v26 = vpack.i.bf16 %v1299_v30, %v4991_v35  ;;  %v2426_v30 = vrot.slane %v4982_v32, 3 }
 0x10f   : > { %3675 = vrot.lane.b32.xlu1 %v3674_v62, %s4370_s24  ;;  %v1397_v62 = vrot.slane %v4715_v1, 5 }
 0x110   : > { %v1410_v35 = vsel %vm910_vm1, %v1407_v13, %v7169_v37  ;;  %v642_v13 = vmul.f32 %v4536_v49, %v629_v34  ;;  %v644_v37 = vmul.f32 %v4536_v49, %v631_v44  ;;  %v7333_v44 = vrot.slane %v4730_v20, 5 }
 0x111   : > { %v1400_v42 = vsel %vm910_vm1, %v1397_v62, %v1399_v11  ;;  %v3714_v63 = vpack.i.bf16 %v1410_v35, %v1408_v53  ;;  %v7332_v53 = vrot.slane %v4667_v38, 5 }
 0x112   : > { %3655 = vrot.lane.b32.xlu0 %v3654_v8, %s4369_s23  ;;  %v632_v8 = vld [vmem:[%s4549_s25 + $0x48] sm:$0xff]  ;;  %v3704_v11 = vpack.i.bf16 %v1402_v16, %v1400_v42  ;;  %v2364_v16 = vsel %vm1112_vm2, %v2362_v15, %v2363_v24  ;;  %v5167_v42 = vpop.permute.xlu1 %846  ;;  %s4372_s25 = smov 32  }
 0x113   : > { %3685 = vrot.lane.b32.xlu1 %v5110_v39, %s4370_s24  ;;  %v645_v14 = vmul.f32 %v4536_v49, %v632_v8  ;;  %v667_v8 = vmax.f32 %v654_v3, 0.0 }
 0x115   : > { %v658_v15 = vadd.f32 %v4562_v0, %v645_v14  ;;  %v1403_v14 = vrot.slane %v4736_v25, 5 }
 0x116   : > { %3660 = vrot.lane.b32.xlu0 %v3659_v28, %s4370_s24  ;;  %v643_v28 = vmul.f32 %v4536_v49, %v630_v18  ;;  %v1413_v18 = vrot.slane %v5059_v12, 5  ;;  %v3689_v49 = vpack.i.bf16 %v2364_v16, %v5073_v29 }
 0x117   : > { %3695 = vrot.lane.b32.xlu1 %v3694_v60, %s4371_s26  ;;  %v7171_v60 = vrot.slane %v4998_v23, 3 }
 0x118   : > { %v656_v24 = vadd.f32 %v4562_v0, %v643_v28  ;;  %v5174_v34 = vsel %vm910_vm1, %v1413_v18, %v7332_v53  ;;  %v1460_v28 = vrot.slane %v4730_v20, 6  ;;  %v5201_v20 = vpop.permute.xlu1 %856 }
 0x119   : > { %v2428_v21 = vsel %vm1219_vm3, %v2426_v30, %v7171_v60  ;;  %v655_v30 = vadd.f32 %v4562_v0, %v642_v13  ;;  %v1406_v60 = vsel %vm910_vm1, %v1403_v14, %v1405_v58 }
 0x11a   : > { %3670 = vrot.lane.b32.xlu0 %v3669_v26, %s4370_s24  ;;  %v1395_v26 = vrot.slane %v4709_v61, 5  ;;  %v1463_v16 = vsel %vm1456_vm5, %v1460_v28, %v1462_v47  ;;  %v669_v13 = vmax.f32 %v656_v24, 0.0 }
 0x11b   : > { %3705 = vrot.lane.b32.xlu1 %v3704_v11, %s4371_s26  ;;  %v7172_v11 = vrot.slane %v4715_v1, 6 }
 0x11c   : > { %v1396_v3 = vsel %vm910_vm1, %v7333_v44, %v1395_v26  ;;  %v1398_v35 = vsel %vm910_vm1, %v1395_v26, %v1397_v62  ;;  %v1470_v62 = vrot.slane %v4736_v25, 6  ;;  %v7175_v26 = vrot.slane %v4746_v48, 6 }
 0x11d   : > { %v1465_v53 = vsel %vm1456_vm5, %v1462_v47, %v7172_v11  ;;  %v5193_v44 = vmul.f32 %v4682_v54, %v667_v8  ;;  %v1468_v47 = vrot.slane %v4754_v36, 6  ;;  %v668_v11 = vmax.f32 %v655_v30, 0.0 }
 0x11e   : > { %3680 = vrot.lane.b32.xlu0 %v3679_v2, %s4370_s24  ;;  %v3724_v2 = vpack.i.bf16 %v2428_v21, %v5174_v34  ;;  %v7334_v21 = vrot.slane %v4754_v36, 5  ;;  %v3734_v8 = vpack.i.bf16 %v1465_v53, %v1463_v16  ;;  %v1478_v53 = vrot.slane %v4923_v17, 6 }
 0x11f   : > { %3715 = vrot.lane.b32.xlu1 %v3714_v63, %s4371_s26  ;;  %v657_v63 = vadd.f32 %v4562_v0, %v644_v37  ;;  %v671_v0 = vmax.f32 %v658_v15, 0.0  ;;  %v3699_v37 = vpack.i.bf16 %v1398_v35, %v1396_v3  ;;  %v1471_v24 = vsel %vm1456_vm5, %v1468_v47, %v1470_v62 }
 0x120   : > { %v1473_v15 = vsel %vm1456_vm5, %v1470_v62, %v7175_v26  ;;  %v1411_v3 = vrot.slane %v4923_v17, 5  ;;  %v7176_v35 = vrot.slane %v5059_v12, 6  ;;  %v7179_v58 = vrot.slane %v5193_v44, 1 }
 0x121   : > { %v670_v25 = vmax.f32 %v657_v63, 0.0  ;;  %v5213_v30 = vmul.f32 %v4751_v33, %v671_v0  ;;  %v5215_v63 = vpop.permute.xlu0 %841  ;;  %v1457_v62 = vrot.slane %v4673_v50, 6  ;;  %v746_v0 = vmul.f32 %v4680_v4, %v668_v11 }
 0x122   : > { %3690 = vrot.lane.b32.xlu0 %v3689_v49, %s4370_s24  ;;  %v1404_v49 = vsel %vm910_vm1, %v7334_v21, %v1403_v14  ;;  %v747_v14 = vmul.f32 %v4720_v10, %v669_v13  ;;  %v1414_v16 = vsel %vm910_vm1, %v1411_v3, %v1413_v18  ;;  %v3744_v13 = vpack.i.bf16 %v1473_v15, %v1471_v24  ;;  %v5242_v15 = vpop.permute.xlu1 %866 }
 0x123   : > { %3725 = vrot.lane.b32.xlu1 %v3724_v2, %s4371_s26  ;;  %v3709_v2 = vpack.i.bf16 %v1406_v60, %v1404_v49  ;;  %v748_v21 = vmul.f32 %v4718_v7, %v670_v25  ;;  %v7335_v26 = vrot.slane %v4692_v56, 5  ;;  %v1476_v60 = vrot.slane %v4692_v56, 6 }
 0x124   : > { %v5232_v18 = vsel %vm1456_vm5, %v1478_v53, %v7176_v35  ;;  %v7336_v25 = vrot.slane %v4659_v31, 1  ;;  %v976_v24 = vrot.slane %v747_v14, 1  ;;  %v7178_v11 = vrot.slane %v5213_v30, 1 }
 0x125   : > { %v1466_v31 = vrot.slane %v4796_v40, 6  ;;  %v978_v10 = vrot.slane %v748_v21, 1  ;;  %v7184_v33 = vrot.slane %v5078_v41, 3 }
 0x126   : > { %3700 = vrot.lane.b32.xlu0 %v3699_v37, %s4371_s26  ;;  %v1458_v37 = vrot.slane %v4762_v55, 6  ;;  %v5239_v49 = vsel %vm962_vm0, %v7336_v25, %v7179_v58  ;;  %v5251_v25 = vpop.permute.xlu0 %851 }
 0x127   : > { %3735 = vrot.lane.b32.xlu1 %v3734_v8, %s4372_s25  ;;  %v1412_v8 = vsel %vm910_vm1, %v7335_v26, %v1411_v3  ;;  %v1479_v3 = vsel %vm1456_vm5, %v1476_v60, %v1478_v53  ;;  %v5262_v53 = vsel %vm962_vm0, %v978_v10, %v7178_v11  ;;  %v1474_v11 = vrot.slane %v4834_v45, 6 }
 0x128   : > { %v5245_v26 = vpack.i.bf16 %v1414_v16, %v1412_v8  ;;  %v1461_v35 = vsel %vm1456_vm5, %v1458_v37, %v1460_v28  ;;  %v5256_v14 = vpack.i.bf16 %v5232_v18, %v1479_v3  ;;  %v1469_v3 = vsel %vm1456_vm5, %v1466_v31, %v1468_v47  ;;  %v5279_v16 = vpop.permute.xlu1 %876 }
 0x129   : > { %v5277_v58 = vsel %vm962_vm0, %v976_v24, %v978_v10  ;;  %v1586_v40 = vrot.slane %v5239_v49, 5  ;;  %v7355_v56 = vrot.slane %v5262_v53, 4 }
 0x12a   : > { %3710 = vrot.lane.b32.xlu0 %v3709_v2, %s4371_s26  ;;  %v1459_v2 = vsel %vm1456_vm5, %v1457_v62, %v1458_v37  ;;  %v1525_v62 = vrot.slane %v4695_v57, 4  ;;  %v1527_v37 = vrot.slane %v4700_v52, 4  ;;  %v5286_v4 = vpop.permute.xlu0 %861 }
 0x12b   : > { %3745 = vrot.lane.b32.xlu1 %v3744_v13, %s4372_s25  ;;  %v974_v13 = vrot.slane %v746_v0, 1  ;;  %v3729_v28 = vpack.i.bf16 %v1461_v35, %v1459_v2  ;;  %v7337_v0 = vrot.slane %v4715_v1, 6  ;;  %v7338_v35 = vrot.slane %v5239_v49, 4 }
 0x12c   : > { %v1528_v10 = vsel %vm1284_vm4, %v1525_v62, %v1527_v37 }
 0x12d   : > { %v5269_v21 = vsel %vm962_vm0, %v974_v13, %v976_v24  ;;  %v1467_v8 = vsel %vm1456_vm5, %v7337_v0, %v1466_v31  ;;  %v1530_v2 = vsel %vm1284_vm4, %v1527_v37, %v7338_v35  ;;  %v7339_v31 = vrot.slane %v4746_v48, 6 }
 0x12e   : > { %3720 = vrot.lane.b32.xlu0 %v5245_v26, %s4371_s26  ;;  %v3739_v47 = vpack.i.bf16 %v1469_v3, %v1467_v8  ;;  %v1533_v24 = vrot.slane %v5269_v21, 4  ;;  %v1477_v0 = vsel %vm1456_vm5, %v1474_v11, %v1476_v60  ;;  %v1535_v35 = vrot.slane %v5277_v58, 4  ;;  %v5321_v54 = vpop.permute.xlu0 %871 }
 0x12f   : > { %3755 = vrot.lane.b32.xlu1 %v5256_v14, %s4372_s25  ;;  %v1482_v8 = vrot.slane %v4667_v38, 6  ;;  %v7340_v37 = vrot.slane %v5262_v53, 4  ;;  %v7347_v48 = vrot.slane %v4667_v38, 5 }
 0x131   : > { %v1538_v3 = vsel %vm1284_vm4, %v1535_v35, %v7340_v37 }
 0x132   : > { %3730 = vrot.lane.b32.xlu0 %v3729_v28, %s4372_s25  ;;  %v1475_v28 = vsel %vm1456_vm5, %v7339_v31, %v1474_v11  ;;  %v1536_v11 = vsel %vm1284_vm4, %v1533_v24, %v1535_v35  ;;  %v7341_v31 = vrot.slane %v4998_v23, 3 }
 0x133   : > { %3765 = vrot.lane.b32.xlu1 %v5110_v39, %s4373_s12  ;;  %v3774_v39 = vpack.i.bf16 %v1530_v2, %v1528_v10  ;;  %v3749_v60 = vpack.i.bf16 %v1477_v0, %v1475_v28  ;;  %v2531_v2 = vrot.slane %v4998_v23, 4  ;;  %v7342_v10 = vrot.slane %v5193_v44, 1 }
 0x134   : > { %v3784_v35 = vpack.i.bf16 %v1538_v3, %v1536_v11  ;;  %v1643_v28 = vrot.slane %v4700_v52, 6 }
 0x135   : > { %v5298_v7 = vpop.permute.xlu1 %3485  ;;  %v5319_v37 = vsel %vm962_vm0, %v7342_v10, %v974_v13  ;;  %v1523_v13 = vrot.slane %v4667_v38, 4  ;;  %v1641_v10 = vrot.slane %v4695_v57, 6 }
 0x136   : > { %3740 = vrot.lane.b32.xlu0 %v3739_v47, %s4372_s25  ;;  %v5313_v47 = vsel %vm1219_vm3, %v7341_v31, %v7184_v33  ;;  %v7345_v33 = vrot.slane %v5078_v41, 4  ;;  %v1588_v61 = vrot.slane %v5319_v37, 5 }
 0x137   : > { %3775 = vrot.lane.b32.xlu1 %v3774_v39, %s4373_s12  ;;  %v7344_v39 = vrot.slane %v5059_v12, 6  ;;  %v1526_v11 = vsel %vm1284_vm4, %v1523_v13, %v1525_v62  ;;  %v1524_v1 = vsel %vm1284_vm4, %v5073_v29, %v1523_v13  ;;  %v5356_v62 = vsel %vm1456_vm5, %v1641_v10, %v1643_v28 }
 0x138   : > { %v2533_v44 = vsel %vm1284_vm4, %v2531_v2, %v7345_v33  ;;  %v5359_v36 = vsel %vm1456_vm5, %v1482_v8, %v1641_v10  ;;  %v3769_v29 = vpack.i.bf16 %v1526_v11, %v1524_v1  ;;  %v7353_v1 = vrot.slane %v5269_v21, 5 }
 0x139   : > { %v5324_v0 = vpop.permute.xlu1 %3495  ;;  %v5330_v31 = vsel %vm1456_vm5, %v7344_v39, %v1482_v8  ;;  %v7346_v39 = vrot.slane %v4695_v57, 5 }
 0x13a   : > { %7343 = vst [vmem:[#allocation31_spill] sm:$0xff] %v5324_v0  ;;  %3750 = vrot.lane.b32.xlu0 %v3749_v60, %s4372_s25  ;;  %v3759_v3 = vpack.i.bf16 %v5313_v47, %v5330_v31  ;;  %v1541_v60 = vrot.slane %v4803_v5, 4 }
 0x13b   : > { %3785 = vrot.lane.b32.xlu1 %v3784_v35, %s4373_s12  ;;  %v1583_v33 = vsel %vm910_vm1, %v7347_v48, %v7346_v39  ;;  %v1531_v35 = vrot.slane %v5319_v37, 4  ;;  %v7349_v48 = vrot.slane %v4766_v59, 1  ;;  %v7350_v39 = vrot.slane %v5213_v30, 1 }
 0x13c   : > { %v3794_v45 = vpack.i.bf16 %v2533_v44, %v1541_v60  ;;  %v5368_v44 = vpop.permute.xlu0 %881  ;;  %v3804_v8 = vpack.i.bf16 %v1583_v33, %v5174_v34  ;;  %v7352_v30 = vrot.slane %v5239_v49, 4 }
 0x13d   : > { %v5348_v2 = vpop.permute.xlu1 %3505  ;;  %v1534_v13 = vsel %vm1284_vm4, %v1531_v35, %v1533_v24  ;;  %v1591_v24 = vsel %vm910_vm1, %v1588_v61, %v7353_v1 }
 0x13e   : > { %7348 = vst [vmem:[#allocation32_spill] sm:$0xff] %v5348_v2  ;;  %3760 = vrot.lane.b32.xlu0 %v3759_v3, %s4372_s25  ;;  %v5366_v3 = vsel %vm962_vm0, %v7350_v39, %v7349_v48  ;;  %v1598_v48 = vrot.slane %v4803_v5, 5  ;;  %v1589_v39 = vsel %vm910_vm1, %v1586_v40, %v1588_v61  ;;  %v7366_v2 = vrot.slane %v4695_v57, 1 }
 0x13f   : > { %3795 = vrot.lane.b32.xlu1 %v3794_v45, %s4373_s12  ;;  %v1532_v45 = vsel %vm1284_vm4, %v7352_v30, %v1531_v35  ;;  %v1539_v11 = vrot.slane %v5366_v3, 4  ;;  %v1594_v35 = vrot.slane %v5262_v53, 5  ;;  %v1596_v30 = vrot.slane %v5366_v3, 5 }
 0x140   : > { %v3779_v33 = vpack.i.bf16 %v1534_v13, %v1532_v45  ;;  %v3814_v1 = vpack.i.bf16 %v1591_v24, %v1589_v39  ;;  %v1584_v24 = vrot.slane %v4700_v52, 5 }
 0x141   : > { %v5375_v10 = vpop.permute.xlu1 %3515  ;;  %v1599_v13 = vsel %vm910_vm1, %v1596_v30, %v1598_v48  ;;  %v1597_v45 = vsel %vm910_vm1, %v1594_v35, %v1596_v30  ;;  %v7360_v30 = vrot.slane %v4695_v57, 5 }
 0x142   : > { %7351 = vst [vmem:[#allocation33_spill] sm:$0xff] %v5375_v10  ;;  %3770 = vrot.lane.b32.xlu0 %v3769_v29, %s4373_s12  ;;  %v1542_v29 = vsel %vm1284_vm4, %v1539_v11, %v1541_v60  ;;  %v1587_v39 = vsel %vm910_vm1, %v1584_v24, %v1586_v40 }
 0x143   : > { %3805 = vrot.lane.b32.xlu1 %v3804_v8, %s4374_s15  ;;  %v1540_v8 = vsel %vm1284_vm4, %v7355_v56, %v1539_v11  ;;  %v7194_v56 = vrot.slane %v5239_v49, 6 }
 0x144   : > { %v5389_v34 = vpop.permute.xlu0 %3490  ;;  %v3789_v60 = vpack.i.bf16 %v1542_v29, %v1540_v8  ;;  %v757_v29 = vld [vmem:[%s4895_s20 + $0x20] sm:$0xff]  ;;  %v1585_v8 = vsel %vm910_vm1, %v7360_v30, %v1584_v24  ;;  %v2100_v24 = vrot.slane %v4700_v52, 1 }
 0x145   : > { %v5395_v59 = vpop.permute.xlu1 %3530 }
 0x146   : > { %7354 = vst [vmem:[#allocation34_spill] sm:$0xff] %v5395_v59  ;;  %3780 = vrot.lane.b32.xlu0 %v3779_v33, %s4373_s12  ;;  %v3824_v33 = vpack.i.bf16 %v1599_v13, %v1597_v45  ;;  %v5426_v13 = vsel %vm1456_vm5, %v1643_v28, %v7194_v56  ;;  %v5441_v28 = vld [vmem:[%s7135_s4] ss:$0 sm:$0xff]  ;;  %v2101_v50 = vsel %vm962_vm0, %v7366_v2, %v2100_v24  ;;  %v2261_v2 = vrot.slane %v5078_v41, 1 }
 0x147   : > { %3815 = vrot.lane.b32.xlu1 %v3814_v1, %s4374_s15  ;;  %v770_v56 = vmul.f32 %v5441_v28, %v757_v29 }
 0x148   : > { %v5403_v61 = vpop.permute.xlu0 %3500 }
 0x149   : > { %7356 = vst [vmem:[#allocation35_spill] sm:$0xff] %v5403_v61  ;;  %v5406_v10 = vpop.permute.xlu1 %3540  ;;  %v2163_v61 = vrot.slane %v5078_v41, 7 }
 0x14a   : > { %7357 = vst [vmem:[#allocation36_spill] sm:$0xff] %v5406_v10  ;;  %3790 = vrot.lane.b32.xlu0 %v3789_v60, %s4373_s12  ;;  %v1592_v60 = vrot.slane %v5277_v58, 5  ;;  %v2596_v10 = vrot.slane %v4998_v23, 5 }
 0x14b   : > { %3825 = vrot.lane.b32.xlu1 %v3824_v33, %s4374_s15  ;;  %v758_v33 = vld [vmem:[%s4895_s20 + $0x28] sm:$0xff] }
 0x14c   : > { %v5412_v11 = vpop.permute.xlu0 %3510  ;;  %v771_v29 = vmul.f32 %v5441_v28, %v758_v33 }
 0x14d   : > { %7358 = vst [vmem:[#allocation37_spill] sm:$0xff] %v5412_v11  ;;  %v5415_v1 = vpop.permute.xlu1 %3550 }
 0x14e   : > { %7359 = vst [vmem:[#allocation38_spill] sm:$0xff] %v5415_v1  ;;  %3800 = vrot.lane.b32.xlu0 %v5245_v26, %s4374_s15  ;;  %v3809_v26 = vpack.i.bf16 %v1587_v39, %v1585_v8  ;;  %v1595_v1 = vsel %vm910_vm1, %v1592_v60, %v1594_v35  ;;  %v7363_v35 = vrot.slane %v5269_v21, 5  ;;  %v7364_v8 = vrot.slane %v5239_v49, 1 }
 0x14f   : > { %3835 = vrot.lane.b32.xlu1 %v5256_v14, %s4375_s13  ;;  %v3844_v14 = vpack.i.bf16 %v5426_v13, %v5356_v62 }
 0x150   : > { %v5432_v40 = vpop.permute.xlu0 %3520  ;;  %v1593_v39 = vsel %vm910_vm1, %v7363_v35, %v1592_v60  ;;  %v2103_v30 = vsel %vm962_vm0, %v2100_v24, %v7364_v8  ;;  %v7367_v60 = vrot.slane %v5078_v41, 5  ;;  %v5470_v8 = vld [vmem:[%s7136_s5] ss:$0 sm:$0xff]  ;;  %v7203_v24 = vrot.slane %v5083_v43, 1 }
 0x151   : > { %7361 = vst [vmem:[#allocation39_spill] sm:$0xff] %v5432_v40  ;;  %v5444_v45 = vpop.permute.xlu1 %3555  ;;  %v1600_v40 = vrot.slane %v4808_v19, 5  ;;  %v3819_v11 = vpack.i.bf16 %v1595_v1, %v1593_v39  ;;  %v783_v33 = vadd.f32 %v5470_v8, %v770_v56  ;;  %v3854_v1 = vpack.i.bf16 %v2103_v30, %v2101_v50 }
 0x152   : > { %7362 = vst [vmem:[#allocation40_spill] sm:$0xff] %v5444_v45  ;;  %3810 = vrot.lane.b32.xlu0 %v3809_v26, %s4374_s15  ;;  %v2598_v35 = vsel %vm910_vm1, %v2596_v10, %v7367_v60  ;;  %v784_v10 = vadd.f32 %v5470_v8, %v771_v29  ;;  %v7204_v56 = vrot.slane %v5269_v21, 6  ;;  %v3864_v50 = vpack.i.bf16 %v4998_v23, %v4982_v32 }
 0x153   : > { %3845 = vrot.lane.b32.xlu1 %v3844_v14, %s4375_s13  ;;  %v1601_v14 = vsel %vm910_vm1, %v1598_v48, %v1600_v40  ;;  %v796_v59 = vmax.f32 %v783_v33, 0.0  ;;  %v7208_v48 = vrot.slane %v5083_v43, 3  ;;  %v5495_v40 = vsel %vm962_vm0, %v2261_v2, %v7203_v24 }
 0x154   : > { %v5459_v26 = vpop.permute.xlu0 %3525  ;;  %v3829_v60 = vpack.i.bf16 %v2598_v35, %v1601_v14  ;;  %v1647_v30 = vrot.slane %v5319_v37, 6  ;;  %v797_v29 = vmax.f32 %v784_v10, 0.0  ;;  %v3839_v33 = vpack.i.bf16 %v5359_v36, %v5330_v31 }
 0x155   : > { %7365 = vst [vmem:[#allocation41_spill] sm:$0xff] %v5459_v26  ;;  %v5473_v55 = vpop.permute.xlu1 %3565  ;;  %v1768_v14 = vrot.slane %v4982_v32, 7  ;;  %v7379_v26 = vrot.slane %v5048_v9, 5 }
 0x156   : > { %7368 = vst [vmem:[#allocation42_spill] sm:$0xff] %v5473_v55  ;;  %3820 = vrot.lane.b32.xlu0 %v3819_v11, %s4374_s15  ;;  %v2262_v11 = vsel %vm962_vm0, %v5017_v46, %v2261_v2  ;;  %v2161_v2 = vrot.slane %v4998_v23, 7  ;;  %v763_v23 = vld [vmem:[%s4895_s20 + $0x50] sm:$0xff] }
 0x157   : > { %3855 = vrot.lane.b32.xlu1 %v3854_v1, %s4365_s14  ;;  %v5506_v1 = vsel %vm1456_vm5, %v1647_v30, %v7204_v56  ;;  %v3874_v10 = vpack.i.bf16 %v5495_v40, %v2262_v11 }
 0x158   : > { %v5481_v39 = vpop.permute.xlu0 %3535 }
 0x159   : > { %7369 = vst [vmem:[#allocation43_spill] sm:$0xff] %v5481_v39  ;;  %v5484_v55 = vpop.permute.xlu1 %3575 }
 0x15a   : > { %7370 = vst [vmem:[#allocation44_spill] sm:$0xff] %v5484_v55  ;;  %3830 = vrot.lane.b32.xlu0 %v3829_v60, %s4374_s15  ;;  %v888_v60 = vmul.f32 %v5215_v63, %v796_v59  ;;  %v7373_v55 = vrot.slane %v5239_v49, 6  ;;  %v7214_v63 = vrot.slane %v5269_v21, 1  ;;  %v5529_v59 = vmul.f32 %v5167_v42, %v797_v29 }
 0x15b   : > { %3865 = vrot.lane.b32.xlu1 %v3864_v50, %s4367_s21  ;;  %v7372_v50 = vrot.slane %v5078_v41, 3 }
 0x15c   : > { %v5499_v35 = vpop.permute.xlu0 %3545 }
 0x15d   : > { %7371 = vst [vmem:[#allocation45_spill] sm:$0xff] %v5499_v35  ;;  %v5511_v24 = vpop.permute.xlu1 %3580  ;;  %v5520_v56 = vsel %vm1219_vm3, %v7372_v50, %v7208_v48  ;;  %v5525_v35 = vsel %vm1456_vm5, %v7373_v55, %v1647_v30  ;;  %v5538_v50 = vsel %vm7277_vm6, %v4817_v22, %v1768_v14  ;;  %v2162_v55 = vsel %vm7277_vm6, %v1768_v14, %v2161_v2 }
 0x15e   : > { %3840 = vrot.lane.b32.xlu0 %v3839_v33, %s4375_s13  ;;  %v3849_v39 = vpack.i.bf16 %v5506_v1, %v5525_v35  ;;  %7375 = vst [vmem:[#allocation47_spill] sm:$0xff] %v5538_v50  ;;  %v2104_v30 = vrot.slane %v5319_v37, 1  ;;  %v1021_v48 = vrot.slane %v888_v60, 5  ;;  %v3884_v42 = vpack.i.bf16 %v5520_v56, %v5313_v47 }
 0x15f   : > { %3875 = vrot.lane.b32.xlu1 %v3874_v10, %s4369_s23  ;;  %v759_v10 = vld [vmem:[%s4895_s20 + $0x30] sm:$0xff]  ;;  %v3859_v47 = vpack.i.bf16 %v2162_v55, %v5538_v50  ;;  %v2164_v14 = vsel %vm7277_vm6, %v2161_v2, %v2163_v61  ;;  %v7381_v55 = vrot.slane %v5083_v43, 7 }
 0x160   : > { %v5532_v33 = vpop.permute.xlu0 %3560  ;;  %v772_v45 = vmul.f32 %v5441_v28, %v759_v10  ;;  %v3869_v10 = vpack.i.bf16 %v2262_v11, %v5033_v51  ;;  %v762_v11 = vld [vmem:[%s4895_s20 + $0x48] sm:$0xff] }
 0x161   : > { %7374 = vst [vmem:[#allocation46_spill] sm:$0xff] %v5532_v33  ;;  %v5544_v29 = vpop.permute.xlu1 %3590  ;;  %v2107_v33 = vsel %vm962_vm0, %v2104_v30, %v7214_v63  ;;  %v5564_v63 = vsel %vm910_vm1, %v7379_v26, %v1021_v48 }
 0x162   : > { %7376 = vst [vmem:[#allocation48_spill] sm:$0xff] %v5544_v29  ;;  %3850 = vrot.lane.b32.xlu0 %v3849_v39, %s4375_s13  ;;  %v7378_v39 = vrot.slane %v5239_v49, 1  ;;  %v2433_v2 = vrot.slane %v5564_v63, 3 }
 0x163   : > { %3885 = vrot.lane.b32.xlu1 %v3884_v42, %s4371_s26 }
 0x164   : > { %v5555_v60 = vpop.permute.xlu0 %3570  ;;  %v2105_v29 = vsel %vm962_vm0, %v7378_v39, %v2104_v30  ;;  %v7382_v30 = vrot.slane %v5529_v59, 5 }
 0x165   : > { %7377 = vst [vmem:[#allocation49_spill] sm:$0xff] %v5555_v60  ;;  %v5567_v0 = vpop.permute.xlu1 %3600  ;;  %v3894_v42 = vpack.i.bf16 %v2107_v33, %v2105_v29  ;;  %v2166_v60 = vsel %vm7277_vm6, %v2163_v61, %v7381_v55  ;;  %v760_v33 = vld [vmem:[%s4895_s20 + $0x38] sm:$0xff]  ;;  %v785_v29 = vadd.f32 %v5470_v8, %v772_v45 }
 0x166   : > { %7380 = vst [vmem:[#allocation50_spill] sm:$0xff] %v5567_v0  ;;  %3860 = vrot.lane.b32.xlu0 %v3859_v47, %s4366_s16  ;;  %v5577_v9 = vsel %vm910_vm1, %v1021_v48, %v7382_v30  ;;  %v3904_v61 = vpack.i.bf16 %v2166_v60, %v2164_v14  ;;  %v2265_v48 = vrot.slane %v5564_v63, 1  ;;  %v761_v30 = vld [vmem:[%s4895_s20 + $0x40] sm:$0xff]  ;;  %v7386_v0 = vrot.slane %v5083_v43, 3 }
 0x167   : > { %3895 = vrot.lane.b32.xlu1 %v3894_v42, %s4365_s14  ;;  %v773_v42 = vmul.f32 %v5441_v28, %v760_v33  ;;  %v7388_v60 = vpack.i.bf16 %v5107_v27, %v5102_v6  ;;  %v3914_v33 = vpack.i.bf16 %v5083_v43, %v5078_v41  ;;  %v775_v27 = vmul.f32 %v5441_v28, %v762_v11 }
 0x168   : > { %v5580_v26 = vpop.permute.xlu0 %3585  ;;  %v2434_v45 = vsel %vm1219_vm3, %v7386_v0, %v2433_v2  ;;  %v7390_v0 = vrot.slane %v5577_v9, 1 }
 0x169   : > { %7383 = vst [vmem:[#allocation51_spill] sm:$0xff] %v5580_v26  ;;  %v5586_v47 = vpop.permute.xlu1 %3615  ;;  %v786_v6 = vadd.f32 %v5470_v8, %v773_v42 }
 0x16a   : > { %7384 = vst [vmem:[#allocation52_spill] sm:$0xff] %v5586_v47  ;;  %3870 = vrot.lane.b32.xlu0 %v3869_v10, %s4368_s22  ;;  %v798_v10 = vmax.f32 %v785_v29, 0.0  ;;  %v5617_v50 = vsel %vm962_vm0, %v2265_v48, %v7390_v0  ;;  %v2534_v29 = vrot.slane %v5083_v43, 4  ;;  %v7392_v47 = vrot.slane %v5564_v63, 4 }
 0x16b   : > { %3905 = vrot.lane.b32.xlu1 %v3904_v61, %s4366_s16  ;;  %v7389_v61 = vrot.slane %v5083_v43, 1  ;;  %v788_v0 = vadd.f32 %v5470_v8, %v775_v27  ;;  %v7399_v27 = vrot.slane %v5078_v41, 5 }
 0x16c   : > { %v5593_v55 = vpop.permute.xlu0 %3595 }
 0x16d   : > { %7385 = vst [vmem:[#allocation53_spill] sm:$0xff] %v5593_v55  ;;  %v5601_v14 = vpop.permute.xlu1 %3625  ;;  %v5612_v39 = vsel %vm962_vm0, %v7389_v61, %v2265_v48  ;;  %v3889_v61 = vpack.i.bf16 %v2434_v45, %v5520_v56  ;;  %v2537_v48 = vsel %vm1284_vm4, %v2534_v29, %v7392_v47  ;;  %v801_v22 = vmax.f32 %v788_v0, 0.0 }
 0x16e   : > { %7387 = vst [vmem:[#allocation54_spill] sm:$0xff] %v5601_v14  ;;  %3880 = vrot.lane.b32.xlu0 %v7388_v60, %s4370_s24  ;;  %v774_v60 = vmul.f32 %v5441_v28, %v761_v30  ;;  %v890_v14 = vmul.f32 %v5251_v25, %v798_v10  ;;  %v3924_v42 = vpack.i.bf16 %v5617_v50, %v5612_v39  ;;  %v7394_v30 = vrot.slane %v5078_v41, 4 }
 0x16f   : > { %3915 = vrot.lane.b32.xlu1 %v3914_v33, %s4367_s21  ;;  %v7395_v33 = vrot.slane %v5577_v9, 3  ;;  %v2599_v25 = vrot.slane %v5083_v43, 5  ;;  %v799_v10 = vmax.f32 %v786_v6, 0.0 }
 0x170   : > { %v5625_v55 = vpop.permute.xlu0 %3605  ;;  %v2535_v56 = vsel %vm1284_vm4, %v7394_v30, %v2534_v29  ;;  %v7397_v29 = vrot.slane %v5564_v63, 5 }
 0x171   : > { %7391 = vst [vmem:[#allocation55_spill] sm:$0xff] %v5625_v55  ;;  %v5633_v26 = vpop.permute.xlu1 %3635  ;;  %v5645_v47 = vsel %vm1219_vm3, %v2433_v2, %v7395_v33  ;;  %v2108_v2 = vrot.slane %v5277_v58, 1  ;;  %v1025_v33 = vrot.slane %v890_v14, 5  ;;  %v891_v14 = vmul.f32 %v5201_v20, %v799_v10 }
 0x172   : > { %7393 = vst [vmem:[#allocation56_spill] sm:$0xff] %v5633_v26  ;;  %3890 = vrot.lane.b32.xlu0 %v3889_v61, %s4372_s25  ;;  %v787_v61 = vadd.f32 %v5470_v8, %v774_v60  ;;  %v3899_v26 = vpack.i.bf16 %v2537_v48, %v2535_v56  ;;  %v2602_v30 = vsel %vm910_vm1, %v2599_v25, %v7397_v29  ;;  %v2167_v56 = vrot.slane %v5564_v63, 7 }
 0x173   : > { %3925 = vrot.lane.b32.xlu1 %v3924_v42, %s4369_s23  ;;  %v3934_v6 = vpack.i.bf16 %v5645_v47, %v2434_v45  ;;  %v2600_v60 = vsel %vm910_vm1, %v7399_v27, %v2599_v25  ;;  %v7400_v42 = vrot.slane %v5262_v53, 1  ;;  %v7401_v45 = vrot.slane %v5269_v21, 1 }
 0x174   : > { %v5651_v11 = vpop.permute.xlu0 %3610  ;;  %v800_v32 = vmax.f32 %v787_v61, 0.0  ;;  %v3909_v41 = vpack.i.bf16 %v2602_v30, %v2600_v60  ;;  %v2369_v27 = vrot.slane %v5564_v63, 2  ;;  %v7402_v29 = vrot.slane %v5529_v59, 5 }
 0x175   : > { %7396 = vst [vmem:[#allocation57_spill] sm:$0xff] %v5651_v11  ;;  %v5657_v55 = vpop.permute.xlu1 %3640  ;;  %v2111_v48 = vsel %vm962_vm0, %v2108_v2, %v7400_v42  ;;  %v2109_v25 = vsel %vm962_vm0, %v7401_v45, %v2108_v2  ;;  %v7230_v42 = vrot.slane %v5577_v9, 2  ;;  %v776_v61 = vmul.f32 %v5441_v28, %v763_v23 }
 0x176   : > { %7398 = vst [vmem:[#allocation58_spill] sm:$0xff] %v5657_v55  ;;  %3900 = vrot.lane.b32.xlu0 %v3899_v26, %s4373_s12  ;;  %v5682_v20 = vsel %vm910_vm1, %v7402_v29, %v1025_v33  ;;  %v3944_v10 = vpack.i.bf16 %v2111_v48, %v2109_v25  ;;  %v7404_v30 = vrot.slane %v5083_v43, 7  ;;  %v1027_v45 = vrot.slane %v891_v14, 5 }
 0x177   : > { %3935 = vrot.lane.b32.xlu1 %v3934_v6, %s4371_s26  ;;  %v7405_v6 = vrot.slane %v5577_v9, 7  ;;  %v5695_v59 = vmul.f32 %v5242_v15, %v801_v22  ;;  %v892_v29 = vmul.f32 %v5286_v4, %v800_v32  ;;  %v3919_v23 = vpack.i.bf16 %v5612_v39, %v5495_v40 }
 0x178   : > { %v5672_v26 = vpop.permute.xlu0 %3620  ;;  %v2168_v2 = vsel %vm7277_vm6, %v7404_v30, %v2167_v56  ;;  %v7407_v48 = vrot.slane %v5083_v43, 2  ;;  %v7231_v22 = vrot.slane %v5682_v20, 3  ;;  %v789_v32 = vadd.f32 %v5470_v8, %v776_v61 }
 0x179   : > { %v5684_v0 = vpop.permute.xlu1 %3650  ;;  %v2170_v60 = vsel %vm7277_vm6, %v2167_v56, %v7405_v6  ;;  %v2372_v56 = vsel %vm1112_vm2, %v2369_v27, %v7230_v42  ;;  %v2114_v14 = vrot.slane %v4803_v5, 1  ;;  %v5716_v40 = vsel %vm910_vm1, %v1025_v33, %v1027_v45  ;;  %v764_v33 = vld [vmem:[%s4895_s20 + $0x58] sm:$0xff] }
 0x17a   : > { %7403 = vst [vmem:[#allocation59_spill] sm:$0xff] %v5684_v0  ;;  %3910 = vrot.lane.b32.xlu0 %v3909_v41, %s4374_s15  ;;  %v2370_v25 = vsel %vm1112_vm2, %v7407_v48, %v2369_v27  ;;  %v3954_v4 = vpack.i.bf16 %v2170_v60, %v2168_v2  ;;  %v1031_v43 = vrot.slane %v5695_v59, 5  ;;  %v1029_v39 = vrot.slane %v892_v29, 5 }
 0x17b   : > { %3945 = vrot.lane.b32.xlu1 %v3944_v10, %s4365_s14  ;;  %v3929_v10 = vpack.i.bf16 %v2372_v56, %v2370_v25  ;;  %v2112_v30 = vrot.slane %v5366_v3, 1  ;;  %v7409_v2 = vrot.slane %v5577_v9, 3  ;;  %v3964_v60 = vpack.i.bf16 %v5577_v9, %v5564_v63 }
 0x17c   : > { %v5699_v41 = vpop.permute.xlu0 %3630  ;;  %v2538_v59 = vrot.slane %v5577_v9, 4  ;;  %v2269_v25 = vrot.slane %v5682_v20, 1 }
 0x17d   : > { %7406 = vst [vmem:[#allocation60_spill] sm:$0xff] %v5699_v41  ;;  %v5710_v15 = vpop.permute.xlu1 %3665  ;;  %v5728_v61 = vsel %vm1219_vm3, %v7409_v2, %v7231_v22  ;;  %v2115_v29 = vsel %vm962_vm0, %v2112_v30, %v2114_v14  ;;  %v802_v2 = vmax.f32 %v789_v32, 0.0  ;;  %v7415_v32 = vrot.slane %v5564_v63, 4 }
 0x17e   : > { %3920 = vrot.lane.b32.xlu0 %v3919_v23, %s4368_s22  ;;  %v7411_v23 = vrot.slane %v4808_v19, 1  ;;  %v3939_v22 = vpack.i.bf16 %v5728_v61, %v5645_v47  ;;  %v7416_v47 = vrot.slane %v5577_v9, 1  ;;  %v7417_v41 = vrot.slane %v5716_v40, 1 }
 0x17f   : > { %3955 = vrot.lane.b32.xlu1 %v3954_v4, %s4366_s16  ;;  %v5744_v4 = vsel %vm910_vm1, %v1027_v45, %v1029_v39 }
 0x180   : > { %v5720_v27 = vpop.permute.xlu0 %3645  ;;  %v2117_v48 = vsel %vm962_vm0, %v2114_v14, %v7411_v23  ;;  %v7413_v14 = vrot.slane %v5682_v20, 4  ;;  %v2175_v56 = vrot.slane %v5744_v4, 7 }
 0x181   : > { %7408 = vst [vmem:[#allocation61_spill] sm:$0xff] %v5720_v27  ;;  %v5731_v6 = vpop.permute.xlu1 %3675 }
 0x182   : > { %7410 = vst [vmem:[#allocation62_spill] sm:$0xff] %v5731_v6  ;;  %3930 = vrot.lane.b32.xlu0 %v3929_v10, %s4370_s24  ;;  %v5747_v10 = vsel %vm910_vm1, %v1029_v39, %v1031_v43  ;;  %v2541_v23 = vsel %vm1284_vm4, %v2538_v59, %v7413_v14  ;;  %v3974_v39 = vpack.i.bf16 %v2117_v48, %v2115_v29 }
 0x183   : > { %3965 = vrot.lane.b32.xlu1 %v3964_v60, %s4367_s21  ;;  %v2539_v60 = vsel %vm1284_vm4, %v7415_v32, %v2538_v59  ;;  %v2270_v6 = vsel %vm962_vm0, %v7416_v47, %v2269_v25  ;;  %v5772_v14 = vsel %vm962_vm0, %v2269_v25, %v7417_v41  ;;  %v777_v29 = vmul.f32 %v5441_v28, %v764_v33 }
 0x184   : > { %v5750_v42 = vpop.permute.xlu0 %3655  ;;  %v894_v48 = vmul.f32 %v5321_v54, %v802_v2  ;;  %v3949_v32 = vpack.i.bf16 %v2541_v23, %v2539_v60  ;;  %v7418_v47 = vrot.slane %v5682_v20, 5  ;;  %v2171_v41 = vrot.slane %v5682_v20, 7 }
 0x185   : > { %7412 = vst [vmem:[#allocation63_spill] sm:$0xff] %v5750_v42  ;;  %v5759_v45 = vpop.permute.xlu1 %3685  ;;  %v2603_v42 = vrot.slane %v5577_v9, 5  ;;  %v7419_v33 = vrot.slane %v5564_v63, 5  ;;  %v7420_v2 = vrot.slane %v5747_v10, 7 }
 0x186   : > { %7414 = vst [vmem:[#allocation64_spill] sm:$0xff] %v5759_v45  ;;  %3940 = vrot.lane.b32.xlu0 %v3939_v22, %s4372_s25  ;;  %v3984_v22 = vpack.i.bf16 %v5772_v14, %v2270_v6  ;;  %v1033_v60 = vrot.slane %v894_v48, 5  ;;  %v765_v48 = vld [vmem:[%s4895_s20 + $0x60] sm:$0xf] }
 0x187   : > { %3975 = vrot.lane.b32.xlu1 %v3974_v39, %s4365_s14  ;;  %v2606_v45 = vsel %vm910_vm1, %v2603_v42, %v7418_v47  ;;  %v2604_v54 = vsel %vm910_vm1, %v7419_v33, %v2603_v42  ;;  %v2178_v23 = vsel %vm7277_vm6, %v2175_v56, %v7420_v2  ;;  %v790_v39 = vadd.f32 %v5470_v8, %v777_v29 }
 0x188   : > { %v5779_v59 = vpop.permute.xlu0 %3660  ;;  %v3959_v0 = vpack.i.bf16 %v2606_v45, %v2604_v54  ;;  %v7239_v33 = vrot.slane %v5716_v40, 3  ;;  %v5807_v29 = vsel %vm910_vm1, %v1031_v43, %v1033_v60  ;;  %v3969_v45 = vpack.i.bf16 %v2270_v6, %v5617_v50 }
 0x189   : > { %v5785_v25 = vpop.permute.xlu1 %3695  ;;  %v803_v2 = vmax.f32 %v790_v39, 0.0  ;;  %v7427_v43 = vrot.slane %v5682_v20, 3  ;;  %v2173_v50 = vrot.slane %v5716_v40, 7 }
 0x18a   : > { %3950 = vrot.lane.b32.xlu0 %v3949_v32, %s4373_s12  ;;  %v7422_v32 = vrot.slane %v5577_v9, 7 }
 0x18b   : > { %3985 = vrot.lane.b32.xlu1 %v3984_v22, %s4369_s23  ;;  %v5827_v39 = vsel %vm1219_vm3, %v7427_v43, %v7239_v33  ;;  %v2275_v43 = vrot.slane %v5747_v10, 1  ;;  %v2373_v33 = vrot.slane %v5682_v20, 2 }
 0x18c   : > { %v5797_v47 = vpop.permute.xlu0 %3670  ;;  %v2172_v27 = vsel %vm7277_vm6, %v7422_v32, %v2171_v41  ;;  %v5832_v32 = vmul.f32 %v5279_v16, %v803_v2  ;;  %v4014_v16 = vpack.i.bf16 %v5827_v39, %v5728_v61  ;;  %v7431_v2 = vrot.slane %v5807_v29, 1 }
 0x18d   : > { %7421 = vst [vmem:[#allocation65_spill] sm:$0xff] %v5797_v47  ;;  %v5802_v63 = vpop.permute.xlu1 %3705  ;;  %v3994_v42 = vpack.i.bf16 %v2172_v27, %v2178_v23  ;;  %v7426_v27 = vrot.slane %v5262_v53, 1 }
 0x18e   : > { %7423 = vst [vmem:[#allocation66_spill] sm:$0xff] %v5802_v63  ;;  %3960 = vrot.lane.b32.xlu0 %v3959_v0, %s4374_s15  ;;  %v4004_v0 = vpack.i.bf16 %v5744_v4, %v5716_v40 }
 0x18f   : > { %3995 = vrot.lane.b32.xlu1 %v3994_v42, %s4366_s16  ;;  %v2113_v23 = vsel %vm962_vm0, %v7426_v27, %v2112_v30  ;;  %v778_v42 = vmul.f32 %v5441_v28, %v765_v48  ;;  %v2176_v27 = vsel %vm7277_vm6, %v2173_v50, %v2175_v56  ;;  %v2174_v28 = vsel %vm7277_vm6, %v2171_v41, %v2173_v50 }
 0x190   : > { %v5810_v22 = vpop.permute.xlu0 %3680  ;;  %v2278_v48 = vsel %vm962_vm0, %v2275_v43, %v7431_v2  ;;  %v1035_v56 = vrot.slane %v5832_v32, 5  ;;  %v2273_v41 = vrot.slane %v5744_v4, 1 }
 0x191   : > { %7424 = vst [vmem:[#allocation67_spill] sm:$0xff] %v5810_v22  ;;  %v5814_v54 = vpop.permute.xlu1 %3715  ;;  %v2375_v22 = vrot.slane %v5716_v40, 2  ;;  %v4024_v32 = vpack.i.bf16 %v5772_v14, %v2278_v48 }
 0x192   : > { %7425 = vst [vmem:[#allocation68_spill] sm:$0xff] %v5814_v54  ;;  %3970 = vrot.lane.b32.xlu0 %v3969_v45, %s4368_s22  ;;  %v7428_v45 = vld [vmem:[#allocation30_spill] sm:$0xff] }
 0x193   : > { %v3979_v54 = vpack.i.bf16 %v2113_v23, %v7428_v45  ;;  %4005 = vrot.lane.b32.xlu1 %v4004_v0, %s4367_s21  ;;  %v791_v0 = vadd.f32 %v5470_v8, %v778_v42  ;;  %v3989_v45 = vpack.i.bf16 %v2176_v27, %v2174_v28  ;;  %v2376_v61 = vsel %vm1112_vm2, %v2373_v33, %v2375_v22 }
 0x194   : > { %v5837_v30 = vpop.permute.xlu0 %3690  ;;  %v7242_v8 = vrot.slane %v5744_v4, 4  ;;  %v5868_v42 = vsel %vm910_vm1, %v1033_v60, %v1035_v56  ;;  %v2542_v28 = vrot.slane %v5716_v40, 4 }
 0x195   : > { %7429 = vst [vmem:[#allocation30_spill] sm:$0xff] %v5837_v30  ;;  %v5843_v6 = vpop.permute.xlu1 %3725  ;;  %v804_v27 = vmax.f32 %v791_v0, 0.0  ;;  %v2381_v0 = vrot.slane %v5807_v29, 2 }
 0x196   : > { %7430 = vst [vmem:[#allocation69_spill] sm:$0xff] %v5843_v6  ;;  %3980 = vrot.lane.b32.xlu0 %v3979_v54, %s4365_s14  ;;  %v7433_v54 = vrot.slane %v5577_v9, 2  ;;  %v2545_v60 = vsel %vm1284_vm4, %v2542_v28, %v7242_v8  ;;  %v2377_v8 = vrot.slane %v5744_v4, 2 }
 0x197   : > { %4015 = vrot.lane.b32.xlu1 %v4014_v16, %s4371_s26 }
 0x198   : > { %v5855_v23 = vpop.permute.xlu0 %3700  ;;  %v2374_v63 = vsel %vm1112_vm2, %v7433_v54, %v2373_v33  ;;  %v2276_v33 = vsel %vm962_vm0, %v2273_v41, %v2275_v43  ;;  %v896_v54 = vmul.f32 %v5368_v44, %v804_v27  ;;  %v4009_v43 = vpack.i.bf16 %v5682_v20, %v5747_v10 }
 0x199   : > { %7432 = vst [vmem:[#allocation70_spill] sm:$0xff] %v5855_v23  ;;  %v5862_v50 = vpop.permute.xlu1 %3735  ;;  %v3999_v16 = vpack.i.bf16 %v2376_v61, %v2374_v63  ;;  %v4034_v14 = vpack.i.bf16 %v2278_v48, %v2276_v33  ;;  %v7438_v61 = vrot.slane %v5682_v20, 4 }
 0x19a   : > { %7434 = vst [vmem:[#allocation71_spill] sm:$0xff] %v5862_v50  ;;  %3990 = vrot.lane.b32.xlu0 %v3989_v45, %s4366_s16  ;;  %v2441_v45 = vrot.slane %v5744_v4, 3  ;;  %v7444_v50 = vrot.slane %v5807_v29, 1 }
 0x19b   : > { %4025 = vrot.lane.b32.xlu1 %v4024_v32, %s4368_s22  ;;  %v2543_v48 = vsel %vm1284_vm4, %v7438_v61, %v2542_v28  ;;  %v7439_v32 = vrot.slane %v5716_v40, 1  ;;  %v1037_v28 = vrot.slane %v896_v54, 5 }
 0x19c   : > { %v5871_v9 = vpop.permute.xlu0 %3710  ;;  %v4044_v27 = vpack.i.bf16 %v2545_v60, %v2543_v48  ;;  %v2443_v60 = vrot.slane %v5747_v10, 3 }
 0x19d   : > { %7435 = vst [vmem:[#allocation72_spill] sm:$0xff] %v5871_v9  ;;  %v5875_v2 = vpop.permute.xlu1 %3745  ;;  %v7442_v9 = vrot.slane %v5716_v40, 3 }
 0x19e   : > { %7436 = vst [vmem:[#allocation73_spill] sm:$0xff] %v5875_v2  ;;  %4000 = vrot.lane.b32.xlu0 %v3999_v16, %s4370_s24  ;;  %v2274_v16 = vsel %vm962_vm0, %v7439_v32, %v2273_v41  ;;  %v2445_v2 = vrot.slane %v5807_v29, 3  ;;  %v2378_v32 = vsel %vm1112_vm2, %v2375_v22, %v2377_v8  ;;  %v2444_v47 = vsel %vm1219_vm3, %v2441_v45, %v2443_v60 }
 0x19f   : > { %4035 = vrot.lane.b32.xlu1 %v4034_v14, %s4369_s23  ;;  %v7441_v14 = vrot.slane %v5868_v42, 2  ;;  %v4019_v41 = vpack.i.bf16 %v2276_v33, %v2274_v16  ;;  %v2447_v33 = vrot.slane %v5868_v42, 3 }
 0x1a0   : > { %v5885_v63 = vpop.permute.xlu0 %3720 }
 0x1a1   : > { %7437 = vst [vmem:[#allocation74_spill] sm:$0xff] %v5885_v63  ;;  %v5897_v44 = vpop.permute.xlu1 %3755  ;;  %v2384_v63 = vsel %vm1112_vm2, %v2381_v0, %v7441_v14  ;;  %v1038_v14 = vsel %vm910_vm1, %v1035_v56, %v1037_v28  ;;  %v7252_v28 = vrot.slane %v5744_v4, 5 }
 0x1a2   : > { %7440 = vst [vmem:[#allocation75_spill] sm:$0xff] %v5897_v44  ;;  %4010 = vrot.lane.b32.xlu0 %v4009_v43, %s4367_s21  ;;  %v2442_v44 = vsel %vm1219_vm3, %v7442_v9, %v2441_v45  ;;  %v5913_v43 = vrot.slane %v5868_v42, 1  ;;  %v4054_v54 = vpack.i.bf16 %v2378_v32, %v2384_v63 }
 0x1a3   : > { %4045 = vrot.lane.b32.xlu1 %v4044_v27, %s4373_s12  ;;  %v2446_v27 = vsel %vm1219_vm3, %v2443_v60, %v2445_v2  ;;  %v4029_v9 = vpack.i.bf16 %v2442_v44, %v5827_v39  ;;  %v5938_v39 = vsel %vm962_vm0, %v1038_v14, 0.0  ;;  %v2607_v14 = vrot.slane %v5716_v40, 5 }
 0x1a4   : > { %v5905_v61 = vpop.permute.xlu0 %3730  ;;  %v4064_v32 = vpack.i.bf16 %v2446_v27, %v2444_v47  ;;  %v4084_v40 = vpack.i.bf16 %v5017_v46, %v5033_v51  ;;  %v2611_v51 = vrot.slane %v5747_v10, 5 }
 0x1a5   : > { %v5915_v48 = vpop.permute.xlu1 %3765 }
 0x1a6   : > { %4020 = vrot.lane.b32.xlu0 %v4019_v41, %s4368_s22  ;;  %v5930_v41 = vsel %vm962_vm0, %v7444_v50, %v5913_v43 }
 0x1a7   : > { %4055 = vrot.lane.b32.xlu1 %v4054_v54, %s4370_s24  ;;  %v2448_v54 = vsel %vm1219_vm3, %v2445_v2, %v2447_v33  ;;  %v4039_v45 = vpack.i.bf16 %v2274_v16, %v5930_v41 }
 0x1a8   : > { %v5921_v22 = vpop.permute.xlu0 %3740  ;;  %v4074_v2 = vpack.i.bf16 %v2448_v54, %v2446_v27 }
 0x1a9   : > { %7443 = vst [vmem:[#allocation76_spill] sm:$0xff] %v5921_v22  ;;  %v5932_v63 = vpop.permute.xlu1 %3775  ;;  %v2379_v22 = vrot.slane %v5747_v10, 2 }
 0x1aa   : > { %7445 = vst [vmem:[#allocation77_spill] sm:$0xff] %v5932_v63  ;;  %4030 = vrot.lane.b32.xlu0 %v4029_v9, %s4372_s25  ;;  %v7254_v63 = vrot.slane %v5938_v39, 4 }
 0x1ab   : > { %4065 = vrot.lane.b32.xlu1 %v4064_v32, %s4371_s26  ;;  %v2382_v50 = vsel %vm1112_vm2, %v2379_v22, %v2381_v0  ;;  %v2380_v9 = vsel %vm1112_vm2, %v2377_v8, %v2379_v22  ;;  %v2610_v0 = vsel %vm910_vm1, %v2607_v14, %v7252_v28  ;;  %v7450_v8 = vrot.slane %v5682_v20, 5 }
 0x1ac   : > { %v5941_v56 = vpop.permute.xlu0 %3750  ;;  %v4049_v16 = vpack.i.bf16 %v2382_v50, %v2380_v9  ;;  %v2615_v9 = vrot.slane %v5868_v42, 5  ;;  %v5981_v20 = vrot.slane %v5938_v39, 3 }
 0x1ad   : > { %7446 = vst [vmem:[#allocation78_spill] sm:$0xff] %v5941_v56  ;;  %v5946_v60 = vpop.permute.xlu1 %3785  ;;  %v2608_v22 = vsel %vm910_vm1, %v7450_v8, %v2607_v14  ;;  %v7452_v56 = vrot.slane %v5744_v4, 4 }
 0x1ae   : > { %7447 = vst [vmem:[#allocation79_spill] sm:$0xff] %v5946_v60  ;;  %4040 = vrot.lane.b32.xlu0 %v4039_v45, %s4369_s23  ;;  %v2546_v60 = vrot.slane %v5747_v10, 4  ;;  %v2550_v45 = vrot.slane %v5868_v42, 4 }
 0x1af   : > { %4075 = vrot.lane.b32.xlu1 %v4074_v2, %s4372_s25  ;;  %v2613_v2 = vrot.slane %v5807_v29, 5 }
 0x1b0   : > { %v5953_v32 = vpop.permute.xlu0 %3760  ;;  %v2553_v50 = vsel %vm1284_vm4, %v2550_v45, %v7254_v63  ;;  %v2547_v46 = vsel %vm1284_vm4, %v7452_v56, %v2546_v60  ;;  %v2450_v56 = vsel %vm1219_vm3, %v2447_v33, %v5981_v20  ;;  %v2179_v33 = vrot.slane %v5807_v29, 7 }
 0x1b1   : > { %7448 = vst [vmem:[#allocation80_spill] sm:$0xff] %v5953_v32  ;;  %v5960_v27 = vpop.permute.xlu1 %3795  ;;  %v4094_v8 = vpack.i.bf16 %v2547_v46, %v2553_v50  ;;  %v2614_v63 = vsel %vm910_vm1, %v2611_v51, %v2613_v2  ;;  %v2321_v50 = vrot.slane %v5938_v39, 1  ;;  %v4079_v46 = vpack.i.bf16 %v2444_v47, %v2450_v56 }
 0x1b2   : > { %7449 = vst [vmem:[#allocation81_spill] sm:$0xff] %v5960_v27  ;;  %4050 = vrot.lane.b32.xlu0 %v4049_v16, %s4370_s24  ;;  %v4059_v16 = vpack.i.bf16 %v2610_v0, %v2608_v22  ;;  %v4069_v22 = vpack.i.bf16 %v2442_v44, %v2448_v54  ;;  %v2181_v54 = vrot.slane %v5868_v42, 7 }
 0x1b3   : > { %4085 = vrot.lane.b32.xlu1 %v4084_v40, %s4365_s14  ;;  %v2616_v40 = vsel %vm910_vm1, %v2613_v2, %v2615_v9  ;;  %s4376_s14 = smov 48  }
 0x1b4   : > { %v5974_v28 = vpop.permute.xlu0 %3770 }
 0x1b5   : > { %7451 = vst [vmem:[#allocation82_spill] sm:$0xff] %v5974_v28  ;;  %v5983_v14 = vpop.permute.xlu1 %3805  ;;  %v2548_v28 = vrot.slane %v5807_v29, 4 }
 0x1b6   : > { %4060 = vrot.lane.b32.xlu0 %v4059_v16, %s4374_s15  ;;  %v4104_v16 = vpack.i.bf16 %v2616_v40, %v2614_v63  ;;  %v4114_v63 = vpack.i.bf16 %v5868_v42, %v5807_v29  ;;  %v2322_v40 = vsel %vm962_vm0, %v5913_v43, %v2321_v50 }
 0x1b7   : > { %4095 = vrot.lane.b32.xlu1 %v4094_v8, %s4373_s12  ;;  %v2549_v8 = vsel %vm1284_vm4, %v2546_v60, %v2548_v28  ;;  %v2551_v44 = vsel %vm1284_vm4, %v2548_v28, %v2550_v45  ;;  %v7457_v28 = vrot.slane %v5747_v10, 7  ;;  %v4124_v29 = vpack.i.bf16 %v2321_v50, %v2322_v40 }
 0x1b8   : > { %v5989_v0 = vpop.permute.xlu0 %3780  ;;  %v4089_v60 = vpack.i.bf16 %v2551_v44, %v2549_v8  ;;  %v7460_v50 = vrot.slane %v5938_v39, 4 }
 0x1b9   : > { %7453 = vst [vmem:[#allocation83_spill] sm:$0xff] %v5989_v0  ;;  %v5994_v23 = vpop.permute.xlu1 %3815  ;;  %v2180_v45 = vsel %vm7277_vm6, %v7457_v28, %v2179_v33 }
 0x1ba   : > { %7454 = vst [vmem:[#allocation84_spill] sm:$0xff] %v5994_v23  ;;  %4070 = vrot.lane.b32.xlu0 %v4069_v22, %s4371_s26  ;;  %v2182_v22 = vsel %vm7277_vm6, %v2179_v33, %v2181_v54  ;;  %v4134_v33 = vpack.i.bf16 %v5981_v20, %v2450_v56  ;;  %v7459_v54 = vrot.slane %v5744_v4, 5 }
 0x1bb   : > { %4105 = vrot.lane.b32.xlu1 %v4104_v16, %s4374_s15  ;;  %v2617_v16 = vrot.slane %v5938_v39, 5  ;;  %v4099_v8 = vpack.i.bf16 %v2182_v22, %v2180_v45 }
 0x1bc   : > { %v5999_v2 = vpop.permute.xlu0 %3790 }
 0x1bd   : > { %7455 = vst [vmem:[#allocation85_spill] sm:$0xff] %v5999_v2  ;;  %v6005_v0 = vpop.permute.xlu1 %3825  ;;  %v2618_v10 = vsel %vm910_vm1, %v2615_v9, %v2617_v16  ;;  %v2385_v9 = vrot.slane %v5938_v39, 2  ;;  %v4154_v39 = vpack.i.bf16 %v5330_v31, %v5232_v18  ;;  %v4314_v18 = vld [vmem:[%s7137_s6] sm:$0xff]  }
 0x1be   : > { %7456 = vst [vmem:[#allocation86_spill] sm:$0xff] %v6005_v0  ;;  %4080 = vrot.lane.b32.xlu0 %v4079_v46, %s4372_s25  ;;  %v7458_v0 = vmov 0.0   ;;  %3363 = vmatpush3.bf16.msra.mxu0 %v4314_v18 }
 0x1bf   : > { %4115 = vrot.lane.b32.xlu1 %v4114_v63, %s4367_s21  ;;  %v2554_v2 = vrot.slane %v7458_v0, 4  ;;  %s4377_s21 = smov 56   ;;  %3411 = vmatpush3.bf16.msra.mxu1 %v4314_v18 }
 0x1c0   : > { %v6013_v47 = vpop.permute.xlu0 %3800  ;;  %3364 = vmatprep.subr.bf16.mxu0 %v7458_v0  ;;  %3405 = vmatprep.subr.bf16.mxu1 %v7458_v0 }
 0x1c1   : > { %v6020_v46 = vpop.permute.xlu1 %3835  ;;  %v2555_v40 = vsel %vm1284_vm4, %v7460_v50, %v2554_v2  ;;  %vm2055_vm4 = vcmask 424960  }
 0x1c2   : > { %4090 = vrot.lane.b32.xlu0 %v4089_v60, %s4373_s12  ;;  %v2612_v60 = vsel %vm910_vm1, %v7459_v54, %v2611_v51  ;;  %v4144_v56 = vpack.i.bf16 %v2554_v2, %v2555_v40  ;;  %v4119_v51 = vpack.i.bf16 %v5913_v43, %v5930_v41  ;;  %v2619_v43 = vrot.slane %v7458_v0, 5 }
 0x1c3   : > { %4125 = vrot.lane.b32.xlu1 %v4124_v29, %s4369_s23  ;;  %v4109_v45 = vpack.i.bf16 %v2612_v60, %v2618_v10  ;;  %v7463_v29 = vrot.slane %v5868_v42, 2  ;;  %v2490_v10 = vrot.slane %v7458_v0, 3  ;;  %v4164_v60 = vpack.i.bf16 %v4667_v38, %v5059_v12 }
 0x1c4   : > { %v6025_v63 = vpop.permute.xlu0 %3810  ;;  %v1744_v40 = vrot.slane %v5059_v12, 7 }
 0x1c5   : > { %v6028_v44 = vpop.permute.xlu1 %3845  ;;  %v2491_v42 = vsel %vm1219_vm3, %v5981_v20, %v2490_v10  ;;  %v2620_v20 = vsel %vm910_vm1, %v2617_v16, %v2619_v43  ;;  %vm2013_vm1 = vcmask 326656   ;;  %vm7280_vm3 = vmmov 0  }
 0x1c6   : > { %4100 = vrot.lane.b32.xlu0 %v4099_v8, %s4366_s16  ;;  %v2386_v8 = vsel %vm1112_vm2, %v7463_v29, %v2385_v9  ;;  %v4139_v50 = vpack.i.bf16 %v2490_v10, %v2491_v42  ;;  %v4149_v12 = vpack.i.bf16 %v2619_v43, %v2620_v20  ;;  %v3488_v29 = vunpack.i.h.bf16 %v5298_v7  ;;  %v4316_v42 = vld [vmem:[%s7137_s6 + $0x10] sm:$0xff]   ;;  %3376 = vmatprep.mubr.msk.bf16.mxu0 %vm7280_vm3, %v7458_v0 }
 0x1c7   : > { %4135 = vrot.lane.b32.xlu1 %v4134_v33, %s4371_s26  ;;  %v4129_v54 = vpack.i.bf16 %v2385_v9, %v2386_v8  ;;  %v3613_v43 = vunpack.i.h.bf16 %v5651_v11  ;;  %3392 = vmatprep.mubr.msk.bf16.mxu1 %vm7280_vm3, %v7458_v0 }
 0x1c8   : > { %v6039_v28 = vpop.permute.xlu0 %3820 }
 0x1c9   : > { %7461 = vst [vmem:[#allocation87_spill] sm:$0xff] %v6039_v28  ;;  %v6042_v22 = vpop.permute.xlu1 %3855 }
 0x1ca   : > { %4110 = vrot.lane.b32.xlu0 %v4109_v45, %s4374_s15  ;;  %v7260_v45 = vrot.slane %v4667_v38, 7  ;;  %v3857_v18 = vunpack.i.l.bf16 %v6042_v22 }
 0x1cb   : > { %4145 = vrot.lane.b32.xlu1 %v4144_v56, %s4373_s12  ;;  %v1743_v56 = vrot.slane %v4923_v17, 7  ;;  %v3493_v17 = vunpack.i.h.bf16 %v5389_v34 }
 0x1cc   : > { %v6046_v4 = vpop.permute.xlu0 %3830  ;;  %v1747_v10 = vsel %vm7277_vm6, %v1744_v40, %v7260_v45 }
 0x1cd   : > { %7462 = vst [vmem:[#allocation88_spill] sm:$0xff] %v6046_v4  ;;  %v6054_v33 = vpop.permute.xlu1 %3865  ;;  %v1745_v8 = vsel %vm7277_vm6, %v1743_v56, %v1744_v40  ;;  %v2661_v40 = vsel %vm7285_vm7, %v4667_v38, %v3488_v29 }
 0x1ce   : > { %4120 = vrot.lane.b32.xlu0 %v4119_v51, %s4368_s22  ;;  %v4315_v51 = vld [vmem:[%s7137_s6 + $0x8] sm:$0xff]   ;;  %v4159_v20 = vpack.i.bf16 %v1747_v10, %v1745_v8  ;;  %v4169_v8 = vpack.i.bf16 %v4695_v57, %v4667_v38 }
 0x1cf   : > { %4155 = vrot.lane.b32.xlu1 %v4154_v39, %s4376_s14  ;;  %3365 = vmatpush3.bf16.msra.mxu0 %v4315_v51 }
 0x1d0   : > { %v6060_v2 = vpop.permute.xlu0 %3840  ;;  %3412 = vmatpush3.bf16.msra.mxu1 %v4315_v51  ;;  %3366 = vmatprep.subr.bf16.mxu0 %v7458_v0 }
 0x1d1   : > { %v6065_v41 = vpop.permute.xlu1 %3875  ;;  %3406 = vmatprep.subr.bf16.mxu1 %v7458_v0 }
 0x1d2   : > { %4130 = vrot.lane.b32.xlu0 %v4129_v54, %s4370_s24  ;;  %v3583_v54 = vunpack.i.h.bf16 %v5511_v24  ;;  %s4381_s24 = smov 64  }
 0x1d3   : > { %4165 = vrot.lane.b32.xlu1 %v4164_v60, %s4377_s21  ;;  %v3858_v60 = vunpack.i.h.bf16 %v6042_v22  ;;  %3367 = vmatpush3.bf16.msra.mxu0 %v4316_v42  ;;  %v4317_v22 = vld [vmem:[%s7137_s6 + $0x18] sm:$0xff]  }
 0x1d4   : > { %v6074_v31 = vpop.permute.xlu0 %3850  ;;  %3413 = vmatpush3.bf16.msra.mxu1 %v4316_v42  ;;  %3368 = vmatprep.subr.bf16.mxu0 %v7458_v0 }
 0x1d5   : > { %7464 = vst [vmem:[#allocation89_spill] sm:$0xff] %v6074_v31  ;;  %v6079_v9 = vpop.permute.xlu1 %3885  ;;  %3407 = vmatprep.subr.bf16.mxu1 %v7458_v0  ;;  %v2663_v42 = vsel %vm7285_vm7, %v4700_v52, %v3858_v60  ;;  %v4318_v60 = vld [vmem:[%s7137_s6 + $0x20] sm:$0xff]  }
 0x1d6   : > { %4140 = vrot.lane.b32.xlu0 %v4139_v50, %s4372_s25  ;;  %s4378_s25 = smov 52  }
 0x1d7   : > { %3369 = vmatpush3.bf16.msra.mxu0 %v4317_v22 }
 0x1d8   : > { %v3861_v16 = vpop.permute.xlu0 %3860  ;;  %3414 = vmatpush3.bf16.msra.mxu1 %v4317_v22  ;;  %3370 = vmatprep.subr.bf16.mxu0 %v7458_v0 }
 0x1d9   : > { %v6094_v39 = vpop.permute.xlu1 %3895  ;;  %v3863_v56 = vunpack.i.h.bf16 %v3861_v16  ;;  %v3862_v51 = vunpack.i.l.bf16 %v3861_v16  ;;  %v3643_v16 = vunpack.i.h.bf16 %v5657_v55  ;;  %3408 = vmatprep.subr.bf16.mxu1 %v7458_v0 }
 0x1da   : > { %4150 = vrot.lane.b32.xlu0 %v4149_v12, %s4374_s15  ;;  %v2674_v12 = vsel %vm7278_vm8, %v2661_v40, %v3493_v17  ;;  %v3693_v17 = vunpack.i.h.bf16 %v5837_v30 }
 0x1db   : > { %v2687_v29 = vsel %vm7279_vm9, %v2674_v12, %v3583_v54  ;;  %v2676_v12 = vsel %vm7278_vm8, %v2663_v42, %v3863_v56  ;;  %v3763_v56 = vunpack.i.h.bf16 %v5953_v32  ;;  %3371 = vmatpush3.bf16.msra.mxu0 %v4318_v60 }
 0x1dc   : > { %v3871_v50 = vpop.permute.xlu0 %3870  ;;  %v2700_v10 = vsel %vm1929_vm10, %v2687_v29, %v3613_v43  ;;  %v3868_v43 = vunpack.i.h.bf16 %v6054_v33  ;;  %v3867_v29 = vunpack.i.l.bf16 %v6054_v33  ;;  %3415 = vmatpush3.bf16.msra.mxu1 %v4318_v60  ;;  %3372 = vmatprep.subr.bf16.mxu0 %v7458_v0 }
 0x1dd   : > { %v6109_v45 = vpop.permute.xlu1 %3905  ;;  %v3873_v31 = vunpack.i.h.bf16 %v3871_v50  ;;  %v3872_v23 = vunpack.i.l.bf16 %v3871_v50  ;;  %v3728_v50 = vunpack.i.h.bf16 %v5843_v6  ;;  %3409 = vmatprep.subr.bf16.mxu1 %v7458_v0 }
 0x1de   : > { %4160 = vrot.lane.b32.xlu0 %v4159_v20, %s4378_s25  ;;  %v2662_v20 = vsel %vm7285_vm7, %v4695_v57, %v3857_v18  ;;  %v2713_v18 = vsel %vm1943_vm11, %v2700_v10, %v3643_v16  ;;  %v2689_v22 = vsel %vm7279_vm9, %v2676_v12, %v3868_v43  ;;  %v3878_v10 = vunpack.i.h.bf16 %v6065_v41 }
 0x1df   : > { %v2675_v54 = vsel %vm7278_vm8, %v2662_v20, %v3862_v51  ;;  %v2726_v33 = vsel %vm7284_vm12, %v2713_v18, %v3693_v17  ;;  %v2702_v20 = vsel %vm1929_vm10, %v2689_v22, %v3873_v31  ;;  %v3877_v17 = vunpack.i.l.bf16 %v6065_v41 }
 0x1e0   : > { %v3881_v40 = vpop.permute.xlu0 %3880  ;;  %v2688_v51 = vsel %vm7279_vm9, %v2675_v54, %v3867_v29  ;;  %v7465_v54 = vpack.i.bf16 %v5356_v62, %v5359_v36  ;;  %v2739_v31 = vsel %vm1971_vm13, %v2726_v33, %v3728_v50  ;;  %v4189_v41 = vpack.i.bf16 %v4700_v52, %v4695_v57 }
 0x1e1   : > { %v6131_v30 = vpop.permute.xlu1 %3915  ;;  %v2701_v42 = vsel %vm1929_vm10, %v2688_v51, %v3872_v23  ;;  %v3883_v28 = vunpack.i.h.bf16 %v3881_v40  ;;  %v3882_v16 = vunpack.i.l.bf16 %v3881_v40  ;;  %v4319_v23 = vld [vmem:[%s7137_s6 + $0x28] sm:$0xff]   ;;  %v3798_v40 = vunpack.i.h.bf16 %v5960_v27 }
 0x1e2   : > { %4170 = vrot.lane.b32.xlu0 %v4169_v8, %s4379_s18  ;;  %v2752_v12 = vsel %vm1985_vm14, %v2739_v31, %v3763_v56  ;;  %v3833_v36 = vunpack.i.h.bf16 %v6046_v4  ;;  %v2714_v62 = vsel %vm1943_vm11, %v2701_v42, %v3877_v17  ;;  %v2715_v43 = vsel %vm1943_vm11, %v2702_v20, %v3878_v10  ;;  %3373 = vmatpush3.bf16.msra.mxu0 %v4319_v23 }
 0x1e3   : > { %v2727_v60 = vsel %vm7284_vm12, %v2714_v62, %v3882_v16  ;;  %v2728_v50 = vsel %vm7284_vm12, %v2715_v43, %v3883_v28  ;;  %3416 = vmatpush3.bf16.msra.mxu1 %v4319_v23  ;;  %v3888_v22 = vunpack.i.h.bf16 %v6079_v9  ;;  %3374 = vmatprep.subr.bf16.mxu0 %v7458_v0  ;;  %v2765_v42 = vsel %vm1999_vm15, %v2752_v12, %v3798_v40  ;;  %v4320_v16 = vld [vmem:[%s7137_s6 + $0x30] sm:$0x3f]  }
 0x1e4   : > { %v3891_v8 = vpop.permute.xlu0 %3890  ;;  %3410 = vmatprep.subr.bf16.mxu1 %v7458_v0  ;;  %v2778_v28 = vsel %vm2013_vm1, %v2765_v42, %v3833_v36  ;;  %v2967_v62 = vsel %vm1112_vm2, %v4320_v16, 0  ;;  %v3917_v16 = vunpack.i.l.bf16 %v6131_v30  ;;  %vm2041_vm2 = vcmask 392192  }
 0x1e5   : > { %v6149_v18 = vpop.permute.xlu1 %3925  ;;  %v3893_v33 = vunpack.i.h.bf16 %v3891_v8  ;;  %v3892_v51 = vunpack.i.l.bf16 %v3891_v8  ;;  %v2741_v20 = vsel %vm1971_vm13, %v2728_v50, %v3888_v22  ;;  %v1748_v22 = vrot.slane %v4695_v57, 7 }
 0x1e6   : > { %4180 = vrot.lane.b32.xlu0 %v7465_v54, %s4376_s14  ;;  %v3887_v54 = vunpack.i.l.bf16 %v6079_v9  ;;  %3375 = vmatpush3.bf16.msra.mxu0 %v2967_v62 }
 0x1e7   : > { %v2754_v17 = vsel %vm1985_vm14, %v2741_v20, %v3893_v33  ;;  %3417 = vmatpush3.bf16.msra.mxu1 %v2967_v62  ;;  %v3907_v20 = vunpack.i.l.bf16 %v6109_v45 }
 0x1e8   : > { %v3901_v29 = vpop.permute.xlu0 %3900  ;;  %v2740_v8 = vsel %vm1971_vm13, %v2727_v60, %v3887_v54  ;;  %v2804_v60 = vrot.slane %v2778_v28, 1  ;;  %v7266_v54 = vrot.slane %v4700_v52, 7 }
 0x1e9   : > { %v3903_v56 = vunpack.i.h.bf16 %v3901_v29  ;;  %v3902_v31 = vunpack.i.l.bf16 %v3901_v29  ;;  %v6172_v4 = vpop.permute.xlu1 %3935  ;;  %v2753_v10 = vsel %vm1985_vm14, %v2740_v8, %v3892_v51  ;;  %v3908_v8 = vunpack.i.h.bf16 %v6109_v45 }
 0x1ea   : > { %4190 = vrot.lane.b32.xlu0 %v4189_v41, %s4377_s21 }
 0x1eb   : > { %v2766_v41 = vsel %vm1999_vm15, %v2753_v10, %v3902_v31  ;;  %v2767_v12 = vsel %vm1999_vm15, %v2754_v17, %v3903_v56  ;;  %v3898_v56 = vunpack.i.h.bf16 %v6094_v39  ;;  %v3897_v31 = vunpack.i.l.bf16 %v6094_v39 }
 0x1ec   : > { %v3911_v9 = vpop.permute.xlu0 %3910 }
 0x1ed   : > { %v3913_v23 = vunpack.i.h.bf16 %v3911_v9  ;;  %v3912_v40 = vunpack.i.l.bf16 %v3911_v9  ;;  %v6188_v36 = vpop.permute.xlu1 %3945  ;;  %v3918_v9 = vunpack.i.h.bf16 %v6131_v30  ;;  %v2665_v62 = vsel %vm7285_vm7, %v5319_v37, %v3898_v56 }
 0x1ee   : > { %v2664_v45 = vsel %vm7285_vm7, %v5239_v49, %v3897_v31 }
 0x1ef   : > { %v2779_v43 = vsel %vm2013_vm1, %v2766_v41, %v3912_v40  ;;  %v6193_v29 = vsel %vm2013_vm1, %v2767_v12, %v3913_v23  ;;  %v7466_v40 = vrot.slane %v4667_v38, 7  ;;  %v1751_v12 = vsel %vm7277_vm6, %v1748_v22, %v7266_v54 }
 0x1f0   : > { %v2805_v50 = vrot.slane %v2779_v43, 1  ;;  %v2807_v33 = vrot.slane %v6193_v29, 1  ;;  %v3921_v51 = vpop.permute.xlu0 %3920  ;;  %v2677_v30 = vsel %vm7278_vm8, %v2664_v45, %v3907_v20  ;;  %v2678_v38 = vsel %vm7278_vm8, %v2665_v62, %v3908_v8 }
 0x1f1   : > { %v6204_v42 = vpop.permute.xlu1 %3955  ;;  %v3923_v23 = vunpack.i.h.bf16 %v3921_v51  ;;  %v3922_v39 = vunpack.i.l.bf16 %v3921_v51  ;;  %v1749_v41 = vsel %vm7277_vm6, %v7466_v40, %v1748_v22  ;;  %v3928_v40 = vunpack.i.h.bf16 %v6149_v18 }
 0x1f2   : > { %v2806_v28 = vsel %vm962_vm0, %v2804_v60, %v2805_v50  ;;  %v2808_v57 = vsel %vm962_vm0, %v2805_v50, %v2807_v33  ;;  %v2690_v60 = vsel %vm7279_vm9, %v2677_v30, %v3917_v16  ;;  %v2691_v50 = vsel %vm7279_vm9, %v2678_v38, %v3918_v9 }
 0x1f3   : > { %v4174_v17 = vpack.i.bf16 %v2808_v57, %v2806_v28  ;;  %v4184_v22 = vpack.i.bf16 %v1751_v12, %v1749_v41  ;;  %v2703_v56 = vsel %vm1929_vm10, %v2690_v60, %v3922_v39  ;;  %v2704_v28 = vsel %vm1929_vm10, %v2691_v50, %v3923_v23 }
 0x1f4   : > { %v3931_v10 = vpop.permute.xlu0 %3930  ;;  %v2717_v20 = vsel %vm1943_vm11, %v2704_v28, %v3928_v40  ;;  %v4194_v16 = vpack.i.bf16 %v5239_v49, %v4700_v52  ;;  %v3937_v12 = vunpack.i.l.bf16 %v6172_v4 }
 0x1f5   : > { %v6224_v43 = vpop.permute.xlu1 %3965  ;;  %4175 = vrot.lane.b32.xlu1 %v4174_v17, %s4381_s24  ;;  %v3933_v31 = vunpack.i.h.bf16 %v3931_v10  ;;  %v3932_v57 = vunpack.i.l.bf16 %v3931_v10  ;;  %v3927_v17 = vunpack.i.l.bf16 %v6149_v18  ;;  %v3938_v18 = vunpack.i.h.bf16 %v6172_v4 }
 0x1f7   : > { %v2716_v8 = vsel %vm1943_vm11, %v2703_v56, %v3927_v17  ;;  %v2730_v10 = vsel %vm7284_vm12, %v2717_v20, %v3933_v31 }
 0x1f8   : > { %v3941_v51 = vpop.permute.xlu0 %3940  ;;  %v2729_v23 = vsel %vm7284_vm12, %v2716_v8, %v3932_v57  ;;  %v2743_v60 = vsel %vm1971_vm13, %v2730_v10, %v3938_v18 }
 0x1f9   : > { %v6235_v54 = vpop.permute.xlu1 %3975  ;;  %4185 = vrot.lane.b32.xlu1 %v4184_v22, %s4378_s25  ;;  %v3943_v39 = vunpack.i.h.bf16 %v3941_v51  ;;  %v3942_v41 = vunpack.i.l.bf16 %v3941_v51  ;;  %v2742_v38 = vsel %vm1971_vm13, %v2729_v23, %v3937_v12  ;;  %v4204_v22 = vpack.i.bf16 %v5525_v35, %v5426_v13 }
 0x1fa   : > { %v7271_v23 = vrot.slane %v5319_v37, 7 }
 0x1fb   : > { %v2755_v51 = vsel %vm1985_vm14, %v2742_v38, %v3942_v41  ;;  %v2756_v56 = vsel %vm1985_vm14, %v2743_v60, %v3943_v39  ;;  %v1651_v60 = vrot.slane %v5277_v58, 6 }
 0x1fc   : > { %v3951_v9 = vpop.permute.xlu0 %3950 }
 0x1fd   : > { %v3953_v62 = vunpack.i.h.bf16 %v3951_v9  ;;  %v3952_v45 = vunpack.i.l.bf16 %v3951_v9  ;;  %v6246_v30 = vpop.permute.xlu1 %3985  ;;  %4195 = vrot.lane.b32.xlu1 %v4194_v16, %s4379_s18  ;;  %v4214_v9 = vpack.i.bf16 %v5319_v37, %v5239_v49  ;;  %v1752_v16 = vrot.slane %v5239_v49, 7 }
 0x1fe   : > { %v4224_v49 = vpack.i.bf16 %v5269_v21, %v5319_v37  ;;  %v3988_v32 = vunpack.i.h.bf16 %v6246_v30 }
 0x1ff   : > { %v2768_v31 = vsel %vm1999_vm15, %v2755_v51, %v3952_v45  ;;  %v2769_v57 = vsel %vm1999_vm15, %v2756_v56, %v3953_v62  ;;  %v7467_v62 = vrot.slane %v4700_v52, 7  ;;  %v1755_v29 = vsel %vm7277_vm6, %v1752_v16, %v7271_v23 }
 0x200   : > { %v3961_v50 = vpop.permute.xlu0 %3960  ;;  %v7267_v51 = vrot.slane %v5366_v3, 6 }
 0x201   : > { %v3963_v28 = vunpack.i.h.bf16 %v3961_v50  ;;  %v3962_v4 = vunpack.i.l.bf16 %v3961_v50  ;;  %v6257_v40 = vpop.permute.xlu1 %3995  ;;  %4205 = vrot.lane.b32.xlu1 %v4204_v22, %s4376_s14  ;;  %v1753_v45 = vsel %vm7277_vm6, %v7467_v62, %v1752_v16 }
 0x202   : > { %v4209_v22 = vpack.i.bf16 %v1755_v29, %v1753_v45  ;;  %v3948_v29 = vunpack.i.h.bf16 %v6188_v36 }
 0x203   : > { %v2781_v17 = vsel %vm2013_vm1, %v2768_v31, %v3962_v4  ;;  %v6262_v8 = vsel %vm2013_vm1, %v2769_v57, %v3963_v28  ;;  %v7468_v28 = vrot.slane %v5269_v21, 6 }
 0x204   : > { %v2809_v13 = vrot.slane %v2781_v17, 1  ;;  %v7270_v35 = vrot.slane %v6262_v8, 1  ;;  %v6265_v20 = vpop.permute.xlu0 %3970 }
 0x205   : > { %v6271_v10 = vpop.permute.xlu1 %4005  ;;  %4215 = vrot.lane.b32.xlu1 %v4214_v9, %s4377_s21  ;;  %v6306_v4 = vsel %vm1456_vm5, %v7468_v28, %v1651_v60  ;;  %v7268_v9 = vrot.slane %v5366_v3, 7  ;;  %v3957_v28 = vunpack.i.l.bf16 %v6204_v42 }
 0x206   : > { %v2810_v39 = vsel %vm962_vm0, %v2807_v33, %v2809_v13  ;;  %v2812_v41 = vsel %vm962_vm0, %v2809_v13, %v7270_v35  ;;  %v1653_v33 = vrot.slane %v5262_v53, 6  ;;  %v1760_v13 = vrot.slane %v5262_v53, 7 }
 0x207   : > { %v4199_v12 = vpack.i.bf16 %v2812_v41, %v2810_v39  ;;  %v7269_v39 = vrot.slane %v5277_v58, 7  ;;  %v4007_v11 = vunpack.i.l.bf16 %v6271_v10 }
 0x208   : > { %v6280_v18 = vpop.permute.xlu0 %3980  ;;  %v1654_v52 = vsel %vm1456_vm5, %v1651_v60, %v1653_v33  ;;  %v6312_v17 = vsel %vm1456_vm5, %v1653_v33, %v7267_v51  ;;  %v1763_v62 = vsel %vm7277_vm6, %v1760_v13, %v7268_v9  ;;  %v3947_v33 = vunpack.i.l.bf16 %v6188_v36 }
 0x209   : > { %v6291_v38 = vpop.permute.xlu1 %4015  ;;  %4200 = vrot.lane.b32.xlu0 %v4199_v12, %s4381_s24  ;;  %4225 = vrot.lane.b32.xlu1 %v4224_v49, %s4379_s18  ;;  %v4219_v57 = vpack.i.bf16 %v1654_v52, %v6306_v4  ;;  %v4229_v12 = vpack.i.bf16 %v6312_v17, %v1654_v52  ;;  %v1761_v49 = vsel %vm7277_vm6, %v7269_v39, %v1760_v13  ;;  %v3958_v52 = vunpack.i.h.bf16 %v6204_v42 }
 0x20a   : > { %v3967_v51 = vunpack.i.l.bf16 %v6224_v43  ;;  %v3972_v9 = vunpack.i.l.bf16 %v6265_v20  ;;  %v2667_v36 = vsel %vm7285_vm7, %v5277_v58, %v3948_v29  ;;  %v4249_v42 = vpack.i.bf16 %v4803_v5, %v5366_v3 }
 0x20b   : > { %v2680_v39 = vsel %vm7278_vm8, %v2667_v36, %v3958_v52  ;;  %v3977_v52 = vunpack.i.l.bf16 %v6235_v54 }
 0x20c   : > { %v6296_v50 = vpop.permute.xlu0 %3990 }
 0x20d   : > { %v6300_v56 = vpop.permute.xlu1 %4025  ;;  %4210 = vrot.lane.b32.xlu0 %v4209_v22, %s4378_s25  ;;  %v4239_v22 = vpack.i.bf16 %v1763_v62, %v1761_v49  ;;  %v2666_v49 = vsel %vm7285_vm7, %v5269_v21, %v3947_v33 }
 0x210   : > { %v4001_v31 = vpop.permute.xlu0 %4000 }
 0x211   : > { %v6316_v16 = vpop.permute.xlu1 %4035  ;;  %4220 = vrot.lane.b32.xlu0 %v4219_v57, %s4375_s13  ;;  %v3968_v57 = vunpack.i.h.bf16 %v6224_v43  ;;  %v2679_v43 = vsel %vm7278_vm8, %v2666_v49, %v3957_v28  ;;  %v4003_v33 = vunpack.i.h.bf16 %v4001_v31  ;;  %v4002_v27 = vunpack.i.l.bf16 %v4001_v31 }
 0x212   : > { %v3987_v28 = vunpack.i.l.bf16 %v6246_v30 }
 0x213   : > { %v2693_v35 = vsel %vm7279_vm9, %v2680_v39, %v3968_v57  ;;  %v3978_v39 = vunpack.i.h.bf16 %v6235_v54  ;;  %v4008_v54 = vunpack.i.h.bf16 %v6271_v10 }
 0x214   : > { %v6320_v41 = vpop.permute.xlu0 %4010 }
 0x215   : > { %v6329_v45 = vpop.permute.xlu1 %4045  ;;  %4230 = vrot.lane.b32.xlu0 %v4229_v12, %s4376_s14  ;;  %v3973_v12 = vunpack.i.h.bf16 %v6265_v20 }
 0x217   : > { %v2706_v29 = vsel %vm1929_vm10, %v2693_v35, %v3973_v12 }
 0x218   : > { %v6334_v60 = vpop.permute.xlu0 %4020 }
 0x219   : > { %v6340_v13 = vpop.permute.xlu1 %4055  ;;  %4240 = vrot.lane.b32.xlu0 %v4239_v22, %s4378_s25  ;;  %v2692_v22 = vsel %vm7279_vm9, %v2679_v43, %v3967_v51  ;;  %v1756_v51 = vrot.slane %v5269_v21, 7  ;;  %v4017_v43 = vunpack.i.l.bf16 %v6291_v38 }
 0x21a   : > { %v2705_v20 = vsel %vm1929_vm10, %v2692_v22, %v3972_v9  ;;  %v2719_v9 = vsel %vm1943_vm11, %v2706_v29, %v3988_v32  ;;  %v3992_v22 = vunpack.i.l.bf16 %v6296_v50  ;;  %v3993_v32 = vunpack.i.h.bf16 %v6296_v50 }
 0x21b   : > { %v2718_v57 = vsel %vm1943_vm11, %v2705_v20, %v3987_v28  ;;  %v2732_v31 = vsel %vm7284_vm12, %v2719_v9, %v4003_v33  ;;  %v7469_v20 = vrot.slane %v5319_v37, 7  ;;  %v2669_v33 = vsel %vm7285_vm7, %v5366_v3, %v3977_v52 }
 0x21c   : > { %v4031_v62 = vpop.permute.xlu0 %4030  ;;  %v2731_v35 = vsel %vm7284_vm12, %v2718_v57, %v4002_v27  ;;  %v3997_v9 = vunpack.i.l.bf16 %v6257_v40  ;;  %v3982_v37 = vunpack.i.l.bf16 %v6280_v18  ;;  %v4048_v52 = vunpack.i.h.bf16 %v6329_v45 }
 0x21d   : > { %v6355_v23 = vpop.permute.xlu1 %4065  ;;  %4250 = vrot.lane.b32.xlu0 %v4249_v42, %s4379_s18  ;;  %v4033_v12 = vunpack.i.h.bf16 %v4031_v62  ;;  %v4032_v30 = vunpack.i.l.bf16 %v4031_v62  ;;  %v4018_v42 = vunpack.i.h.bf16 %v6291_v38  ;;  %v6386_v62 = vsel %vm7277_vm6, %v7469_v20, %v1756_v51 }
 0x21e   : > { %v2670_v38 = vsel %vm7285_vm7, %v4803_v5, %v3978_v39  ;;  %v2744_v28 = vsel %vm1971_vm13, %v2731_v35, %v4017_v43  ;;  %v2682_v39 = vsel %vm7278_vm8, %v2669_v33, %v3992_v22  ;;  %v4047_v35 = vunpack.i.l.bf16 %v6329_v45 }
 0x21f   : > { %v2745_v50 = vsel %vm1971_vm13, %v2732_v31, %v4018_v42  ;;  %v2757_v20 = vsel %vm1985_vm14, %v2744_v28, %v4032_v30  ;;  %v2683_v31 = vsel %vm7278_vm8, %v2670_v38, %v3993_v32  ;;  %v4022_v42 = vunpack.i.l.bf16 %v6334_v60 }
 0x220   : > { %v6362_v49 = vpop.permute.xlu0 %4040  ;;  %v2758_v27 = vsel %vm1985_vm14, %v2745_v50, %v4033_v12  ;;  %v4023_v30 = vunpack.i.h.bf16 %v6334_v60  ;;  %v2770_v12 = vsel %vm1999_vm15, %v2757_v20, %v4047_v35  ;;  %v3983_v22 = vunpack.i.h.bf16 %v6280_v18 }
 0x221   : > { %v6369_v36 = vpop.permute.xlu1 %4075  ;;  %v2771_v28 = vsel %vm1999_vm15, %v2758_v27, %v4048_v52  ;;  %v2671_v45 = vsel %vm7285_vm7, %v4808_v19, %v3982_v37  ;;  %v2695_v10 = vsel %vm7279_vm9, %v2682_v39, %v4007_v11  ;;  %v2696_v60 = vsel %vm7279_vm9, %v2683_v31, %v4008_v54 }
 0x222   : > { %v4037_v18 = vunpack.i.l.bf16 %v6316_v16  ;;  %v4012_v37 = vunpack.i.l.bf16 %v6320_v41  ;;  %v2709_v52 = vsel %vm1929_vm10, %v2696_v60, %v4023_v30  ;;  %v7470_v11 = vrot.slane %v6262_v8, 1 }
 0x223   : > { %v4038_v31 = vunpack.i.h.bf16 %v6316_v16  ;;  %v7473_v8 = vrot.slane %v5366_v3, 6  ;;  %v3998_v60 = vunpack.i.h.bf16 %v6257_v40  ;;  %v4068_v40 = vunpack.i.h.bf16 %v6355_v23 }
 0x224   : > { %v6376_v6 = vpop.permute.xlu0 %4050 }
 0x225   : > { %v6395_v57 = vpop.permute.xlu1 %4085  ;;  %v4053_v35 = vunpack.i.h.bf16 %v6376_v6 }
 0x228   : > { %v4061_v43 = vpop.permute.xlu0 %4060 }
 0x229   : > { %v4063_v29 = vunpack.i.h.bf16 %v4061_v43  ;;  %v4062_v55 = vunpack.i.l.bf16 %v4061_v43  ;;  %v6418_v38 = vpop.permute.xlu1 %4095  ;;  %v2668_v43 = vsel %vm7285_vm7, %v5262_v53, %v3983_v22 }
 0x22b   : > { %v2783_v33 = vsel %vm2013_vm1, %v2770_v12, %v4062_v55  ;;  %v6416_v32 = vsel %vm2013_vm1, %v2771_v28, %v4063_v29  ;;  %v2708_v55 = vsel %vm1929_vm10, %v2695_v10, %v4022_v42  ;;  %v4052_v29 = vunpack.i.l.bf16 %v6376_v6 }
 0x22c   : > { %v2813_v50 = vrot.slane %v2783_v33, 1  ;;  %v2815_v20 = vrot.slane %v6416_v32, 1  ;;  %v6423_v27 = vpop.permute.xlu0 %4070  ;;  %v7471_v42 = vrot.slane %v5277_v58, 7  ;;  %v7472_v6 = vrot.slane %v4803_v5, 6 }
 0x22d   : > { %v4013_v28 = vunpack.i.h.bf16 %v6320_v41  ;;  %v2684_v33 = vsel %vm7278_vm8, %v2671_v45, %v3997_v9  ;;  %v2721_v22 = vsel %vm1943_vm11, %v2708_v55, %v4037_v18  ;;  %v4067_v41 = vunpack.i.l.bf16 %v6355_v23 }
 0x22e   : > { %v2814_v54 = vsel %vm962_vm0, %v7470_v11, %v2813_v50  ;;  %v2816_v39 = vsel %vm962_vm0, %v2813_v50, %v2815_v20  ;;  %v6443_v12 = vsel %vm7277_vm6, %v1756_v51, %v7471_v42  ;;  %v6450_v30 = vsel %vm1456_vm5, %v7473_v8, %v7472_v6  ;;  %v4106_v42 = vpop.permute.xlu1 %4105 }
 0x22f   : > { %v4234_v16 = vpack.i.bf16 %v2816_v39, %v2814_v54  ;;  %v2697_v51 = vsel %vm7279_vm9, %v2684_v33, %v4012_v37  ;;  %v2722_v50 = vsel %vm1943_vm11, %v2709_v52, %v4038_v31  ;;  %v2734_v11 = vsel %vm7284_vm12, %v2721_v22, %v4052_v29 }
 0x230   : > { %v6455_v10 = vpop.permute.xlu0 %4080  ;;  %v4027_v6 = vunpack.i.l.bf16 %v6300_v56  ;;  %v4042_v9 = vunpack.i.l.bf16 %v6362_v49  ;;  %v2735_v45 = vsel %vm7284_vm12, %v2722_v50, %v4053_v35  ;;  %v2681_v18 = vsel %vm7278_vm8, %v2668_v43, %v3998_v60 }
 0x231   : > { %4235 = vrot.lane.b32.xlu1 %v4234_v16, %s4381_s24  ;;  %v4264_v37 = vpack.i.bf16 %v6443_v12, %v6386_v62  ;;  %v4274_v55 = vpack.i.bf16 %v6450_v30, %v6312_v17  ;;  %v2694_v29 = vsel %vm7279_vm9, %v2681_v18, %v4013_v28  ;;  %v4043_v52 = vunpack.i.h.bf16 %v6362_v49 }
 0x232   : > { %v2710_v54 = vsel %vm1929_vm10, %v2697_v51, %v4027_v6  ;;  %v2747_v35 = vsel %vm1971_vm13, %v2734_v11, %v4067_v41  ;;  %v4077_v31 = vunpack.i.l.bf16 %v6369_v36  ;;  %v2748_v43 = vsel %vm1971_vm13, %v2735_v45, %v4068_v40  ;;  %v4116_v60 = vpop.permute.xlu1 %4115 }
 0x233   : > { %v4028_v62 = vunpack.i.h.bf16 %v6300_v56  ;;  %v2723_v12 = vsel %vm1943_vm11, %v2710_v54, %v4042_v9  ;;  %v4078_v33 = vunpack.i.h.bf16 %v6369_v36  ;;  %v4072_v28 = vunpack.i.l.bf16 %v6423_v27 }
 0x234   : > { %v4091_v39 = vpop.permute.xlu0 %4090  ;;  %v7474_v49 = vpack.i.bf16 %v5366_v3, %v5262_v53  ;;  %v4057_v22 = vunpack.i.l.bf16 %v6340_v13  ;;  %v4082_v16 = vunpack.i.l.bf16 %v6455_v10  ;;  %v2760_v51 = vsel %vm1985_vm14, %v2747_v35, %v4077_v31 }
 0x235   : > { %v4093_v23 = vunpack.i.h.bf16 %v4091_v39  ;;  %v4092_v8 = vunpack.i.l.bf16 %v4091_v39  ;;  %v1659_v56 = vrot.slane %v4808_v19, 6  ;;  %v4058_v50 = vunpack.i.h.bf16 %v6340_v13 }
 0x236   : > { %4245 = vrot.lane.b32.xlu1 %v7474_v49, %s4377_s21  ;;  %v2707_v36 = vsel %vm1929_vm10, %v2694_v29, %v4028_v62  ;;  %v2761_v11 = vsel %vm1985_vm14, %v2748_v43, %v4078_v33  ;;  %v2736_v45 = vsel %vm7284_vm12, %v2723_v12, %v4057_v22  ;;  %v4107_v18 = vunpack.i.l.bf16 %v4106_v42 }
 0x237   : > { %v2773_v6 = vsel %vm1999_vm15, %v2760_v51, %v4092_v8  ;;  %v2720_v9 = vsel %vm1943_vm11, %v2707_v36, %v4043_v52  ;;  %v2774_v40 = vsel %vm1999_vm15, %v2761_v11, %v4093_v23  ;;  %v4088_v54 = vunpack.i.h.bf16 %v6395_v57  ;;  %v7478_v51 = vld [vmem:[#allocation28_spill] sm:$0xff] }
 0x238   : > { %v4101_v41 = vpop.permute.xlu0 %4100  ;;  %v4087_v35 = vunpack.i.l.bf16 %v6395_v57  ;;  %v2749_v13 = vsel %vm1971_vm13, %v2736_v45, %v4072_v28  ;;  %v4108_v39 = vunpack.i.h.bf16 %v4106_v42  ;;  %v7475_v29 = vpack.i.bf16 %v6306_v4, %v5506_v1  ;;  %v4126_v4 = vpop.permute.xlu1 %4125 }
 0x239   : > { %v2762_v31 = vsel %vm1985_vm14, %v2749_v13, %v4082_v16  ;;  %v6506_v52 = vsel %vm2013_vm1, %v2773_v6, %v4107_v18  ;;  %v4103_v43 = vunpack.i.h.bf16 %v4101_v41  ;;  %v4102_v8 = vunpack.i.l.bf16 %v4101_v41  ;;  %v7477_v16 = vld [vmem:[#allocation29_spill] sm:$0xff] }
 0x23a   : > { %4255 = vrot.lane.b32.xlu1 %v7475_v29, %s4376_s14  ;;  %v4097_v23 = vunpack.i.l.bf16 %v6418_v38  ;;  %v4073_v62 = vunpack.i.h.bf16 %v6423_v27  ;;  %v2787_v57 = vsel %vm2013_vm1, %v2774_v40, %v4108_v39  ;;  %v1764_v42 = vrot.slane %v4803_v5, 7 }
 0x23b   : > { %v2733_v33 = vsel %vm7284_vm12, %v2720_v9, %v4058_v50  ;;  %v4083_v1 = vunpack.i.h.bf16 %v6455_v10  ;;  %v7476_v49 = vrot.slane %v4803_v5, 6  ;;  %v2673_v27 = vsel %vm7285_vm7, %v7477_v16, %v4088_v54 }
 0x23c   : > { %v4111_v12 = vpop.permute.xlu0 %4110  ;;  %v2672_v36 = vsel %vm7285_vm7, %v7478_v51, %v4087_v35  ;;  %v2819_v11 = vrot.slane %v6506_v52, 1  ;;  %v2775_v50 = vsel %vm1999_vm15, %v2762_v31, %v4097_v23  ;;  %v2821_v10 = vrot.slane %v2787_v57, 1  ;;  %v4136_v57 = vpop.permute.xlu1 %4135 }
 0x23d   : > { %v4112_v28 = vunpack.i.l.bf16 %v4111_v12  ;;  %v6519_v22 = vsel %vm1456_vm5, %v7476_v49, %v1659_v56  ;;  %v2685_v6 = vsel %vm7278_vm8, %v2672_v36, %v4102_v8  ;;  %v2686_v41 = vsel %vm7278_vm8, %v2673_v27, %v4103_v43 }
 0x23e   : > { %4265 = vrot.lane.b32.xlu1 %v4264_v37, %s4378_s25  ;;  %v2746_v45 = vsel %vm1971_vm13, %v2733_v33, %v4073_v62  ;;  %v4118_v18 = vunpack.i.h.bf16 %v4116_v60  ;;  %v4117_v40 = vunpack.i.l.bf16 %v4116_v60  ;;  %v7479_v37 = vrot.slane %v5366_v3, 7 }
 0x23f   : > { %v6531_v9 = vsel %vm2013_vm1, %v2775_v50, %v4112_v28  ;;  %v2759_v13 = vsel %vm1985_vm14, %v2746_v45, %v4083_v1  ;;  %v4113_v8 = vunpack.i.h.bf16 %v4111_v12  ;;  %v4098_v62 = vunpack.i.h.bf16 %v6418_v38  ;;  %v7480_v50 = vld [vmem:[#allocation26_spill] sm:$0xff] }
 0x240   : > { %v2823_v54 = vrot.slane %v6531_v9, 1  ;;  %v4121_v35 = vpop.permute.xlu0 %4120  ;;  %v1765_v31 = vsel %vm7277_vm6, %v7479_v37, %v1764_v42  ;;  %v2698_v43 = vsel %vm7279_vm9, %v2685_v6, %v4117_v40  ;;  %v2699_v23 = vsel %vm7279_vm9, %v2686_v41, %v4118_v18 }
 0x241   : > { %v4123_v39 = vunpack.i.h.bf16 %v4121_v35  ;;  %v4122_v29 = vunpack.i.l.bf16 %v4121_v35  ;;  %v2822_v33 = vsel %vm962_vm0, %v2819_v11, %v2821_v10  ;;  %v4128_v1 = vunpack.i.h.bf16 %v4126_v4 }
 0x242   : > { %4275 = vrot.lane.b32.xlu1 %v4274_v55, %s4375_s13  ;;  %v2824_v60 = vsel %vm962_vm0, %v2821_v10, %v2823_v54  ;;  %v4127_v28 = vunpack.i.l.bf16 %v4126_v4  ;;  %v4284_v55 = vpack.i.bf16 %v6519_v22, %v6450_v30  ;;  %v2772_v27 = vsel %vm1999_vm15, %v2759_v13, %v4098_v62 }
 0x243   : > { %v2711_v3 = vsel %vm1929_vm10, %v2698_v43, %v4122_v29  ;;  %v2712_v12 = vsel %vm1929_vm10, %v2699_v23, %v4123_v39  ;;  %v4259_v17 = vpack.i.bf16 %v2824_v60, %v2822_v33  ;;  %v1767_v6 = vsel %vm7277_vm6, %v1764_v42, %v7480_v50  ;;  %v4146_v29 = vpop.permute.xlu1 %4145  ;;  %v7481_v43 = vld [vmem:[#allocation31_spill] sm:$0xff] }
 0x244   : > { %v4131_v49 = vpop.permute.xlu0 %4130  ;;  %v2785_v41 = vsel %vm2013_vm1, %v2772_v27, %v4113_v8  ;;  %v2724_v45 = vsel %vm1943_vm11, %v2711_v3, %v4127_v28  ;;  %v2725_v10 = vsel %vm1943_vm11, %v2712_v12, %v4128_v1  ;;  %v4138_v18 = vunpack.i.h.bf16 %v4136_v57 }
 0x245   : > { %v4133_v36 = vunpack.i.h.bf16 %v4131_v49  ;;  %v4132_v38 = vunpack.i.l.bf16 %v4131_v49  ;;  %4260 = vrot.lane.b32.xlu0 %v4259_v17, %s4381_s24  ;;  %v4137_v40 = vunpack.i.l.bf16 %v4136_v57  ;;  %v4269_v42 = vpack.i.bf16 %v5277_v58, %v5269_v21  ;;  %v7482_v57 = vld [vmem:[#allocation41_spill] sm:$0xff] }
 0x246   : > { %4285 = vrot.lane.b32.xlu1 %v4284_v55, %s4376_s14  ;;  %v4294_v13 = vpack.i.bf16 %v1767_v6, %v1765_v31  ;;  %v2817_v39 = vrot.slane %v2785_v41, 1  ;;  %v3498_v23 = vunpack.i.h.bf16 %v7481_v43  ;;  %v3497_v60 = vunpack.i.l.bf16 %v7481_v43 }
 0x247   : > { %v2737_v4 = vsel %vm7284_vm12, %v2724_v45, %v4132_v38  ;;  %v2738_v30 = vsel %vm7284_vm12, %v2725_v10, %v4133_v36  ;;  %v3528_v12 = vunpack.i.h.bf16 %v7482_v57  ;;  %v3527_v21 = vunpack.i.l.bf16 %v7482_v57  ;;  %v7484_v10 = vld [vmem:[#allocation51_spill] sm:$0xff] }
 0x248   : > { %v4141_v35 = vpop.permute.xlu0 %4140  ;;  %v2750_v62 = vsel %vm1971_vm13, %v2737_v4, %v4137_v40  ;;  %v2751_v3 = vsel %vm1971_vm13, %v2738_v30, %v4138_v18  ;;  %v4148_v1 = vunpack.i.h.bf16 %v4146_v29  ;;  %v4147_v28 = vunpack.i.l.bf16 %v4146_v29  ;;  %v7485_v40 = vld [vmem:[#allocation40_spill] sm:$0xff] }
 0x249   : > { %v4143_v37 = vunpack.i.h.bf16 %v4141_v35  ;;  %v4142_v8 = vunpack.i.l.bf16 %v4141_v35  ;;  %4270 = vrot.lane.b32.xlu0 %v4269_v42, %s4377_s21  ;;  %v4279_v17 = vpack.i.bf16 %v5262_v53, %v5277_v58  ;;  %v4304_v55 = vpack.i.bf16 %v7478_v51, %v4808_v19  ;;  %v7483_v58 = vld [vmem:[#allocation11_spill] sm:$0xff] }
 0x24a   : > { %4295 = vrot.lane.b32.xlu1 %v4294_v13, %s4378_s25  ;;  %v2818_v38 = vsel %vm962_vm0, %v2815_v20, %v2817_v39  ;;  %v2820_v50 = vsel %vm962_vm0, %v2817_v39, %v2819_v11  ;;  %v1888_v6 = vsel %vm7285_vm7, 0.0, %v3497_v60  ;;  %v1889_v53 = vsel %vm7285_vm7, %v7483_v58, %v3498_v23 }
 0x24b   : > { %v2763_v31 = vsel %vm1985_vm14, %v2750_v62, %v4142_v8  ;;  %v2764_v33 = vsel %vm1985_vm14, %v2751_v3, %v4143_v37  ;;  %v1902_v32 = vsel %vm7278_vm8, %v1888_v6, %v3527_v21  ;;  %v1903_v11 = vsel %vm7278_vm8, %v1889_v53, %v3528_v12  ;;  %v7486_v8 = vld [vmem:[#allocation52_spill] sm:$0xff] }
 0x24c   : > { %v4151_v49 = vpop.permute.xlu0 %4150  ;;  %v2776_v41 = vsel %vm1999_vm15, %v2763_v31, %v4147_v28  ;;  %v2777_v45 = vsel %vm1999_vm15, %v2764_v33, %v4148_v1  ;;  %v3588_v4 = vunpack.i.h.bf16 %v7484_v10  ;;  %v3587_v30 = vunpack.i.l.bf16 %v7484_v10  ;;  %v7487_v31 = vld [vmem:[#allocation47_spill] sm:$0xff] }
 0x24d   : > { %v4153_v27 = vunpack.i.h.bf16 %v4151_v49  ;;  %v4152_v36 = vunpack.i.l.bf16 %v4151_v49  ;;  %4280 = vrot.lane.b32.xlu0 %v4279_v17, %s4379_s18  ;;  %v4289_v18 = vpack.i.bf16 %v2820_v50, %v2818_v38  ;;  %v3558_v35 = vunpack.i.h.bf16 %v7485_v40 }
 0x24e   : > { %4305 = vrot.lane.b32.xlu1 %v4304_v55, %s4379_s18  ;;  %v3557_v42 = vunpack.i.l.bf16 %v7485_v40  ;;  %v3617_v43 = vunpack.i.l.bf16 %v7486_v8  ;;  %v3618_v62 = vunpack.i.h.bf16 %v7486_v8  ;;  %v4299_v3 = vpack.i.bf16 %v4808_v19, %v4803_v5  ;;  %v4156_v19 = vpop.permute.xlu1 %4155 }
 0x24f   : > { %v2789_v20 = vsel %vm2013_vm1, %v2776_v41, %v4152_v36  ;;  %v6598_v52 = vsel %vm2013_vm1, %v2777_v45, %v4153_v27  ;;  %v1917_v37 = vsel %vm7279_vm9, %v1903_v11, %v3558_v35  ;;  %v3663_v57 = vunpack.i.h.bf16 %v5779_v59  ;;  %v7488_v27 = vld [vmem:[#allocation35_spill] sm:$0xff]  ;;  %v7490_v11 = vld [vmem:[#allocation22_spill] sm:$0xff] }
 0x250   : > { %v2825_v13 = vrot.slane %v2789_v20, 1  ;;  %v2827_v39 = vrot.slane %v6598_v52, 1  ;;  %v1916_v29 = vsel %vm7279_vm9, %v1902_v32, %v3557_v42  ;;  %v1931_v60 = vsel %vm1929_vm10, %v1917_v37, %v3588_v4  ;;  %v4161_v32 = vpop.permute.xlu0 %4160  ;;  %v7491_v4 = vld [vmem:[#allocation7_spill] sm:$0xff] }
 0x251   : > { %4290 = vrot.lane.b32.xlu0 %v4289_v18, %s4381_s24  ;;  %v1930_v23 = vsel %vm1929_vm10, %v1916_v29, %v3587_v30  ;;  %v3662_v12 = vunpack.i.l.bf16 %v5779_v59  ;;  %v1701_v5 = vrot.slane %v7478_v51, 6  ;;  %v1945_v1 = vsel %vm1943_vm11, %v1931_v60, %v3618_v62  ;;  %v7492_v30 = vld [vmem:[#allocation46_spill] sm:$0xff] }
 0x252   : > { %1685 = vrot.lane.b32.xlu1 %v6519_v22, %s4375_s13  ;;  %v2826_v22 = vsel %vm962_vm0, %v2823_v54, %v2825_v13  ;;  %v2828_v21 = vsel %vm962_vm0, %v2825_v13, %v2827_v39  ;;  %v1944_v33 = vsel %vm1943_vm11, %v1930_v23, %v3617_v43  ;;  %v3698_v59 = vunpack.i.h.bf16 %v5785_v25  ;;  %s3422_s13 = smul.u32 104, %s7660_s28 }
 0x253   : > { %v3697_v9 = vunpack.i.l.bf16 %v5785_v25  ;;  %v4309_v54 = vpack.i.bf16 %v2828_v21, %v2826_v22  ;;  %v1958_v28 = vsel %vm7284_vm12, %v1944_v33, %v3662_v12  ;;  %v1959_v49 = vsel %vm7284_vm12, %v1945_v1, %v3663_v57  ;;  %v4166_v21 = vpop.permute.xlu1 %4165 }
 0x254   : > { %v3733_v17 = vunpack.i.h.bf16 %v5905_v61  ;;  %v3732_v55 = vunpack.i.l.bf16 %v5905_v61  ;;  %v3503_v36 = vunpack.i.h.bf16 %v7488_v27  ;;  %v3502_v38 = vunpack.i.l.bf16 %v7488_v27 }
 0x255   : > { %4300 = vrot.lane.b32.xlu0 %v4299_v3, %s4377_s21  ;;  %v1702_v25 = vsel %vm1456_vm5, %v1659_v56, %v1701_v5  ;;  %v1972_v50 = vsel %vm1971_vm13, %v1958_v28, %v3697_v9  ;;  %v1973_v6 = vsel %vm1971_vm13, %v1959_v49, %v3698_v59  ;;  %v3768_v41 = vunpack.i.h.bf16 %v5915_v48  ;;  %v7489_v56 = vld [vmem:[#allocation34_spill] sm:$0xff]  ;;  %v4171_v3 = vpop.permute.xlu0 %4170 }
 0x256   : > { %1794 = vrot.lane.b32.xlu1 %v7487_v31, %s4378_s25  ;;  %v3767_v61 = vunpack.i.l.bf16 %v5915_v48  ;;  %v1986_v45 = vsel %vm1985_vm14, %v1972_v50, %v3732_v55  ;;  %v3803_v58 = vunpack.i.h.bf16 %v6013_v47  ;;  %v3802_v53 = vunpack.i.l.bf16 %v6013_v47 }
 0x257   : > { %vm2027_vm0 = vcmask 359424   ;;  %v3533_v20 = vunpack.i.h.bf16 %v7489_v56  ;;  %v1891_v10 = vsel %vm7285_vm7, %v7490_v11, %v3503_v36  ;;  %v1890_v48 = vsel %vm7285_vm7, %v7491_v4, %v3502_v38 }
 0x258   : > { %v3562_v18 = vunpack.i.l.bf16 %v7492_v30  ;;  %v2000_v40 = vsel %vm1999_vm15, %v1986_v45, %v3767_v61  ;;  %v3838_v47 = vunpack.i.h.bf16 %v6020_v46  ;;  %v3837_v42 = vunpack.i.l.bf16 %v6020_v46 }
 0x259   : > { %4310 = vrot.lane.b32.xlu0 %v4309_v54, %s4381_s24  ;;  %v2014_v13 = vsel %vm2013_vm1, %v2000_v40, %v3802_v53  ;;  %v4158_v37 = vunpack.i.h.bf16 %v4156_v19  ;;  %v4157_v8 = vunpack.i.l.bf16 %v4156_v19  ;;  %v3532_v43 = vunpack.i.l.bf16 %v7489_v56 }
 0x25a   : > { %1872 = vrot.lane.b32.xlu1 %v7477_v16, %s4379_s18  ;;  %v1987_v16 = vsel %vm1985_vm14, %v1973_v6, %v3733_v17  ;;  %v4163_v23 = vunpack.i.h.bf16 %v4161_v32  ;;  %v4162_v60 = vunpack.i.l.bf16 %v4161_v32  ;;  %v3563_v62 = vunpack.i.h.bf16 %v7492_v30  ;;  %v7493_v17 = vld [vmem:[#allocation48_spill] sm:$0xff]  ;;  %v7494_v32 = vld [vmem:[#allocation70_spill] sm:$0xff]  ;;  %v7495_v30 = vld [vmem:[#allocation71_spill] sm:$0xff]  ;;  %s3328_s18 = sshll.u32 %s7660_s28, 3 }
 0x25b   : > { %v2001_v35 = vsel %vm1999_vm15, %v1987_v16, %v3768_v41  ;;  %v1904_v46 = vsel %vm7278_vm8, %v1890_v48, %v3532_v43  ;;  %v1905_v57 = vsel %vm7278_vm8, %v1891_v10, %v3533_v20  ;;  %v2028_v12 = vsel %vm2027_vm0, %v2014_v13, %v3837_v42  ;;  %v7496_v42 = vld [vmem:[#allocation82_spill] sm:$0xff]  ;;  %s442_s19 = sadd.s32 %s3328_s18, %s7662_s27 }
 0x25c   : > { %v2015_v29 = vsel %vm2013_vm1, %v2001_v35, %v3803_v58  ;;  %v1918_v31 = vsel %vm7279_vm9, %v1904_v46, %v3562_v18  ;;  %v2042_v33 = vsel %vm2041_vm2, %v2028_v12, %v4157_v8  ;;  %vm2069_vm5 = vcmask 457728   ;;  %v4181_v8 = vpop.permute.xlu0 %4180  ;;  %s3329_s17 = sshll.u32 %s442_s19, 1 }
 0x25d   : > { %1727 = vrot.lane.b32.xlu0 %v1702_v25, %s4376_s14  ;;  %v2029_v22 = vsel %vm2027_vm0, %v2015_v29, %v3838_v47  ;;  %v4173_v59 = vunpack.i.h.bf16 %v4171_v3  ;;  %v4172_v9 = vunpack.i.l.bf16 %v4171_v3  ;;  %v1919_v54 = vsel %vm7279_vm9, %v1905_v57, %v3563_v62  ;;  %s3421_s14 = smul.u32 13, %s7662_s27  ;;  %s444_s22 = scalar_lea.vmem %s7139_s8, %s3329_s17 }
 0x25e   : > { %v2043_v5 = vsel %vm2041_vm2, %v2029_v22, %v4158_v37  ;;  %v4168_v28 = vunpack.i.h.bf16 %v4166_v21  ;;  %v4167_v49 = vunpack.i.l.bf16 %v4166_v21  ;;  %vm7286_vm6 = vcmask 490496  }
 0x25f   : > { %v2057_v1 = vsel %vm2055_vm4, %v2043_v5, %v4163_v23  ;;  %v3593_v55 = vunpack.i.h.bf16 %v7493_v17  ;;  %v3592_v27 = vunpack.i.l.bf16 %v7493_v17  ;;  %v3623_v36 = vunpack.i.h.bf16 %v5672_v26 }
 0x260   : > { %vm7283_vm8 = vcmask 523264   ;;  %v2071_v50 = vsel %vm2069_vm5, %v2057_v1, %v4168_v28  ;;  %v3668_v41 = vunpack.i.h.bf16 %v5710_v15  ;;  %v3667_v16 = vunpack.i.l.bf16 %v5710_v15 }
 0x261   : > { %1833 = vrot.lane.b32.xlu0 %v7478_v51, %s4377_s21  ;;  %v2056_v51 = vsel %vm2055_vm4, %v2042_v33, %v4162_v60  ;;  %v2085_v45 = vsel %vm7286_vm6, %v2071_v50, %v4173_v59  ;;  %vm7282_vm9 = vcmask 883712   ;;  %v3703_v19 = vunpack.i.h.bf16 %v7494_v32  ;;  %s434_s21 = sadd.s32 %s3422_s13, %s3421_s14 }
 0x262   : > { %v2070_v25 = vsel %vm2069_vm5, %v2056_v51, %v4167_v49  ;;  %v3702_v56 = vunpack.i.l.bf16 %v7494_v32  ;;  %v1933_v11 = vsel %vm1929_vm10, %v1919_v54, %v3593_v55  ;;  %v3738_v18 = vunpack.i.h.bf16 %v7495_v30  ;;  %s3327_s26 = sshll.u32 %s434_s21, 3 }
 0x263   : > { %v2084_v61 = vsel %vm7286_vm6, %v2070_v25, %v4172_v9  ;;  %v1947_v4 = vsel %vm1943_vm11, %v1933_v11, %v3623_v36  ;;  %v3737_v40 = vunpack.i.l.bf16 %v7495_v30  ;;  %v3773_v13 = vunpack.i.h.bf16 %v7496_v42  ;;  %v4191_v9 = vpop.permute.xlu0 %4190  ;;  %v7499_v11 = vld [vmem:[#allocation33_spill] sm:$0xff]  ;;  %s7046_s15 = scalar_lea.vmem %s7138_s7, %s3327_s26 }
 0x264   : > { %v1961_v48 = vsel %vm7284_vm12, %v1947_v4, %v3668_v41  ;;  %v3772_v29 = vunpack.i.l.bf16 %v7496_v42  ;;  %v3808_v60 = vunpack.i.h.bf16 %v5983_v14  ;;  %v3807_v62 = vunpack.i.l.bf16 %v5983_v14 }
 0x265   : > { %2853 = vrot.lane.b32.xlu0 %v2827_v39, %s4381_s24  ;;  %v3622_v39 = vunpack.i.l.bf16 %v5672_v26  ;;  %v1932_v26 = vsel %vm1929_vm10, %v1918_v31, %v3592_v27  ;;  %v1975_v47 = vsel %vm1971_vm13, %v1961_v48, %v3703_v19  ;;  %v3843_v57 = vunpack.i.h.bf16 %v6060_v2  ;;  %v7500_v48 = vld [vmem:[#allocation10_spill] sm:$0xff] }
 0x266   : > { %v1989_v23 = vsel %vm1985_vm14, %v1975_v47, %v3738_v18  ;;  %v3842_v12 = vunpack.i.l.bf16 %v6060_v2  ;;  %v4183_v22 = vunpack.i.h.bf16 %v4181_v8  ;;  %v4182_v21 = vunpack.i.l.bf16 %v4181_v8  ;;  %v7501_v18 = vld [vmem:[#allocation12_spill] sm:$0xff]  ;;  %v7506_v8 = vld [vmem:[#allocation37_spill] sm:$0xff] }
 0x267   : > { %v4176_v38 = vpop.permute.xlu1 %4175  ;;  %v1946_v10 = vsel %vm1943_vm11, %v1932_v26, %v3622_v39  ;;  %v2003_v46 = vsel %vm1999_vm15, %v1989_v23, %v3773_v13  ;;  %v4193_v27 = vunpack.i.h.bf16 %v4191_v9  ;;  %v4192_v36 = vunpack.i.l.bf16 %v4191_v9  ;;  %v7505_v13 = vld [vmem:[#allocation53_spill] sm:$0xff]  ;;  %v7507_v23 = vld [vmem:[#allocation42_spill] sm:$0xff] }
 0x268   : > { %v4178_v6 = vunpack.i.h.bf16 %v4176_v38  ;;  %v4177_v52 = vunpack.i.l.bf16 %v4176_v38  ;;  %v1960_v15 = vsel %vm7284_vm12, %v1946_v10, %v3667_v16  ;;  %v2017_v51 = vsel %vm2013_vm1, %v2003_v46, %v3808_v60 }
 0x269   : > { %v1974_v35 = vsel %vm1971_vm13, %v1960_v15, %v3702_v56  ;;  %v2031_v14 = vsel %vm2027_vm0, %v2017_v51, %v3843_v57  ;;  %v7498_v56 = vld [vmem:[#allocation43_spill] sm:$0xff]  ;;  %v3518_v10 = vunpack.i.h.bf16 %v7499_v11  ;;  %v3517_v4 = vunpack.i.l.bf16 %v7499_v11  ;;  %v7509_v57 = vld [vmem:[#allocation21_spill] sm:$0xff] }
 0x26a   : > { %v2869_v58 = vsel %vm7283_vm8, %v2084_v61, %v4177_v52  ;;  %v2870_v53 = vsel %vm7283_vm8, %v2085_v45, %v4178_v6  ;;  %v1988_v43 = vsel %vm1985_vm14, %v1974_v35, %v3737_v40  ;;  %v2045_v28 = vsel %vm2041_vm2, %v2031_v14, %v4183_v22  ;;  %v7502_v40 = vld [vmem:[#allocation16_spill] sm:$0xff]  ;;  %v7513_v14 = vld [vmem:[#allocation65_spill] sm:$0xff] }
 0x26b   : > { %v2882_v20 = vpack.c.bf16 %v2870_v53, %v2869_v58  ;;  %v4186_v37 = vpop.permute.xlu1 %4185  ;;  %v2002_v3 = vsel %vm1999_vm15, %v1988_v43, %v3772_v29  ;;  %v3487_v58 = vunpack.i.l.bf16 %v5298_v7  ;;  %v7497_v53 = vld [vmem:[#allocation32_spill] sm:$0xff]  ;;  %v3537_v26 = vunpack.i.l.bf16 %v7498_v56 }
 0x26c   : > { %v4188_v31 = vunpack.i.h.bf16 %v4186_v37  ;;  %v4187_v33 = vunpack.i.l.bf16 %v4186_v37  ;;  %v2016_v5 = vsel %vm2013_vm1, %v2002_v3, %v3807_v62  ;;  %v3508_v32 = vunpack.i.h.bf16 %v7497_v53  ;;  %v7508_v3 = vld [vmem:[#allocation17_spill] sm:$0xff] }
 0x26d   : > { %3377 = vmatmul.mubr.msk.bf16.vlgmr.msra.gmra.mrb[0].mxu0 %vm7282_vm9, %v2882_v20  ;;  %v2030_v59 = vsel %vm2027_vm0, %v2016_v5, %v3842_v12  ;;  %v3507_v19 = vunpack.i.l.bf16 %v7497_v53  ;;  %v3538_v20 = vunpack.i.h.bf16 %v7498_v56  ;;  %v3492_v15 = vunpack.i.l.bf16 %v5389_v34 }
 0x26e   : > { %3380 = vmatprep.mubr.msk.bf16.mxu0 %vm7280_vm3, %v7458_v0  ;;  %v2044_v54 = vsel %vm2041_vm2, %v2030_v59, %v4182_v21  ;;  %v2059_v49 = vsel %vm2055_vm4, %v2045_v28, %v4188_v31  ;;  %v1900_v30 = vsel %vm7285_vm7, %v7500_v48, %v3487_v58  ;;  %v1893_v7 = vsel %vm7285_vm7, %v7501_v18, %v3508_v32  ;;  %v7514_v28 = vld [vmem:[#allocation36_spill] sm:$0xff] }
 0x26f   : > { %v4196_v1 = vpop.permute.xlu1 %4195  ;;  %v2058_v2 = vsel %vm2055_vm4, %v2044_v54, %v4187_v33  ;;  %v2073_v50 = vsel %vm2069_vm5, %v2059_v49, %v4193_v27  ;;  %v1892_v35 = vsel %vm7285_vm7, %v7502_v40, %v3507_v19  ;;  %v3598_v29 = vunpack.i.h.bf16 %v7505_v13  ;;  %v7512_v33 = vld [vmem:[#allocation54_spill] sm:$0xff]  ;;  %v7516_v27 = vld [vmem:[#allocation13_spill] sm:$0xff]  ;;  %v7520_v19 = vld [vmem:[#allocation76_spill] sm:$0xff] }
 0x270   : > { %v4198_v17 = vunpack.i.h.bf16 %v4196_v1  ;;  %v4197_v55 = vunpack.i.l.bf16 %v4196_v1  ;;  %v2072_v25 = vsel %vm2069_vm5, %v2058_v2, %v4192_v36  ;;  %v3597_v37 = vunpack.i.l.bf16 %v7505_v13  ;;  %v7526_v13 = vld [vmem:[#allocation77_spill] sm:$0xff] }
 0x271   : > { %v3513_v43 = vunpack.i.h.bf16 %v7506_v8  ;;  %v3512_v34 = vunpack.i.l.bf16 %v7506_v8  ;;  %v3568_v60 = vunpack.i.h.bf16 %v7507_v23  ;;  %v3567_v62 = vunpack.i.l.bf16 %v7507_v23 }
 0x272   : > { %v2086_v39 = vsel %vm7286_vm6, %v2072_v25, %v4197_v55  ;;  %v2087_v41 = vsel %vm7286_vm6, %v2073_v50, %v4198_v17  ;;  %v1897_v46 = vsel %vm7285_vm7, %v7508_v3, %v3518_v10  ;;  %v1896_v12 = vsel %vm7285_vm7, %v7509_v57, %v3517_v4  ;;  %v7515_v17 = vld [vmem:[#allocation25_spill] sm:$0xff]  ;;  %v7528_v3 = vld [vmem:[#allocation18_spill] sm:$0xff] }
 0x273   : > { %v3628_v5 = vunpack.i.h.bf16 %v7512_v33  ;;  %v3627_v51 = vunpack.i.l.bf16 %v7512_v33  ;;  %v3673_v9 = vunpack.i.h.bf16 %v7513_v14  ;;  %v3672_v54 = vunpack.i.l.bf16 %v7513_v14  ;;  %v4206_v48 = vpop.permute.xlu1 %4205 }
 0x274   : > { %v3543_v2 = vunpack.i.h.bf16 %v7514_v28  ;;  %v3542_v49 = vunpack.i.l.bf16 %v7514_v28  ;;  %v1895_v55 = vsel %vm7285_vm7, %v7515_v17, %v3513_v43  ;;  %v1894_v36 = vsel %vm7285_vm7, %v7516_v27, %v3512_v34 }
 0x275   : > { %v3743_v56 = vunpack.i.h.bf16 %v7520_v19  ;;  %v3813_v34 = vunpack.i.h.bf16 %v6025_v63  ;;  %v3812_v23 = vunpack.i.l.bf16 %v6025_v63  ;;  %v3582_v57 = vunpack.i.l.bf16 %v5511_v24 }
 0x276   : > { %v4207_v17 = vunpack.i.l.bf16 %v4206_v48 }
 0x277   : > { %v4216_v24 = vpop.permute.xlu1 %4215 }
 0x27b   : > { %v4201_v38 = vpop.permute.xlu0 %4200 }
 0x27c   : > { %v4203_v6 = vunpack.i.h.bf16 %v4201_v38  ;;  %v4202_v52 = vunpack.i.l.bf16 %v4201_v38  ;;  %v7517_v38 = vld [vmem:[#allocation38_spill] sm:$0xff] }
 0x27d   : > { %v3553_v25 = vunpack.i.h.bf16 %v7517_v38  ;;  %v3552_v50 = vunpack.i.l.bf16 %v7517_v38 }
 0x27e   : > { %v2871_v61 = vsel %vm7283_vm8, %v2086_v39, %v4202_v52  ;;  %v2872_v45 = vsel %vm7283_vm8, %v2087_v41, %v4203_v6  ;;  %v7518_v6 = vld [vmem:[#allocation45_spill] sm:$0xff] }
 0x27f   : > { %v2883_v16 = vpack.c.bf16 %v2872_v45, %v2871_v61  ;;  %v3548_v52 = vunpack.i.h.bf16 %v7518_v6  ;;  %v3547_v39 = vunpack.i.l.bf16 %v7518_v6  ;;  %v7519_v45 = vld [vmem:[#allocation66_spill] sm:$0xff] }
 0x280   : > { %v3707_v58 = vunpack.i.l.bf16 %v7519_v45 }
 0x281   : > { %3381 = vmatmul.mubr.msk.bf16.gmra.mrb[4].mxu0 %vm7282_vm9, %v2883_v16  ;;  %v3708_v16 = vunpack.i.h.bf16 %v7519_v45 }
 0x282   : > { %3384 = vmatprep.mubr.msk.bf16.mxu0 %vm7280_vm3, %v7458_v0  ;;  %vm7503_vm3 = vcmask 64512  }
 0x283   : > { %v1906_v47 = vsel %vm7503_vm3, %v1892_v35, %v3537_v26  ;;  %vm7504_vm9 = vmmov %vm7503_vm3  ;;  %v1914_v22 = vsel %vm7503_vm3, %v1900_v30, %v3492_v15  ;;  %v7521_v26 = vld [vmem:[#allocation39_spill] sm:$0xff]  ;;  %v1909_v15 = vsel %vm7503_vm3, %v1895_v55, %v3543_v2  ;;  %v7523_v30 = vld [vmem:[#allocation44_spill] sm:$0xff] }
 0x284   : > { %v1907_v42 = vsel %vm7504_vm9, %v1893_v7, %v3538_v20  ;;  %vm7510_vm9 = vcmask 97280   ;;  %v3742_v20 = vunpack.i.l.bf16 %v7520_v19  ;;  %v3523_v11 = vunpack.i.h.bf16 %v7521_v26 }
 0x285   : > { %v1920_v21 = vsel %vm7510_vm9, %v1906_v47, %v3567_v62  ;;  %vm7511_vm8 = vmmov %vm7510_vm9  ;;  %v3522_v10 = vunpack.i.l.bf16 %v7521_v26  ;;  %v3578_v18 = vunpack.i.h.bf16 %v7523_v30  ;;  %v3577_v7 = vunpack.i.l.bf16 %v7523_v30 }
 0x286   : > { %v1921_v31 = vsel %vm7511_vm8, %v1907_v42, %v3568_v60  ;;  %v1934_v1 = vsel %vm1929_vm10, %v1920_v21, %v3597_v37  ;;  %vm7522_vm8 = vmmov %vm7503_vm3  ;;  %v3777_v37 = vunpack.i.l.bf16 %v7526_v13  ;;  %v7527_v60 = vld [vmem:[#allocation27_spill] sm:$0xff]  ;;  %v7530_v21 = vld [vmem:[#allocation49_spill] sm:$0xff] }
 0x287   : > { %v1935_v59 = vsel %vm1929_vm10, %v1921_v31, %v3598_v29  ;;  %v1948_v41 = vsel %vm1943_vm11, %v1934_v1, %v3627_v51  ;;  %v1908_v4 = vsel %vm7522_vm8, %v1894_v36, %v3542_v49  ;;  %vm7524_vm9 = vmmov %vm7503_vm3  ;;  %v3778_v29 = vunpack.i.h.bf16 %v7526_v13  ;;  %v7541_v13 = vld [vmem:[#allocation61_spill] sm:$0xff] }
 0x288   : > { %v1949_v61 = vsel %vm1943_vm11, %v1935_v59, %v3628_v5  ;;  %v1962_v53 = vsel %vm7284_vm12, %v1948_v41, %v3672_v54  ;;  %v1910_v40 = vsel %vm7524_vm9, %v1896_v12, %v3547_v39  ;;  %v1899_v62 = vsel %vm7285_vm7, %v7527_v60, %v3523_v11  ;;  %v7531_v5 = vld [vmem:[#allocation55_spill] sm:$0xff]  ;;  %v4211_v59 = vpop.permute.xlu0 %4210  ;;  %v7536_v41 = vld [vmem:[#allocation50_spill] sm:$0xff] }
 0x289   : > { %v1963_v32 = vsel %vm7284_vm12, %v1949_v61, %v3673_v9  ;;  %vm7525_vm12 = vmmov %vm7503_vm3  ;;  %v1976_v47 = vsel %vm1971_vm13, %v1962_v53, %v3707_v58  ;;  %v3573_v31 = vunpack.i.h.bf16 %v7530_v21  ;;  %v3572_v33 = vunpack.i.l.bf16 %v7530_v21  ;;  %v7544_v21 = vld [vmem:[#allocation60_spill] sm:$0xff] }
 0x28a   : > { %v1911_v35 = vsel %vm7525_vm12, %v1897_v46, %v3548_v52  ;;  %v1977_v42 = vsel %vm1971_vm13, %v1963_v32, %v3708_v16  ;;  %v1990_v8 = vsel %vm1985_vm14, %v1976_v47, %v3742_v20  ;;  %v1898_v46 = vsel %vm7285_vm7, %v7528_v3, %v3522_v10  ;;  %v7538_v32 = vld [vmem:[#allocation56_spill] sm:$0xff]  ;;  %v7539_v10 = vld [vmem:[#allocation58_spill] sm:$0xff]  ;;  %v7543_v3 = vld [vmem:[#allocation59_spill] sm:$0xff] }
 0x28b   : > { %v1991_v43 = vsel %vm1985_vm14, %v1977_v42, %v3743_v56  ;;  %vm7529_vm12 = vcmask 97280   ;;  %v3607_v51 = vunpack.i.l.bf16 %v7531_v5  ;;  %v2004_v63 = vsel %vm1999_vm15, %v1990_v8, %v3777_v37 }
 0x28c   : > { %v1924_v12 = vsel %vm7529_vm12, %v1910_v40, %v3577_v7  ;;  %vm7532_vm8 = vmmov %vm7529_vm12  ;;  %v2005_v14 = vsel %vm1999_vm15, %v1991_v43, %v3778_v29  ;;  %v3848_v9 = vunpack.i.h.bf16 %v6028_v44  ;;  %v3847_v54 = vunpack.i.l.bf16 %v6028_v44  ;;  %v7537_v44 = vld [vmem:[#allocation57_spill] sm:$0xff]  ;;  %v6850_v8 = vpop.permute.xlu0 %4220 }
 0x28d   : > { %v1925_v1 = vsel %vm7532_vm8, %v1911_v35, %v3578_v18  ;;  %v2018_v28 = vsel %vm2013_vm1, %v2004_v63, %v3812_v23  ;;  %v2019_v2 = vsel %vm2013_vm1, %v2005_v14, %v3813_v34  ;;  %v4208_v49 = vunpack.i.h.bf16 %v4206_v48  ;;  %vm7533_vm3 = vmmov %vm7532_vm8  ;;  %v7545_v63 = vld [vmem:[#allocation67_spill] sm:$0xff] }
 0x28e   : > { %v1928_v55 = vsel %vm7533_vm3, %v1914_v22, %v3582_v57  ;;  %v3608_v27 = vunpack.i.h.bf16 %v7531_v5  ;;  %v4213_v36 = vunpack.i.h.bf16 %v4211_v59  ;;  %v4212_v6 = vunpack.i.l.bf16 %v4211_v59  ;;  %vm7534_vm9 = vmmov %vm7533_vm3 }
 0x28f   : > { %v1922_v52 = vsel %vm7534_vm9, %v1908_v4, %v3572_v33  ;;  %vm7535_vm12 = vmmov %vm7533_vm3  ;;  %v3603_v61 = vunpack.i.h.bf16 %v7536_v41  ;;  %v3612_v45 = vunpack.i.l.bf16 %v7537_v44  ;;  %v3602_v16 = vunpack.i.l.bf16 %v7536_v41 }
 0x290   : > { %v1923_v39 = vsel %vm7535_vm12, %v1909_v15, %v3573_v31  ;;  %v1938_v58 = vsel %vm1929_vm10, %v1924_v12, %v3607_v51  ;;  %v2032_v53 = vsel %vm2027_vm0, %v2018_v28, %v3847_v54  ;;  %v2033_v22 = vsel %vm2027_vm0, %v2019_v2, %v3848_v9  ;;  %v4226_v15 = vpop.permute.xlu1 %4225  ;;  %v7548_v28 = vld [vmem:[#allocation62_spill] sm:$0xff] }
 0x291   : > { %v3638_v19 = vunpack.i.h.bf16 %v7538_v32  ;;  %v3637_v56 = vunpack.i.l.bf16 %v7538_v32  ;;  %v2046_v20 = vsel %vm2041_vm2, %v2032_v53, %v4207_v17  ;;  %v2047_v26 = vsel %vm2041_vm2, %v2033_v22, %v4208_v49  ;;  %v7549_v17 = vld [vmem:[#allocation63_spill] sm:$0xff] }
 0x292   : > { %v1939_v11 = vsel %vm1929_vm10, %v1925_v1, %v3608_v27  ;;  %v3642_v4 = vunpack.i.l.bf16 %v7539_v10  ;;  %v2060_v48 = vsel %vm2055_vm4, %v2046_v20, %v4212_v6  ;;  %v2061_v30 = vsel %vm2055_vm4, %v2047_v26, %v4213_v36  ;;  %v6873_v27 = vpop.permute.xlu0 %4230 }
 0x293   : > { %v1942_v18 = vsel %vm1929_vm10, %v1928_v55, %v3612_v45  ;;  %vm7540_vm8 = vcmask 64512   ;;  %v4218_v40 = vunpack.i.h.bf16 %v4216_v24  ;;  %v4217_v35 = vunpack.i.l.bf16 %v4216_v24 }
 0x294   : > { %v1912_v7 = vsel %vm7540_vm8, %v1898_v46, %v3552_v50  ;;  %v1936_v47 = vsel %vm1929_vm10, %v1922_v52, %v3602_v16  ;;  %v1937_v42 = vsel %vm1929_vm10, %v1923_v39, %v3603_v61  ;;  %v3647_v29 = vunpack.i.l.bf16 %v7541_v13  ;;  %vm7542_vm3 = vmmov %vm7540_vm8  ;;  %v7551_v16 = vld [vmem:[#allocation68_spill] sm:$0xff] }
 0x295   : > { %v1913_v37 = vsel %vm7542_vm3, %v1899_v62, %v3553_v25  ;;  %v1952_v43 = vsel %vm1943_vm11, %v1938_v58, %v3637_v56  ;;  %v1953_v34 = vsel %vm1943_vm11, %v1939_v11, %v3638_v19  ;;  %v2074_v50 = vsel %vm2069_vm5, %v2060_v48, %v4217_v35  ;;  %vm7550_vm3 = vmmov %vm7534_vm9  ;;  %v7555_v19 = vld [vmem:[#allocation78_spill] sm:$0xff] }
 0x296   : > { %v2075_v23 = vsel %vm2069_vm5, %v2061_v30, %v4218_v40  ;;  %v6857_v60 = vsel %vm1943_vm11, %v1942_v18, %v3642_v4  ;;  %v3652_v46 = vunpack.i.l.bf16 %v7543_v3  ;;  %v4228_v57 = vunpack.i.h.bf16 %v4226_v15  ;;  %v7559_v30 = vld [vmem:[#allocation64_spill] sm:$0xff] }
 0x297   : > { %v4227_v12 = vunpack.i.l.bf16 %v4226_v15  ;;  %v3632_v25 = vunpack.i.l.bf16 %v7544_v21  ;;  %v3648_v62 = vunpack.i.h.bf16 %v7541_v13  ;;  %v3633_v5 = vunpack.i.h.bf16 %v7544_v21  ;;  %v7560_v40 = vld [vmem:[#allocation72_spill] sm:$0xff]  ;;  %v7561_v13 = vld [vmem:[#allocation79_spill] sm:$0xff] }
 0x298   : > { %v1926_v51 = vsel %vm7534_vm9, %v1912_v7, %v3647_v29  ;;  %v2089_v59 = vsel %vm7286_vm6, %v2075_v23, %v4228_v57  ;;  %v3683_v14 = vunpack.i.h.bf16 %v7545_v63  ;;  %v3682_v9 = vunpack.i.l.bf16 %v7545_v63  ;;  %v7562_v23 = vld [vmem:[#allocation87_spill] sm:$0xff]  ;;  %v7563_v57 = vld [vmem:[#allocation30_spill] sm:$0xff] }
 0x299   : > { %v2088_v1 = vsel %vm7286_vm6, %v2074_v50, %v4227_v12  ;;  %vm7546_vm12 = vcmask 523264   ;;  %v3678_v2 = vunpack.i.h.bf16 %v7548_v28  ;;  %v3677_v49 = vunpack.i.l.bf16 %v7548_v28 }
 0x29a   : > { %vm7547_vm8 = vmmov %vm7546_vm12  ;;  %v3657_v55 = vunpack.i.l.bf16 %v7549_v17  ;;  %v3653_v52 = vunpack.i.h.bf16 %v7543_v3  ;;  %v1950_v39 = vsel %vm1943_vm11, %v1936_v47, %v3632_v25  ;;  %v1927_v41 = vsel %vm7550_vm3, %v1913_v37, %v3648_v62 }
 0x29b   : > { %v3658_v61 = vunpack.i.h.bf16 %v7549_v17  ;;  %v1951_v44 = vsel %vm1943_vm11, %v1937_v42, %v3633_v5  ;;  %v1940_v45 = vsel %vm1929_vm10, %v1926_v51, %v3652_v46  ;;  %v3718_v58 = vunpack.i.h.bf16 %v7551_v16 }
 0x29c   : > { %v3717_v53 = vunpack.i.l.bf16 %v7551_v16  ;;  %vm7552_vm9 = vcmask 883712   ;;  %v3753_v56 = vunpack.i.h.bf16 %v7555_v19  ;;  %v3752_v20 = vunpack.i.l.bf16 %v7555_v19 }
 0x29d   : > { %vm7556_vm3 = vmmov 0   ;;  %v1941_v10 = vsel %vm1929_vm10, %v1927_v41, %v3653_v52  ;;  %v1954_v4 = vsel %vm1943_vm11, %v1940_v45, %v3657_v55  ;;  %v3688_v18 = vunpack.i.h.bf16 %v7559_v30 }
 0x29e   : > { %v1955_v48 = vsel %vm1943_vm11, %v1941_v10, %v3658_v61  ;;  %v3687_v7 = vunpack.i.l.bf16 %v7559_v30  ;;  %v3712_v35 = vunpack.i.l.bf16 %v7560_v40  ;;  %v3788_v29 = vunpack.i.h.bf16 %v7561_v13 }
 0x29f   : > { %v3787_v37 = vunpack.i.l.bf16 %v7561_v13  ;;  %v3823_v3 = vunpack.i.h.bf16 %v7562_v23  ;;  %v3822_v46 = vunpack.i.l.bf16 %v7562_v23  ;;  %v3692_v12 = vunpack.i.l.bf16 %v7563_v57 }
 0x2a0   : > { %v4223_v21 = vunpack.i.h.bf16 %v6850_v8  ;;  %v4222_v25 = vunpack.i.l.bf16 %v6850_v8  ;;  %v4233_v51 = vunpack.i.h.bf16 %v6873_v27  ;;  %vm7570_vm11 = vcmask 490496  }
 0x2a3   : > { %v4236_v38 = vpop.permute.xlu1 %4235 }
 0x2a4   : > { %v4238_v31 = vunpack.i.h.bf16 %v4236_v38  ;;  %v4237_v33 = vunpack.i.l.bf16 %v4236_v38  ;;  %v3713_v38 = vunpack.i.h.bf16 %v7560_v40 }
 0x2a6   : > { %v2873_v54 = vsel %vm7546_vm12, %v2088_v1, %v4237_v33  ;;  %v2874_v24 = vsel %vm7547_vm8, %v2089_v59, %v4238_v31  ;;  %vm7553_vm12 = vcmask 195584   ;;  %v7564_v33 = vld [vmem:[#allocation73_spill] sm:$0xff]  ;;  %v4232_v1 = vunpack.i.l.bf16 %v6873_v27 }
 0x2a7   : > { %v2884_v36 = vpack.c.bf16 %v2874_v24, %v2873_v54  ;;  %v1966_v22 = vsel %vm7553_vm12, %v1952_v43, %v3682_v9  ;;  %vm7554_vm8 = vmmov %vm7553_vm12  ;;  %v4241_v43 = vpop.permute.xlu0 %4240  ;;  %v3747_v5 = vunpack.i.l.bf16 %v7564_v33  ;;  %vm7573_vm12 = vcmask 523264  }
 0x2a8   : > { %v6875_v6 = vpop.permute.xlu1 %4245  ;;  %v1967_v32 = vsel %vm7554_vm8, %v1953_v34, %v3683_v14  ;;  %vm7557_vm7 = vmmov %vm7554_vm8  ;;  %v1980_v47 = vsel %vm1971_vm13, %v1966_v22, %v3717_v53  ;;  %v4243_v14 = vunpack.i.h.bf16 %v4241_v43  ;;  %v4242_v9 = vunpack.i.l.bf16 %v4241_v43 }
 0x2a9   : > { %3385 = vmatmul.mubr.msk.bf16.gmra.mrb[8].mxu0 %vm7552_vm9, %v2884_v36  ;;  %v1964_v26 = vsel %vm7557_vm7, %v1950_v39, %v3677_v49  ;;  %vm7558_vm6 = vmmov %vm7557_vm7  ;;  %v1981_v42 = vsel %vm1971_vm13, %v1967_v32, %v3718_v58  ;;  %v1994_v34 = vsel %vm1985_vm14, %v1980_v47, %v3752_v20  ;;  %v4248_v24 = vunpack.i.h.bf16 %v6875_v6  ;;  %v7565_v49 = vld [vmem:[#allocation74_spill] sm:$0xff] }
 0x2aa   : > { %3388 = vmatprep.mubr.msk.bf16.mxu0 %vm7556_vm3, %v7458_v0  ;;  %v1965_v11 = vsel %vm7558_vm6, %v1951_v44, %v3678_v2  ;;  %v1995_v50 = vsel %vm1985_vm14, %v1981_v42, %v3753_v56  ;;  %v1978_v31 = vsel %vm1971_vm13, %v1964_v26, %v3712_v35  ;;  %v2008_v59 = vsel %vm1999_vm15, %v1994_v34, %v3787_v37  ;;  %vm7566_vm7 = vmmov %vm7558_vm6  ;;  %v7569_v35 = vld [vmem:[#allocation75_spill] sm:$0xff]  ;;  %v7572_v37 = vld [vmem:[#allocation84_spill] sm:$0xff] }
 0x2ab   : > { %v2009_v63 = vsel %vm1999_vm15, %v1995_v50, %v3788_v29  ;;  %v2022_v54 = vsel %vm2013_vm1, %v2008_v59, %v3822_v46  ;;  %v4247_v28 = vunpack.i.l.bf16 %v6875_v6  ;;  %v3748_v2 = vunpack.i.h.bf16 %v7564_v33  ;;  %v4251_v36 = vpop.permute.xlu0 %4250  ;;  %vm7567_vm10 = vmmov %vm7558_vm6 }
 0x2ac   : > { %v6896_v15 = vpop.permute.xlu1 %4255  ;;  %v2023_v8 = vsel %vm2013_vm1, %v2009_v63, %v3823_v3  ;;  %v3722_v17 = vunpack.i.l.bf16 %v7565_v49  ;;  %v2036_v55 = vsel %vm2027_vm0, %v2022_v54, %v4222_v25  ;;  %v1968_v39 = vsel %vm7558_vm6, %v1954_v4, %v3687_v7  ;;  %v7568_v4 = vld [vmem:[#allocation83_spill] sm:$0xff]  ;;  %vm7571_vm9 = vmmov %vm7570_vm11  ;;  %v7575_v3 = vld [vmem:[#allocation85_spill] sm:$0xff] }
 0x2ad   : > { %v2037_v27 = vsel %vm2027_vm0, %v2023_v8, %v4223_v21  ;;  %v1979_v41 = vsel %vm1971_vm13, %v1965_v11, %v3713_v38  ;;  %v2050_v61 = vsel %vm2041_vm2, %v2036_v55, %v4232_v1  ;;  %v1969_v6 = vsel %vm7566_vm7, %v1955_v48, %v3688_v18  ;;  %vm7574_vm8 = vmmov %vm7573_vm12  ;;  %v7579_v54 = vld [vmem:[#allocation80_spill] sm:$0xff] }
 0x2ae   : > { %v2051_v44 = vsel %vm2041_vm2, %v2037_v27, %v4233_v51  ;;  %v3723_v45 = vunpack.i.h.bf16 %v7565_v49  ;;  %v2064_v16 = vsel %vm2055_vm4, %v2050_v61, %v4242_v9  ;;  %v6942_v53 = vsel %vm7567_vm10, %v6857_v60, %v3692_v12  ;;  %v7577_v51 = vld [vmem:[#allocation69_spill] sm:$0xff]  ;;  %vm7581_vm7 = vmmov %vm7571_vm9 }
 0x2af   : > { %v2065_v58 = vsel %vm2055_vm4, %v2051_v44, %v4243_v14  ;;  %v1992_v22 = vsel %vm1985_vm14, %v1978_v31, %v3747_v5  ;;  %v2078_v32 = vsel %vm2069_vm5, %v2064_v16, %v4247_v28  ;;  %v1993_v56 = vsel %vm1985_vm14, %v1979_v41, %v3748_v2  ;;  %v7576_v31 = vld [vmem:[#allocation89_spill] sm:$0xff]  ;;  %v7580_v16 = vld [vmem:[#allocation86_spill] sm:$0xff]  ;;  %vm7582_vm10 = vmmov %vm7581_vm7 }
 0x2b0   : > { %v6914_v62 = vpop.permute.xlu1 %4265  ;;  %v2079_v19 = vsel %vm2069_vm5, %v2065_v58, %v4248_v24  ;;  %v1982_v20 = vsel %vm1971_vm13, %v1968_v39, %v3722_v17  ;;  %v4253_v26 = vunpack.i.h.bf16 %v4251_v36  ;;  %v4252_v11 = vunpack.i.l.bf16 %v4251_v36 }
 0x2b1   : > { %v3783_v48 = vunpack.i.h.bf16 %v7568_v4  ;;  %v3782_v30 = vunpack.i.l.bf16 %v7568_v4  ;;  %v1983_v40 = vsel %vm1971_vm13, %v1969_v6, %v3723_v45  ;;  %v3757_v47 = vunpack.i.l.bf16 %v7569_v35 }
 0x2b2   : > { %v2092_v42 = vsel %vm7570_vm11, %v2078_v32, %v4252_v11  ;;  %v2093_v13 = vsel %vm7571_vm9, %v2079_v19, %v4253_v26  ;;  %v3758_v29 = vunpack.i.h.bf16 %v7569_v35  ;;  %v3818_v43 = vunpack.i.h.bf16 %v7572_v37  ;;  %vm7583_vm11 = vmmov %vm7574_vm8 }
 0x2b3   : > { %v3817_v23 = vunpack.i.l.bf16 %v7572_v37  ;;  %v3793_v46 = vunpack.i.h.bf16 %v7575_v3  ;;  %v3792_v57 = vunpack.i.l.bf16 %v7575_v3  ;;  %v2006_v21 = vsel %vm1999_vm15, %v1992_v22, %v3782_v30  ;;  %vm7584_vm9 = vmmov %vm7574_vm8 }
 0x2b4   : > { %v6930_v52 = vpop.permute.xlu1 %4275  ;;  %v2007_v25 = vsel %vm1999_vm15, %v1993_v56, %v3783_v48  ;;  %v3853_v33 = vunpack.i.h.bf16 %v7576_v31  ;;  %v3852_v5 = vunpack.i.l.bf16 %v7576_v31  ;;  %v3727_v1 = vunpack.i.l.bf16 %v7577_v51 }
 0x2b5   : > { %v1996_v59 = vsel %vm1985_vm14, %v1982_v20, %v3757_v47  ;;  %v4258_v63 = vunpack.i.h.bf16 %v6896_v15  ;;  %v4257_v14 = vunpack.i.l.bf16 %v6896_v15  ;;  %vm7578_vm6 = vcmask 883712  }
 0x2b6   : > { %v1997_v9 = vsel %vm1985_vm14, %v1983_v40, %v3758_v29  ;;  %v3762_v8 = vunpack.i.l.bf16 %v7579_v54  ;;  %v4268_v24 = vunpack.i.h.bf16 %v6914_v62  ;;  %v4267_v28 = vunpack.i.l.bf16 %v6914_v62 }
 0x2b7   : > { %v4261_v10 = vpop.permute.xlu0 %4260  ;;  %v2020_v49 = vsel %vm2013_vm1, %v2006_v21, %v3817_v23  ;;  %v2021_v17 = vsel %vm2013_vm1, %v2007_v25, %v3818_v43  ;;  %v2010_v15 = vsel %vm1999_vm15, %v1996_v59, %v3792_v57  ;;  %v2011_v55 = vsel %vm1999_vm15, %v1997_v9, %v3793_v46 }
 0x2b8   : > { %v4263_v18 = vunpack.i.h.bf16 %v4261_v10  ;;  %v4262_v60 = vunpack.i.l.bf16 %v4261_v10  ;;  %v6951_v7 = vpop.permute.xlu1 %4285  ;;  %v2034_v36 = vsel %vm2027_vm0, %v2020_v49, %v3852_v5  ;;  %v2035_v39 = vsel %vm2027_vm0, %v2021_v17, %v3853_v33  ;;  %v7587_v5 = vld [vmem:[#allocation88_spill] sm:$0xff] }
 0x2b9   : > { %v2048_v62 = vsel %vm2041_vm2, %v2034_v36, %v4257_v14  ;;  %v2049_v44 = vsel %vm2041_vm2, %v2035_v39, %v4258_v63  ;;  %v3828_v58 = vunpack.i.h.bf16 %v7580_v16  ;;  %v3827_v22 = vunpack.i.l.bf16 %v7580_v16 }
 0x2ba   : > { %v2877_v34 = vsel %vm7573_vm12, %v2092_v42, %v4262_v60  ;;  %v2878_v50 = vsel %vm7574_vm8, %v2093_v13, %v4263_v18  ;;  %v2062_v32 = vsel %vm2055_vm4, %v2048_v62, %v4267_v28  ;;  %v2063_v19 = vsel %vm2055_vm4, %v2049_v44, %v4268_v24  ;;  %vm7586_vm12 = vmmov %vm7578_vm6 }
 0x2bb   : > { %v2886_v12 = vpack.c.bf16 %v2878_v50, %v2877_v34  ;;  %v4271_v38 = vpop.permute.xlu0 %4270  ;;  %v4278_v56 = vunpack.i.h.bf16 %v6930_v52  ;;  %v4277_v20 = vunpack.i.l.bf16 %v6930_v52  ;;  %v4288_v26 = vunpack.i.h.bf16 %v6951_v7  ;;  %vm7589_vm8 = vmmov %vm7581_vm7 }
 0x2bc   : > { %v4296_v2 = vpop.permute.xlu1 %4295  ;;  %v4273_v41 = vunpack.i.h.bf16 %v4271_v38  ;;  %v4272_v61 = vunpack.i.l.bf16 %v4271_v38  ;;  %v4287_v11 = vunpack.i.l.bf16 %v6951_v7  ;;  %v2024_v52 = vsel %vm2013_vm1, %v2010_v15, %v3827_v22  ;;  %v7585_v38 = vld [vmem:[#allocation81_spill] sm:$0xff] }
 0x2bd   : > { %3393 = vmatmul.mubr.msk.bf16.vlgmr.msra.gmra.mrb[0].mxu1 %vm7578_vm6, %v2886_v12  ;;  %v4298_v40 = vunpack.i.h.bf16 %v4296_v2  ;;  %v4297_v35 = vunpack.i.l.bf16 %v4296_v2  ;;  %v2025_v13 = vsel %vm2013_vm1, %v2011_v55, %v3828_v58  ;;  %v2038_v37 = vsel %vm2027_vm0, %v2024_v52, %v4277_v20  ;;  %vm7591_vm6 = vmmov %vm7584_vm9  ;;  %v7605_v52 = vld [vmem:[#allocation3_spill] sm:$0xff] }
 0x2be   : > { %3396 = vmatprep.mubr.msk.bf16.mxu1 %vm7556_vm3, %v7458_v0  ;;  %v2076_v4 = vsel %vm2069_vm5, %v2062_v32, %v4272_v61  ;;  %v2077_v48 = vsel %vm2069_vm5, %v2063_v19, %v4273_v41  ;;  %v2039_v43 = vsel %vm2027_vm0, %v2025_v13, %v4278_v56  ;;  %v2052_v23 = vsel %vm2041_vm2, %v2038_v37, %v4287_v11  ;;  %v7597_v32 = vld [vmem:[#allocation2_spill] sm:$0xff]  ;;  %v7599_v11 = vld [vmem:[#allocation4_spill] sm:$0xff] }
 0x2bf   : > { %v4281_v27 = vpop.permute.xlu0 %4280  ;;  %v2053_v3 = vsel %vm2041_vm2, %v2039_v43, %v4288_v26  ;;  %v1984_v12 = vsel %vm1971_vm13, %v6942_v53, %v3727_v1  ;;  %v3797_v21 = vunpack.i.l.bf16 %v7585_v38  ;;  %v2066_v25 = vsel %vm2055_vm4, %v2052_v23, %v4297_v35  ;;  %vm7588_vm13 = vmmov %vm7581_vm7 }
 0x2c0   : > { %v4283_v6 = vunpack.i.h.bf16 %v4281_v27  ;;  %v4282_v45 = vunpack.i.l.bf16 %v4281_v27  ;;  %v4306_v30 = vpop.permute.xlu1 %4305  ;;  %v2067_v31 = vsel %vm2055_vm4, %v2053_v3, %v4298_v40  ;;  %v1998_v33 = vsel %vm1985_vm14, %v1984_v12, %v3762_v8  ;;  %vm7590_vm14 = vmmov %vm7584_vm9 }
 0x2c1   : > { %v3832_v51 = vunpack.i.l.bf16 %v7587_v5  ;;  %v4308_v9 = vunpack.i.h.bf16 %v4306_v30  ;;  %v4307_v54 = vunpack.i.l.bf16 %v4306_v30  ;;  %v2012_v28 = vsel %vm1999_vm15, %v1998_v33, %v3797_v21  ;;  %vm7592_vm15 = vmmov %vm7586_vm12  ;;  %v7613_v5 = vld [vmem:[#allocation5_spill] sm:$0xff] }
 0x2c2   : > { %v2090_v47 = vsel %vm7581_vm7, %v2076_v4, %v4282_v45  ;;  %v2091_v42 = vsel %vm7582_vm10, %v2077_v48, %v4283_v6 }
 0x2c3   : > { %v4291_v10 = vpop.permute.xlu0 %4290  ;;  %v2026_v8 = vsel %vm2013_vm1, %v2012_v28, %v3832_v51  ;;  %vm7593_vm1 = vmmov %vm7581_vm7 }
 0x2c4   : > { %v4293_v18 = vunpack.i.h.bf16 %v4291_v10  ;;  %v4292_v60 = vunpack.i.l.bf16 %v4291_v10  ;;  %v1686_v59 = vpop.permute.xlu1 %1685  ;;  %vm7595_vm7 = vmmov %vm7586_vm12 }
 0x2c5   : > { %v2040_v55 = vsel %vm2027_vm0, %v2026_v8, %v1686_v59  ;;  %vm7594_vm0 = vmmov %vm7591_vm6 }
 0x2c6   : > { %v2875_v7 = vsel %vm7583_vm11, %v2090_v47, %v4292_v60  ;;  %v2876_v29 = vsel %vm7584_vm9, %v2091_v42, %v4293_v18 }
 0x2c7   : > { %v2885_v34 = vpack.c.bf16 %v2876_v29, %v2875_v7  ;;  %v4301_v50 = vpop.permute.xlu0 %4300 }
 0x2c8   : > { %v4303_v46 = vunpack.i.h.bf16 %v4301_v50  ;;  %v4302_v57 = vunpack.i.l.bf16 %v4301_v50  ;;  %v1795_v39 = vpop.permute.xlu1 %1794 }
 0x2c9   : > { %3389 = vmatmul.mubr.msk.bf16.gmra.mrb[12].mxu0 %vm7586_vm12, %v2885_v34  ;;  %v7608_v34 = vld [vmem:[#allocation6_spill] sm:$0xff] }
 0x2ca   : > { %v2080_v63 = vsel %vm2069_vm5, %v2066_v25, %v4302_v57  ;;  %v2081_v14 = vsel %vm2069_vm5, %v2067_v31, %v4303_v46 }
 0x2cb   : > { %v4311_v53 = vpop.permute.xlu0 %4310  ;;  %v2094_v2 = vsel %vm7588_vm13, %v2080_v63, %v4307_v54  ;;  %v2095_v49 = vsel %vm7589_vm8, %v2081_v14, %v4308_v9  ;;  %v7616_v54 = vld [vmem:[#allocation9_spill] sm:$0xff] }
 0x2cc   : > { %v4313_v1 = vunpack.i.h.bf16 %v4311_v53  ;;  %v4312_v24 = vunpack.i.l.bf16 %v4311_v53  ;;  %v1873_v6 = vpop.permute.xlu1 %1872 }
 0x2ce   : > { %v2879_v17 = vsel %vm7590_vm14, %v2094_v2, %v4312_v24  ;;  %v2880_v15 = vsel %vm7591_vm6, %v2095_v49, %v4313_v1 }
 0x2cf   : > { %v2887_v27 = vpack.c.bf16 %v2880_v15, %v2879_v17  ;;  %v1728_v36 = vpop.permute.xlu0 %1727 }
 0x2d0   : > { %v2054_v41 = vsel %vm2041_vm2, %v2040_v55, %v1728_v36  ;;  %vm7596_vm2 = vcmask 31744  }
 0x2d1   : > { %3397 = vmatmul.mubr.msk.bf16.gmra.mrb[4].mxu1 %vm7592_vm15, %v2887_v27  ;;  %v2068_v62 = vsel %vm2055_vm4, %v2054_v41, %v1795_v39  ;;  %vm7598_vm4 = vmmov %vm7596_vm2 }
 0x2d2   : > { %3400 = vmatprep.mubr.msk.bf16.mxu1 %vm7556_vm3, %v7458_v0  ;;  %vm7601_vm3 = vmmov %vm7596_vm2 }
 0x2d3   : > { %v1834_v61 = vpop.permute.xlu0 %1833  ;;  %vm7602_vm10 = vmmov %vm7596_vm2 }
 0x2d4   : > { %v2082_v44 = vsel %vm2069_vm5, %v2068_v62, %v1834_v61  ;;  %vm7600_vm5 = vmmov %vm7596_vm2  ;;  %v7622_v62 = vld [vmem:[#allocation14_spill] sm:$0xff] }
 0x2d5   : > { %v2096_v16 = vsel %vm7593_vm1, %v2082_v44, %v1873_v6  ;;  %vm7603_vm11 = vmmov %vm7596_vm2  ;;  %v7624_v6 = vld [vmem:[#allocation8_spill] sm:$0xff] }
 0x2d6   : > { %vm7604_vm9 = vmmov %vm7596_vm2 }
 0x2d7   : > { %v2854_v45 = vpop.permute.xlu0 %2853  ;;  %vm7606_vm12 = vmmov %vm7596_vm2 }
 0x2d8   : > { %v2881_v58 = vsel %vm7594_vm0, %v2096_v16, %v2854_v45  ;;  %vm7607_vm13 = vmmov %vm7596_vm2 }
 0x2d9   : > { %v2888_v22 = vpack.c.bf16 %v2881_v58, %v2881_v58  ;;  %vm7609_vm8 = vmmov %vm7596_vm2 }
 0x2da   : > { %vm7610_vm14 = vmmov %vm7596_vm2 }
 0x2db   : > { %3401 = vmatmul.mubr.msk.bf16.gmra.mrb[8].mxu1 %vm7595_vm7, %v2888_v22  ;;  %vm7611_vm6 = vmmov %vm7596_vm2  ;;  %v7625_v22 = vld [vmem:[#allocation20_spill] sm:$0xff] }
 0x2dc   : > { %vm7612_vm15 = vmmov %vm7596_vm2 }
 0x2dd   : > { %vm7614_vm1 = vmmov %vm7596_vm2 }
 0x2de   : > { %vm7615_vm0 = vmmov %vm7614_vm1 }
 0x2df   : > { %vm7617_vm7 = vmmov %vm7615_vm0 }
 0x340   : > { %v3003_v0 = vpop.f32.mrb[0].mxu0 }
 0x341   : > { %3057 = vst.msk [vmem:[%s7046_s15] sm:$0xff] %vm7596_vm2, %v3003_v0  ;;  %v3071_v19 = vmul.f32 %v3003_v0, %v7597_v32  ;;  %v3378_v56 = vpop.f32.mrb[1].mxu0  ;;  %vm7618_vm2 = vmmov %vm7615_vm0 }
 0x342   : > { %v3006_v20 = vpop.f32.mrb[2].mxu0  ;;  %v7628_v56 = vld [vmem:[#allocation15_spill] sm:$0xff] }
 0x343   : > { %v3115_v26 = vmul.f32 %v3071_v19, %v3003_v0  ;;  %3058 = vst.msk [vmem:[%s7046_s15 + $0x8] sm:$0xff] %vm7598_vm4, %v3006_v20  ;;  %v3072_v10 = vmul.f32 %v3006_v20, %v7599_v11  ;;  %v3379_v4 = vpop.f32.mrb[3].mxu0  ;;  %v3084_v48 = vsel %vm7600_vm5, %v3071_v19, 0.0  ;;  %vm7619_vm4 = vmmov %vm7615_vm0 }
 0x344   : > { %vm7620_vm5 = vmmov %vm7615_vm0 }
 0x345   : > { %v3085_v30 = vsel %vm7601_vm3, %v3072_v10, 0.0  ;;  %v3116_v18 = vmul.f32 %v3072_v10, %v3006_v20  ;;  %v3128_v40 = vsel %vm7602_vm10, %v3115_v26, 0.0  ;;  %vm7621_vm3 = vmmov %vm7615_vm0 }
 0x346   : > { %v3086_v60 = vadd.f32 %v3085_v30, %v3084_v48  ;;  %vm7623_vm10 = vmmov %vm7615_vm0 }
 0x347   : > { %v3129_v35 = vsel %vm7603_vm11, %v3116_v18, 0.0  ;;  %vm7626_vm11 = vmmov %vm7615_vm0 }
 0x348   : > { %v3130_v47 = vadd.f32 %v3129_v35, %v3128_v40 }
 0x354   : > { %v3011_v42 = vpop.f32.mrb[4].mxu0 }
 0x355   : > { %3059 = vst.msk [vmem:[%s7046_s15 + $0x10] sm:$0xff] %vm7604_vm9, %v3011_v42  ;;  %v3073_v13 = vmul.f32 %v3011_v42, %v7605_v52  ;;  %v3382_v7 = vpop.f32.mrb[5].mxu0  ;;  %vm7627_vm9 = vmmov %vm7615_vm0 }
 0x356   : > { %v3014_v29 = vpop.f32.mrb[6].mxu0 }
 0x357   : > { %v3087_v37 = vsel %vm7606_vm12, %v3073_v13, 0.0  ;;  %v3117_v43 = vmul.f32 %v3073_v13, %v3011_v42  ;;  %3060 = vst.msk [vmem:[%s7046_s15 + $0x18] sm:$0xff] %vm7607_vm13, %v3014_v29  ;;  %v3074_v50 = vmul.f32 %v3014_v29, %v7608_v34  ;;  %v3383_v23 = vpop.f32.mrb[7].mxu0  ;;  %vm7629_vm12 = vmmov %vm7615_vm0 }
 0x358   : > { %v3088_v3 = vadd.f32 %v3087_v37, %v3086_v60  ;;  %vm7630_vm13 = vmmov %vm7615_vm0  ;;  %v7636_v37 = vld [vmem:[#allocation19_spill] sm:$0xff] }
 0x359   : > { %v3131_v46 = vsel %vm7609_vm8, %v3117_v43, 0.0  ;;  %v3089_v57 = vsel %vm7610_vm14, %v3074_v50, 0.0  ;;  %v3118_v12 = vmul.f32 %v3074_v50, %v3014_v29  ;;  %vm7631_vm8 = vmmov %vm7615_vm0 }
 0x35a   : > { %v3132_v38 = vadd.f32 %v3131_v46, %v3130_v47  ;;  %v3090_v21 = vadd.f32 %v3089_v57, %v3088_v3  ;;  %vm7632_vm14 = vmmov %vm7615_vm0 }
 0x35b   : > { %v3133_v25 = vsel %vm7611_vm6, %v3118_v12, 0.0  ;;  %vm7633_vm6 = vmmov %vm7615_vm0 }
 0x35c   : > { %v3134_v31 = vadd.f32 %v3133_v25, %v3132_v38  ;;  %v7639_v38 = vld [vmem:[#allocation24_spill] sm:$0xff] }
 0x37c   : > { %v3019_v33 = vpop.f32.mrb[8].mxu0 }
 0x37d   : > { %3061 = vst.msk [vmem:[%s7046_s15 + $0x20] sm:$0xff] %vm7612_vm15, %v3019_v33  ;;  %v3075_v51 = vmul.f32 %v3019_v33, %v7613_v5  ;;  %v3386_v59 = vpop.f32.mrb[9].mxu0  ;;  %vm7634_vm15 = vmmov %vm7615_vm0 }
 0x37e   : > { %v3022_v63 = vpop.f32.mrb[10].mxu0 }
 0x37f   : > { %v3091_v14 = vsel %vm7614_vm1, %v3075_v51, 0.0  ;;  %v3119_v9 = vmul.f32 %v3075_v51, %v3019_v33  ;;  %3062 = vst.msk [vmem:[%s7046_s15 + $0x28] sm:$0xff] %vm7615_vm0, %v3022_v63  ;;  %v3076_v53 = vmul.f32 %v3022_v63, %v7616_v54  ;;  %v3387_v1 = vpop.f32.mrb[11].mxu0  ;;  %vm7635_vm1 = vmmov %vm7615_vm0 }
 0x380   : > { %v3092_v24 = vadd.f32 %v3091_v14, %v3090_v21  ;;  %v7643_v1 = vld [vmem:[#allocation23_spill] sm:$0xff] }
 0x381   : > { %v3135_v28 = vsel %vm7617_vm7, %v3119_v9, 0.0  ;;  %v3093_v2 = vsel %vm7618_vm2, %v3076_v53, 0.0  ;;  %v3120_v49 = vmul.f32 %v3076_v53, %v3022_v63  ;;  %vm7637_vm7 = vmmov %vm7615_vm0 }
 0x382   : > { %v3136_v8 = vadd.f32 %v3135_v28, %v3134_v31  ;;  %v3094_v17 = vadd.f32 %v3093_v2, %v3092_v24  ;;  %vm7638_vm2 = vmmov %vm7615_vm0 }
 0x383   : > { %v3137_v15 = vsel %vm7619_vm4, %v3120_v49, 0.0  ;;  %vm7640_vm4 = vmmov %vm7615_vm0 }
 0x384   : > { %v3138_v55 = vadd.f32 %v3137_v15, %v3136_v8 }
 0x390   : > { %v3035_v27 = vpop.f32.mrb[0].mxu1 }
 0x391   : > { %3065 = vst.msk [vmem:[%s7046_s15 + $0x40] sm:$0xff] %vm7620_vm5, %v3035_v27  ;;  %v3394_v36 = vpop.f32.mrb[1].mxu1  ;;  %v3079_v44 = vmul.f32 %v3035_v27, %v7622_v62  ;;  %vm7641_vm5 = vmmov %vm7615_vm0 }
 0x392   : > { %v3038_v39 = vpop.f32.mrb[2].mxu1 }
 0x393   : > { %3066 = vst.msk [vmem:[%s7046_s15 + $0x48] sm:$0xff] %vm7621_vm3, %v3038_v39  ;;  %v3395_v41 = vpop.f32.mrb[3].mxu1  ;;  %v3080_v0 = vmul.f32 %v3038_v39, %v7625_v22  ;;  %v3123_v10 = vmul.f32 %v3079_v44, %v3035_v27  ;;  %v3099_v40 = vsel %vm7631_vm8, %v3079_v44, 0.0  ;;  %vm7642_vm3 = vmmov %vm7615_vm0 }
 0x395   : > { %v3124_v35 = vmul.f32 %v3080_v0, %v3038_v39  ;;  %v3143_v7 = vsel %vm7633_vm6, %v3123_v10, 0.0  ;;  %v3101_v29 = vsel %vm7634_vm15, %v3080_v0, 0.0 }
 0x397   : > { %v3145_v46 = vsel %vm7615_vm0, %v3124_v35, 0.0 }
 0x39c   : > { %v3027_v61 = vpop.f32.mrb[12].mxu0 }
 0x39d   : > { %3063 = vst.msk [vmem:[%s7046_s15 + $0x30] sm:$0xff] %vm7623_vm10, %v3027_v61  ;;  %v3077_v45 = vmul.f32 %v3027_v61, %v7624_v6  ;;  %v3390_v16 = vpop.f32.mrb[13].mxu0  ;;  %vm3069_vm10 = vcmask 27648  }
 0x39e   : > { %v3030_v58 = vpop.f32.mrb[14].mxu0 }
 0x39f   : > { %v3095_v32 = vsel %vm7626_vm11, %v3077_v45, 0.0  ;;  %v3121_v19 = vmul.f32 %v3077_v45, %v3027_v61  ;;  %3064 = vst.msk [vmem:[%s7046_s15 + $0x38] sm:$0xff] %vm7627_vm9, %v3030_v58  ;;  %v3078_v20 = vmul.f32 %v3030_v58, %v7628_v56  ;;  %v3391_v26 = vpop.f32.mrb[15].mxu0  ;;  %vm3160_vm11 = vcmask 25600  }
 0x3a0   : > { %v3096_v11 = vadd.f32 %v3095_v32, %v3094_v17  ;;  %vm7644_vm9 = vcmask 1040384  }
 0x3a1   : > { %v3139_v4 = vsel %vm7629_vm12, %v3121_v19, 0.0  ;;  %v3097_v48 = vsel %vm7630_vm13, %v3078_v20, 0.0  ;;  %v3122_v30 = vmul.f32 %v3078_v20, %v3030_v58 }
 0x3a2   : > { %v3140_v18 = vadd.f32 %v3139_v4, %v3138_v55  ;;  %v3098_v60 = vadd.f32 %v3097_v48, %v3096_v11 }
 0x3a3   : > { %v3141_v47 = vsel %vm7632_vm14, %v3122_v30, 0.0 }
 0x3a4   : > { %v3100_v42 = vadd.f32 %v3099_v40, %v3098_v60  ;;  %v3142_v52 = vadd.f32 %v3141_v47, %v3140_v18  ;;  %v3043_v13 = vpop.f32.mrb[4].mxu1 }
 0x3a5   : > { %3067 = vst.msk [vmem:[%s7046_s15 + $0x50] sm:$0xff] %vm7635_vm1, %v3043_v13  ;;  %v3081_v43 = vmul.f32 %v3043_v13, %v7636_v37  ;;  %v3398_v34 = vpop.f32.mrb[5].mxu1 }
 0x3a6   : > { %v3144_v50 = vadd.f32 %v3143_v7, %v3142_v52  ;;  %v3102_v23 = vadd.f32 %v3101_v29, %v3100_v42  ;;  %v3046_v3 = vpop.f32.mrb[6].mxu1 }
 0x3a7   : > { %v3103_v57 = vsel %vm7637_vm7, %v3081_v43, 0.0  ;;  %v3125_v12 = vmul.f32 %v3081_v43, %v3043_v13  ;;  %3068 = vst.msk [vmem:[%s7046_s15 + $0x58] sm:$0xff] %vm7638_vm2, %v3046_v3  ;;  %v3082_v21 = vmul.f32 %v3046_v3, %v7639_v38  ;;  %v3399_v25 = vpop.f32.mrb[7].mxu1 }
 0x3a8   : > { %v3104_v31 = vadd.f32 %v3103_v57, %v3102_v23  ;;  %v3146_v33 = vadd.f32 %v3145_v46, %v3144_v50 }
 0x3a9   : > { %v3147_v5 = vsel %vm7640_vm4, %v3125_v12, 0.0  ;;  %v3105_v51 = vsel %vm7641_vm5, %v3082_v21, 0.0  ;;  %v3126_v59 = vmul.f32 %v3082_v21, %v3046_v3 }
 0x3aa   : > { %v3148_v63 = vadd.f32 %v3147_v5, %v3146_v33  ;;  %v3106_v14 = vadd.f32 %v3105_v51, %v3104_v31 }
 0x3ab   : > { %v3149_v9 = vsel %vm7642_vm3, %v3126_v59, 0.0 }
 0x3ac   : > { %v3150_v54 = vadd.f32 %v3149_v9, %v3148_v63 }
 0x3ae   : > { %v3051_v53 = vpop.f32.mrb[8].mxu1 }
 0x3af   : > { %3070 = vst.msk [vmem:[%s7046_s15 + $0x60] sm:$0xf] %vm3069_vm10, %v3051_v53  ;;  %v3083_v24 = vmul.f32 %v3051_v53, %v7643_v1  ;;  %v3402_v28 = vpop.f32.mrb[9].mxu1 }
 0x3b0   : > { %v3054_v2 = vpop.f32.mrb[10].mxu1 }
 0x3b1   : > { %v3107_v49 = vsel %vm3069_vm10, %v3083_v24, 0.0  ;;  %v3127_v8 = vmul.f32 %v3083_v24, %v3051_v53  ;;  %v3403_v17 = vpop.f32.mrb[11].mxu1 }
 0x3b2   : > { %v3108_v15 = vadd.f32 %v3107_v49, %v3106_v14 }
 0x3b3   : > { %v3151_v55 = vsel %vm3069_vm10, %v3127_v8, 0.0 }
 0x3b4   : > { %v3109_v27 = vrot.slane %v3108_v15, 4  ;;  %v3152_v36 = vadd.f32 %v3151_v55, %v3150_v54 }
 0x3b6   : > { %v3110_v39 = vadd.f32 %v3109_v27, %v3108_v15  ;;  %v3153_v41 = vrot.slane %v3152_v36, 4 }
 0x3b8   : > { %v3111_v61 = vrot.slane %v3110_v39, 2  ;;  %v3154_v62 = vadd.f32 %v3153_v41, %v3152_v36 }
 0x3ba   : > { %v3112_v44 = vadd.f32 %v3111_v61, %v3110_v39  ;;  %v3155_v6 = vrot.slane %v3154_v62, 2 }
 0x3bc   : > { %v3113_v45 = vrot.slane %v3112_v44, 1  ;;  %v3156_v16 = vadd.f32 %v3155_v6, %v3154_v62 }
 0x3be   : > { %v3157_v58 = vrot.slane %v3156_v16, 1  ;;  %v3114_v22 = vadd.f32 %v3113_v45, %v3112_v44 }
 0x3c0   : > { %v3158_v0 = vadd.f32 %v3157_v58, %v3156_v16 }
 0x3c2   : > { %v3159_v32 = vsel %vm7644_vm9, %v3114_v22, %v3158_v0 }
 0x3c3   : > { %3161 = vst.msk [vmem:[%s444_s22] sm:$0x3] %vm3160_vm11, %v3159_v32 }
 0x3c4 PF: > { %s19_s9 = sadd.s32 1, %s4361_s9   ;;  %s7645_s27 = smov %s4353_s29 }
 0x3c5   : > { %p16_p12 = scmp.ge.s32.totalorder %s19_s9, 18   ;;  %s7646_s28 = smov %s4357_s30 }
 0x3c6   : > { %s7647_s29 = smov %s7650_s10  ;;  %s7648_s30 = smov %s7654_s11 }
 0x3c7   :  { %18 = sbr.rel (!%p16_p12) target bundleno = 3 (0x3), region = 96 }

// kernel: bottleneck_forward.6
= control target key start
LH: loop header
LB: loop body
LE: loop exit
PB: predicated region body
PF: predicated region fallthrough
CT: control target
= control target key end

     0   :  { %vm804_vm0 = vcmask 1041408   ;;  %vm611_vm1 = vcmask 31744   ;;  %vm1353_vm2 = vcmask 130048   ;;  %vm2132_vm3 = vcmask 1040384   ;;  %s4342_s3 = inlined_call_operand.vmem [shape: bf16[4,16], index: 3, kind: input, shape index: {}]   ;;  %s4343_s0 = inlined_call_operand.vmem [shape: f32[1024,4], index: 0, kind: input, shape index: {}]   ;;  %s4344_s1 = inlined_call_operand.vmem [shape: f32[1,4], index: 1, kind: input, shape index: {}]   ;;  %s4345_s2 = inlined_call_operand.vmem [shape: f32[1,4], index: 2, kind: input, shape index: {}]   ;;  %s4346_s4 = inlined_call_operand.vmem [shape: f32[1024,16], index: 4, kind: output, shape index: {0}]   ;;  %s4347_s5 = inlined_call_operand.vmem [shape: f32[1,2,16], index: 5, kind: output, shape index: {1}]  }
   0x1   :  { %v610_v0 = vld [vmem:[%s4342_s3] sm:$0x3]  ;;  %v21_v2 = vld [vmem:[%s4343_s0 + $0x8] sm:$0xff]  ;;  %v22_v6 = vld [vmem:[%s4343_s0 + $0x10] sm:$0xff]  ;;  %vm2134_vm4 = vcmask 123904  }
   0x2   :  { %v20_v1 = vld [vmem:[%s4343_s0] sm:$0xff]  ;;  %2407 = vmatprep.subr.msk.bf16.mxu0 %vm804_vm0, %v610_v0  ;;  %v806_v3 = vsel %vm804_vm0, %v610_v0, 0  ;;  %2408 = vmatprep.subr.msk.bf16.mxu1 %vm804_vm0, %v610_v0  ;;  %v23_v9 = vld [vmem:[%s4343_s0 + $0x18] sm:$0xff]  ;;  %v25_v12 = vld [vmem:[%s4343_s0 + $0x28] sm:$0xff] }
   0x3   :  { %v2453_v4 = vld [vmem:[%s4344_s1] ss:$0 sm:$0xff]  ;;  %2276 = vmatpush3.bf16.msra.mxu0 %v806_v3  ;;  %2406 = vmatpush3.bf16.msra.mxu1 %v806_v3  ;;  %v26_v16 = vld [vmem:[%s4343_s0 + $0x30] sm:$0xff]  ;;  %v27_v17 = vld [vmem:[%s4343_s0 + $0x38] sm:$0xff] }
   0x4   :  { %v2458_v5 = vld [vmem:[%s4345_s2] ss:$0 sm:$0xff]  ;;  %v155_v7 = vmul.f32 %v2453_v4, %v20_v1  ;;  %v156_v8 = vmul.f32 %v2453_v4, %v21_v2  ;;  %v157_v10 = vmul.f32 %v2453_v4, %v22_v6  ;;  %v158_v13 = vmul.f32 %v2453_v4, %v23_v9  ;;  %v29_v27 = vld [vmem:[%s4343_s0 + $0x48] sm:$0xff]  ;;  %v30_v39 = vld [vmem:[%s4343_s0 + $0x50] sm:$0xff] }
   0x5   :  { %v24_v11 = vld [vmem:[%s4343_s0 + $0x20] sm:$0xff]  ;;  %v160_v15 = vmul.f32 %v2453_v4, %v25_v12  ;;  %v161_v21 = vmul.f32 %v2453_v4, %v26_v16  ;;  %v162_v25 = vmul.f32 %v2453_v4, %v27_v17  ;;  %v164_v38 = vmul.f32 %v2453_v4, %v29_v27  ;;  %v31_v40 = vld [vmem:[%s4343_s0 + $0x58] sm:$0xff]  ;;  %v33_v44 = vld [vmem:[%s4343_s0 + $0x68] sm:$0xff] }
   0x6   :  { %v159_v14 = vmul.f32 %v2453_v4, %v24_v11  ;;  %v290_v18 = vadd.f32 %v2458_v5, %v155_v7  ;;  %v291_v19 = vadd.f32 %v2458_v5, %v156_v8  ;;  %v292_v20 = vadd.f32 %v2458_v5, %v157_v10  ;;  %v28_v26 = vld [vmem:[%s4343_s0 + $0x40] sm:$0xff]  ;;  %v34_v61 = vld [vmem:[%s4343_s0 + $0x70] sm:$0xff]  ;;  %v35_v62 = vld [vmem:[%s4343_s0 + $0x78] sm:$0xff] }
   0x7   :  { %v293_v22 = vadd.f32 %v2458_v5, %v158_v13  ;;  %v295_v24 = vadd.f32 %v2458_v5, %v160_v15  ;;  %v296_v31 = vadd.f32 %v2458_v5, %v161_v21  ;;  %v297_v35 = vadd.f32 %v2458_v5, %v162_v25  ;;  %v32_v43 = vld [vmem:[%s4343_s0 + $0x60] sm:$0xff]  ;;  %v37_v0 = vld [vmem:[%s4343_s0 + $0x88] sm:$0xff]  ;;  %v38_v17 = vld [vmem:[%s4343_s0 + $0x90] sm:$0xff] }
   0x8   :  { %v294_v23 = vadd.f32 %v2458_v5, %v159_v14  ;;  %v418_v28 = vmax.f32 %v290_v18, 0.0  ;;  %v419_v29 = vmax.f32 %v291_v19, 0.0  ;;  %v420_v30 = vmax.f32 %v292_v20, 0.0  ;;  %v36_v63 = vld [vmem:[%s4343_s0 + $0x80] sm:$0xff]  ;;  %v39_v18 = vld [vmem:[%s4343_s0 + $0x98] sm:$0xff]  ;;  %v41_v20 = vld [vmem:[%s4343_s0 + $0xa8] sm:$0xff] }
   0x9   :  { %v421_v32 = vmax.f32 %v293_v22, 0.0  ;;  %v423_v34 = vmax.f32 %v295_v24, 0.0  ;;  %v163_v37 = vmul.f32 %v2453_v4, %v28_v26  ;;  %v299_v46 = vadd.f32 %v2458_v5, %v164_v38  ;;  %v40_v19 = vld [vmem:[%s4343_s0 + $0xa0] sm:$0xff]  ;;  %v45_v38 = vld [vmem:[%s4343_s0 + $0xc8] sm:$0xff] }
   0xa   :  { %v422_v33 = vmax.f32 %v294_v23, 0.0  ;;  %v546_v36 = vpack.c.bf16 %v419_v29, %v418_v28  ;;  %v424_v47 = vmax.f32 %v296_v31, 0.0  ;;  %v425_v48 = vmax.f32 %v297_v35, 0.0 }
   0xb   :  { %v547_v41 = vpack.c.bf16 %v421_v32, %v420_v30  ;;  %v298_v45 = vadd.f32 %v2458_v5, %v163_v37  ;;  %v165_v49 = vmul.f32 %v2453_v4, %v30_v39  ;;  %v166_v50 = vmul.f32 %v2453_v4, %v31_v40  ;;  %v42_v32 = vld [vmem:[%s4343_s0 + $0xb0] sm:$0xff]  ;;  %v44_v37 = vld [vmem:[%s4343_s0 + $0xc0] sm:$0xff] }
   0xc   :  { %v548_v42 = vpack.c.bf16 %v423_v34, %v422_v33  ;;  %2277 = vmatprep.mubr.msk.bf16.mxu0 %vm611_vm1, %v546_v36  ;;  %v427_v52 = vmax.f32 %v299_v46, 0.0  ;;  %v167_v53 = vmul.f32 %v2453_v4, %v32_v43  ;;  %v168_v54 = vmul.f32 %v2453_v4, %v33_v44  ;;  %v43_v36 = vld [vmem:[%s4343_s0 + $0xb8] sm:$0xff] }
   0xd   :  { %2278 = vmatmul.mubr.msk.bf16.vlgmr.msra.gmra.mrb[0].mxu0 %vm611_vm1, %v547_v41  ;;  %v426_v51 = vmax.f32 %v298_v45, 0.0  ;;  %v549_v55 = vpack.c.bf16 %v425_v48, %v424_v47  ;;  %v300_v56 = vadd.f32 %v2458_v5, %v165_v49  ;;  %v301_v57 = vadd.f32 %v2458_v5, %v166_v50  ;;  %v46_v50 = vld [vmem:[%s4343_s0 + $0xd0] sm:$0xff] }
   0xe   :  { %2281 = vmatprep.mubr.msk.bf16.mxu0 %vm611_vm1, %v548_v42  ;;  %v302_v59 = vadd.f32 %v2458_v5, %v167_v53  ;;  %v303_v60 = vadd.f32 %v2458_v5, %v168_v54  ;;  %v169_v3 = vmul.f32 %v2453_v4, %v34_v61  ;;  %v170_v6 = vmul.f32 %v2453_v4, %v35_v62  ;;  %v47_v54 = vld [vmem:[%s4343_s0 + $0xd8] sm:$0xff] }
   0xf   :  { %v550_v58 = vpack.c.bf16 %v427_v52, %v426_v51  ;;  %v428_v1 = vmax.f32 %v300_v56, 0.0  ;;  %v429_v2 = vmax.f32 %v301_v57, 0.0  ;;  %v171_v9 = vmul.f32 %v2453_v4, %v36_v63  ;;  %v49_v56 = vld [vmem:[%s4343_s0 + $0xe8] sm:$0xff]  ;;  %v50_v57 = vld [vmem:[%s4343_s0 + $0xf0] sm:$0xff] }
  0x10   :  { %v430_v7 = vmax.f32 %v302_v59, 0.0  ;;  %v431_v8 = vmax.f32 %v303_v60, 0.0  ;;  %v172_v10 = vmul.f32 %v2453_v4, %v37_v0  ;;  %v304_v12 = vadd.f32 %v2458_v5, %v169_v3 }
  0x11   :  { %v551_v11 = vpack.c.bf16 %v429_v2, %v428_v1  ;;  %v305_v13 = vadd.f32 %v2458_v5, %v170_v6  ;;  %v306_v15 = vadd.f32 %v2458_v5, %v171_v9  ;;  %v173_v23 = vmul.f32 %v2453_v4, %v38_v17  ;;  %v53_v9 = vld [vmem:[%s4343_s0 + $0x108] sm:$0xff] }
  0x12   :  { %v552_v14 = vpack.c.bf16 %v431_v8, %v430_v7  ;;  %v307_v16 = vadd.f32 %v2458_v5, %v172_v10  ;;  %v432_v21 = vmax.f32 %v304_v12, 0.0  ;;  %v174_v24 = vmul.f32 %v2453_v4, %v39_v18  ;;  %v52_v7 = vld [vmem:[%s4343_s0 + $0x100] sm:$0xff] }
  0x13   :  { %v433_v22 = vmax.f32 %v305_v13, 0.0  ;;  %v434_v25 = vmax.f32 %v306_v15, 0.0  ;;  %v175_v27 = vmul.f32 %v2453_v4, %v40_v19  ;;  %v176_v28 = vmul.f32 %v2453_v4, %v41_v20  ;;  %v55_v19 = vld [vmem:[%s4343_s0 + $0x118] sm:$0xff] }
  0x14   :  { %v435_v26 = vmax.f32 %v307_v16, 0.0  ;;  %v308_v30 = vadd.f32 %v2458_v5, %v173_v23  ;;  %v309_v31 = vadd.f32 %v2458_v5, %v174_v24  ;;  %v177_v39 = vmul.f32 %v2453_v4, %v42_v32 }
  0x15   :  { %2282 = vmatmul.mubr.msk.bf16.gmra.mrb[4].mxu0 %vm611_vm1, %v549_v55  ;;  %v553_v29 = vpack.c.bf16 %v433_v22, %v432_v21  ;;  %v310_v34 = vadd.f32 %v2458_v5, %v175_v27  ;;  %v311_v35 = vadd.f32 %v2458_v5, %v176_v28  ;;  %v178_v42 = vmul.f32 %v2453_v4, %v43_v36  ;;  %v48_v55 = vld [vmem:[%s4343_s0 + $0xe0] sm:$0xff]  ;;  %v58_v36 = vld [vmem:[%s4343_s0 + $0x130] sm:$0xff] }
  0x16   :  { %2285 = vmatprep.mubr.msk.bf16.mxu0 %vm611_vm1, %v550_v58  ;;  %v554_v33 = vpack.c.bf16 %v435_v26, %v434_v25  ;;  %v436_v40 = vmax.f32 %v308_v30, 0.0  ;;  %v437_v41 = vmax.f32 %v309_v31, 0.0  ;;  %v179_v45 = vmul.f32 %v2453_v4, %v44_v37  ;;  %v51_v58 = vld [vmem:[%s4343_s0 + $0xf8] sm:$0xff]  ;;  %v56_v22 = vld [vmem:[%s4343_s0 + $0x120] sm:$0xff]  ;;  %v57_v31 = vld [vmem:[%s4343_s0 + $0x128] sm:$0xff] }
  0x17   :  { %v438_v43 = vmax.f32 %v310_v34, 0.0  ;;  %v439_v44 = vmax.f32 %v311_v35, 0.0  ;;  %v180_v46 = vmul.f32 %v2453_v4, %v45_v38  ;;  %v312_v47 = vadd.f32 %v2458_v5, %v177_v39  ;;  %v84_v34 = vld [vmem:[%s4343_s0 + $0x200] sm:$0xff]  ;;  %v85_v37 = vld [vmem:[%s4343_s0 + $0x208] sm:$0xff] }
  0x18   :  { %v555_v48 = vpack.c.bf16 %v437_v41, %v436_v40  ;;  %v313_v49 = vadd.f32 %v2458_v5, %v178_v42  ;;  %v314_v52 = vadd.f32 %v2458_v5, %v179_v45  ;;  %v181_v60 = vmul.f32 %v2453_v4, %v46_v50  ;;  %v86_v41 = vld [vmem:[%s4343_s0 + $0x210] sm:$0xff]  ;;  %v87_v42 = vld [vmem:[%s4343_s0 + $0x218] sm:$0xff] }
  0x19   :  { %v556_v51 = vpack.c.bf16 %v439_v44, %v438_v43  ;;  %v315_v53 = vadd.f32 %v2458_v5, %v180_v46  ;;  %v440_v59 = vmax.f32 %v312_v47, 0.0  ;;  %v182_v62 = vmul.f32 %v2453_v4, %v47_v54  ;;  %v88_v47 = vld [vmem:[%s4343_s0 + $0x220] sm:$0xff] }
  0x1a   :  { %v441_v61 = vmax.f32 %v313_v49, 0.0  ;;  %v183_v63 = vmul.f32 %v2453_v4, %v48_v55  ;;  %v184_v0 = vmul.f32 %v2453_v4, %v49_v56  ;;  %v442_v1 = vmax.f32 %v314_v52, 0.0  ;;  %v89_v52 = vld [vmem:[%s4343_s0 + $0x228] sm:$0xff] }
  0x1b   :  { %v443_v2 = vmax.f32 %v315_v53, 0.0  ;;  %v185_v3 = vmul.f32 %v2453_v4, %v50_v57  ;;  %v186_v6 = vmul.f32 %v2453_v4, %v51_v58  ;;  %v316_v8 = vadd.f32 %v2458_v5, %v181_v60  ;;  %v90_v57 = vld [vmem:[%s4343_s0 + $0x230] sm:$0xff] }
  0x1c   :  { %v557_v10 = vpack.c.bf16 %v441_v61, %v440_v59  ;;  %v318_v12 = vadd.f32 %v2458_v5, %v183_v63  ;;  %v319_v13 = vadd.f32 %v2458_v5, %v184_v0  ;;  %v187_v18 = vmul.f32 %v2453_v4, %v52_v7 }
  0x1d   :  { %2286 = vmatmul.mubr.msk.bf16.gmra.mrb[8].mxu0 %vm611_vm1, %v551_v11  ;;  %v317_v11 = vadd.f32 %v2458_v5, %v182_v62  ;;  %v558_v15 = vpack.c.bf16 %v443_v2, %v442_v1  ;;  %v320_v16 = vadd.f32 %v2458_v5, %v185_v3  ;;  %v321_v17 = vadd.f32 %v2458_v5, %v186_v6  ;;  %v91_v62 = vld [vmem:[%s4343_s0 + $0x238] sm:$0xff]  ;;  %v92_v3 = vld [vmem:[%s4343_s0 + $0x240] sm:$0xff] }
  0x1e   :  { %2289 = vmatprep.mubr.msk.bf16.mxu0 %vm611_vm1, %v552_v14  ;;  %v54_v14 = vld [vmem:[%s4343_s0 + $0x110] sm:$0xff]  ;;  %v188_v20 = vmul.f32 %v2453_v4, %v53_v9  ;;  %v444_v23 = vmax.f32 %v316_v8, 0.0  ;;  %v446_v25 = vmax.f32 %v318_v12, 0.0  ;;  %v190_v26 = vmul.f32 %v2453_v4, %v55_v19 }
  0x1f   :  { %v189_v21 = vmul.f32 %v2453_v4, %v54_v14  ;;  %v445_v24 = vmax.f32 %v317_v11, 0.0  ;;  %v447_v27 = vmax.f32 %v319_v13, 0.0  ;;  %v448_v28 = vmax.f32 %v320_v16, 0.0  ;;  %v59_v11 = vld [vmem:[%s4343_s0 + $0x138] sm:$0xff]  ;;  %v94_v16 = vld [vmem:[%s4343_s0 + $0x250] sm:$0xff] }
  0x20   :  { %v322_v30 = vadd.f32 %v2458_v5, %v187_v18  ;;  %v323_v32 = vadd.f32 %v2458_v5, %v188_v20  ;;  %v2665_v39 = vadd.f32 %v2458_v5, %v190_v26  ;;  %v192_v40 = vmul.f32 %v2453_v4, %v57_v31  ;;  %v96_v26 = vld [vmem:[%s4343_s0 + $0x260] sm:$0xff] }
  0x21   :  { %v2656_v35 = vadd.f32 %v2458_v5, %v189_v21  ;;  %v559_v38 = vpack.c.bf16 %v445_v24, %v444_v23  ;;  %v560_v43 = vpack.c.bf16 %v447_v27, %v446_v25  ;;  %v219_v46 = vmul.f32 %v2453_v4, %v84_v34  ;;  %v95_v21 = vld [vmem:[%s4343_s0 + $0x258] sm:$0xff]  ;;  %v97_v27 = vld [vmem:[%s4343_s0 + $0x268] sm:$0xff] }
  0x22   :  { %v450_v45 = vmax.f32 %v322_v30, 0.0  ;;  %v2682_v50 = vmul.f32 %v2453_v4, %v58_v36  ;;  %v221_v55 = vmul.f32 %v2453_v4, %v86_v41  ;;  %v222_v56 = vmul.f32 %v2453_v4, %v87_v42  ;;  %v61_v30 = vld [vmem:[%s4343_s0 + $0x148] sm:$0xff] }
  0x23   :  { %v452_v53 = vmax.f32 %v2656_v35, 0.0  ;;  %v354_v54 = vadd.f32 %v2458_v5, %v219_v46  ;;  %v453_v58 = vmax.f32 %v2665_v39, 0.0  ;;  %v2698_v59 = vadd.f32 %v2458_v5, %v192_v40  ;;  %v100_v39 = vld [vmem:[%s4343_s0 + $0x280] sm:$0xff] }
  0x24   :  { %v223_v61 = vmul.f32 %v2453_v4, %v88_v47  ;;  %v356_v0 = vadd.f32 %v2458_v5, %v221_v55  ;;  %v357_v1 = vadd.f32 %v2458_v5, %v222_v56  ;;  %v224_v2 = vmul.f32 %v2453_v4, %v89_v52  ;;  %v63_v52 = vld [vmem:[%s4343_s0 + $0x158] sm:$0xff] }
  0x25   :  { %2290 = vmatmul.mubr.msk.bf16.gmra.mrb[12].mxu0 %vm611_vm1, %v553_v29  ;;  %v449_v29 = vmax.f32 %v321_v17, 0.0  ;;  %v482_v63 = vmax.f32 %v354_v54, 0.0  ;;  %v225_v9 = vmul.f32 %v2453_v4, %v90_v57  ;;  %v227_v20 = vmul.f32 %v2453_v4, %v92_v3 }
  0x26   :  { %2293 = vmatprep.mubr.msk.bf16.mxu0 %vm611_vm1, %v554_v33  ;;  %v191_v33 = vmul.f32 %v2453_v4, %v56_v22  ;;  %v358_v8 = vadd.f32 %v2458_v5, %v223_v61  ;;  %v484_v12 = vmax.f32 %v356_v0, 0.0  ;;  %v485_v13 = vmax.f32 %v357_v1, 0.0  ;;  %v98_v61 = vld [vmem:[%s4343_s0 + $0x270] sm:$0xff] }
  0x27   :  { %v561_v44 = vpack.c.bf16 %v449_v29, %v448_v28  ;;  %v359_v14 = vadd.f32 %v2458_v5, %v224_v2  ;;  %v360_v19 = vadd.f32 %v2458_v5, %v225_v9  ;;  %v194_v28 = vmul.f32 %v2453_v4, %v59_v11  ;;  %v60_v29 = vld [vmem:[%s4343_s0 + $0x140] sm:$0xff] }
  0x28   :  { %v2679_v49 = vadd.f32 %v2458_v5, %v191_v33  ;;  %v486_v18 = vmax.f32 %v358_v8, 0.0  ;;  %v579_v22 = vpack.c.bf16 %v485_v13, %v484_v12  ;;  %v229_v33 = vmul.f32 %v2453_v4, %v94_v16 }
  0x29   :  { %v487_v23 = vmax.f32 %v359_v14, 0.0  ;;  %v488_v31 = vmax.f32 %v360_v19, 0.0  ;;  %v231_v42 = vmul.f32 %v2453_v4, %v96_v26  ;;  %v195_v46 = vmul.f32 %v2453_v4, %v60_v29 }
  0x2a   :  { %v454_v40 = vmax.f32 %v2679_v49, 0.0  ;;  %v196_v47 = vmul.f32 %v2453_v4, %v61_v30  ;;  %v329_v49 = vadd.f32 %v2458_v5, %v194_v28  ;;  %v364_v55 = vadd.f32 %v2458_v5, %v229_v33 }
  0x2b   :  { %v580_v34 = vpack.c.bf16 %v487_v23, %v486_v18  ;;  %v330_v0 = vadd.f32 %v2458_v5, %v195_v46  ;;  %v198_v3 = vmul.f32 %v2453_v4, %v63_v52  ;;  %v235_v14 = vmul.f32 %v2453_v4, %v100_v39  ;;  %v67_v23 = vld [vmem:[%s4343_s0 + $0x178] sm:$0xff]  ;;  %v69_v46 = vld [vmem:[%s4343_s0 + $0x188] sm:$0xff] }
  0x2c   :  { %v331_v35 = vadd.f32 %v2458_v5, %v196_v47  ;;  %v457_v1 = vmax.f32 %v329_v49, 0.0  ;;  %v492_v8 = vmax.f32 %v364_v55, 0.0 }
  0x2d   :  { %2294 = vmatmul.mubr.msk.bf16.gmra.mrb[16].mxu0 %vm611_vm1, %v555_v48  ;;  %v451_v48 = vmax.f32 %v323_v32, 0.0  ;;  %v362_v32 = vadd.f32 %v2458_v5, %v227_v20  ;;  %v458_v16 = vmax.f32 %v330_v0, 0.0  ;;  %v370_v29 = vadd.f32 %v2458_v5, %v235_v14 }
  0x2e   :  { %2297 = vmatprep.mubr.msk.bf16.mxu0 %vm611_vm1, %v556_v51  ;;  %v220_v51 = vmul.f32 %v2453_v4, %v85_v37 }
  0x2f   :  { %v562_v6 = vpack.c.bf16 %v451_v48, %v450_v45  ;;  %v490_v41 = vmax.f32 %v362_v32, 0.0  ;;  %v455_v45 = vmax.f32 %v2698_v59, 0.0  ;;  %v366_v59 = vadd.f32 %v2458_v5, %v231_v42  ;;  %v103_v32 = vld [vmem:[%s4343_s0 + $0x298] sm:$0xff] }
  0x30   :  { %v355_v60 = vadd.f32 %v2458_v5, %v220_v51  ;;  %v62_v51 = vld [vmem:[%s4343_s0 + $0x150] sm:$0xff]  ;;  %v238_v49 = vmul.f32 %v2453_v4, %v103_v32 }
  0x31   :  { %v197_v2 = vmul.f32 %v2453_v4, %v62_v51  ;;  %v494_v12 = vmax.f32 %v366_v59, 0.0  ;;  %v498_v51 = vmax.f32 %v370_v29, 0.0  ;;  %v204_v59 = vmul.f32 %v2453_v4, %v69_v46  ;;  %v74_v32 = vld [vmem:[%s4343_s0 + $0x1b0] sm:$0xff] }
  0x32   :  { %v483_v7 = vmax.f32 %v355_v60, 0.0  ;;  %v373_v39 = vadd.f32 %v2458_v5, %v238_v49  ;;  %v113_v49 = vld [vmem:[%s4343_s0 + $0x2e8] sm:$0xff] }
  0x33   :  { %v332_v20 = vadd.f32 %v2458_v5, %v197_v2 }
  0x34   :  { %v578_v17 = vpack.c.bf16 %v483_v7, %v482_v63  ;;  %v564_v63 = vpack.c.bf16 %v455_v45, %v454_v40  ;;  %v65_v7 = vld [vmem:[%s4343_s0 + $0x168] sm:$0xff]  ;;  %v68_v45 = vld [vmem:[%s4343_s0 + $0x180] sm:$0xff] }
  0x35   :  { %2298 = vmatmul.mubr.msk.bf16.gmra.mrb[20].mxu0 %vm611_vm1, %v557_v10  ;;  %v93_v10 = vld [vmem:[%s4343_s0 + $0x248] sm:$0xff]  ;;  %v200_v19 = vmul.f32 %v2453_v4, %v65_v7  ;;  %v460_v40 = vmax.f32 %v332_v20, 0.0 }
  0x36   :  { %2301 = vmatprep.mubr.msk.bf16.mxu0 %vm611_vm1, %v558_v15  ;;  %v226_v15 = vmul.f32 %v2453_v4, %v91_v62  ;;  %v228_v25 = vmul.f32 %v2453_v4, %v93_v10  ;;  %2341 = vmatprep.mubr.msk.bf16.mxu1 %vm611_vm1, %v578_v17  ;;  %v99_v62 = vld [vmem:[%s4343_s0 + $0x278] sm:$0xff]  ;;  %v233_v10 = vmul.f32 %v2453_v4, %v98_v61  ;;  %v459_v17 = vmax.f32 %v331_v35, 0.0 }
  0x37   :  { %2342 = vmatmul.mubr.msk.bf16.vlgmr.msra.gmra.mrb[0].mxu1 %vm611_vm1, %v579_v22  ;;  %v234_v11 = vmul.f32 %v2453_v4, %v99_v62  ;;  %v66_v22 = vld [vmem:[%s4343_s0 + $0x170] sm:$0xff] }
  0x38   :  { %v361_v24 = vadd.f32 %v2458_v5, %v226_v15  ;;  %v363_v37 = vadd.f32 %v2458_v5, %v228_v25  ;;  %2345 = vmatprep.mubr.msk.bf16.mxu1 %vm611_vm1, %v580_v34  ;;  %v368_v25 = vadd.f32 %v2458_v5, %v233_v10  ;;  %v566_v33 = vpack.c.bf16 %v459_v17, %v458_v16  ;;  %v70_v62 = vld [vmem:[%s4343_s0 + $0x190] sm:$0xff]  ;;  %v108_v10 = vld [vmem:[%s4343_s0 + $0x2c0] sm:$0xff]  ;;  %v73_v17 = vld [vmem:[%s4343_s0 + $0x1a8] sm:$0xff] }
  0x39   :  { %v369_v26 = vadd.f32 %v2458_v5, %v234_v11  ;;  %v201_v42 = vmul.f32 %v2453_v4, %v66_v22  ;;  %v109_v11 = vld [vmem:[%s4343_s0 + $0x2c8] sm:$0xff]  ;;  %v205_v14 = vmul.f32 %v2453_v4, %v70_v62  ;;  %v72_v16 = vld [vmem:[%s4343_s0 + $0x1a0] sm:$0xff]  ;;  %v208_v29 = vmul.f32 %v2453_v4, %v73_v17 }
  0x3a   :  { %v489_v36 = vmax.f32 %v361_v24, 0.0  ;;  %v491_v48 = vmax.f32 %v363_v37, 0.0  ;;  %v104_v37 = vld [vmem:[%s4343_s0 + $0x2a0] sm:$0xff]  ;;  %v496_v47 = vmax.f32 %v368_v25, 0.0  ;;  %v244_v25 = vmul.f32 %v2453_v4, %v109_v11 }
  0x3c   :  { %v581_v54 = vpack.c.bf16 %v489_v36, %v488_v31  ;;  %v582_v57 = vpack.c.bf16 %v491_v48, %v490_v41  ;;  %v102_v31 = vld [vmem:[%s4343_s0 + $0x290] sm:$0xff]  ;;  %v335_v36 = vadd.f32 %v2458_v5, %v200_v19  ;;  %v497_v48 = vmax.f32 %v369_v26, 0.0 }
  0x3d   :  { %2302 = vmatmul.mubr.msk.bf16.gmra.mrb[24].mxu0 %vm611_vm1, %v559_v38  ;;  %v230_v38 = vmul.f32 %v2453_v4, %v95_v21  ;;  %v333_v21 = vadd.f32 %v2458_v5, %v198_v3  ;;  %v106_v3 = vld [vmem:[%s4343_s0 + $0x2b0] sm:$0xff]  ;;  %v501_v19 = vmax.f32 %v373_v39, 0.0 }
  0x3e   :  { %2305 = vmatprep.mubr.msk.bf16.mxu0 %vm611_vm1, %v560_v43  ;;  %v232_v43 = vmul.f32 %v2453_v4, %v97_v27  ;;  %v585_v0 = vpack.c.bf16 %v497_v48, %v496_v47  ;;  %v241_v20 = vmul.f32 %v2453_v4, %v106_v3  ;;  %v343_v48 = vadd.f32 %v2458_v5, %v208_v29 }
  0x3f   :  { %v365_v56 = vadd.f32 %v2458_v5, %v230_v38  ;;  %2346 = vmatmul.mubr.msk.bf16.gmra.mrb[4].mxu1 %vm611_vm1, %v581_v54  ;;  %v105_v38 = vld [vmem:[%s4343_s0 + $0x2a8] sm:$0xff]  ;;  %v461_v41 = vmax.f32 %v333_v21, 0.0  ;;  %v239_v54 = vmul.f32 %v2453_v4, %v104_v37 }
  0x40   :  { %v367_v60 = vadd.f32 %v2458_v5, %v232_v43  ;;  %2349 = vmatprep.mubr.msk.bf16.mxu1 %vm611_vm1, %v582_v57  ;;  %v202_v43 = vmul.f32 %v2453_v4, %v67_v23  ;;  %v240_v55 = vmul.f32 %v2453_v4, %v105_v38  ;;  %v203_v57 = vmul.f32 %v2453_v4, %v68_v45  ;;  %v111_v45 = vld [vmem:[%s4343_s0 + $0x2d8] sm:$0xff] }
  0x41   :  { %v493_v9 = vmax.f32 %v365_v56, 0.0 }
  0x42   :  { %v495_v13 = vmax.f32 %v367_v60, 0.0  ;;  %v336_v60 = vadd.f32 %v2458_v5, %v201_v42  ;;  %v337_v61 = vadd.f32 %v2458_v5, %v202_v43  ;;  %v375_v2 = vadd.f32 %v2458_v5, %v240_v55  ;;  %v110_v43 = vld [vmem:[%s4343_s0 + $0x2d0] sm:$0xff] }
  0x43   :  { %v583_v24 = vpack.c.bf16 %v493_v9, %v492_v8  ;;  %v338_v8 = vadd.f32 %v2458_v5, %v203_v57  ;;  %v339_v9 = vadd.f32 %v2458_v5, %v204_v59  ;;  %v379_v42 = vadd.f32 %v2458_v5, %v244_v25 }
  0x44   :  { %v584_v28 = vpack.c.bf16 %v495_v13, %v494_v12  ;;  %v464_v12 = vmax.f32 %v336_v60, 0.0  ;;  %v465_v13 = vmax.f32 %v337_v61, 0.0  ;;  %v503_v23 = vmax.f32 %v375_v2, 0.0 }
  0x45   :  { %2306 = vmatmul.mubr.msk.bf16.gmra.mrb[28].mxu0 %vm611_vm1, %v561_v44  ;;  %v328_v44 = vadd.f32 %v2458_v5, %v2682_v50  ;;  %v563_v50 = vpack.c.bf16 %v453_v58, %v452_v53  ;;  %v101_v53 = vld [vmem:[%s4343_s0 + $0x288] sm:$0xff]  ;;  %v466_v26 = vmax.f32 %v338_v8, 0.0  ;;  %v245_v60 = vmul.f32 %v2453_v4, %v110_v43 }
  0x46   :  { %2309 = vmatprep.mubr.msk.bf16.mxu0 %vm611_vm1, %v562_v6  ;;  %v64_v6 = vld [vmem:[%s4343_s0 + $0x160] sm:$0xff]  ;;  %v236_v15 = vmul.f32 %v2453_v4, %v101_v53  ;;  %v567_v53 = vpack.c.bf16 %v461_v41, %v460_v40  ;;  %v569_v38 = vpack.c.bf16 %v465_v13, %v464_v12  ;;  %v246_v61 = vmul.f32 %v2453_v4, %v111_v45  ;;  %v82_v45 = vld [vmem:[%s4343_s0 + $0x1f0] sm:$0xff] }
  0x47   :  { %v456_v58 = vmax.f32 %v328_v44, 0.0  ;;  %v199_v18 = vmul.f32 %v2453_v4, %v64_v6  ;;  %2350 = vmatmul.mubr.msk.bf16.gmra.mrb[8].mxu1 %vm611_vm1, %v583_v24  ;;  %v237_v44 = vmul.f32 %v2453_v4, %v102_v31  ;;  %v107_v6 = vld [vmem:[%s4343_s0 + $0x2b8] sm:$0xff]  ;;  %v243_v24 = vmul.f32 %v2453_v4, %v108_v10 }
  0x48   :  { %v371_v30 = vadd.f32 %v2458_v5, %v236_v15  ;;  %2353 = vmatprep.mubr.msk.bf16.mxu1 %vm611_vm1, %v584_v28  ;;  %v242_v21 = vmul.f32 %v2453_v4, %v107_v6  ;;  %v207_v28 = vmul.f32 %v2453_v4, %v72_v16  ;;  %v78_v6 = vld [vmem:[%s4343_s0 + $0x1d0] sm:$0xff]  ;;  %v381_v10 = vadd.f32 %v2458_v5, %v246_v61  ;;  %v115_v16 = vld [vmem:[%s4343_s0 + $0x2f8] sm:$0xff]  ;;  %v121_v61 = vld [vmem:[%s4343_s0 + $0x328] sm:$0xff] }
  0x49   :  { %v565_v27 = vpack.c.bf16 %v457_v1, %v456_v58  ;;  %v334_v34 = vadd.f32 %v2458_v5, %v199_v18  ;;  %v372_v35 = vadd.f32 %v2458_v5, %v237_v44  ;;  %v374_v1 = vadd.f32 %v2458_v5, %v239_v54  ;;  %v112_v44 = vld [vmem:[%s4343_s0 + $0x2e0] sm:$0xff] }
  0x4a   :  { %v499_v52 = vmax.f32 %v371_v30, 0.0  ;;  %v340_v30 = vadd.f32 %v2458_v5, %v205_v14  ;;  %v377_v37 = vadd.f32 %v2458_v5, %v242_v21  ;;  %v378_v41 = vadd.f32 %v2458_v5, %v243_v24  ;;  %v117_v21 = vld [vmem:[%s4343_s0 + $0x308] sm:$0xff] }
  0x4b   :  { %v462_v56 = vmax.f32 %v334_v34, 0.0  ;;  %v500_v18 = vmax.f32 %v372_v35, 0.0  ;;  %v502_v22 = vmax.f32 %v374_v1, 0.0  ;;  %v342_v47 = vadd.f32 %v2458_v5, %v207_v28 }
  0x4c   :  { %v586_v58 = vpack.c.bf16 %v499_v52, %v498_v51  ;;  %v468_v51 = vmax.f32 %v340_v30, 0.0  ;;  %v209_v54 = vmul.f32 %v2453_v4, %v74_v32  ;;  %v505_v59 = vmax.f32 %v377_v37, 0.0 }
  0x4d   :  { %2310 = vmatmul.mubr.msk.bf16.gmra.mrb[32].mxu0 %vm611_vm1, %v563_v50  ;;  %v463_v50 = vmax.f32 %v335_v36, 0.0  ;;  %v587_v34 = vpack.c.bf16 %v501_v19, %v500_v18  ;;  %v376_v36 = vadd.f32 %v2458_v5, %v241_v20  ;;  %v588_v40 = vpack.c.bf16 %v503_v23, %v502_v22  ;;  %v116_v20 = vld [vmem:[%s4343_s0 + $0x300] sm:$0xff] }
  0x4e   :  { %2313 = vmatprep.mubr.msk.bf16.mxu0 %vm611_vm1, %v564_v63  ;;  %v71_v63 = vld [vmem:[%s4343_s0 + $0x198] sm:$0xff]  ;;  %v506_v62 = vmax.f32 %v378_v41, 0.0  ;;  %v248_v35 = vmul.f32 %v2453_v4, %v113_v49  ;;  %v470_v39 = vmax.f32 %v342_v47, 0.0  ;;  %v344_v2 = vadd.f32 %v2458_v5, %v209_v54 }
  0x4f   :  { %v568_v7 = vpack.c.bf16 %v463_v50, %v462_v56  ;;  %v206_v15 = vmul.f32 %v2453_v4, %v71_v63  ;;  %2354 = vmatmul.mubr.msk.bf16.gmra.mrb[12].mxu1 %vm611_vm1, %v585_v0  ;;  %v76_v56 = vld [vmem:[%s4343_s0 + $0x1c0] sm:$0xff]  ;;  %v77_v50 = vld [vmem:[%s4343_s0 + $0x1c8] sm:$0xff]  ;;  %v504_v57 = vmax.f32 %v376_v36, 0.0  ;;  %v507_v63 = vmax.f32 %v379_v42, 0.0 }
  0x50   :  { %2357 = vmatprep.mubr.msk.bf16.mxu1 %vm611_vm1, %v586_v58  ;;  %v247_v0 = vmul.f32 %v2453_v4, %v112_v44  ;;  %v211_v58 = vmul.f32 %v2453_v4, %v76_v56  ;;  %v212_v1 = vmul.f32 %v2453_v4, %v77_v50  ;;  %v383_v14 = vadd.f32 %v2458_v5, %v248_v35  ;;  %v119_v56 = vld [vmem:[%s4343_s0 + $0x318] sm:$0xff] }
  0x51   :  { %v341_v31 = vadd.f32 %v2458_v5, %v206_v15  ;;  %v589_v8 = vpack.c.bf16 %v505_v59, %v504_v57  ;;  %v590_v12 = vpack.c.bf16 %v507_v63, %v506_v62  ;;  %v114_v15 = vld [vmem:[%s4343_s0 + $0x2f0] sm:$0xff]  ;;  %v472_v22 = vmax.f32 %v344_v2, 0.0 }
  0x52   :  { %v382_v13 = vadd.f32 %v2458_v5, %v247_v0  ;;  %v346_v18 = vadd.f32 %v2458_v5, %v211_v58  ;;  %v347_v19 = vadd.f32 %v2458_v5, %v212_v1  ;;  %v213_v24 = vmul.f32 %v2453_v4, %v78_v6 }
  0x53   :  { %v469_v52 = vmax.f32 %v341_v31, 0.0  ;;  %v509_v29 = vmax.f32 %v381_v10, 0.0  ;;  %v249_v30 = vmul.f32 %v2453_v4, %v114_v15  ;;  %v250_v31 = vmul.f32 %v2453_v4, %v115_v16 }
  0x54   :  { %v510_v32 = vmax.f32 %v382_v13, 0.0  ;;  %v252_v36 = vmul.f32 %v2453_v4, %v117_v21  ;;  %v474_v37 = vmax.f32 %v346_v18, 0.0  ;;  %v348_v42 = vadd.f32 %v2458_v5, %v213_v24 }
  0x55   :  { %2314 = vmatmul.mubr.msk.bf16.gmra.mrb[36].mxu0 %vm611_vm1, %v565_v27  ;;  %v467_v27 = vmax.f32 %v339_v9, 0.0  ;;  %v380_v9 = vadd.f32 %v2458_v5, %v245_v60  ;;  %v571_v11 = vpack.c.bf16 %v469_v52, %v468_v51  ;;  %v385_v44 = vadd.f32 %v2458_v5, %v250_v31  ;;  %v120_v60 = vld [vmem:[%s4343_s0 + $0x320] sm:$0xff] }
  0x56   :  { %2317 = vmatprep.mubr.msk.bf16.mxu0 %vm611_vm1, %v566_v33  ;;  %v75_v33 = vld [vmem:[%s4343_s0 + $0x1b8] sm:$0xff]  ;;  %v387_v54 = vadd.f32 %v2458_v5, %v252_v36  ;;  %v476_v62 = vmax.f32 %v348_v42, 0.0  ;;  %v217_v0 = vmul.f32 %v2453_v4, %v82_v45  ;;  %v254_v1 = vmul.f32 %v2453_v4, %v119_v56  ;;  %v3047_v31 = vld [vmem:[%s4344_s1] ss:$0 sm:$0xff] }
  0x57   :  { %v570_v46 = vpack.c.bf16 %v467_v27, %v466_v26  ;;  %v210_v55 = vmul.f32 %v2453_v4, %v75_v33  ;;  %2358 = vmatmul.mubr.msk.bf16.gmra.mrb[16].mxu1 %vm611_vm1, %v587_v34  ;;  %v80_v26 = vld [vmem:[%s4343_s0 + $0x1e0] sm:$0xff]  ;;  %v81_v27 = vld [vmem:[%s4343_s0 + $0x1e8] sm:$0xff]  ;;  %v508_v28 = vmax.f32 %v380_v9, 0.0  ;;  %v511_v33 = vmax.f32 %v383_v14, 0.0  ;;  %v127_v45 = vld [vmem:[%s4343_s0 + $0x358] sm:$0xff] }
  0x58   :  { %2361 = vmatprep.mubr.msk.bf16.mxu1 %vm611_vm1, %v588_v40  ;;  %v251_v34 = vmul.f32 %v2453_v4, %v116_v20  ;;  %v215_v40 = vmul.f32 %v2453_v4, %v80_v26  ;;  %v216_v41 = vmul.f32 %v2453_v4, %v81_v27  ;;  %v255_v6 = vmul.f32 %v2453_v4, %v120_v60  ;;  %v123_v20 = vld [vmem:[%s4343_s0 + $0x338] sm:$0xff] }
  0x59   :  { %v345_v3 = vadd.f32 %v2458_v5, %v210_v55  ;;  %v591_v47 = vpack.c.bf16 %v509_v29, %v508_v28  ;;  %v592_v51 = vpack.c.bf16 %v511_v33, %v510_v32  ;;  %v118_v55 = vld [vmem:[%s4343_s0 + $0x310] sm:$0xff]  ;;  %v352_v10 = vadd.f32 %v2458_v5, %v217_v0  ;;  %v131_v0 = vld [vmem:[%s4343_s0 + $0x378] sm:$0xff] }
  0x5a   :  { %v386_v52 = vadd.f32 %v2458_v5, %v251_v34  ;;  %v350_v57 = vadd.f32 %v2458_v5, %v215_v40  ;;  %v351_v59 = vadd.f32 %v2458_v5, %v216_v41  ;;  %v253_v58 = vmul.f32 %v2453_v4, %v118_v55 }
  0x5b   :  { %v473_v23 = vmax.f32 %v345_v3, 0.0  ;;  %v515_v3 = vmax.f32 %v387_v54, 0.0  ;;  %v389_v14 = vadd.f32 %v2458_v5, %v254_v1  ;;  %v480_v24 = vmax.f32 %v352_v10, 0.0 }
  0x5c   :  { %v514_v2 = vmax.f32 %v386_v52, 0.0  ;;  %v479_v9 = vmax.f32 %v351_v59, 0.0  ;;  %v388_v13 = vadd.f32 %v2458_v5, %v253_v58  ;;  %v258_v28 = vmul.f32 %v2453_v4, %v123_v20 }
  0x5d   :  { %2318 = vmatmul.mubr.msk.bf16.gmra.mrb[40].mxu0 %vm611_vm1, %v567_v53  ;;  %v471_v53 = vmax.f32 %v343_v48, 0.0  ;;  %v384_v48 = vadd.f32 %v2458_v5, %v249_v30  ;;  %v573_v49 = vpack.c.bf16 %v473_v23, %v472_v22  ;;  %v124_v22 = vld [vmem:[%s4343_s0 + $0x340] sm:$0xff]  ;;  %v125_v23 = vld [vmem:[%s4343_s0 + $0x348] sm:$0xff]  ;;  %v517_v26 = vmax.f32 %v389_v14, 0.0 }
  0x5e   :  { %2321 = vmatprep.mubr.msk.bf16.mxu0 %vm611_vm1, %v568_v7  ;;  %v79_v7 = vld [vmem:[%s4343_s0 + $0x1d8] sm:$0xff]  ;;  %v594_v16 = vpack.c.bf16 %v515_v3, %v514_v2  ;;  %v259_v32 = vmul.f32 %v3047_v31, %v124_v22  ;;  %v260_v33 = vmul.f32 %v3047_v31, %v125_v23  ;;  %v266_v2 = vmul.f32 %v3047_v31, %v131_v0 }
  0x5f   :  { %v572_v17 = vpack.c.bf16 %v471_v53, %v470_v39  ;;  %v214_v25 = vmul.f32 %v2453_v4, %v79_v7  ;;  %2362 = vmatmul.mubr.msk.bf16.gmra.mrb[20].mxu1 %vm611_vm1, %v589_v8  ;;  %v512_v39 = vmax.f32 %v384_v48, 0.0  ;;  %v513_v53 = vmax.f32 %v385_v44, 0.0 }
  0x60   :  { %2365 = vmatprep.mubr.msk.bf16.mxu1 %vm611_vm1, %v590_v12  ;;  %v256_v7 = vmul.f32 %v2453_v4, %v121_v61  ;;  %v478_v8 = vmax.f32 %v350_v57, 0.0 }
  0x61   :  { %v349_v43 = vadd.f32 %v2458_v5, %v214_v25  ;;  %v593_v12 = vpack.c.bf16 %v513_v53, %v512_v39  ;;  %v133_v39 = vld [vmem:[%s4343_s0 + $0x388] sm:$0xff] }
  0x62   :  { %v391_v18 = vadd.f32 %v2458_v5, %v256_v7  ;;  %v576_v21 = vpack.c.bf16 %v479_v9, %v478_v8  ;;  %v268_v8 = vmul.f32 %v3047_v31, %v133_v39 }
  0x63   :  { %v477_v63 = vmax.f32 %v349_v43, 0.0  ;;  %v126_v43 = vld [vmem:[%s4343_s0 + $0x350] sm:$0xff] }
  0x64   :  { %v519_v30 = vmax.f32 %v391_v18, 0.0  ;;  %v137_v18 = vld [vmem:[%s4343_s0 + $0x3a8] sm:$0xff] }
  0x65   :  { %2322 = vmatmul.mubr.msk.bf16.gmra.mrb[44].mxu0 %vm611_vm1, %v569_v38  ;;  %v475_v38 = vmax.f32 %v347_v19, 0.0  ;;  %v575_v15 = vpack.c.bf16 %v477_v63, %v476_v62  ;;  %v122_v19 = vld [vmem:[%s4343_s0 + $0x330] sm:$0xff] }
  0x66   :  { %2325 = vmatprep.mubr.msk.bf16.mxu0 %vm611_vm1, %v570_v46  ;;  %v83_v46 = vld [vmem:[%s4343_s0 + $0x1f8] sm:$0xff]  ;;  %v257_v27 = vmul.f32 %v2453_v4, %v122_v19  ;;  %v130_v63 = vld [vmem:[%s4343_s0 + $0x370] sm:$0xff] }
  0x67   :  { %v574_v50 = vpack.c.bf16 %v475_v38, %v474_v37  ;;  %v218_v35 = vmul.f32 %v2453_v4, %v83_v46  ;;  %2366 = vmatmul.mubr.msk.bf16.gmra.mrb[24].mxu1 %vm611_vm1, %v591_v47  ;;  %v3055_v4 = vld [vmem:[%s4345_s2] ss:$0 sm:$0xff]  ;;  %v129_v47 = vld [vmem:[%s4343_s0 + $0x368] sm:$0xff]  ;;  %v265_v1 = vmul.f32 %v3047_v31, %v130_v63 }
  0x68   :  { %2369 = vmatprep.mubr.msk.bf16.mxu1 %vm611_vm1, %v592_v51  ;;  %v392_v36 = vadd.f32 %v3055_v4, %v257_v27  ;;  %v393_v37 = vadd.f32 %v3055_v4, %v258_v28  ;;  %v394_v41 = vadd.f32 %v3055_v4, %v259_v32  ;;  %v395_v42 = vadd.f32 %v3055_v4, %v260_v33  ;;  %v128_v46 = vld [vmem:[%s4343_s0 + $0x360] sm:$0xff]  ;;  %v138_v33 = vld [vmem:[%s4343_s0 + $0x3b0] sm:$0xff] }
  0x69   :  { %v262_v51 = vmul.f32 %v3047_v31, %v127_v45  ;;  %v263_v55 = vmul.f32 %v3047_v31, %v128_v46  ;;  %v264_v56 = vmul.f32 %v3047_v31, %v129_v47  ;;  %v400_v10 = vadd.f32 %v3055_v4, %v265_v1 }
  0x6a   :  { %v520_v48 = vmax.f32 %v392_v36, 0.0  ;;  %v521_v44 = vmax.f32 %v393_v37, 0.0  ;;  %v522_v52 = vmax.f32 %v394_v41, 0.0  ;;  %v523_v54 = vmax.f32 %v395_v42, 0.0  ;;  %v140_v36 = vld [vmem:[%s4343_s0 + $0x3c0] sm:$0xff]  ;;  %v141_v37 = vld [vmem:[%s4343_s0 + $0x3c8] sm:$0xff] }
  0x6b   :  { %v397_v59 = vadd.f32 %v3055_v4, %v262_v51  ;;  %v398_v61 = vadd.f32 %v3055_v4, %v263_v55  ;;  %v399_v62 = vadd.f32 %v3055_v4, %v264_v56  ;;  %v403_v14 = vadd.f32 %v3055_v4, %v268_v8  ;;  %v142_v55 = vld [vmem:[%s4343_s0 + $0x3d0] sm:$0xff]  ;;  %v143_v56 = vld [vmem:[%s4343_s0 + $0x3d8] sm:$0xff] }
  0x6c   :  { %v598_v60 = vpack.c.bf16 %v523_v54, %v522_v52  ;;  %v528_v19 = vmax.f32 %v400_v10, 0.0  ;;  %v273_v41 = vmul.f32 %v3047_v31, %v138_v33  ;;  %v275_v46 = vmul.f32 %v3047_v31, %v140_v36  ;;  %v147_v8 = vld [vmem:[%s4343_s0 + $0x3f8] sm:$0xff] }
  0x6d   :  { %2326 = vmatmul.mubr.msk.bf16.gmra.mrb[48].mxu0 %vm611_vm1, %v571_v11  ;;  %v353_v11 = vadd.f32 %v2458_v5, %v218_v35  ;;  %v132_v35 = vld [vmem:[%s4343_s0 + $0x380] sm:$0xff]  ;;  %v525_v58 = vmax.f32 %v397_v59, 0.0  ;;  %v526_v3 = vmax.f32 %v398_v61, 0.0  ;;  %v276_v47 = vmul.f32 %v3047_v31, %v141_v37 }
  0x6e   :  { %2329 = vmatprep.mubr.msk.bf16.mxu0 %vm611_vm1, %v572_v17  ;;  %v390_v17 = vadd.f32 %v2458_v5, %v255_v6  ;;  %v516_v5 = vmax.f32 %v388_v13, 0.0  ;;  %v527_v6 = vmax.f32 %v399_v62, 0.0  ;;  %v267_v7 = vmul.f32 %v3047_v31, %v132_v35 }
  0x6f   :  { %v481_v25 = vmax.f32 %v353_v11, 0.0  ;;  %2370 = vmatmul.mubr.msk.bf16.gmra.mrb[28].mxu1 %vm611_vm1, %v593_v12  ;;  %v401_v11 = vadd.f32 %v3055_v4, %v266_v2  ;;  %v410_v52 = vadd.f32 %v3055_v4, %v275_v46  ;;  %v411_v54 = vadd.f32 %v3055_v4, %v276_v47 }
  0x70   :  { %2373 = vmatprep.mubr.msk.bf16.mxu1 %vm611_vm1, %v594_v16  ;;  %v518_v29 = vmax.f32 %v390_v17, 0.0  ;;  %v595_v34 = vpack.c.bf16 %v517_v26, %v516_v5  ;;  %v600_v12 = vpack.c.bf16 %v527_v6, %v526_v3  ;;  %v402_v13 = vadd.f32 %v3055_v4, %v267_v7  ;;  %v135_v16 = vld [vmem:[%s4343_s0 + $0x398] sm:$0xff]  ;;  %v136_v17 = vld [vmem:[%s4343_s0 + $0x3a0] sm:$0xff]  ;;  %v146_v7 = vld [vmem:[%s4343_s0 + $0x3f0] sm:$0xff] }
  0x71   :  { %v577_v38 = vpack.c.bf16 %v481_v25, %v480_v24  ;;  %v529_v20 = vmax.f32 %v401_v11, 0.0  ;;  %v270_v22 = vmul.f32 %v3047_v31, %v135_v16  ;;  %v531_v24 = vmax.f32 %v403_v14, 0.0 }
  0x72   :  { %v596_v40 = vpack.c.bf16 %v519_v30, %v518_v29  ;;  %v530_v23 = vmax.f32 %v402_v13, 0.0  ;;  %v271_v25 = vmul.f32 %v3047_v31, %v136_v17  ;;  %v272_v5 = vmul.f32 %v3047_v31, %v137_v18 }
  0x73   :  { %v601_v26 = vpack.c.bf16 %v529_v20, %v528_v19  ;;  %v405_v28 = vadd.f32 %v3055_v4, %v270_v22  ;;  %v277_v61 = vmul.f32 %v3047_v31, %v142_v55  ;;  %v278_v62 = vmul.f32 %v3047_v31, %v143_v56 }
  0x74   :  { %v602_v29 = vpack.c.bf16 %v531_v24, %v530_v23  ;;  %v406_v30 = vadd.f32 %v3055_v4, %v271_v25  ;;  %v407_v32 = vadd.f32 %v3055_v4, %v272_v5  ;;  %v538_v63 = vmax.f32 %v410_v52, 0.0 }
  0x75   :  { %2330 = vmatmul.mubr.msk.bf16.gmra.mrb[52].mxu0 %vm611_vm1, %v573_v49  ;;  %v261_v49 = vmul.f32 %v3047_v31, %v126_v43  ;;  %v539_v0 = vmax.f32 %v411_v54, 0.0  ;;  %v413_v1 = vadd.f32 %v3055_v4, %v278_v62  ;;  %v281_v11 = vmul.f32 %v3047_v31, %v146_v7 }
  0x76   :  { %2333 = vmatprep.mubr.msk.bf16.mxu0 %vm611_vm1, %v574_v50  ;;  %v597_v50 = vpack.c.bf16 %v521_v44, %v520_v48  ;;  %v534_v43 = vmax.f32 %v406_v30, 0.0  ;;  %v535_v45 = vmax.f32 %v407_v32, 0.0  ;;  %v408_v44 = vadd.f32 %v3055_v4, %v273_v41 }
  0x77   :  { %2374 = vmatmul.mubr.msk.bf16.gmra.mrb[32].mxu1 %vm611_vm1, %v595_v34  ;;  %v396_v57 = vadd.f32 %v3055_v4, %v261_v49  ;;  %v139_v34 = vld [vmem:[%s4343_s0 + $0x3b8] sm:$0xff]  ;;  %v606_v2 = vpack.c.bf16 %v539_v0, %v538_v63  ;;  %v541_v10 = vmax.f32 %v413_v1, 0.0  ;;  %v416_v16 = vadd.f32 %v3055_v4, %v281_v11 }
  0x78   :  { %2377 = vmatprep.mubr.msk.bf16.mxu1 %vm611_vm1, %v596_v40  ;;  %v533_v40 = vmax.f32 %v405_v28, 0.0  ;;  %v274_v42 = vmul.f32 %v3047_v31, %v139_v34  ;;  %v604_v51 = vpack.c.bf16 %v535_v45, %v534_v43  ;;  %v536_v59 = vmax.f32 %v408_v44, 0.0 }
  0x79   :  { %v524_v53 = vmax.f32 %v396_v57, 0.0  ;;  %v145_v57 = vld [vmem:[%s4343_s0 + $0x3e8] sm:$0xff]  ;;  %v544_v19 = vmax.f32 %v416_v16, 0.0 }
  0x7a   :  { %v409_v49 = vadd.f32 %v3055_v4, %v274_v42  ;;  %v280_v39 = vmul.f32 %v3047_v31, %v145_v57 }
  0x7b   :  { %v599_v9 = vpack.c.bf16 %v525_v58, %v524_v53  ;;  %v412_v58 = vadd.f32 %v3055_v4, %v277_v61 }
  0x7c   :  { %v415_v6 = vadd.f32 %v3055_v4, %v280_v39 }
  0x7d   :  { %2334 = vmatmul.mubr.msk.bf16.gmra.mrb[56].mxu0 %vm611_vm1, %v575_v15  ;;  %v134_v15 = vld [vmem:[%s4343_s0 + $0x390] sm:$0xff] }
  0x7e   :  { %2337 = vmatprep.mubr.msk.bf16.mxu0 %vm611_vm1, %v576_v21  ;;  %v269_v21 = vmul.f32 %v3047_v31, %v134_v15  ;;  %v543_v14 = vmax.f32 %v415_v6, 0.0 }
  0x7f   :  { %2378 = vmatmul.mubr.msk.bf16.gmra.mrb[36].mxu1 %vm611_vm1, %v597_v50  ;;  %v144_v50 = vld [vmem:[%s4343_s0 + $0x3e0] sm:$0xff] }
  0x80   :  { %2381 = vmatprep.mubr.msk.bf16.mxu1 %vm611_vm1, %v598_v60  ;;  %v404_v27 = vadd.f32 %v3055_v4, %v269_v21  ;;  %v537_v60 = vmax.f32 %v409_v49, 0.0  ;;  %v279_v35 = vmul.f32 %v3047_v31, %v144_v50 }
  0x82   :  { %v605_v53 = vpack.c.bf16 %v537_v60, %v536_v59  ;;  %v414_v3 = vadd.f32 %v3055_v4, %v279_v35 }
  0x84   :  { %v542_v13 = vmax.f32 %v414_v3, 0.0 }
  0x85   :  { %2338 = vmatmul.mubr.msk.bf16.gmra.mrb[60].mxu0 %vm611_vm1, %v577_v38  ;;  %v532_v38 = vmax.f32 %v404_v27, 0.0 }
  0x86   :  { %v608_v18 = vpack.c.bf16 %v543_v14, %v542_v13 }
  0x87   :  { %2382 = vmatmul.mubr.msk.bf16.gmra.mrb[40].mxu1 %vm611_vm1, %v599_v9  ;;  %v603_v48 = vpack.c.bf16 %v533_v40, %v532_v38  ;;  %v540_v9 = vmax.f32 %v412_v58, 0.0 }
  0x88   :  { %2385 = vmatprep.mubr.msk.bf16.mxu1 %vm611_vm1, %v600_v12  ;;  %v282_v12 = vmul.f32 %v3047_v31, %v147_v8 }
  0x89   :  { %v607_v15 = vpack.c.bf16 %v541_v10, %v540_v9 }
  0x8a   :  { %v417_v17 = vadd.f32 %v3055_v4, %v282_v12 }
  0x8c   :  { %v545_v20 = vmax.f32 %v417_v17, 0.0 }
  0x8e   :  { %v609_v21 = vpack.c.bf16 %v545_v20, %v544_v19 }
  0x8f   :  { %2386 = vmatmul.mubr.msk.bf16.gmra.mrb[44].mxu1 %vm611_vm1, %v601_v26 }
  0x90   :  { %2389 = vmatprep.mubr.msk.bf16.mxu1 %vm611_vm1, %v602_v29 }
  0x97   :  { %2390 = vmatmul.mubr.msk.bf16.gmra.mrb[48].mxu1 %vm611_vm1, %v603_v48 }
  0x98   :  { %2393 = vmatprep.mubr.msk.bf16.mxu1 %vm611_vm1, %v604_v51 }
  0x9f   :  { %2394 = vmatmul.mubr.msk.bf16.gmra.mrb[52].mxu1 %vm611_vm1, %v605_v53 }
  0xa0   :  { %2397 = vmatprep.mubr.msk.bf16.mxu1 %vm611_vm1, %v606_v2 }
  0xa7   :  { %2398 = vmatmul.mubr.msk.bf16.gmra.mrb[56].mxu1 %vm611_vm1, %v607_v15 }
  0xa8   :  { %2401 = vmatprep.mubr.msk.bf16.mxu1 %vm611_vm1, %v608_v18 }
  0xaf   :  { %2402 = vmatmul.mubr.msk.bf16.gmra.mrb[60].mxu1 %vm611_vm1, %v609_v21 }
  0xe0   :  { %v2279_v31 = vpop.f32.mrb[0].mxu0 }
  0xe1   :  { %1356 = vst.msk [vmem:[%s4346_s4 + $0x10] sm:$0xff] %vm1353_vm2, %v2279_v31  ;;  %v842_v22 = vpop.f32.mrb[1].mxu0  ;;  %v1745_v25 = vmul.f32 %v2279_v31, %v2279_v31  ;;  %v1485_v29 = vsel %vm1353_vm2, %v2279_v31, 0.0 }
  0xe2   :  { %1354 = vst.msk [vmem:[%s4346_s4] sm:$0xff] %vm1353_vm2, %v842_v22  ;;  %v1743_v4 = vmul.f32 %v842_v22, %v842_v22  ;;  %v2280_v23 = vpop.f32.mrb[2].mxu0  ;;  %v1482_v5 = vsel %vm1353_vm2, %v842_v22, 0.0 }
  0xe3   :  { %1357 = vst.msk [vmem:[%s4346_s4 + $0x18] sm:$0xff] %vm1353_vm2, %v2280_v23  ;;  %v845_v24 = vpop.f32.mrb[3].mxu0  ;;  %v1746_v32 = vmul.f32 %v2280_v23, %v2280_v23  ;;  %v1874_v37 = vsel %vm1353_vm2, %v1745_v25, 0.0  ;;  %v1487_v38 = vsel %vm1353_vm2, %v2280_v23, 0.0 }
  0xe4   :  { %1355 = vst.msk [vmem:[%s4346_s4 + $0x8] sm:$0xff] %vm1353_vm2, %v845_v24  ;;  %v1483_v26 = vsel %vm1353_vm2, %v845_v24, 0.0  ;;  %v1744_v27 = vmul.f32 %v845_v24, %v845_v24  ;;  %v1871_v30 = vsel %vm1353_vm2, %v1743_v4, 0.0 }
  0xe5   :  { %v1484_v28 = vadd.f32 %v1483_v26, %v1482_v5  ;;  %v1876_v45 = vsel %vm1353_vm2, %v1746_v32, 0.0 }
  0xe6   :  { %v1872_v33 = vsel %vm1353_vm2, %v1744_v27, 0.0 }
  0xe7   :  { %v1486_v34 = vadd.f32 %v1485_v29, %v1484_v28  ;;  %v1873_v36 = vadd.f32 %v1872_v33, %v1871_v30 }
  0xe8   :  { %v2283_v40 = vpop.f32.mrb[4].mxu0 }
  0xe9   :  { %v1875_v41 = vadd.f32 %v1874_v37, %v1873_v36  ;;  %1360 = vst.msk [vmem:[%s4346_s4 + $0x30] sm:$0xff] %vm1353_vm2, %v2283_v40  ;;  %v858_v42 = vpop.f32.mrb[5].mxu0  ;;  %v1488_v43 = vadd.f32 %v1487_v38, %v1486_v34  ;;  %v1749_v52 = vmul.f32 %v2283_v40, %v2283_v40  ;;  %v1493_v59 = vsel %vm1353_vm2, %v2283_v40, 0.0 }
  0xea   :  { %1358 = vst.msk [vmem:[%s4346_s4 + $0x20] sm:$0xff] %vm1353_vm2, %v858_v42  ;;  %v1489_v46 = vsel %vm1353_vm2, %v858_v42, 0.0  ;;  %v1747_v47 = vmul.f32 %v858_v42, %v858_v42  ;;  %v2284_v48 = vpop.f32.mrb[6].mxu0 }
  0xeb   :  { %v1490_v44 = vadd.f32 %v1489_v46, %v1488_v43  ;;  %v1877_v49 = vadd.f32 %v1876_v45, %v1875_v41  ;;  %1361 = vst.msk [vmem:[%s4346_s4 + $0x38] sm:$0xff] %vm1353_vm2, %v2284_v48  ;;  %v861_v51 = vpop.f32.mrb[7].mxu0  ;;  %v1750_v60 = vmul.f32 %v2284_v48, %v2284_v48  ;;  %v1882_v0 = vsel %vm1353_vm2, %v1749_v52, 0.0 }
  0xec   :  { %v1878_v54 = vsel %vm1353_vm2, %v1747_v47, 0.0  ;;  %1359 = vst.msk [vmem:[%s4346_s4 + $0x28] sm:$0xff] %vm1353_vm2, %v861_v51  ;;  %v1491_v55 = vsel %vm1353_vm2, %v861_v51, 0.0  ;;  %v1748_v56 = vmul.f32 %v861_v51, %v861_v51  ;;  %v1495_v35 = vsel %vm1353_vm2, %v2284_v48, 0.0 }
  0xed   :  { %v1879_v50 = vadd.f32 %v1878_v54, %v1877_v49  ;;  %v1492_v57 = vadd.f32 %v1491_v55, %v1490_v44  ;;  %v1884_v2 = vsel %vm1353_vm2, %v1750_v60, 0.0 }
  0xee   :  { %v1880_v61 = vsel %vm1353_vm2, %v1748_v56, 0.0 }
  0xef   :  { %v1494_v62 = vadd.f32 %v1493_v59, %v1492_v57  ;;  %v1881_v63 = vadd.f32 %v1880_v61, %v1879_v50 }
  0xf0   :  { %v2287_v39 = vpop.f32.mrb[8].mxu0 }
  0xf1   :  { %v1883_v53 = vadd.f32 %v1882_v0, %v1881_v63  ;;  %1364 = vst.msk [vmem:[%s4346_s4 + $0x50] sm:$0xff] %vm1353_vm2, %v2287_v39  ;;  %v874_v58 = vpop.f32.mrb[9].mxu0  ;;  %v1496_v1 = vadd.f32 %v1495_v35, %v1494_v62  ;;  %v1753_v11 = vmul.f32 %v2287_v39, %v2287_v39  ;;  %v1501_v17 = vsel %vm1353_vm2, %v2287_v39, 0.0 }
  0xf2   :  { %1362 = vst.msk [vmem:[%s4346_s4 + $0x40] sm:$0xff] %vm1353_vm2, %v874_v58  ;;  %v1497_v3 = vsel %vm1353_vm2, %v874_v58, 0.0  ;;  %v1751_v6 = vmul.f32 %v874_v58, %v874_v58  ;;  %v2288_v7 = vpop.f32.mrb[10].mxu0 }
  0xf3   :  { %v1498_v8 = vadd.f32 %v1497_v3, %v1496_v1  ;;  %v1885_v9 = vadd.f32 %v1884_v2, %v1883_v53  ;;  %1365 = vst.msk [vmem:[%s4346_s4 + $0x58] sm:$0xff] %vm1353_vm2, %v2288_v7  ;;  %v877_v10 = vpop.f32.mrb[11].mxu0  ;;  %v1754_v18 = vmul.f32 %v2288_v7, %v2288_v7  ;;  %v1890_v31 = vsel %vm1353_vm2, %v1753_v11, 0.0 }
  0xf4   :  { %v1886_v12 = vsel %vm1353_vm2, %v1751_v6, 0.0  ;;  %1363 = vst.msk [vmem:[%s4346_s4 + $0x48] sm:$0xff] %vm1353_vm2, %v877_v10  ;;  %v1499_v13 = vsel %vm1353_vm2, %v877_v10, 0.0  ;;  %v1752_v14 = vmul.f32 %v877_v10, %v877_v10  ;;  %v1503_v22 = vsel %vm1353_vm2, %v2288_v7, 0.0 }
  0xf5   :  { %v1887_v15 = vadd.f32 %v1886_v12, %v1885_v9  ;;  %v1500_v16 = vadd.f32 %v1499_v13, %v1498_v8  ;;  %v1892_v5 = vsel %vm1353_vm2, %v1754_v18, 0.0 }
  0xf6   :  { %v1888_v19 = vsel %vm1353_vm2, %v1752_v14, 0.0 }
  0xf7   :  { %v1502_v20 = vadd.f32 %v1501_v17, %v1500_v16  ;;  %v1889_v21 = vadd.f32 %v1888_v19, %v1887_v15 }
  0xf8   :  { %v2291_v4 = vpop.f32.mrb[12].mxu0 }
  0xf9   :  { %v1891_v23 = vadd.f32 %v1890_v31, %v1889_v21  ;;  %1368 = vst.msk [vmem:[%s4346_s4 + $0x70] sm:$0xff] %vm1353_vm2, %v2291_v4  ;;  %v890_v24 = vpop.f32.mrb[13].mxu0  ;;  %v1504_v25 = vadd.f32 %v1503_v22, %v1502_v20  ;;  %v1757_v33 = vmul.f32 %v2291_v4, %v2291_v4  ;;  %v1509_v41 = vsel %vm1353_vm2, %v2291_v4, 0.0 }
  0xfa   :  { %1366 = vst.msk [vmem:[%s4346_s4 + $0x60] sm:$0xff] %vm1353_vm2, %v890_v24  ;;  %v1505_v26 = vsel %vm1353_vm2, %v890_v24, 0.0  ;;  %v1755_v27 = vmul.f32 %v890_v24, %v890_v24  ;;  %v2292_v28 = vpop.f32.mrb[14].mxu0 }
  0xfb   :  { %v1506_v29 = vadd.f32 %v1505_v26, %v1504_v25  ;;  %v1893_v30 = vadd.f32 %v1892_v5, %v1891_v23  ;;  %1369 = vst.msk [vmem:[%s4346_s4 + $0x78] sm:$0xff] %vm1353_vm2, %v2292_v28  ;;  %v893_v32 = vpop.f32.mrb[15].mxu0  ;;  %v1758_v42 = vmul.f32 %v2292_v28, %v2292_v28  ;;  %v1898_v47 = vsel %vm1353_vm2, %v1757_v33, 0.0 }
  0xfc   :  { %v1894_v34 = vsel %vm1353_vm2, %v1755_v27, 0.0  ;;  %1367 = vst.msk [vmem:[%s4346_s4 + $0x68] sm:$0xff] %vm1353_vm2, %v893_v32  ;;  %v1507_v36 = vsel %vm1353_vm2, %v893_v32, 0.0  ;;  %v1756_v37 = vmul.f32 %v893_v32, %v893_v32  ;;  %v1511_v48 = vsel %vm1353_vm2, %v2292_v28, 0.0 }
  0xfd   :  { %v1895_v38 = vadd.f32 %v1894_v34, %v1893_v30  ;;  %v1508_v40 = vadd.f32 %v1507_v36, %v1506_v29  ;;  %v1900_v54 = vsel %vm1353_vm2, %v1758_v42, 0.0 }
  0xfe   :  { %v1896_v43 = vsel %vm1353_vm2, %v1756_v37, 0.0 }
  0xff   :  { %v1510_v45 = vadd.f32 %v1509_v41, %v1508_v40  ;;  %v1897_v46 = vadd.f32 %v1896_v43, %v1895_v38 }
 0x100   :  { %v2295_v44 = vpop.f32.mrb[16].mxu0 }
 0x101   :  { %v1899_v49 = vadd.f32 %v1898_v47, %v1897_v46  ;;  %1372 = vst.msk [vmem:[%s4346_s4 + $0x90] sm:$0xff] %vm1353_vm2, %v2295_v44  ;;  %v906_v51 = vpop.f32.mrb[17].mxu0  ;;  %v1512_v52 = vadd.f32 %v1511_v48, %v1510_v45  ;;  %v1761_v61 = vmul.f32 %v2295_v44, %v2295_v44  ;;  %v1517_v53 = vsel %vm1353_vm2, %v2295_v44, 0.0 }
 0x102   :  { %1370 = vst.msk [vmem:[%s4346_s4 + $0x80] sm:$0xff] %vm1353_vm2, %v906_v51  ;;  %v1513_v55 = vsel %vm1353_vm2, %v906_v51, 0.0  ;;  %v1759_v56 = vmul.f32 %v906_v51, %v906_v51  ;;  %v2296_v50 = vpop.f32.mrb[18].mxu0 }
 0x103   :  { %v1514_v57 = vadd.f32 %v1513_v55, %v1512_v52  ;;  %v1901_v59 = vadd.f32 %v1900_v54, %v1899_v49  ;;  %1373 = vst.msk [vmem:[%s4346_s4 + $0x98] sm:$0xff] %vm1353_vm2, %v2296_v50  ;;  %v909_v60 = vpop.f32.mrb[19].mxu0  ;;  %v1762_v58 = vmul.f32 %v2296_v50, %v2296_v50  ;;  %v1906_v6 = vsel %vm1353_vm2, %v1761_v61, 0.0 }
 0x104   :  { %v1902_v62 = vsel %vm1353_vm2, %v1759_v56, 0.0  ;;  %1371 = vst.msk [vmem:[%s4346_s4 + $0x88] sm:$0xff] %vm1353_vm2, %v909_v60  ;;  %v1515_v63 = vsel %vm1353_vm2, %v909_v60, 0.0  ;;  %v1760_v0 = vmul.f32 %v909_v60, %v909_v60  ;;  %v1519_v7 = vsel %vm1353_vm2, %v2296_v50, 0.0 }
 0x105   :  { %v1903_v35 = vadd.f32 %v1902_v62, %v1901_v59  ;;  %v1516_v39 = vadd.f32 %v1515_v63, %v1514_v57  ;;  %v1908_v12 = vsel %vm1353_vm2, %v1762_v58, 0.0 }
 0x106   :  { %v1904_v1 = vsel %vm1353_vm2, %v1760_v0, 0.0 }
 0x107   :  { %v1518_v2 = vadd.f32 %v1517_v53, %v1516_v39  ;;  %v1905_v3 = vadd.f32 %v1904_v1, %v1903_v35 }
 0x108   :  { %v2299_v8 = vpop.f32.mrb[20].mxu0 }
 0x109   :  { %v1907_v9 = vadd.f32 %v1906_v6, %v1905_v3  ;;  %1376 = vst.msk [vmem:[%s4346_s4 + $0xb0] sm:$0xff] %vm1353_vm2, %v2299_v8  ;;  %v922_v10 = vpop.f32.mrb[21].mxu0  ;;  %v1520_v11 = vadd.f32 %v1519_v7, %v1518_v2  ;;  %v1765_v19 = vmul.f32 %v2299_v8, %v2299_v8  ;;  %v1525_v23 = vsel %vm1353_vm2, %v2299_v8, 0.0 }
 0x10a   :  { %1374 = vst.msk [vmem:[%s4346_s4 + $0xa0] sm:$0xff] %vm1353_vm2, %v922_v10  ;;  %v1521_v13 = vsel %vm1353_vm2, %v922_v10, 0.0  ;;  %v1763_v14 = vmul.f32 %v922_v10, %v922_v10  ;;  %v2300_v15 = vpop.f32.mrb[22].mxu0  ;;  %v3352_v56 = vpop.f32.mrb[0].mxu1 }
 0x10b   :  { %v1522_v16 = vadd.f32 %v1521_v13, %v1520_v11  ;;  %v1909_v17 = vadd.f32 %v1908_v12, %v1907_v9  ;;  %1377 = vst.msk [vmem:[%s4346_s4 + $0xb8] sm:$0xff] %vm1353_vm2, %v2300_v15  ;;  %v925_v18 = vpop.f32.mrb[23].mxu0  ;;  %v1766_v24 = vmul.f32 %v2300_v15, %v2300_v15  ;;  %v1914_v27 = vsel %vm1353_vm2, %v1765_v19, 0.0  ;;  %1420 = vst.msk [vmem:[%s4346_s4 + $0x210] sm:$0xff] %vm1353_vm2, %v3352_v56  ;;  %v3361_v60 = vpop.f32.mrb[1].mxu1 }
 0x10c   :  { %v1910_v20 = vsel %vm1353_vm2, %v1763_v14, 0.0  ;;  %1375 = vst.msk [vmem:[%s4346_s4 + $0xa8] sm:$0xff] %vm1353_vm2, %v925_v18  ;;  %v1523_v21 = vsel %vm1353_vm2, %v925_v18, 0.0  ;;  %v1764_v31 = vmul.f32 %v925_v18, %v925_v18  ;;  %v1527_v28 = vsel %vm1353_vm2, %v2300_v15, 0.0  ;;  %1418 = vst.msk [vmem:[%s4346_s4 + $0x200] sm:$0xff] %vm1353_vm2, %v3361_v60  ;;  %v3372_v0 = vpop.f32.mrb[2].mxu1 }
 0x10d   :  { %v1911_v22 = vadd.f32 %v1910_v20, %v1909_v17  ;;  %v1524_v4 = vadd.f32 %v1523_v21, %v1522_v16  ;;  %v1916_v34 = vsel %vm1353_vm2, %v1766_v24, 0.0  ;;  %1421 = vst.msk [vmem:[%s4346_s4 + $0x218] sm:$0xff] %vm1353_vm2, %v3372_v0  ;;  %v3385_v1 = vpop.f32.mrb[3].mxu1 }
 0x10e   :  { %v1912_v25 = vsel %vm1353_vm2, %v1764_v31, 0.0  ;;  %1419 = vst.msk [vmem:[%s4346_s4 + $0x208] sm:$0xff] %vm1353_vm2, %v3385_v1 }
 0x10f   :  { %v1526_v5 = vadd.f32 %v1525_v23, %v1524_v4  ;;  %v1913_v26 = vadd.f32 %v1912_v25, %v1911_v22 }
 0x110   :  { %v2303_v29 = vpop.f32.mrb[24].mxu0 }
 0x111   :  { %v1915_v30 = vadd.f32 %v1914_v27, %v1913_v26  ;;  %1380 = vst.msk [vmem:[%s4346_s4 + $0xd0] sm:$0xff] %vm1353_vm2, %v2303_v29  ;;  %v938_v32 = vpop.f32.mrb[25].mxu0  ;;  %v1528_v33 = vadd.f32 %v1527_v28, %v1526_v5  ;;  %v1769_v43 = vmul.f32 %v2303_v29, %v2303_v29  ;;  %v1533_v49 = vsel %vm1353_vm2, %v2303_v29, 0.0 }
 0x112   :  { %1378 = vst.msk [vmem:[%s4346_s4 + $0xc0] sm:$0xff] %vm1353_vm2, %v938_v32  ;;  %v1529_v36 = vsel %vm1353_vm2, %v938_v32, 0.0  ;;  %v1767_v37 = vmul.f32 %v938_v32, %v938_v32  ;;  %v2304_v38 = vpop.f32.mrb[26].mxu0  ;;  %v3404_v18 = vpop.f32.mrb[4].mxu1 }
 0x113   :  { %v1530_v40 = vadd.f32 %v1529_v36, %v1528_v33  ;;  %v1917_v41 = vadd.f32 %v1916_v34, %v1915_v30  ;;  %1381 = vst.msk [vmem:[%s4346_s4 + $0xd8] sm:$0xff] %vm1353_vm2, %v2304_v38  ;;  %v941_v42 = vpop.f32.mrb[27].mxu0  ;;  %v1770_v51 = vmul.f32 %v2304_v38, %v2304_v38  ;;  %v1922_v50 = vsel %vm1353_vm2, %v1769_v43, 0.0  ;;  %1424 = vst.msk [vmem:[%s4346_s4 + $0x230] sm:$0xff] %vm1353_vm2, %v3404_v18  ;;  %v3413_v31 = vpop.f32.mrb[5].mxu1 }
 0x114   :  { %v1918_v45 = vsel %vm1353_vm2, %v1767_v37, 0.0  ;;  %1379 = vst.msk [vmem:[%s4346_s4 + $0xc8] sm:$0xff] %vm1353_vm2, %v941_v42  ;;  %v1531_v46 = vsel %vm1353_vm2, %v941_v42, 0.0  ;;  %v1768_v47 = vmul.f32 %v941_v42, %v941_v42  ;;  %v1535_v57 = vsel %vm1353_vm2, %v2304_v38, 0.0  ;;  %1422 = vst.msk [vmem:[%s4346_s4 + $0x220] sm:$0xff] %vm1353_vm2, %v3413_v31  ;;  %v3424_v24 = vpop.f32.mrb[6].mxu1 }
 0x115   :  { %v1919_v48 = vadd.f32 %v1918_v45, %v1917_v41  ;;  %v1532_v44 = vadd.f32 %v1531_v46, %v1530_v40  ;;  %v1924_v35 = vsel %vm1353_vm2, %v1770_v51, 0.0  ;;  %1425 = vst.msk [vmem:[%s4346_s4 + $0x238] sm:$0xff] %vm1353_vm2, %v3424_v24  ;;  %v3437_v28 = vpop.f32.mrb[7].mxu1 }
 0x116   :  { %v1920_v52 = vsel %vm1353_vm2, %v1768_v47, 0.0  ;;  %1423 = vst.msk [vmem:[%s4346_s4 + $0x228] sm:$0xff] %vm1353_vm2, %v3437_v28 }
 0x117   :  { %v1534_v54 = vadd.f32 %v1533_v49, %v1532_v44  ;;  %v1921_v55 = vadd.f32 %v1920_v52, %v1919_v48 }
 0x118   :  { %v2307_v59 = vpop.f32.mrb[28].mxu0 }
 0x119   :  { %v1923_v61 = vadd.f32 %v1922_v50, %v1921_v55  ;;  %1384 = vst.msk [vmem:[%s4346_s4 + $0xf0] sm:$0xff] %vm1353_vm2, %v2307_v59  ;;  %v954_v62 = vpop.f32.mrb[29].mxu0  ;;  %v1536_v63 = vadd.f32 %v1535_v57, %v1534_v54  ;;  %v1773_v7 = vmul.f32 %v2307_v59, %v2307_v59  ;;  %v1541_v13 = vsel %vm1353_vm2, %v2307_v59, 0.0 }
 0x11a   :  { %1382 = vst.msk [vmem:[%s4346_s4 + $0xe0] sm:$0xff] %vm1353_vm2, %v954_v62  ;;  %v1537_v39 = vsel %vm1353_vm2, %v954_v62, 0.0  ;;  %v1771_v53 = vmul.f32 %v954_v62, %v954_v62  ;;  %v2308_v58 = vpop.f32.mrb[30].mxu0  ;;  %v3456_v47 = vpop.f32.mrb[8].mxu1 }
 0x11b   :  { %v1538_v2 = vadd.f32 %v1537_v39, %v1536_v63  ;;  %v1925_v3 = vadd.f32 %v1924_v35, %v1923_v61  ;;  %1385 = vst.msk [vmem:[%s4346_s4 + $0xf8] sm:$0xff] %vm1353_vm2, %v2308_v58  ;;  %v957_v6 = vpop.f32.mrb[31].mxu0  ;;  %v1774_v14 = vmul.f32 %v2308_v58, %v2308_v58  ;;  %v1930_v19 = vsel %vm1353_vm2, %v1773_v7, 0.0  ;;  %1428 = vst.msk [vmem:[%s4346_s4 + $0x250] sm:$0xff] %vm1353_vm2, %v3456_v47  ;;  %v3465_v51 = vpop.f32.mrb[9].mxu1 }
 0x11c   :  { %v1926_v8 = vsel %vm1353_vm2, %v1771_v53, 0.0  ;;  %1383 = vst.msk [vmem:[%s4346_s4 + $0xe8] sm:$0xff] %vm1353_vm2, %v957_v6  ;;  %v1539_v9 = vsel %vm1353_vm2, %v957_v6, 0.0  ;;  %v1772_v10 = vmul.f32 %v957_v6, %v957_v6  ;;  %v1543_v20 = vsel %vm1353_vm2, %v2308_v58, 0.0  ;;  %1426 = vst.msk [vmem:[%s4346_s4 + $0x240] sm:$0xff] %vm1353_vm2, %v3465_v51  ;;  %v3476_v50 = vpop.f32.mrb[10].mxu1 }
 0x11d   :  { %v1927_v11 = vadd.f32 %v1926_v8, %v1925_v3  ;;  %v1540_v12 = vadd.f32 %v1539_v9, %v1538_v2  ;;  %v1932_v25 = vsel %vm1353_vm2, %v1774_v14, 0.0  ;;  %1429 = vst.msk [vmem:[%s4346_s4 + $0x258] sm:$0xff] %vm1353_vm2, %v3476_v50  ;;  %v3489_v63 = vpop.f32.mrb[11].mxu1 }
 0x11e   :  { %v1928_v15 = vsel %vm1353_vm2, %v1772_v10, 0.0  ;;  %1427 = vst.msk [vmem:[%s4346_s4 + $0x248] sm:$0xff] %vm1353_vm2, %v3489_v63 }
 0x11f   :  { %v1542_v16 = vadd.f32 %v1541_v13, %v1540_v12  ;;  %v1929_v17 = vadd.f32 %v1928_v15, %v1927_v11 }
 0x120   :  { %v2311_v21 = vpop.f32.mrb[32].mxu0 }
 0x121   :  { %v1931_v22 = vadd.f32 %v1930_v19, %v1929_v17  ;;  %1388 = vst.msk [vmem:[%s4346_s4 + $0x110] sm:$0xff] %vm1353_vm2, %v2311_v21  ;;  %v970_v4 = vpop.f32.mrb[33].mxu0  ;;  %v1544_v23 = vadd.f32 %v1543_v20, %v1542_v16  ;;  %v1777_v33 = vmul.f32 %v2311_v21, %v2311_v21  ;;  %v1549_v41 = vsel %vm1353_vm2, %v2311_v21, 0.0 }
 0x122   :  { %1386 = vst.msk [vmem:[%s4346_s4 + $0x100] sm:$0xff] %vm1353_vm2, %v970_v4  ;;  %v1545_v5 = vsel %vm1353_vm2, %v970_v4, 0.0  ;;  %v1775_v26 = vmul.f32 %v970_v4, %v970_v4  ;;  %v2312_v27 = vpop.f32.mrb[34].mxu0  ;;  %v3508_v14 = vpop.f32.mrb[12].mxu1 }
 0x123   :  { %v1546_v29 = vadd.f32 %v1545_v5, %v1544_v23  ;;  %v1933_v30 = vadd.f32 %v1932_v25, %v1931_v22  ;;  %1389 = vst.msk [vmem:[%s4346_s4 + $0x118] sm:$0xff] %vm1353_vm2, %v2312_v27  ;;  %v973_v32 = vpop.f32.mrb[35].mxu0  ;;  %v1778_v42 = vmul.f32 %v2312_v27, %v2312_v27  ;;  %v1938_v48 = vsel %vm1353_vm2, %v1777_v33, 0.0  ;;  %1432 = vst.msk [vmem:[%s4346_s4 + $0x270] sm:$0xff] %vm1353_vm2, %v3508_v14  ;;  %v3517_v19 = vpop.f32.mrb[13].mxu1 }
 0x124   :  { %v1934_v34 = vsel %vm1353_vm2, %v1775_v26, 0.0  ;;  %1387 = vst.msk [vmem:[%s4346_s4 + $0x108] sm:$0xff] %vm1353_vm2, %v973_v32  ;;  %v1547_v36 = vsel %vm1353_vm2, %v973_v32, 0.0  ;;  %v1776_v37 = vmul.f32 %v973_v32, %v973_v32  ;;  %v1551_v44 = vsel %vm1353_vm2, %v2312_v27, 0.0  ;;  %1430 = vst.msk [vmem:[%s4346_s4 + $0x260] sm:$0xff] %vm1353_vm2, %v3517_v19  ;;  %v3528_v4 = vpop.f32.mrb[14].mxu1 }
 0x125   :  { %v1935_v38 = vadd.f32 %v1934_v34, %v1933_v30  ;;  %v1548_v40 = vadd.f32 %v1547_v36, %v1546_v29  ;;  %v1940_v57 = vsel %vm1353_vm2, %v1778_v42, 0.0  ;;  %1433 = vst.msk [vmem:[%s4346_s4 + $0x278] sm:$0xff] %vm1353_vm2, %v3528_v4  ;;  %v3541_v27 = vpop.f32.mrb[15].mxu1 }
 0x126   :  { %v1936_v43 = vsel %vm1353_vm2, %v1776_v37, 0.0  ;;  %1431 = vst.msk [vmem:[%s4346_s4 + $0x268] sm:$0xff] %vm1353_vm2, %v3541_v27 }
 0x127   :  { %v1550_v45 = vadd.f32 %v1549_v41, %v1548_v40  ;;  %v1937_v46 = vadd.f32 %v1936_v43, %v1935_v38 }
 0x128   :  { %v2315_v49 = vpop.f32.mrb[36].mxu0 }
 0x129   :  { %v1939_v52 = vadd.f32 %v1938_v48, %v1937_v46  ;;  %1392 = vst.msk [vmem:[%s4346_s4 + $0x130] sm:$0xff] %vm1353_vm2, %v2315_v49  ;;  %v986_v54 = vpop.f32.mrb[37].mxu0  ;;  %v1552_v55 = vadd.f32 %v1551_v44, %v1550_v45  ;;  %v1781_v58 = vmul.f32 %v2315_v49, %v2315_v49  ;;  %v1557_v9 = vsel %vm1353_vm2, %v2315_v49, 0.0 }
 0x12a   :  { %1390 = vst.msk [vmem:[%s4346_s4 + $0x120] sm:$0xff] %vm1353_vm2, %v986_v54  ;;  %v1553_v59 = vsel %vm1353_vm2, %v986_v54, 0.0  ;;  %v1779_v61 = vmul.f32 %v986_v54, %v986_v54  ;;  %v2316_v62 = vpop.f32.mrb[38].mxu0  ;;  %v3560_v48 = vpop.f32.mrb[16].mxu1 }
 0x12b   :  { %v1554_v35 = vadd.f32 %v1553_v59, %v1552_v55  ;;  %v1941_v39 = vadd.f32 %v1940_v57, %v1939_v52  ;;  %1393 = vst.msk [vmem:[%s4346_s4 + $0x138] sm:$0xff] %vm1353_vm2, %v2316_v62  ;;  %v989_v53 = vpop.f32.mrb[39].mxu0  ;;  %v1782_v10 = vmul.f32 %v2316_v62, %v2316_v62  ;;  %v1946_v15 = vsel %vm1353_vm2, %v1781_v58, 0.0  ;;  %1436 = vst.msk [vmem:[%s4346_s4 + $0x290] sm:$0xff] %vm1353_vm2, %v3560_v48  ;;  %v3569_v54 = vpop.f32.mrb[17].mxu1 }
 0x12c   :  { %v1942_v2 = vsel %vm1353_vm2, %v1779_v61, 0.0  ;;  %1391 = vst.msk [vmem:[%s4346_s4 + $0x128] sm:$0xff] %vm1353_vm2, %v989_v53  ;;  %v1555_v3 = vsel %vm1353_vm2, %v989_v53, 0.0  ;;  %v1780_v6 = vmul.f32 %v989_v53, %v989_v53  ;;  %v1559_v16 = vsel %vm1353_vm2, %v2316_v62, 0.0  ;;  %1434 = vst.msk [vmem:[%s4346_s4 + $0x280] sm:$0xff] %vm1353_vm2, %v3569_v54  ;;  %v3580_v61 = vpop.f32.mrb[18].mxu1 }
 0x12d   :  { %v1943_v7 = vadd.f32 %v1942_v2, %v1941_v39  ;;  %v1556_v8 = vadd.f32 %v1555_v3, %v1554_v35  ;;  %v1948_v23 = vsel %vm1353_vm2, %v1782_v10, 0.0  ;;  %1437 = vst.msk [vmem:[%s4346_s4 + $0x298] sm:$0xff] %vm1353_vm2, %v3580_v61  ;;  %v3593_v58 = vpop.f32.mrb[19].mxu1 }
 0x12e   :  { %v1944_v11 = vsel %vm1353_vm2, %v1780_v6, 0.0  ;;  %1435 = vst.msk [vmem:[%s4346_s4 + $0x288] sm:$0xff] %vm1353_vm2, %v3593_v58 }
 0x12f   :  { %v1558_v12 = vadd.f32 %v1557_v9, %v1556_v8  ;;  %v1945_v13 = vadd.f32 %v1944_v11, %v1943_v7 }
 0x130   :  { %v2319_v17 = vpop.f32.mrb[40].mxu0 }
 0x131   :  { %v1947_v20 = vadd.f32 %v1946_v15, %v1945_v13  ;;  %1396 = vst.msk [vmem:[%s4346_s4 + $0x150] sm:$0xff] %vm1353_vm2, %v2319_v17  ;;  %v1002_v21 = vpop.f32.mrb[41].mxu0  ;;  %v1560_v22 = vadd.f32 %v1559_v16, %v1558_v12  ;;  %v1785_v33 = vmul.f32 %v2319_v17, %v2319_v17  ;;  %v1565_v41 = vsel %vm1353_vm2, %v2319_v17, 0.0 }
 0x132   :  { %1394 = vst.msk [vmem:[%s4346_s4 + $0x140] sm:$0xff] %vm1353_vm2, %v1002_v21  ;;  %v1561_v25 = vsel %vm1353_vm2, %v1002_v21, 0.0  ;;  %v1783_v5 = vmul.f32 %v1002_v21, %v1002_v21  ;;  %v2320_v26 = vpop.f32.mrb[42].mxu0  ;;  %v3612_v21 = vpop.f32.mrb[20].mxu1 }
 0x133   :  { %v1562_v29 = vadd.f32 %v1561_v25, %v1560_v22  ;;  %v1949_v30 = vadd.f32 %v1948_v23, %v1947_v20  ;;  %1397 = vst.msk [vmem:[%s4346_s4 + $0x158] sm:$0xff] %vm1353_vm2, %v2320_v26  ;;  %v1005_v32 = vpop.f32.mrb[43].mxu0  ;;  %v1786_v42 = vmul.f32 %v2320_v26, %v2320_v26  ;;  %v1954_v44 = vsel %vm1353_vm2, %v1785_v33, 0.0  ;;  %1440 = vst.msk [vmem:[%s4346_s4 + $0x2b0] sm:$0xff] %vm1353_vm2, %v3612_v21 }
 0x134   :  { %v1950_v34 = vsel %vm1353_vm2, %v1783_v5, 0.0  ;;  %1395 = vst.msk [vmem:[%s4346_s4 + $0x148] sm:$0xff] %vm1353_vm2, %v1005_v32  ;;  %v1563_v36 = vsel %vm1353_vm2, %v1005_v32, 0.0  ;;  %v1784_v37 = vmul.f32 %v1005_v32, %v1005_v32  ;;  %v1567_v49 = vsel %vm1353_vm2, %v2320_v26, 0.0  ;;  %v3621_v5 = vpop.f32.mrb[21].mxu1 }
 0x135   :  { %v1951_v38 = vadd.f32 %v1950_v34, %v1949_v30  ;;  %v1564_v40 = vadd.f32 %v1563_v36, %v1562_v29  ;;  %v1956_v62 = vsel %vm1353_vm2, %v1786_v42, 0.0  ;;  %1438 = vst.msk [vmem:[%s4346_s4 + $0x2a0] sm:$0xff] %vm1353_vm2, %v3621_v5  ;;  %v3632_v32 = vpop.f32.mrb[22].mxu1 }
 0x136   :  { %v1952_v43 = vsel %vm1353_vm2, %v1784_v37, 0.0  ;;  %1441 = vst.msk [vmem:[%s4346_s4 + $0x2b8] sm:$0xff] %vm1353_vm2, %v3632_v32 }
 0x137   :  { %v1566_v45 = vadd.f32 %v1565_v41, %v1564_v40  ;;  %v1953_v46 = vadd.f32 %v1952_v43, %v1951_v38  ;;  %v3645_v38 = vpop.f32.mrb[23].mxu1 }
 0x138   :  { %v2323_v52 = vpop.f32.mrb[44].mxu0  ;;  %1439 = vst.msk [vmem:[%s4346_s4 + $0x2a8] sm:$0xff] %vm1353_vm2, %v3645_v38 }
 0x139   :  { %v1955_v55 = vadd.f32 %v1954_v44, %v1953_v46  ;;  %1400 = vst.msk [vmem:[%s4346_s4 + $0x170] sm:$0xff] %vm1353_vm2, %v2323_v52  ;;  %v1018_v57 = vpop.f32.mrb[45].mxu0  ;;  %v1568_v59 = vadd.f32 %v1567_v49, %v1566_v45  ;;  %v1789_v7 = vmul.f32 %v2323_v52, %v2323_v52  ;;  %v1573_v13 = vsel %vm1353_vm2, %v2323_v52, 0.0 }
 0x13a   :  { %1398 = vst.msk [vmem:[%s4346_s4 + $0x160] sm:$0xff] %vm1353_vm2, %v1018_v57  ;;  %v1569_v35 = vsel %vm1353_vm2, %v1018_v57, 0.0  ;;  %v1787_v39 = vmul.f32 %v1018_v57, %v1018_v57  ;;  %v2324_v53 = vpop.f32.mrb[46].mxu0 }
 0x13b   :  { %v1570_v2 = vadd.f32 %v1569_v35, %v1568_v59  ;;  %v1957_v3 = vadd.f32 %v1956_v62, %v1955_v55  ;;  %1401 = vst.msk [vmem:[%s4346_s4 + $0x178] sm:$0xff] %vm1353_vm2, %v2324_v53  ;;  %v1021_v6 = vpop.f32.mrb[47].mxu0  ;;  %v1790_v15 = vmul.f32 %v2324_v53, %v2324_v53  ;;  %v1962_v22 = vsel %vm1353_vm2, %v1789_v7, 0.0 }
 0x13c   :  { %v1958_v8 = vsel %vm1353_vm2, %v1787_v39, 0.0  ;;  %1399 = vst.msk [vmem:[%s4346_s4 + $0x168] sm:$0xff] %vm1353_vm2, %v1021_v6  ;;  %v1571_v9 = vsel %vm1353_vm2, %v1021_v6, 0.0  ;;  %v1788_v10 = vmul.f32 %v1021_v6, %v1021_v6  ;;  %v1575_v23 = vsel %vm1353_vm2, %v2324_v53, 0.0  ;;  %v3664_v39 = vpop.f32.mrb[24].mxu1 }
 0x13d   :  { %v1959_v11 = vadd.f32 %v1958_v8, %v1957_v3  ;;  %v1572_v12 = vadd.f32 %v1571_v9, %v1570_v2  ;;  %v1964_v33 = vsel %vm1353_vm2, %v1790_v15, 0.0  ;;  %1444 = vst.msk [vmem:[%s4346_s4 + $0x2d0] sm:$0xff] %vm1353_vm2, %v3664_v39  ;;  %v3673_v6 = vpop.f32.mrb[25].mxu1 }
 0x13e   :  { %v1960_v16 = vsel %vm1353_vm2, %v1788_v10, 0.0  ;;  %1442 = vst.msk [vmem:[%s4346_s4 + $0x2c0] sm:$0xff] %vm1353_vm2, %v3673_v6  ;;  %v3684_v10 = vpop.f32.mrb[26].mxu1 }
 0x13f   :  { %v1574_v17 = vadd.f32 %v1573_v13, %v1572_v12  ;;  %v1961_v20 = vadd.f32 %v1960_v16, %v1959_v11  ;;  %1445 = vst.msk [vmem:[%s4346_s4 + $0x2d8] sm:$0xff] %vm1353_vm2, %v3684_v10  ;;  %v3697_v16 = vpop.f32.mrb[27].mxu1 }
 0x140   :  { %v2327_v25 = vpop.f32.mrb[48].mxu0  ;;  %1443 = vst.msk [vmem:[%s4346_s4 + $0x2c8] sm:$0xff] %vm1353_vm2, %v3697_v16 }
 0x141   :  { %v1963_v26 = vadd.f32 %v1962_v22, %v1961_v20  ;;  %1404 = vst.msk [vmem:[%s4346_s4 + $0x190] sm:$0xff] %vm1353_vm2, %v2327_v25  ;;  %v1034_v29 = vpop.f32.mrb[49].mxu0  ;;  %v1576_v30 = vadd.f32 %v1575_v23, %v1574_v17  ;;  %v1793_v43 = vmul.f32 %v2327_v25, %v2327_v25  ;;  %v1581_v55 = vsel %vm1353_vm2, %v2327_v25, 0.0 }
 0x142   :  { %1402 = vst.msk [vmem:[%s4346_s4 + $0x180] sm:$0xff] %vm1353_vm2, %v1034_v29  ;;  %v1577_v34 = vsel %vm1353_vm2, %v1034_v29, 0.0  ;;  %v1791_v36 = vmul.f32 %v1034_v29, %v1034_v29  ;;  %v2328_v37 = vpop.f32.mrb[50].mxu0 }
 0x143   :  { %v1578_v40 = vadd.f32 %v1577_v34, %v1576_v30  ;;  %v1965_v41 = vadd.f32 %v1964_v33, %v1963_v26  ;;  %1405 = vst.msk [vmem:[%s4346_s4 + $0x198] sm:$0xff] %vm1353_vm2, %v2328_v37  ;;  %v1037_v42 = vpop.f32.mrb[51].mxu0  ;;  %v1794_v57 = vmul.f32 %v2328_v37, %v2328_v37  ;;  %v1970_v53 = vsel %vm1353_vm2, %v1793_v43, 0.0 }
 0x144   :  { %v1966_v45 = vsel %vm1353_vm2, %v1791_v36, 0.0  ;;  %1403 = vst.msk [vmem:[%s4346_s4 + $0x188] sm:$0xff] %vm1353_vm2, %v1037_v42  ;;  %v1579_v46 = vsel %vm1353_vm2, %v1037_v42, 0.0  ;;  %v1792_v44 = vmul.f32 %v1037_v42, %v1037_v42  ;;  %v1583_v2 = vsel %vm1353_vm2, %v2328_v37, 0.0  ;;  %v3716_v42 = vpop.f32.mrb[28].mxu1 }
 0x145   :  { %v1967_v49 = vadd.f32 %v1966_v45, %v1965_v41  ;;  %v1580_v52 = vadd.f32 %v1579_v46, %v1578_v40  ;;  %v1972_v11 = vsel %vm1353_vm2, %v1794_v57, 0.0  ;;  %1448 = vst.msk [vmem:[%s4346_s4 + $0x2f0] sm:$0xff] %vm1353_vm2, %v3716_v42 }
 0x146   :  { %v1968_v59 = vsel %vm1353_vm2, %v1792_v44, 0.0  ;;  %v3725_v44 = vpop.f32.mrb[29].mxu1 }
 0x147   :  { %v1582_v62 = vadd.f32 %v1581_v55, %v1580_v52  ;;  %v1969_v35 = vadd.f32 %v1968_v59, %v1967_v49  ;;  %1446 = vst.msk [vmem:[%s4346_s4 + $0x2e0] sm:$0xff] %vm1353_vm2, %v3725_v44  ;;  %v3736_v57 = vpop.f32.mrb[30].mxu1 }
 0x148   :  { %v2331_v3 = vpop.f32.mrb[52].mxu0  ;;  %1449 = vst.msk [vmem:[%s4346_s4 + $0x2f8] sm:$0xff] %vm1353_vm2, %v3736_v57 }
 0x149   :  { %v1971_v7 = vadd.f32 %v1970_v53, %v1969_v35  ;;  %1408 = vst.msk [vmem:[%s4346_s4 + $0x1b0] sm:$0xff] %vm1353_vm2, %v2331_v3  ;;  %v1050_v8 = vpop.f32.mrb[53].mxu0  ;;  %v1584_v9 = vadd.f32 %v1583_v2, %v1582_v62  ;;  %v1797_v23 = vmul.f32 %v2331_v3, %v2331_v3  ;;  %v1589_v34 = vsel %vm1353_vm2, %v2331_v3, 0.0  ;;  %v3749_v2 = vpop.f32.mrb[31].mxu1 }
 0x14a   :  { %1406 = vst.msk [vmem:[%s4346_s4 + $0x1a0] sm:$0xff] %vm1353_vm2, %v1050_v8  ;;  %v1585_v12 = vsel %vm1353_vm2, %v1050_v8, 0.0  ;;  %v1795_v13 = vmul.f32 %v1050_v8, %v1050_v8  ;;  %v2332_v15 = vpop.f32.mrb[54].mxu0  ;;  %1447 = vst.msk [vmem:[%s4346_s4 + $0x2e8] sm:$0xff] %vm1353_vm2, %v3749_v2 }
 0x14b   :  { %v1586_v17 = vadd.f32 %v1585_v12, %v1584_v9  ;;  %v1973_v20 = vadd.f32 %v1972_v11, %v1971_v7  ;;  %1409 = vst.msk [vmem:[%s4346_s4 + $0x1b8] sm:$0xff] %vm1353_vm2, %v2332_v15  ;;  %v1053_v22 = vpop.f32.mrb[55].mxu0  ;;  %v1798_v36 = vmul.f32 %v2332_v15, %v2332_v15  ;;  %v1978_v43 = vsel %vm1353_vm2, %v1797_v23, 0.0 }
 0x14c   :  { %v1974_v25 = vsel %vm1353_vm2, %v1795_v13, 0.0  ;;  %1407 = vst.msk [vmem:[%s4346_s4 + $0x1a8] sm:$0xff] %vm1353_vm2, %v1053_v22  ;;  %v1587_v26 = vsel %vm1353_vm2, %v1053_v22, 0.0  ;;  %v1796_v29 = vmul.f32 %v1053_v22, %v1053_v22  ;;  %v1591_v45 = vsel %vm1353_vm2, %v2332_v15, 0.0 }
 0x14d   :  { %v1975_v30 = vadd.f32 %v1974_v25, %v1973_v20  ;;  %v1588_v33 = vadd.f32 %v1587_v26, %v1586_v17  ;;  %v1980_v59 = vsel %vm1353_vm2, %v1798_v36, 0.0 }
 0x14e   :  { %v1976_v37 = vsel %vm1353_vm2, %v1796_v29, 0.0  ;;  %v3768_v29 = vpop.f32.mrb[32].mxu1 }
 0x14f   :  { %v1590_v40 = vadd.f32 %v1589_v34, %v1588_v33  ;;  %v1977_v41 = vadd.f32 %v1976_v37, %v1975_v30  ;;  %1452 = vst.msk [vmem:[%s4346_s4 + $0x310] sm:$0xff] %vm1353_vm2, %v3768_v29  ;;  %v3777_v36 = vpop.f32.mrb[33].mxu1 }
 0x150   :  { %v2335_v46 = vpop.f32.mrb[56].mxu0  ;;  %1450 = vst.msk [vmem:[%s4346_s4 + $0x300] sm:$0xff] %vm1353_vm2, %v3777_v36 }
 0x151   :  { %v1979_v49 = vadd.f32 %v1978_v43, %v1977_v41  ;;  %1412 = vst.msk [vmem:[%s4346_s4 + $0x1d0] sm:$0xff] %vm1353_vm2, %v2335_v46  ;;  %v1066_v52 = vpop.f32.mrb[57].mxu0  ;;  %v1592_v55 = vadd.f32 %v1591_v45, %v1590_v40  ;;  %v1801_v9 = vmul.f32 %v2335_v46, %v2335_v46  ;;  %v1597_v20 = vsel %vm1353_vm2, %v2335_v46, 0.0  ;;  %v3788_v43 = vpop.f32.mrb[34].mxu1 }
 0x152   :  { %1410 = vst.msk [vmem:[%s4346_s4 + $0x1c0] sm:$0xff] %vm1353_vm2, %v1066_v52  ;;  %v1593_v62 = vsel %vm1353_vm2, %v1066_v52, 0.0  ;;  %v1799_v35 = vmul.f32 %v1066_v52, %v1066_v52  ;;  %v2336_v53 = vpop.f32.mrb[58].mxu0  ;;  %1453 = vst.msk [vmem:[%s4346_s4 + $0x318] sm:$0xff] %vm1353_vm2, %v3788_v43 }
 0x153   :  { %v1594_v3 = vadd.f32 %v1593_v62, %v1592_v55  ;;  %v1981_v7 = vadd.f32 %v1980_v59, %v1979_v49  ;;  %1413 = vst.msk [vmem:[%s4346_s4 + $0x1d8] sm:$0xff] %vm1353_vm2, %v2336_v53  ;;  %v1069_v8 = vpop.f32.mrb[59].mxu0  ;;  %v1802_v22 = vmul.f32 %v2336_v53, %v2336_v53  ;;  %v1986_v30 = vsel %vm1353_vm2, %v1801_v9, 0.0  ;;  %v3801_v55 = vpop.f32.mrb[35].mxu1 }
 0x154   :  { %v1982_v11 = vsel %vm1353_vm2, %v1799_v35, 0.0  ;;  %1411 = vst.msk [vmem:[%s4346_s4 + $0x1c8] sm:$0xff] %vm1353_vm2, %v1069_v8  ;;  %v1595_v12 = vsel %vm1353_vm2, %v1069_v8, 0.0  ;;  %v1800_v13 = vmul.f32 %v1069_v8, %v1069_v8  ;;  %v1599_v33 = vsel %vm1353_vm2, %v2336_v53, 0.0  ;;  %1451 = vst.msk [vmem:[%s4346_s4 + $0x308] sm:$0xff] %vm1353_vm2, %v3801_v55 }
 0x155   :  { %v1983_v15 = vadd.f32 %v1982_v11, %v1981_v7  ;;  %v1596_v17 = vadd.f32 %v1595_v12, %v1594_v3  ;;  %v1988_v45 = vsel %vm1353_vm2, %v1802_v22, 0.0 }
 0x156   :  { %v1984_v23 = vsel %vm1353_vm2, %v1800_v13, 0.0 }
 0x157   :  { %v1598_v25 = vadd.f32 %v1597_v20, %v1596_v17  ;;  %v1985_v26 = vadd.f32 %v1984_v23, %v1983_v15  ;;  %v1807_v17 = vmul.f32 %v3361_v60, %v3361_v60  ;;  %v3822_v23 = vpop.f32.mrb[36].mxu1 }
 0x158   :  { %v2339_v34 = vpop.f32.mrb[60].mxu0  ;;  %1456 = vst.msk [vmem:[%s4346_s4 + $0x330] sm:$0xff] %vm1353_vm2, %v3822_v23 }
 0x159   :  { %v1987_v37 = vadd.f32 %v1986_v30, %v1985_v26  ;;  %1416 = vst.msk [vmem:[%s4346_s4 + $0x1f0] sm:$0xff] %vm1353_vm2, %v2339_v34  ;;  %v1082_v40 = vpop.f32.mrb[61].mxu0  ;;  %v1600_v41 = vadd.f32 %v1599_v33, %v1598_v25  ;;  %v1805_v53 = vmul.f32 %v2339_v34, %v2339_v34  ;;  %v1605_v12 = vsel %vm1353_vm2, %v2339_v34, 0.0  ;;  %v3833_v33 = vpop.f32.mrb[37].mxu1 }
 0x15a   :  { %1414 = vst.msk [vmem:[%s4346_s4 + $0x1e0] sm:$0xff] %vm1353_vm2, %v1082_v40  ;;  %v1601_v46 = vsel %vm1353_vm2, %v1082_v40, 0.0  ;;  %v1803_v49 = vmul.f32 %v1082_v40, %v1082_v40  ;;  %v2340_v52 = vpop.f32.mrb[62].mxu0  ;;  %v1609_v30 = vsel %vm1353_vm2, %v3361_v60, 0.0  ;;  %1454 = vst.msk [vmem:[%s4346_s4 + $0x320] sm:$0xff] %vm1353_vm2, %v3833_v33  ;;  %v3840_v40 = vpop.f32.mrb[38].mxu1 }
 0x15b   :  { %v1602_v59 = vadd.f32 %v1601_v46, %v1600_v41  ;;  %v1989_v62 = vadd.f32 %v1988_v45, %v1987_v37  ;;  %1417 = vst.msk [vmem:[%s4346_s4 + $0x1f8] sm:$0xff] %vm1353_vm2, %v2340_v52  ;;  %v1085_v35 = vpop.f32.mrb[63].mxu0  ;;  %v1806_v13 = vmul.f32 %v2340_v52, %v2340_v52  ;;  %v1994_v25 = vsel %vm1353_vm2, %v1805_v53, 0.0  ;;  %1457 = vst.msk [vmem:[%s4346_s4 + $0x338] sm:$0xff] %vm1353_vm2, %v3840_v40  ;;  %v3851_v46 = vpop.f32.mrb[39].mxu1 }
 0x15c   :  { %v1990_v3 = vsel %vm1353_vm2, %v1803_v49, 0.0  ;;  %1415 = vst.msk [vmem:[%s4346_s4 + $0x1e8] sm:$0xff] %vm1353_vm2, %v1085_v35  ;;  %v1603_v7 = vsel %vm1353_vm2, %v1085_v35, 0.0  ;;  %v1804_v8 = vmul.f32 %v1085_v35, %v1085_v35  ;;  %v1607_v26 = vsel %vm1353_vm2, %v2340_v52, 0.0  ;;  %1455 = vst.msk [vmem:[%s4346_s4 + $0x328] sm:$0xff] %vm1353_vm2, %v3851_v46 }
 0x15d   :  { %v1991_v9 = vadd.f32 %v1990_v3, %v1989_v62  ;;  %v1604_v11 = vadd.f32 %v1603_v7, %v1602_v59  ;;  %v1996_v60 = vsel %vm1353_vm2, %v1806_v13, 0.0  ;;  %v1998_v41 = vsel %vm1353_vm2, %v1807_v17, 0.0  ;;  %v3869_v13 = vpop.f32.mrb[40].mxu1 }
 0x15e   :  { %v1992_v15 = vsel %vm1353_vm2, %v1804_v8, 0.0  ;;  %v1808_v45 = vmul.f32 %v3385_v1, %v3385_v1  ;;  %v1809_v59 = vmul.f32 %v3352_v56, %v3352_v56  ;;  %v1611_v62 = vsel %vm1353_vm2, %v3385_v1, 0.0  ;;  %1460 = vst.msk [vmem:[%s4346_s4 + $0x350] sm:$0xff] %vm1353_vm2, %v3869_v13  ;;  %v3881_v17 = vpop.f32.mrb[41].mxu1 }
 0x15f   :  { %v1606_v20 = vadd.f32 %v1605_v12, %v1604_v11  ;;  %v1993_v22 = vadd.f32 %v1992_v15, %v1991_v9  ;;  %v1613_v3 = vsel %vm1353_vm2, %v3352_v56, 0.0  ;;  %v1810_v7 = vmul.f32 %v3372_v0, %v3372_v0  ;;  %1458 = vst.msk [vmem:[%s4346_s4 + $0x340] sm:$0xff] %vm1353_vm2, %v3881_v17 }
 0x160   :  { %v2000_v8 = vsel %vm1353_vm2, %v1808_v45, 0.0  ;;  %v1811_v9 = vmul.f32 %v3413_v31, %v3413_v31  ;;  %v2002_v15 = vsel %vm1353_vm2, %v1809_v59, 0.0  ;;  %v1615_v1 = vsel %vm1353_vm2, %v3372_v0, 0.0  ;;  %v3888_v0 = vpop.f32.mrb[42].mxu1 }
 0x161   :  { %v1608_v34 = vadd.f32 %v1607_v26, %v1606_v20  ;;  %v1995_v37 = vadd.f32 %v1994_v25, %v1993_v22  ;;  %v1617_v56 = vsel %vm1353_vm2, %v3413_v31, 0.0  ;;  %v2004_v31 = vsel %vm1353_vm2, %v1810_v7, 0.0  ;;  %1461 = vst.msk [vmem:[%s4346_s4 + $0x358] sm:$0xff] %vm1353_vm2, %v3888_v0 }
 0x162   :  { %v2006_v25 = vsel %vm1353_vm2, %v1811_v9, 0.0  ;;  %v1812_v26 = vmul.f32 %v3437_v28, %v3437_v28  ;;  %v1814_v59 = vmul.f32 %v3424_v24, %v3424_v24 }
 0x163   :  { %v1997_v49 = vadd.f32 %v1996_v60, %v1995_v37  ;;  %v1610_v52 = vadd.f32 %v1609_v30, %v1608_v34  ;;  %v3899_v30 = vpop.f32.mrb[43].mxu1  ;;  %v1813_v60 = vmul.f32 %v3404_v18, %v3404_v18 }
 0x164   :  { %1459 = vst.msk [vmem:[%s4346_s4 + $0x348] sm:$0xff] %vm1353_vm2, %v3899_v30  ;;  %v3917_v7 = vpop.f32.mrb[44].mxu1 }
 0x165   :  { %v1999_v35 = vadd.f32 %v1998_v41, %v1997_v49  ;;  %v1612_v53 = vadd.f32 %v1611_v62, %v1610_v52  ;;  %v1619_v41 = vsel %vm1353_vm2, %v3437_v28, 0.0  ;;  %v1621_v52 = vsel %vm1353_vm2, %v3404_v18, 0.0  ;;  %1464 = vst.msk [vmem:[%s4346_s4 + $0x370] sm:$0xff] %vm1353_vm2, %v3917_v7  ;;  %v3929_v9 = vpop.f32.mrb[45].mxu1 }
 0x166   :  { %v2008_v62 = vsel %vm1353_vm2, %v1812_v26, 0.0  ;;  %v1623_v28 = vsel %vm1353_vm2, %v3424_v24, 0.0  ;;  %v1625_v18 = vsel %vm1353_vm2, %v3465_v51, 0.0  ;;  %1462 = vst.msk [vmem:[%s4346_s4 + $0x360] sm:$0xff] %vm1353_vm2, %v3929_v9  ;;  %v3936_v24 = vpop.f32.mrb[46].mxu1 }
 0x167   :  { %v1614_v11 = vadd.f32 %v1613_v3, %v1612_v53  ;;  %v2001_v12 = vadd.f32 %v2000_v8, %v1999_v35  ;;  %v1815_v35 = vmul.f32 %v3465_v51, %v3465_v51  ;;  %v2010_v8 = vsel %vm1353_vm2, %v1813_v60, 0.0  ;;  %1465 = vst.msk [vmem:[%s4346_s4 + $0x378] sm:$0xff] %vm1353_vm2, %v3936_v24 }
 0x168   :  { %v2012_v51 = vsel %vm1353_vm2, %v1814_v59, 0.0  ;;  %v1818_v60 = vmul.f32 %v3476_v50, %v3476_v50 }
 0x169   :  { %v2003_v20 = vadd.f32 %v2002_v15, %v2001_v12  ;;  %v1616_v22 = vadd.f32 %v1615_v1, %v1614_v11  ;;  %v2014_v15 = vsel %vm1353_vm2, %v1815_v35, 0.0  ;;  %v1816_v1 = vmul.f32 %v3489_v63, %v3489_v63 }
 0x16b   :  { %v1618_v34 = vadd.f32 %v1617_v56, %v1616_v22  ;;  %v2005_v37 = vadd.f32 %v2004_v31, %v2003_v20  ;;  %v3947_v56 = vpop.f32.mrb[47].mxu1  ;;  %v1817_v31 = vmul.f32 %v3456_v47, %v3456_v47 }
 0x16c   :  { %1463 = vst.msk [vmem:[%s4346_s4 + $0x368] sm:$0xff] %vm1353_vm2, %v3947_v56  ;;  %v3965_v59 = vpop.f32.mrb[48].mxu1 }
 0x16d   :  { %v2007_v45 = vadd.f32 %v2006_v25, %v2005_v37  ;;  %v1620_v49 = vadd.f32 %v1619_v41, %v1618_v34  ;;  %v1627_v25 = vsel %vm1353_vm2, %v3489_v63, 0.0  ;;  %v1629_v37 = vsel %vm1353_vm2, %v3456_v47, 0.0  ;;  %1468 = vst.msk [vmem:[%s4346_s4 + $0x390] sm:$0xff] %vm1353_vm2, %v3965_v59  ;;  %v3977_v35 = vpop.f32.mrb[49].mxu1 }
 0x16e   :  { %v2016_v41 = vsel %vm1353_vm2, %v1816_v1, 0.0  ;;  %v1631_v63 = vsel %vm1353_vm2, %v3476_v50, 0.0  ;;  %v1633_v47 = vsel %vm1353_vm2, %v3517_v19, 0.0  ;;  %1466 = vst.msk [vmem:[%s4346_s4 + $0x380] sm:$0xff] %vm1353_vm2, %v3977_v35  ;;  %v3984_v50 = vpop.f32.mrb[50].mxu1 }
 0x16f   :  { %v1622_v53 = vadd.f32 %v1621_v52, %v1620_v49  ;;  %v2009_v3 = vadd.f32 %v2008_v62, %v2007_v45  ;;  %v1819_v45 = vmul.f32 %v3517_v19, %v3517_v19  ;;  %v2018_v62 = vsel %vm1353_vm2, %v1817_v31, 0.0  ;;  %1469 = vst.msk [vmem:[%s4346_s4 + $0x398] sm:$0xff] %vm1353_vm2, %v3984_v50 }
 0x170   :  { %v2020_v19 = vsel %vm1353_vm2, %v1818_v60, 0.0  ;;  %v1822_v31 = vmul.f32 %v3528_v4, %v3528_v4 }
 0x171   :  { %v2011_v11 = vadd.f32 %v2010_v8, %v2009_v3  ;;  %v1624_v12 = vadd.f32 %v1623_v28, %v1622_v53  ;;  %v2022_v8 = vsel %vm1353_vm2, %v1819_v45, 0.0  ;;  %v1820_v28 = vmul.f32 %v3541_v27, %v3541_v27 }
 0x173   :  { %v1626_v20 = vadd.f32 %v1625_v18, %v1624_v12  ;;  %v2013_v22 = vadd.f32 %v2012_v51, %v2011_v11  ;;  %v3995_v18 = vpop.f32.mrb[51].mxu1  ;;  %v1821_v51 = vmul.f32 %v3508_v14, %v3508_v14 }
 0x174   :  { %1467 = vst.msk [vmem:[%s4346_s4 + $0x388] sm:$0xff] %vm1353_vm2, %v3995_v18  ;;  %v4013_v60 = vpop.f32.mrb[52].mxu1 }
 0x175   :  { %v2015_v26 = vadd.f32 %v2014_v15, %v2013_v22  ;;  %v1628_v34 = vadd.f32 %v1627_v25, %v1626_v20  ;;  %v1635_v15 = vsel %vm1353_vm2, %v3541_v27, 0.0  ;;  %v1637_v22 = vsel %vm1353_vm2, %v3508_v14, 0.0  ;;  %1472 = vst.msk [vmem:[%s4346_s4 + $0x3b0] sm:$0xff] %vm1353_vm2, %v4013_v60  ;;  %v4025_v45 = vpop.f32.mrb[53].mxu1 }
 0x176   :  { %v2024_v25 = vsel %vm1353_vm2, %v1820_v28, 0.0  ;;  %v1639_v27 = vsel %vm1353_vm2, %v3528_v4, 0.0  ;;  %v1641_v14 = vsel %vm1353_vm2, %v3569_v54, 0.0  ;;  %1470 = vst.msk [vmem:[%s4346_s4 + $0x3a0] sm:$0xff] %vm1353_vm2, %v4025_v45  ;;  %v4032_v4 = vpop.f32.mrb[54].mxu1 }
 0x177   :  { %v1630_v49 = vadd.f32 %v1629_v37, %v1628_v34  ;;  %v2017_v52 = vadd.f32 %v2016_v41, %v2015_v26  ;;  %v1823_v26 = vmul.f32 %v3569_v54, %v3569_v54  ;;  %v2026_v41 = vsel %vm1353_vm2, %v1821_v51, 0.0  ;;  %1473 = vst.msk [vmem:[%s4346_s4 + $0x3b8] sm:$0xff] %vm1353_vm2, %v4032_v4 }
 0x178   :  { %v2028_v54 = vsel %vm1353_vm2, %v1822_v31, 0.0  ;;  %v1826_v51 = vmul.f32 %v3580_v61, %v3580_v61 }
 0x179   :  { %v2019_v53 = vadd.f32 %v2018_v62, %v2017_v52  ;;  %v1632_v3 = vadd.f32 %v1631_v63, %v1630_v49  ;;  %v2030_v62 = vsel %vm1353_vm2, %v1823_v26, 0.0  ;;  %v1824_v63 = vmul.f32 %v3593_v58, %v3593_v58 }
 0x17b   :  { %v1634_v11 = vadd.f32 %v1633_v47, %v1632_v3  ;;  %v2021_v12 = vadd.f32 %v2020_v19, %v2019_v53  ;;  %v4043_v47 = vpop.f32.mrb[55].mxu1  ;;  %v1825_v19 = vmul.f32 %v3560_v48, %v3560_v48 }
 0x17c   :  { %1471 = vst.msk [vmem:[%s4346_s4 + $0x3a8] sm:$0xff] %vm1353_vm2, %v4043_v47  ;;  %v4061_v31 = vpop.f32.mrb[56].mxu1 }
 0x17d   :  { %v2023_v1 = vadd.f32 %v2022_v8, %v2021_v12  ;;  %v1636_v20 = vadd.f32 %v1635_v15, %v1634_v11  ;;  %v1643_v8 = vsel %vm1353_vm2, %v3593_v58, 0.0  ;;  %v1645_v12 = vsel %vm1353_vm2, %v3560_v48, 0.0  ;;  %1476 = vst.msk [vmem:[%s4346_s4 + $0x3d0] sm:$0xff] %vm1353_vm2, %v4061_v31  ;;  %v4073_v26 = vpop.f32.mrb[57].mxu1 }
 0x17e   :  { %v2032_v15 = vsel %vm1353_vm2, %v1824_v63, 0.0  ;;  %v1647_v58 = vsel %vm1353_vm2, %v3580_v61, 0.0  ;;  %v1649_v48 = vsel %vm1353_vm2, %v3621_v5, 0.0  ;;  %1474 = vst.msk [vmem:[%s4346_s4 + $0x3c0] sm:$0xff] %vm1353_vm2, %v4073_v26  ;;  %v4080_v61 = vpop.f32.mrb[58].mxu1 }
 0x17f   :  { %v1638_v34 = vadd.f32 %v1637_v22, %v1636_v20  ;;  %v2025_v37 = vadd.f32 %v2024_v25, %v2023_v1  ;;  %v1827_v1 = vmul.f32 %v3621_v5, %v3621_v5  ;;  %v2034_v25 = vsel %vm1353_vm2, %v1825_v19, 0.0  ;;  %1477 = vst.msk [vmem:[%s4346_s4 + $0x3d8] sm:$0xff] %vm1353_vm2, %v4080_v61 }
 0x180   :  { %v2036_v5 = vsel %vm1353_vm2, %v1826_v51, 0.0  ;;  %v1830_v19 = vmul.f32 %v3632_v32, %v3632_v32 }
 0x181   :  { %v2027_v49 = vadd.f32 %v2026_v41, %v2025_v37  ;;  %v1640_v52 = vadd.f32 %v1639_v27, %v1638_v34  ;;  %v2038_v41 = vsel %vm1353_vm2, %v1827_v1, 0.0  ;;  %v1828_v27 = vmul.f32 %v3645_v38, %v3645_v38 }
 0x183   :  { %v1642_v53 = vadd.f32 %v1641_v14, %v1640_v52  ;;  %v2029_v3 = vadd.f32 %v2028_v54, %v2027_v49  ;;  %v4091_v14 = vpop.f32.mrb[59].mxu1  ;;  %v1829_v54 = vmul.f32 %v3612_v21, %v3612_v21 }
 0x184   :  { %1475 = vst.msk [vmem:[%s4346_s4 + $0x3c8] sm:$0xff] %vm1353_vm2, %v4091_v14  ;;  %v4109_v51 = vpop.f32.mrb[60].mxu1 }
 0x185   :  { %v2031_v28 = vadd.f32 %v2030_v62, %v2029_v3  ;;  %v1644_v11 = vadd.f32 %v1643_v8, %v1642_v53  ;;  %v1651_v62 = vsel %vm1353_vm2, %v3645_v38, 0.0  ;;  %v1653_v3 = vsel %vm1353_vm2, %v3612_v21, 0.0  ;;  %1480 = vst.msk [vmem:[%s4346_s4 + $0x3f0] sm:$0xff] %vm1353_vm2, %v4109_v51  ;;  %v4121_v1 = vpop.f32.mrb[61].mxu1 }
 0x186   :  { %v2040_v8 = vsel %vm1353_vm2, %v1828_v27, 0.0  ;;  %v1655_v38 = vsel %vm1353_vm2, %v3632_v32, 0.0  ;;  %v1657_v21 = vsel %vm1353_vm2, %v3673_v6, 0.0  ;;  %1478 = vst.msk [vmem:[%s4346_s4 + $0x3e0] sm:$0xff] %vm1353_vm2, %v4121_v1  ;;  %v4128_v32 = vpop.f32.mrb[62].mxu1 }
 0x187   :  { %v1646_v20 = vadd.f32 %v1645_v12, %v1644_v11  ;;  %v2033_v22 = vadd.f32 %v2032_v15, %v2031_v28  ;;  %v1831_v28 = vmul.f32 %v3673_v6, %v3673_v6  ;;  %v2042_v15 = vsel %vm1353_vm2, %v1829_v54, 0.0  ;;  %1481 = vst.msk [vmem:[%s4346_s4 + $0x3f8] sm:$0xff] %vm1353_vm2, %v4128_v32 }
 0x188   :  { %v2044_v6 = vsel %vm1353_vm2, %v1830_v19, 0.0  ;;  %v1834_v54 = vmul.f32 %v3684_v10, %v3684_v10 }
 0x189   :  { %v2035_v34 = vadd.f32 %v2034_v25, %v2033_v22  ;;  %v1648_v37 = vadd.f32 %v1647_v58, %v1646_v20  ;;  %v2046_v25 = vsel %vm1353_vm2, %v1831_v28, 0.0  ;;  %v1832_v58 = vmul.f32 %v3697_v16, %v3697_v16 }
 0x18b   :  { %v1650_v49 = vadd.f32 %v1649_v48, %v1648_v37  ;;  %v2037_v52 = vadd.f32 %v2036_v5, %v2035_v34  ;;  %v4139_v48 = vpop.f32.mrb[63].mxu1  ;;  %v1833_v5 = vmul.f32 %v3664_v39, %v3664_v39 }
 0x18c   :  { %1479 = vst.msk [vmem:[%s4346_s4 + $0x3e8] sm:$0xff] %vm1353_vm2, %v4139_v48 }
 0x18d   :  { %v2039_v63 = vadd.f32 %v2038_v41, %v2037_v52  ;;  %v1652_v53 = vadd.f32 %v1651_v62, %v1650_v49  ;;  %v1659_v41 = vsel %vm1353_vm2, %v3697_v16, 0.0  ;;  %v1661_v52 = vsel %vm1353_vm2, %v3664_v39, 0.0 }
 0x18e   :  { %v2048_v62 = vsel %vm1353_vm2, %v1832_v58, 0.0  ;;  %v2050_v19 = vsel %vm1353_vm2, %v1833_v5, 0.0  ;;  %v1663_v16 = vsel %vm1353_vm2, %v3684_v10, 0.0  ;;  %v1667_v10 = vsel %vm1353_vm2, %v3749_v2, 0.0 }
 0x18f   :  { %v1654_v11 = vadd.f32 %v1653_v3, %v1652_v53  ;;  %v2041_v12 = vadd.f32 %v2040_v8, %v2039_v63  ;;  %v1835_v63 = vmul.f32 %v3725_v44, %v3725_v44  ;;  %v1665_v8 = vsel %vm1353_vm2, %v3725_v44, 0.0 }
 0x190   :  { %v1669_v44 = vsel %vm1353_vm2, %v3716_v42, 0.0 }
 0x191   :  { %v2043_v20 = vadd.f32 %v2042_v15, %v2041_v12  ;;  %v1656_v22 = vadd.f32 %v1655_v38, %v1654_v11  ;;  %v2052_v11 = vsel %vm1353_vm2, %v1834_v54, 0.0  ;;  %v2054_v12 = vsel %vm1353_vm2, %v1835_v63, 0.0 }
 0x192   :  { %v1836_v15 = vmul.f32 %v3749_v2, %v3749_v2  ;;  %v1671_v2 = vsel %vm1353_vm2, %v3736_v57, 0.0 }
 0x193   :  { %v1658_v34 = vadd.f32 %v1657_v21, %v1656_v22  ;;  %v2045_v37 = vadd.f32 %v2044_v6, %v2043_v20  ;;  %v1837_v20 = vmul.f32 %v3716_v42, %v3716_v42 }
 0x194   :  { %v2056_v58 = vsel %vm1353_vm2, %v1836_v15, 0.0 }
 0x195   :  { %v2047_v27 = vadd.f32 %v2046_v25, %v2045_v37  ;;  %v1660_v49 = vadd.f32 %v1659_v41, %v1658_v34  ;;  %v1838_v25 = vmul.f32 %v3736_v57, %v3736_v57  ;;  %v1839_v34 = vmul.f32 %v3777_v36, %v3777_v36 }
 0x196   :  { %v2058_v41 = vsel %vm1353_vm2, %v1837_v20, 0.0  ;;  %v1675_v57 = vsel %vm1353_vm2, %v3801_v55, 0.0 }
 0x197   :  { %v1662_v53 = vadd.f32 %v1661_v52, %v1660_v49  ;;  %v2049_v3 = vadd.f32 %v2048_v62, %v2047_v27  ;;  %v1673_v27 = vsel %vm1353_vm2, %v3777_v36, 0.0  ;;  %v2060_v52 = vsel %vm1353_vm2, %v1838_v25, 0.0 }
 0x198   :  { %v2062_v54 = vsel %vm1353_vm2, %v1839_v34, 0.0  ;;  %v1840_v62 = vmul.f32 %v3801_v55, %v3801_v55  ;;  %v1677_v36 = vsel %vm1353_vm2, %v3768_v29, 0.0  ;;  %v1679_v55 = vsel %vm1353_vm2, %v3788_v43, 0.0 }
 0x199   :  { %v2051_v28 = vadd.f32 %v2050_v19, %v2049_v3  ;;  %v1664_v39 = vadd.f32 %v1663_v16, %v1662_v53  ;;  %v1841_v3 = vmul.f32 %v3768_v29, %v3768_v29  ;;  %v1845_v25 = vmul.f32 %v3822_v23, %v3822_v23 }
 0x19b   :  { %v1666_v38 = vadd.f32 %v1665_v8, %v1664_v39  ;;  %v2053_v21 = vadd.f32 %v2052_v11, %v2051_v28  ;;  %v1842_v8 = vmul.f32 %v3788_v43, %v3788_v43  ;;  %v2064_v28 = vsel %vm1353_vm2, %v1840_v62, 0.0 }
 0x19c   :  { %v1843_v39 = vmul.f32 %v3833_v33, %v3833_v33  ;;  %v2066_v15 = vsel %vm1353_vm2, %v1841_v3, 0.0  ;;  %v1683_v43 = vsel %vm1353_vm2, %v3851_v46, 0.0 }
 0x19d   :  { %v2055_v22 = vadd.f32 %v2054_v12, %v2053_v21  ;;  %v1668_v6 = vadd.f32 %v1667_v10, %v1666_v38  ;;  %v1681_v38 = vsel %vm1353_vm2, %v3833_v33, 0.0  ;;  %v2068_v20 = vsel %vm1353_vm2, %v1842_v8, 0.0 }
 0x19e   :  { %v2070_v10 = vsel %vm1353_vm2, %v1843_v39, 0.0  ;;  %v1685_v33 = vsel %vm1353_vm2, %v3822_v23, 0.0 }
 0x19f   :  { %v1670_v37 = vadd.f32 %v1669_v44, %v1668_v6  ;;  %v2057_v5 = vadd.f32 %v2056_v58, %v2055_v22  ;;  %v1844_v22 = vmul.f32 %v3851_v46, %v3851_v46  ;;  %v1687_v46 = vsel %vm1353_vm2, %v3840_v40, 0.0 }
 0x1a1   :  { %v2059_v49 = vadd.f32 %v2058_v41, %v2057_v5  ;;  %v1672_v42 = vadd.f32 %v1671_v2, %v1670_v37  ;;  %v1846_v37 = vmul.f32 %v3840_v40, %v3840_v40  ;;  %v2072_v5 = vsel %vm1353_vm2, %v1844_v22, 0.0 }
 0x1a2   :  { %v1847_v41 = vmul.f32 %v3881_v17, %v3881_v17  ;;  %v1691_v40 = vsel %vm1353_vm2, %v3899_v30, 0.0  ;;  %v1853_v22 = vmul.f32 %v3917_v7, %v3917_v7 }
 0x1a3   :  { %v1674_v63 = vadd.f32 %v1673_v27, %v1672_v42  ;;  %v2061_v53 = vadd.f32 %v2060_v52, %v2059_v49  ;;  %v2074_v49 = vsel %vm1353_vm2, %v1845_v25, 0.0  ;;  %v1689_v42 = vsel %vm1353_vm2, %v3881_v17, 0.0 }
 0x1a4   :  { %v2078_v62 = vsel %vm1353_vm2, %v1847_v41, 0.0  ;;  %v1693_v17 = vsel %vm1353_vm2, %v3869_v13, 0.0  ;;  %v1854_v25 = vmul.f32 %v3936_v24, %v3936_v24 }
 0x1a5   :  { %v2063_v19 = vadd.f32 %v2062_v54, %v2061_v53  ;;  %v1676_v16 = vadd.f32 %v1675_v57, %v1674_v63  ;;  %v2076_v54 = vsel %vm1353_vm2, %v1846_v37, 0.0  ;;  %v1848_v63 = vmul.f32 %v3899_v30, %v3899_v30 }
 0x1a6   :  { %v1849_v57 = vmul.f32 %v3869_v13, %v3869_v13  ;;  %v1695_v30 = vsel %vm1353_vm2, %v3888_v0, 0.0  ;;  %v2090_v37 = vsel %vm1353_vm2, %v1853_v22, 0.0 }
 0x1a7   :  { %v1678_v11 = vadd.f32 %v1677_v36, %v1676_v16  ;;  %v2065_v12 = vadd.f32 %v2064_v28, %v2063_v19  ;;  %v1850_v36 = vmul.f32 %v3888_v0, %v3888_v0  ;;  %v2080_v8 = vsel %vm1353_vm2, %v1848_v63, 0.0 }
 0x1a8   :  { %v1851_v28 = vmul.f32 %v3929_v9, %v3929_v9  ;;  %v1699_v0 = vsel %vm1353_vm2, %v3947_v56, 0.0 }
 0x1a9   :  { %v2067_v21 = vadd.f32 %v2066_v15, %v2065_v12  ;;  %v1680_v29 = vadd.f32 %v1679_v55, %v1678_v11  ;;  %v2082_v12 = vsel %vm1353_vm2, %v1849_v57, 0.0  ;;  %v1697_v15 = vsel %vm1353_vm2, %v3929_v9, 0.0 }
 0x1aa   :  { %v1701_v9 = vsel %vm1353_vm2, %v3917_v7, 0.0 }
 0x1ab   :  { %v1682_v6 = vadd.f32 %v1681_v38, %v1680_v29  ;;  %v2069_v44 = vadd.f32 %v2068_v20, %v2067_v21  ;;  %v2084_v38 = vsel %vm1353_vm2, %v1850_v36, 0.0  ;;  %v2086_v21 = vsel %vm1353_vm2, %v1851_v28, 0.0 }
 0x1ac   :  { %v1852_v29 = vmul.f32 %v3947_v56, %v3947_v56  ;;  %v1703_v56 = vsel %vm1353_vm2, %v3936_v24, 0.0  ;;  %v1707_v24 = vsel %vm1353_vm2, %v3995_v18, 0.0 }
 0x1ad   :  { %v2071_v58 = vadd.f32 %v2070_v10, %v2069_v44  ;;  %v1684_v34 = vadd.f32 %v1683_v43, %v1682_v6 }
 0x1ae   :  { %v2088_v43 = vsel %vm1353_vm2, %v1852_v29, 0.0 }
 0x1af   :  { %v1686_v2 = vadd.f32 %v1685_v33, %v1684_v34  ;;  %v2073_v27 = vadd.f32 %v2072_v5, %v2071_v58  ;;  %v1855_v58 = vmul.f32 %v3977_v35, %v3977_v35  ;;  %v1705_v5 = vsel %vm1353_vm2, %v3977_v35, 0.0 }
 0x1b0   :  { %v1709_v35 = vsel %vm1353_vm2, %v3965_v59, 0.0 }
 0x1b1   :  { %v2075_v52 = vadd.f32 %v2074_v49, %v2073_v27  ;;  %v1688_v23 = vadd.f32 %v1687_v46, %v1686_v2  ;;  %v2092_v2 = vsel %vm1353_vm2, %v1854_v25, 0.0  ;;  %v2094_v27 = vsel %vm1353_vm2, %v1855_v58, 0.0 }
 0x1b2   :  { %v1856_v49 = vmul.f32 %v3995_v18, %v3995_v18  ;;  %v1711_v18 = vsel %vm1353_vm2, %v3984_v50, 0.0  ;;  %v1865_v25 = vmul.f32 %v4061_v31, %v4061_v31 }
 0x1b3   :  { %v1690_v53 = vadd.f32 %v1689_v42, %v1688_v23  ;;  %v2077_v3 = vadd.f32 %v2076_v54, %v2075_v52  ;;  %v1857_v52 = vmul.f32 %v3965_v59, %v3965_v59 }
 0x1b4   :  { %v2096_v63 = vsel %vm1353_vm2, %v1856_v49, 0.0 }
 0x1b5   :  { %v2079_v19 = vadd.f32 %v2078_v62, %v2077_v3  ;;  %v1692_v16 = vadd.f32 %v1691_v40, %v1690_v53  ;;  %v1858_v62 = vmul.f32 %v3984_v50, %v3984_v50  ;;  %v1859_v53 = vmul.f32 %v4025_v45, %v4025_v45 }
 0x1b6   :  { %v2098_v40 = vsel %vm1353_vm2, %v1857_v52, 0.0  ;;  %v1715_v50 = vsel %vm1353_vm2, %v4043_v47, 0.0 }
 0x1b7   :  { %v1694_v39 = vadd.f32 %v1693_v17, %v1692_v16  ;;  %v2081_v11 = vadd.f32 %v2080_v8, %v2079_v19  ;;  %v1713_v19 = vsel %vm1353_vm2, %v4025_v45, 0.0  ;;  %v2100_v17 = vsel %vm1353_vm2, %v1858_v62, 0.0 }
 0x1b8   :  { %v2102_v36 = vsel %vm1353_vm2, %v1859_v53, 0.0  ;;  %v1860_v8 = vmul.f32 %v4043_v47, %v4043_v47  ;;  %v1717_v45 = vsel %vm1353_vm2, %v4013_v60, 0.0  ;;  %v1719_v47 = vsel %vm1353_vm2, %v4032_v4, 0.0 }
 0x1b9   :  { %v2083_v55 = vadd.f32 %v2082_v12, %v2081_v11  ;;  %v1696_v13 = vadd.f32 %v1695_v30, %v1694_v39  ;;  %v1861_v11 = vmul.f32 %v4013_v60, %v4013_v60 }
 0x1bb   :  { %v1698_v20 = vadd.f32 %v1697_v15, %v1696_v13  ;;  %v2085_v10 = vadd.f32 %v2084_v38, %v2083_v55  ;;  %v1862_v15 = vmul.f32 %v4032_v4, %v4032_v4  ;;  %v2104_v55 = vsel %vm1353_vm2, %v1860_v8, 0.0 }
 0x1bc   :  { %v1863_v13 = vmul.f32 %v4073_v26, %v4073_v26  ;;  %v2106_v29 = vsel %vm1353_vm2, %v1861_v11, 0.0  ;;  %v1723_v4 = vsel %vm1353_vm2, %v4091_v14, 0.0 }
 0x1bd   :  { %v2087_v6 = vadd.f32 %v2086_v21, %v2085_v10  ;;  %v1700_v44 = vadd.f32 %v1699_v0, %v1698_v20  ;;  %v1721_v20 = vsel %vm1353_vm2, %v4073_v26, 0.0  ;;  %v2108_v22 = vsel %vm1353_vm2, %v1862_v15, 0.0 }
 0x1be   :  { %v2110_v0 = vsel %vm1353_vm2, %v1863_v13, 0.0  ;;  %v1725_v26 = vsel %vm1353_vm2, %v4061_v31, 0.0 }
 0x1bf   :  { %v1702_v34 = vadd.f32 %v1701_v9, %v1700_v44  ;;  %v2089_v33 = vadd.f32 %v2088_v43, %v2087_v6  ;;  %v1864_v6 = vmul.f32 %v4091_v14, %v4091_v14  ;;  %v1727_v14 = vsel %vm1353_vm2, %v4080_v61, 0.0 }
 0x1c1   :  { %v2091_v41 = vadd.f32 %v2090_v37, %v2089_v33  ;;  %v1704_v7 = vadd.f32 %v1703_v56, %v1702_v34  ;;  %v1866_v34 = vmul.f32 %v4080_v61, %v4080_v61  ;;  %v2112_v33 = vsel %vm1353_vm2, %v1864_v6, 0.0 }
 0x1c2   :  { %v1867_v37 = vmul.f32 %v4121_v1, %v4121_v1  ;;  %v1731_v61 = vsel %vm1353_vm2, %v4139_v48, 0.0 }
 0x1c3   :  { %v1706_v46 = vadd.f32 %v1705_v5, %v1704_v7  ;;  %v2093_v42 = vadd.f32 %v2092_v2, %v2091_v41  ;;  %v2114_v41 = vsel %vm1353_vm2, %v1865_v25, 0.0  ;;  %v1729_v7 = vsel %vm1353_vm2, %v4121_v1, 0.0 }
 0x1c4   :  { %v2118_v49 = vsel %vm1353_vm2, %v1867_v37, 0.0  ;;  %v1733_v1 = vsel %vm1353_vm2, %v4109_v51, 0.0 }
 0x1c5   :  { %v2095_v23 = vadd.f32 %v2094_v27, %v2093_v42  ;;  %v1708_v54 = vadd.f32 %v1707_v24, %v1706_v46  ;;  %v2116_v27 = vsel %vm1353_vm2, %v1866_v34, 0.0  ;;  %v1868_v46 = vmul.f32 %v4139_v48, %v4139_v48 }
 0x1c6   :  { %v1869_v24 = vmul.f32 %v4109_v51, %v4109_v51 }
 0x1c7   :  { %v1710_v3 = vadd.f32 %v1709_v35, %v1708_v54  ;;  %v2097_v57 = vadd.f32 %v2096_v63, %v2095_v23  ;;  %v1870_v35 = vmul.f32 %v4128_v32, %v4128_v32  ;;  %v2120_v62 = vsel %vm1353_vm2, %v1868_v46, 0.0 }
 0x1c9   :  { %v2099_v16 = vadd.f32 %v2098_v40, %v2097_v57  ;;  %v1712_v59 = vadd.f32 %v1711_v18, %v1710_v3  ;;  %v2122_v3 = vsel %vm1353_vm2, %v1869_v24, 0.0  ;;  %v1735_v57 = vsel %vm1353_vm2, %v4128_v32, 0.0 }
 0x1ca   :  { %v2124_v48 = vsel %vm1353_vm2, %v1870_v35, 0.0 }
 0x1cb   :  { %v1714_v28 = vadd.f32 %v1713_v19, %v1712_v59  ;;  %v2101_v39 = vadd.f32 %v2100_v17, %v2099_v16 }
 0x1cd   :  { %v2103_v12 = vadd.f32 %v2102_v36, %v2101_v39  ;;  %v1716_v30 = vadd.f32 %v1715_v50, %v1714_v28 }
 0x1cf   :  { %v1718_v38 = vadd.f32 %v1717_v45, %v1716_v30  ;;  %v2105_v21 = vadd.f32 %v2104_v55, %v2103_v12 }
 0x1d1   :  { %v2107_v10 = vadd.f32 %v2106_v29, %v2105_v21  ;;  %v1720_v60 = vadd.f32 %v1719_v47, %v1718_v38 }
 0x1d3   :  { %v1722_v44 = vadd.f32 %v1721_v20, %v1720_v60  ;;  %v2109_v9 = vadd.f32 %v2108_v22, %v2107_v10 }
 0x1d5   :  { %v2111_v43 = vadd.f32 %v2110_v0, %v2109_v9  ;;  %v1724_v58 = vadd.f32 %v1723_v4, %v1722_v44 }
 0x1d7   :  { %v1726_v56 = vadd.f32 %v1725_v26, %v1724_v58  ;;  %v2113_v5 = vadd.f32 %v2112_v33, %v2111_v43 }
 0x1d9   :  { %v2115_v2 = vadd.f32 %v2114_v41, %v2113_v5  ;;  %v1728_v31 = vadd.f32 %v1727_v14, %v1726_v56 }
 0x1db   :  { %v1730_v42 = vadd.f32 %v1729_v7, %v1728_v31  ;;  %v2117_v52 = vadd.f32 %v2116_v27, %v2115_v2 }
 0x1dd   :  { %v2119_v23 = vadd.f32 %v2118_v49, %v2117_v52  ;;  %v1732_v54 = vadd.f32 %v1731_v61, %v1730_v42 }
 0x1df   :  { %v1734_v63 = vadd.f32 %v1733_v1, %v1732_v54  ;;  %v2121_v53 = vadd.f32 %v2120_v62, %v2119_v23 }
 0x1e1   :  { %v1736_v40 = vadd.f32 %v1735_v57, %v1734_v63  ;;  %v2123_v18 = vadd.f32 %v2122_v3, %v2121_v53 }
 0x1e3   :  { %v1737_v19 = vrot.slane %v1736_v40, 4  ;;  %v2125_v16 = vadd.f32 %v2124_v48, %v2123_v18 }
 0x1e5   :  { %v1738_v59 = vadd.f32 %v1737_v19, %v1736_v40  ;;  %v2126_v51 = vrot.slane %v2125_v16, 4 }
 0x1e7   :  { %v1739_v17 = vrot.slane %v1738_v59, 2  ;;  %v2127_v36 = vadd.f32 %v2126_v51, %v2125_v16 }
 0x1e9   :  { %v1740_v8 = vadd.f32 %v1739_v17, %v1738_v59  ;;  %v2128_v28 = vrot.slane %v2127_v36, 2 }
 0x1eb   :  { %v1741_v39 = vrot.slane %v1740_v8, 1  ;;  %v2129_v11 = vadd.f32 %v2128_v28, %v2127_v36 }
 0x1ed   :  { %v2130_v50 = vrot.slane %v2129_v11, 1  ;;  %v1742_v12 = vadd.f32 %v1741_v39, %v1740_v8 }
 0x1ef   :  { %v2131_v30 = vadd.f32 %v2130_v50, %v2129_v11 }
 0x1f1   :  { %v2133_v32 = vsel %vm2132_vm3, %v1742_v12, %v2131_v30 }
 0x1f2   :  { %2135 = vst.msk [vmem:[%s4347_s5] sm:$0x3] %vm2134_vm4, %v2133_v32 }

// kernel: bottleneck_forward.7
= control target key start
LH: loop header
LB: loop body
LE: loop exit
PB: predicated region body
PF: predicated region fallthrough
CT: control target
= control target key end

     0   :  { %vm800_vm0 = vcmask 130048   ;;  %s2188_s0 = inlined_call_operand.vmem [shape: f32[1024,16], index: 0, kind: input, shape index: {}]   ;;  %s2189_s1 = inlined_call_operand.vmem [shape: f32[1,16], index: 1, kind: input, shape index: {}]   ;;  %s2190_s2 = inlined_call_operand.vmem [shape: f32[1,16], index: 2, kind: input, shape index: {}]   ;;  %s2191_s3 = inlined_call_operand.vmem [shape: f32[1024,16], index: 3, kind: input, shape index: {}]   ;;  %s2192_s4 = inlined_call_operand.hbm [shape: f32[1024,16], index: 4, kind: output, shape index: {}]  }
   0x1   :  { %v18_v0 = vld [vmem:[%s2188_s0] sm:$0xff]  ;;  %v19_v4 = vld [vmem:[%s2188_s0 + $0x8] sm:$0xff]  ;;  %v20_v7 = vld [vmem:[%s2188_s0 + $0x10] sm:$0xff] }
   0x2   :  { %v1010_v1 = vld [vmem:[%s2189_s1] ss:$0 sm:$0xff]  ;;  %v21_v8 = vld [vmem:[%s2188_s0 + $0x18] sm:$0xff]  ;;  %v417_v10 = vld [vmem:[%s2191_s3 + $0x8] sm:$0xff] }
   0x3   :  { %v1015_v2 = vld [vmem:[%s2190_s2] ss:$0 sm:$0xff]  ;;  %v153_v3 = vmul.f32 %v1010_v1, %v18_v0  ;;  %v154_v6 = vmul.f32 %v1010_v1, %v19_v4  ;;  %v155_v11 = vmul.f32 %v1010_v1, %v20_v7  ;;  %v418_v12 = vld [vmem:[%s2191_s3 + $0x10] sm:$0xff]  ;;  %v156_v13 = vmul.f32 %v1010_v1, %v21_v8  ;;  %v419_v16 = vld [vmem:[%s2191_s3 + $0x18] sm:$0xff] }
   0x4   :  { %v416_v5 = vld [vmem:[%s2191_s3] sm:$0xff]  ;;  %v23_v18 = vld [vmem:[%s2188_s0 + $0x28] sm:$0xff]  ;;  %v24_v19 = vld [vmem:[%s2188_s0 + $0x30] sm:$0xff] }
   0x5   :  { %v288_v9 = vadd.f32 %v1015_v2, %v153_v3  ;;  %v22_v14 = vld [vmem:[%s2188_s0 + $0x20] sm:$0xff]  ;;  %v289_v15 = vadd.f32 %v1015_v2, %v154_v6  ;;  %v290_v21 = vadd.f32 %v1015_v2, %v155_v11  ;;  %v291_v22 = vadd.f32 %v1015_v2, %v156_v13  ;;  %v25_v25 = vld [vmem:[%s2188_s0 + $0x38] sm:$0xff]  ;;  %v421_v28 = vld [vmem:[%s2191_s3 + $0x28] sm:$0xff] }
   0x6   :  { %v157_v17 = vmul.f32 %v1010_v1, %v22_v14  ;;  %v420_v23 = vld [vmem:[%s2191_s3 + $0x20] sm:$0xff]  ;;  %v158_v24 = vmul.f32 %v1010_v1, %v23_v18  ;;  %v159_v29 = vmul.f32 %v1010_v1, %v24_v19  ;;  %v160_v30 = vmul.f32 %v1010_v1, %v25_v25  ;;  %v422_v36 = vld [vmem:[%s2191_s3 + $0x30] sm:$0xff]  ;;  %v423_v37 = vld [vmem:[%s2191_s3 + $0x38] sm:$0xff] }
   0x7   :  { %v544_v20 = vadd.f32 %v416_v5, %v288_v9  ;;  %v545_v26 = vadd.f32 %v417_v10, %v289_v15  ;;  %v26_v31 = vld [vmem:[%s2188_s0 + $0x40] sm:$0xff]  ;;  %v546_v33 = vadd.f32 %v418_v12, %v290_v21  ;;  %v547_v34 = vadd.f32 %v419_v16, %v291_v22  ;;  %v27_v38 = vld [vmem:[%s2188_s0 + $0x48] sm:$0xff]  ;;  %v28_v43 = vld [vmem:[%s2188_s0 + $0x50] sm:$0xff] }
   0x8   :  { %v292_v27 = vadd.f32 %v1015_v2, %v157_v17  ;;  %v293_v35 = vadd.f32 %v1015_v2, %v158_v24  ;;  %v294_v41 = vadd.f32 %v1015_v2, %v159_v29  ;;  %v295_v42 = vadd.f32 %v1015_v2, %v160_v30  ;;  %v29_v44 = vld [vmem:[%s2188_s0 + $0x58] sm:$0xff]  ;;  %v30_v49 = vld [vmem:[%s2188_s0 + $0x60] sm:$0xff]  ;;  %v31_v55 = vld [vmem:[%s2188_s0 + $0x68] sm:$0xff] }
   0x9   :  { %v672_v32 = vmax.f32 %v544_v20, 0.0  ;;  %v673_v39 = vmax.f32 %v545_v26, 0.0  ;;  %v674_v45 = vmax.f32 %v546_v33, 0.0  ;;  %v675_v46 = vmax.f32 %v547_v34, 0.0  ;;  %v424_v53 = vld [vmem:[%s2191_s3 + $0x40] sm:$0xff]  ;;  %v425_v58 = vld [vmem:[%s2191_s3 + $0x48] sm:$0xff] }
   0xa   :  { %v548_v40 = vadd.f32 %v420_v23, %v292_v27  ;;  %v549_v47 = vadd.f32 %v421_v28, %v293_v35  ;;  %v161_v48 = vmul.f32 %v1010_v1, %v26_v31  ;;  %v550_v51 = vadd.f32 %v422_v36, %v294_v41  ;;  %v32_v61 = vld [vmem:[%s2188_s0 + $0x70] sm:$0xff]  ;;  %v33_v62 = vld [vmem:[%s2188_s0 + $0x78] sm:$0xff]  ;;  %v428_v10 = vld [vmem:[%s2191_s3 + $0x60] sm:$0xff] }
   0xb   :  { %801 = vst.msk [vmem:[#allocation2] sm:$0xff] %vm800_vm0, %v672_v32  ;;  %802 = vst.msk [vmem:[#allocation2 + $0x8] sm:$0xff] %vm800_vm0, %v673_v39  ;;  %v551_v52 = vadd.f32 %v423_v37, %v295_v42  ;;  %v162_v54 = vmul.f32 %v1010_v1, %v27_v38  ;;  %v163_v59 = vmul.f32 %v1010_v1, %v28_v43  ;;  %v426_v4 = vld [vmem:[%s2191_s3 + $0x50] sm:$0xff]  ;;  %v427_v5 = vld [vmem:[%s2191_s3 + $0x58] sm:$0xff] }
   0xc   :  { %v676_v50 = vmax.f32 %v548_v40, 0.0  ;;  %803 = vst.msk [vmem:[#allocation2 + $0x10] sm:$0xff] %vm800_vm0, %v674_v45  ;;  %804 = vst.msk [vmem:[#allocation2 + $0x18] sm:$0xff] %vm800_vm0, %v675_v46  ;;  %v677_v56 = vmax.f32 %v549_v47, 0.0  ;;  %v296_v57 = vadd.f32 %v1015_v2, %v161_v48  ;;  %v164_v60 = vmul.f32 %v1010_v1, %v29_v44  ;;  %v429_v14 = vld [vmem:[%s2191_s3 + $0x68] sm:$0xff]  ;;  %v34_v17 = vld [vmem:[%s2188_s0 + $0x80] sm:$0xff] }
   0xd   :  { %v678_v63 = vmax.f32 %v550_v51, 0.0  ;;  %v679_v0 = vmax.f32 %v551_v52, 0.0  ;;  %v297_v3 = vadd.f32 %v1015_v2, %v162_v54  ;;  %v165_v6 = vmul.f32 %v1010_v1, %v30_v49  ;;  %v430_v22 = vld [vmem:[%s2191_s3 + $0x70] sm:$0xff]  ;;  %v431_v23 = vld [vmem:[%s2191_s3 + $0x78] sm:$0xff]  ;;  %v35_v24 = vld [vmem:[%s2188_s0 + $0x88] sm:$0xff] }
   0xe   :  { %805 = vst.msk [vmem:[#allocation2 + $0x20] sm:$0xff] %vm800_vm0, %v676_v50  ;;  %806 = vst.msk [vmem:[#allocation2 + $0x28] sm:$0xff] %vm800_vm0, %v677_v56  ;;  %v552_v7 = vadd.f32 %v424_v53, %v296_v57  ;;  %v298_v8 = vadd.f32 %v1015_v2, %v163_v59  ;;  %v299_v9 = vadd.f32 %v1015_v2, %v164_v60  ;;  %v36_v29 = vld [vmem:[%s2188_s0 + $0x90] sm:$0xff]  ;;  %v37_v30 = vld [vmem:[%s2188_s0 + $0x98] sm:$0xff] }
   0xf   :  { %v166_v11 = vmul.f32 %v1010_v1, %v31_v55  ;;  %807 = vst.msk [vmem:[#allocation2 + $0x30] sm:$0xff] %vm800_vm0, %v678_v63  ;;  %808 = vst.msk [vmem:[#allocation2 + $0x38] sm:$0xff] %vm800_vm0, %v679_v0  ;;  %v553_v12 = vadd.f32 %v425_v58, %v297_v3  ;;  %v300_v13 = vadd.f32 %v1015_v2, %v165_v6  ;;  %v38_v35 = vld [vmem:[%s2188_s0 + $0xa0] sm:$0xff]  ;;  %v39_v41 = vld [vmem:[%s2188_s0 + $0xa8] sm:$0xff] }
  0x10   :  { %v167_v15 = vmul.f32 %v1010_v1, %v32_v61  ;;  %v168_v16 = vmul.f32 %v1010_v1, %v33_v62  ;;  %v680_v18 = vmax.f32 %v552_v7, 0.0  ;;  %v554_v19 = vadd.f32 %v426_v4, %v298_v8  ;;  %v432_v39 = vld [vmem:[%s2191_s3 + $0x80] sm:$0xff]  ;;  %v433_v44 = vld [vmem:[%s2191_s3 + $0x88] sm:$0xff]  ;;  %v40_v47 = vld [vmem:[%s2188_s0 + $0xb0] sm:$0xff] }
  0x11   :  { %v555_v20 = vadd.f32 %v427_v5, %v299_v9  ;;  %v301_v21 = vadd.f32 %v1015_v2, %v166_v11  ;;  %v681_v25 = vmax.f32 %v553_v12, 0.0  ;;  %v556_v26 = vadd.f32 %v428_v10, %v300_v13  ;;  %v41_v48 = vld [vmem:[%s2188_s0 + $0xb8] sm:$0xff]  ;;  %v434_v52 = vld [vmem:[%s2191_s3 + $0x90] sm:$0xff]  ;;  %v436_v58 = vld [vmem:[%s2191_s3 + $0xa0] sm:$0xff] }
  0x12   :  { %v302_v27 = vadd.f32 %v1015_v2, %v167_v15  ;;  %v303_v28 = vadd.f32 %v1015_v2, %v168_v16  ;;  %809 = vst.msk [vmem:[#allocation2 + $0x40] sm:$0xff] %vm800_vm0, %v680_v18  ;;  %v682_v31 = vmax.f32 %v554_v19, 0.0  ;;  %v169_v34 = vmul.f32 %v1010_v1, %v34_v17  ;;  %v435_v53 = vld [vmem:[%s2191_s3 + $0x98] sm:$0xff]  ;;  %v437_v62 = vld [vmem:[%s2191_s3 + $0xa8] sm:$0xff]  ;;  %v42_v3 = vld [vmem:[%s2188_s0 + $0xc0] sm:$0xff] }
  0x13   :  { %v683_v32 = vmax.f32 %v555_v20, 0.0  ;;  %v557_v33 = vadd.f32 %v429_v14, %v301_v21  ;;  %810 = vst.msk [vmem:[#allocation2 + $0x48] sm:$0xff] %vm800_vm0, %v681_v25  ;;  %v684_v36 = vmax.f32 %v556_v26, 0.0  ;;  %v170_v40 = vmul.f32 %v1010_v1, %v35_v24  ;;  %v438_v8 = vld [vmem:[%s2191_s3 + $0xb0] sm:$0xff]  ;;  %v439_v9 = vld [vmem:[%s2191_s3 + $0xb8] sm:$0xff]  ;;  %v43_v10 = vld [vmem:[%s2188_s0 + $0xc8] sm:$0xff] }
  0x14   :  { %v558_v37 = vadd.f32 %v430_v22, %v302_v27  ;;  %v559_v38 = vadd.f32 %v431_v23, %v303_v28  ;;  %811 = vst.msk [vmem:[#allocation2 + $0x50] sm:$0xff] %vm800_vm0, %v682_v31  ;;  %v304_v43 = vadd.f32 %v1015_v2, %v169_v34  ;;  %v171_v45 = vmul.f32 %v1010_v1, %v36_v29  ;;  %v44_v15 = vld [vmem:[%s2188_s0 + $0xd0] sm:$0xff]  ;;  %v45_v16 = vld [vmem:[%s2188_s0 + $0xd8] sm:$0xff]  ;;  %v46_v21 = vld [vmem:[%s2188_s0 + $0xe0] sm:$0xff] }
  0x15   :  { %812 = vst.msk [vmem:[#allocation2 + $0x58] sm:$0xff] %vm800_vm0, %v683_v32  ;;  %v685_v42 = vmax.f32 %v557_v33, 0.0  ;;  %v172_v46 = vmul.f32 %v1010_v1, %v37_v30  ;;  %813 = vst.msk [vmem:[#allocation2 + $0x60] sm:$0xff] %vm800_vm0, %v684_v36  ;;  %v305_v51 = vadd.f32 %v1015_v2, %v170_v40  ;;  %v173_v54 = vmul.f32 %v1010_v1, %v38_v35  ;;  %v440_v25 = vld [vmem:[%s2191_s3 + $0xc0] sm:$0xff]  ;;  %v47_v27 = vld [vmem:[%s2188_s0 + $0xe8] sm:$0xff] }
  0x16   :  { %v686_v49 = vmax.f32 %v558_v37, 0.0  ;;  %v687_v50 = vmax.f32 %v559_v38, 0.0  ;;  %v560_v55 = vadd.f32 %v432_v39, %v304_v43  ;;  %v306_v56 = vadd.f32 %v1015_v2, %v171_v45  ;;  %v441_v30 = vld [vmem:[%s2191_s3 + $0xc8] sm:$0xff]  ;;  %v48_v33 = vld [vmem:[%s2188_s0 + $0xf0] sm:$0xff]  ;;  %v49_v34 = vld [vmem:[%s2188_s0 + $0xf8] sm:$0xff] }
  0x17   :  { %814 = vst.msk [vmem:[#allocation2 + $0x68] sm:$0xff] %vm800_vm0, %v685_v42  ;;  %v307_v57 = vadd.f32 %v1015_v2, %v172_v46  ;;  %v174_v59 = vmul.f32 %v1010_v1, %v39_v41  ;;  %v561_v60 = vadd.f32 %v433_v44, %v305_v51  ;;  %v308_v61 = vadd.f32 %v1015_v2, %v173_v54  ;;  %v442_v38 = vld [vmem:[%s2191_s3 + $0xd0] sm:$0xff]  ;;  %v443_v39 = vld [vmem:[%s2191_s3 + $0xd8] sm:$0xff]  ;;  %v444_v44 = vld [vmem:[%s2191_s3 + $0xe0] sm:$0xff] }
  0x18   :  { %815 = vst.msk [vmem:[#allocation2 + $0x70] sm:$0xff] %vm800_vm0, %v686_v49  ;;  %816 = vst.msk [vmem:[#allocation2 + $0x78] sm:$0xff] %vm800_vm0, %v687_v50  ;;  %v175_v63 = vmul.f32 %v1010_v1, %v40_v47  ;;  %v176_v0 = vmul.f32 %v1010_v1, %v41_v48  ;;  %v688_v4 = vmax.f32 %v560_v55, 0.0  ;;  %v562_v5 = vadd.f32 %v434_v52, %v306_v56  ;;  %v445_v48 = vld [vmem:[%s2191_s3 + $0xe8] sm:$0xff]  ;;  %v50_v51 = vld [vmem:[%s2188_s0 + $0x100] sm:$0xff] }
  0x19   :  { %v563_v6 = vadd.f32 %v435_v53, %v307_v57  ;;  %v309_v7 = vadd.f32 %v1015_v2, %v174_v59  ;;  %v689_v11 = vmax.f32 %v561_v60, 0.0  ;;  %v564_v12 = vadd.f32 %v436_v58, %v308_v61  ;;  %v446_v56 = vld [vmem:[%s2191_s3 + $0xf0] sm:$0xff]  ;;  %v447_v57 = vld [vmem:[%s2191_s3 + $0xf8] sm:$0xff]  ;;  %v51_v58 = vld [vmem:[%s2188_s0 + $0x108] sm:$0xff] }
  0x1a   :  { %v310_v13 = vadd.f32 %v1015_v2, %v175_v63  ;;  %v311_v14 = vadd.f32 %v1015_v2, %v176_v0  ;;  %817 = vst.msk [vmem:[#allocation2 + $0x80] sm:$0xff] %vm800_vm0, %v688_v4  ;;  %v690_v17 = vmax.f32 %v562_v5, 0.0  ;;  %v177_v20 = vmul.f32 %v1010_v1, %v42_v3  ;;  %v52_v63 = vld [vmem:[%s2188_s0 + $0x110] sm:$0xff]  ;;  %v53_v0 = vld [vmem:[%s2188_s0 + $0x118] sm:$0xff] }
  0x1b   :  { %v691_v18 = vmax.f32 %v563_v6, 0.0  ;;  %v565_v19 = vadd.f32 %v437_v62, %v309_v7  ;;  %818 = vst.msk [vmem:[#allocation2 + $0x88] sm:$0xff] %vm800_vm0, %v689_v11  ;;  %v692_v22 = vmax.f32 %v564_v12, 0.0  ;;  %v178_v26 = vmul.f32 %v1010_v1, %v43_v10  ;;  %v54_v7 = vld [vmem:[%s2188_s0 + $0x120] sm:$0xff] }
  0x1c   :  { %v566_v23 = vadd.f32 %v438_v8, %v310_v13  ;;  %v567_v24 = vadd.f32 %v439_v9, %v311_v14  ;;  %819 = vst.msk [vmem:[#allocation2 + $0x90] sm:$0xff] %vm800_vm0, %v690_v17  ;;  %v312_v29 = vadd.f32 %v1015_v2, %v177_v20  ;;  %v179_v31 = vmul.f32 %v1010_v1, %v44_v15  ;;  %v448_v11 = vld [vmem:[%s2191_s3 + $0x100] sm:$0xff]  ;;  %v55_v13 = vld [vmem:[%s2188_s0 + $0x128] sm:$0xff]  ;;  %v57_v20 = vld [vmem:[%s2188_s0 + $0x138] sm:$0xff] }
  0x1d   :  { %820 = vst.msk [vmem:[#allocation2 + $0x98] sm:$0xff] %vm800_vm0, %v691_v18  ;;  %v693_v28 = vmax.f32 %v565_v19, 0.0  ;;  %v180_v32 = vmul.f32 %v1010_v1, %v45_v16  ;;  %821 = vst.msk [vmem:[#allocation2 + $0xa0] sm:$0xff] %vm800_vm0, %v692_v22  ;;  %v313_v37 = vadd.f32 %v1015_v2, %v178_v26  ;;  %v181_v40 = vmul.f32 %v1010_v1, %v46_v21  ;;  %v449_v16 = vld [vmem:[%s2191_s3 + $0x108] sm:$0xff]  ;;  %v56_v19 = vld [vmem:[%s2188_s0 + $0x130] sm:$0xff] }
  0x1e   :  { %v694_v35 = vmax.f32 %v566_v23, 0.0  ;;  %v695_v36 = vmax.f32 %v567_v24, 0.0  ;;  %v568_v41 = vadd.f32 %v440_v25, %v312_v29  ;;  %v314_v42 = vadd.f32 %v1015_v2, %v179_v31  ;;  %v450_v24 = vld [vmem:[%s2191_s3 + $0x110] sm:$0xff]  ;;  %v451_v25 = vld [vmem:[%s2191_s3 + $0x118] sm:$0xff] }
  0x1f   :  { %822 = vst.msk [vmem:[#allocation2 + $0xa8] sm:$0xff] %vm800_vm0, %v693_v28  ;;  %v315_v43 = vadd.f32 %v1015_v2, %v180_v32  ;;  %v182_v45 = vmul.f32 %v1010_v1, %v47_v27  ;;  %v569_v46 = vadd.f32 %v441_v30, %v313_v37  ;;  %v316_v47 = vadd.f32 %v1015_v2, %v181_v40  ;;  %v452_v30 = vld [vmem:[%s2191_s3 + $0x120] sm:$0xff] }
  0x20   :  { %823 = vst.msk [vmem:[#allocation2 + $0xb0] sm:$0xff] %vm800_vm0, %v694_v35  ;;  %824 = vst.msk [vmem:[#allocation2 + $0xb8] sm:$0xff] %vm800_vm0, %v695_v36  ;;  %v183_v49 = vmul.f32 %v1010_v1, %v48_v33  ;;  %v184_v50 = vmul.f32 %v1010_v1, %v49_v34  ;;  %v696_v52 = vmax.f32 %v568_v41, 0.0  ;;  %v570_v53 = vadd.f32 %v442_v38, %v314_v42  ;;  %v453_v34 = vld [vmem:[%s2191_s3 + $0x128] sm:$0xff]  ;;  %v58_v37 = vld [vmem:[%s2188_s0 + $0x140] sm:$0xff] }
  0x21   :  { %v571_v54 = vadd.f32 %v443_v39, %v315_v43  ;;  %v317_v55 = vadd.f32 %v1015_v2, %v182_v45  ;;  %v697_v59 = vmax.f32 %v569_v46, 0.0  ;;  %v572_v60 = vadd.f32 %v444_v44, %v316_v47  ;;  %v454_v42 = vld [vmem:[%s2191_s3 + $0x130] sm:$0xff]  ;;  %v455_v43 = vld [vmem:[%s2191_s3 + $0x138] sm:$0xff]  ;;  %v59_v44 = vld [vmem:[%s2188_s0 + $0x148] sm:$0xff] }
  0x22   :  { %v318_v61 = vadd.f32 %v1015_v2, %v183_v49  ;;  %v319_v62 = vadd.f32 %v1015_v2, %v184_v50  ;;  %825 = vst.msk [vmem:[#allocation2 + $0xc0] sm:$0xff] %vm800_vm0, %v696_v52  ;;  %v698_v3 = vmax.f32 %v570_v53, 0.0  ;;  %v185_v6 = vmul.f32 %v1010_v1, %v50_v51  ;;  %v60_v49 = vld [vmem:[%s2188_s0 + $0x150] sm:$0xff]  ;;  %v61_v50 = vld [vmem:[%s2188_s0 + $0x158] sm:$0xff] }
  0x23   :  { %v699_v4 = vmax.f32 %v571_v54, 0.0  ;;  %v573_v5 = vadd.f32 %v445_v48, %v317_v55  ;;  %826 = vst.msk [vmem:[#allocation2 + $0xc8] sm:$0xff] %vm800_vm0, %v697_v59  ;;  %v700_v8 = vmax.f32 %v572_v60, 0.0  ;;  %v186_v12 = vmul.f32 %v1010_v1, %v51_v58  ;;  %v62_v55 = vld [vmem:[%s2188_s0 + $0x160] sm:$0xff] }
  0x24   :  { %v574_v9 = vadd.f32 %v446_v56, %v318_v61  ;;  %v575_v10 = vadd.f32 %v447_v57, %v319_v62  ;;  %827 = vst.msk [vmem:[#allocation2 + $0xd0] sm:$0xff] %vm800_vm0, %v698_v3  ;;  %v320_v15 = vadd.f32 %v1015_v2, %v185_v6  ;;  %v187_v17 = vmul.f32 %v1010_v1, %v52_v63  ;;  %v456_v59 = vld [vmem:[%s2191_s3 + $0x140] sm:$0xff]  ;;  %v63_v61 = vld [vmem:[%s2188_s0 + $0x168] sm:$0xff]  ;;  %v65_v6 = vld [vmem:[%s2188_s0 + $0x178] sm:$0xff] }
  0x25   :  { %828 = vst.msk [vmem:[#allocation2 + $0xd8] sm:$0xff] %vm800_vm0, %v699_v4  ;;  %v701_v14 = vmax.f32 %v573_v5, 0.0  ;;  %v188_v18 = vmul.f32 %v1010_v1, %v53_v0  ;;  %829 = vst.msk [vmem:[#allocation2 + $0xe0] sm:$0xff] %vm800_vm0, %v700_v8  ;;  %v321_v23 = vadd.f32 %v1015_v2, %v186_v12  ;;  %v189_v26 = vmul.f32 %v1010_v1, %v54_v7  ;;  %v457_v0 = vld [vmem:[%s2191_s3 + $0x148] sm:$0xff]  ;;  %v64_v5 = vld [vmem:[%s2188_s0 + $0x170] sm:$0xff] }
  0x26   :  { %v702_v21 = vmax.f32 %v574_v9, 0.0  ;;  %v703_v22 = vmax.f32 %v575_v10, 0.0  ;;  %v576_v27 = vadd.f32 %v448_v11, %v320_v15  ;;  %v322_v28 = vadd.f32 %v1015_v2, %v187_v17  ;;  %v458_v10 = vld [vmem:[%s2191_s3 + $0x150] sm:$0xff]  ;;  %v459_v11 = vld [vmem:[%s2191_s3 + $0x158] sm:$0xff] }
  0x27   :  { %830 = vst.msk [vmem:[#allocation2 + $0xe8] sm:$0xff] %vm800_vm0, %v701_v14  ;;  %v323_v29 = vadd.f32 %v1015_v2, %v188_v18  ;;  %v190_v31 = vmul.f32 %v1010_v1, %v55_v13  ;;  %v577_v32 = vadd.f32 %v449_v16, %v321_v23  ;;  %v324_v33 = vadd.f32 %v1015_v2, %v189_v26  ;;  %v460_v16 = vld [vmem:[%s2191_s3 + $0x160] sm:$0xff] }
  0x28   :  { %831 = vst.msk [vmem:[#allocation2 + $0xf0] sm:$0xff] %vm800_vm0, %v702_v21  ;;  %832 = vst.msk [vmem:[#allocation2 + $0xf8] sm:$0xff] %vm800_vm0, %v703_v22  ;;  %v191_v35 = vmul.f32 %v1010_v1, %v56_v19  ;;  %v192_v36 = vmul.f32 %v1010_v1, %v57_v20  ;;  %v704_v38 = vmax.f32 %v576_v27, 0.0  ;;  %v578_v39 = vadd.f32 %v450_v24, %v322_v28  ;;  %v461_v20 = vld [vmem:[%s2191_s3 + $0x168] sm:$0xff]  ;;  %v66_v23 = vld [vmem:[%s2188_s0 + $0x180] sm:$0xff] }
  0x29   :  { %v579_v40 = vadd.f32 %v451_v25, %v323_v29  ;;  %v325_v41 = vadd.f32 %v1015_v2, %v190_v31  ;;  %v705_v45 = vmax.f32 %v577_v32, 0.0  ;;  %v580_v46 = vadd.f32 %v452_v30, %v324_v33  ;;  %v462_v28 = vld [vmem:[%s2191_s3 + $0x170] sm:$0xff]  ;;  %v463_v29 = vld [vmem:[%s2191_s3 + $0x178] sm:$0xff]  ;;  %v67_v30 = vld [vmem:[%s2188_s0 + $0x188] sm:$0xff] }
  0x2a   :  { %v326_v47 = vadd.f32 %v1015_v2, %v191_v35  ;;  %v327_v48 = vadd.f32 %v1015_v2, %v192_v36  ;;  %833 = vst.msk [vmem:[#allocation2 + $0x100] sm:$0xff] %vm800_vm0, %v704_v38  ;;  %v706_v51 = vmax.f32 %v578_v39, 0.0  ;;  %v193_v54 = vmul.f32 %v1010_v1, %v58_v37  ;;  %v68_v35 = vld [vmem:[%s2188_s0 + $0x190] sm:$0xff]  ;;  %v69_v36 = vld [vmem:[%s2188_s0 + $0x198] sm:$0xff] }
  0x2b   :  { %v707_v52 = vmax.f32 %v579_v40, 0.0  ;;  %v581_v53 = vadd.f32 %v453_v34, %v325_v41  ;;  %834 = vst.msk [vmem:[#allocation2 + $0x108] sm:$0xff] %vm800_vm0, %v705_v45  ;;  %v708_v56 = vmax.f32 %v580_v46, 0.0  ;;  %v194_v60 = vmul.f32 %v1010_v1, %v59_v44  ;;  %v70_v41 = vld [vmem:[%s2188_s0 + $0x1a0] sm:$0xff] }
  0x2c   :  { %v582_v57 = vadd.f32 %v454_v42, %v326_v47  ;;  %v583_v58 = vadd.f32 %v455_v43, %v327_v48  ;;  %835 = vst.msk [vmem:[#allocation2 + $0x110] sm:$0xff] %vm800_vm0, %v706_v51  ;;  %v328_v63 = vadd.f32 %v1015_v2, %v193_v54  ;;  %v195_v3 = vmul.f32 %v1010_v1, %v60_v49  ;;  %v464_v45 = vld [vmem:[%s2191_s3 + $0x180] sm:$0xff]  ;;  %v71_v47 = vld [vmem:[%s2188_s0 + $0x1a8] sm:$0xff]  ;;  %v73_v54 = vld [vmem:[%s2188_s0 + $0x1b8] sm:$0xff] }
  0x2d   :  { %836 = vst.msk [vmem:[#allocation2 + $0x118] sm:$0xff] %vm800_vm0, %v707_v52  ;;  %v709_v62 = vmax.f32 %v581_v53, 0.0  ;;  %v196_v4 = vmul.f32 %v1010_v1, %v61_v50  ;;  %837 = vst.msk [vmem:[#allocation2 + $0x120] sm:$0xff] %vm800_vm0, %v708_v56  ;;  %v329_v9 = vadd.f32 %v1015_v2, %v194_v60  ;;  %v197_v12 = vmul.f32 %v1010_v1, %v62_v55  ;;  %v465_v50 = vld [vmem:[%s2191_s3 + $0x188] sm:$0xff]  ;;  %v72_v53 = vld [vmem:[%s2188_s0 + $0x1b0] sm:$0xff] }
  0x2e   :  { %v710_v7 = vmax.f32 %v582_v57, 0.0  ;;  %v711_v8 = vmax.f32 %v583_v58, 0.0  ;;  %v584_v13 = vadd.f32 %v456_v59, %v328_v63  ;;  %v330_v14 = vadd.f32 %v1015_v2, %v195_v3  ;;  %v466_v58 = vld [vmem:[%s2191_s3 + $0x190] sm:$0xff]  ;;  %v467_v59 = vld [vmem:[%s2191_s3 + $0x198] sm:$0xff] }
  0x2f   :  { %838 = vst.msk [vmem:[#allocation2 + $0x128] sm:$0xff] %vm800_vm0, %v709_v62  ;;  %v331_v15 = vadd.f32 %v1015_v2, %v196_v4  ;;  %v198_v17 = vmul.f32 %v1010_v1, %v63_v61  ;;  %v585_v18 = vadd.f32 %v457_v0, %v329_v9  ;;  %v332_v19 = vadd.f32 %v1015_v2, %v197_v12  ;;  %v468_v0 = vld [vmem:[%s2191_s3 + $0x1a0] sm:$0xff] }
  0x30   :  { %839 = vst.msk [vmem:[#allocation2 + $0x130] sm:$0xff] %vm800_vm0, %v710_v7  ;;  %840 = vst.msk [vmem:[#allocation2 + $0x138] sm:$0xff] %vm800_vm0, %v711_v8  ;;  %v199_v21 = vmul.f32 %v1010_v1, %v64_v5  ;;  %v200_v22 = vmul.f32 %v1010_v1, %v65_v6  ;;  %v712_v24 = vmax.f32 %v584_v13, 0.0  ;;  %v586_v25 = vadd.f32 %v458_v10, %v330_v14  ;;  %v469_v6 = vld [vmem:[%s2191_s3 + $0x1a8] sm:$0xff]  ;;  %v74_v9 = vld [vmem:[%s2188_s0 + $0x1c0] sm:$0xff] }
  0x31   :  { %v587_v26 = vadd.f32 %v459_v11, %v331_v15  ;;  %v333_v27 = vadd.f32 %v1015_v2, %v198_v17  ;;  %v713_v31 = vmax.f32 %v585_v18, 0.0  ;;  %v588_v32 = vadd.f32 %v460_v16, %v332_v19  ;;  %v470_v14 = vld [vmem:[%s2191_s3 + $0x1b0] sm:$0xff]  ;;  %v471_v15 = vld [vmem:[%s2191_s3 + $0x1b8] sm:$0xff]  ;;  %v75_v16 = vld [vmem:[%s2188_s0 + $0x1c8] sm:$0xff] }
  0x32   :  { %v334_v33 = vadd.f32 %v1015_v2, %v199_v21  ;;  %v335_v34 = vadd.f32 %v1015_v2, %v200_v22  ;;  %841 = vst.msk [vmem:[#allocation2 + $0x140] sm:$0xff] %vm800_vm0, %v712_v24  ;;  %v714_v37 = vmax.f32 %v586_v25, 0.0  ;;  %v201_v40 = vmul.f32 %v1010_v1, %v66_v23  ;;  %v76_v21 = vld [vmem:[%s2188_s0 + $0x1d0] sm:$0xff]  ;;  %v77_v22 = vld [vmem:[%s2188_s0 + $0x1d8] sm:$0xff] }
  0x33   :  { %v715_v38 = vmax.f32 %v587_v26, 0.0  ;;  %v589_v39 = vadd.f32 %v461_v20, %v333_v27  ;;  %842 = vst.msk [vmem:[#allocation2 + $0x148] sm:$0xff] %vm800_vm0, %v713_v31  ;;  %v716_v42 = vmax.f32 %v588_v32, 0.0  ;;  %v202_v46 = vmul.f32 %v1010_v1, %v67_v30  ;;  %v78_v27 = vld [vmem:[%s2188_s0 + $0x1e0] sm:$0xff] }
  0x34   :  { %v590_v43 = vadd.f32 %v462_v28, %v334_v33  ;;  %v591_v44 = vadd.f32 %v463_v29, %v335_v34  ;;  %843 = vst.msk [vmem:[#allocation2 + $0x150] sm:$0xff] %vm800_vm0, %v714_v37  ;;  %v336_v49 = vadd.f32 %v1015_v2, %v201_v40  ;;  %v203_v51 = vmul.f32 %v1010_v1, %v68_v35  ;;  %v472_v31 = vld [vmem:[%s2191_s3 + $0x1c0] sm:$0xff]  ;;  %v79_v33 = vld [vmem:[%s2188_s0 + $0x1e8] sm:$0xff]  ;;  %v81_v40 = vld [vmem:[%s2188_s0 + $0x1f8] sm:$0xff] }
  0x35   :  { %844 = vst.msk [vmem:[#allocation2 + $0x158] sm:$0xff] %vm800_vm0, %v715_v38  ;;  %v717_v48 = vmax.f32 %v589_v39, 0.0  ;;  %v204_v52 = vmul.f32 %v1010_v1, %v69_v36  ;;  %845 = vst.msk [vmem:[#allocation2 + $0x160] sm:$0xff] %vm800_vm0, %v716_v42  ;;  %v337_v57 = vadd.f32 %v1015_v2, %v202_v46  ;;  %v205_v60 = vmul.f32 %v1010_v1, %v70_v41  ;;  %v473_v36 = vld [vmem:[%s2191_s3 + $0x1c8] sm:$0xff]  ;;  %v80_v39 = vld [vmem:[%s2188_s0 + $0x1f0] sm:$0xff] }
  0x36   :  { %v718_v55 = vmax.f32 %v590_v43, 0.0  ;;  %v719_v56 = vmax.f32 %v591_v44, 0.0  ;;  %v592_v61 = vadd.f32 %v464_v45, %v336_v49  ;;  %v338_v62 = vadd.f32 %v1015_v2, %v203_v51  ;;  %v474_v44 = vld [vmem:[%s2191_s3 + $0x1d0] sm:$0xff]  ;;  %v475_v45 = vld [vmem:[%s2191_s3 + $0x1d8] sm:$0xff] }
  0x37   :  { %846 = vst.msk [vmem:[#allocation2 + $0x168] sm:$0xff] %vm800_vm0, %v717_v48  ;;  %v339_v63 = vadd.f32 %v1015_v2, %v204_v52  ;;  %v206_v3 = vmul.f32 %v1010_v1, %v71_v47  ;;  %v593_v4 = vadd.f32 %v465_v50, %v337_v57  ;;  %v340_v5 = vadd.f32 %v1015_v2, %v205_v60  ;;  %v476_v50 = vld [vmem:[%s2191_s3 + $0x1e0] sm:$0xff] }
  0x38   :  { %847 = vst.msk [vmem:[#allocation2 + $0x170] sm:$0xff] %vm800_vm0, %v718_v55  ;;  %848 = vst.msk [vmem:[#allocation2 + $0x178] sm:$0xff] %vm800_vm0, %v719_v56  ;;  %v207_v7 = vmul.f32 %v1010_v1, %v72_v53  ;;  %v208_v8 = vmul.f32 %v1010_v1, %v73_v54  ;;  %v720_v10 = vmax.f32 %v592_v61, 0.0  ;;  %v594_v11 = vadd.f32 %v466_v58, %v338_v62  ;;  %v477_v54 = vld [vmem:[%s2191_s3 + $0x1e8] sm:$0xff]  ;;  %v82_v57 = vld [vmem:[%s2188_s0 + $0x200] sm:$0xff] }
  0x39   :  { %v595_v12 = vadd.f32 %v467_v59, %v339_v63  ;;  %v341_v13 = vadd.f32 %v1015_v2, %v206_v3  ;;  %v721_v17 = vmax.f32 %v593_v4, 0.0  ;;  %v596_v18 = vadd.f32 %v468_v0, %v340_v5  ;;  %v478_v62 = vld [vmem:[%s2191_s3 + $0x1f0] sm:$0xff]  ;;  %v479_v63 = vld [vmem:[%s2191_s3 + $0x1f8] sm:$0xff]  ;;  %v83_v0 = vld [vmem:[%s2188_s0 + $0x208] sm:$0xff] }
  0x3a   :  { %v342_v19 = vadd.f32 %v1015_v2, %v207_v7  ;;  %v343_v20 = vadd.f32 %v1015_v2, %v208_v8  ;;  %849 = vst.msk [vmem:[#allocation2 + $0x180] sm:$0xff] %vm800_vm0, %v720_v10  ;;  %v722_v23 = vmax.f32 %v594_v11, 0.0  ;;  %v209_v26 = vmul.f32 %v1010_v1, %v74_v9  ;;  %v84_v7 = vld [vmem:[%s2188_s0 + $0x210] sm:$0xff]  ;;  %v85_v8 = vld [vmem:[%s2188_s0 + $0x218] sm:$0xff] }
  0x3b   :  { %v723_v24 = vmax.f32 %v595_v12, 0.0  ;;  %v597_v25 = vadd.f32 %v469_v6, %v341_v13  ;;  %850 = vst.msk [vmem:[#allocation2 + $0x188] sm:$0xff] %vm800_vm0, %v721_v17  ;;  %v724_v28 = vmax.f32 %v596_v18, 0.0  ;;  %v210_v32 = vmul.f32 %v1010_v1, %v75_v16  ;;  %v86_v13 = vld [vmem:[%s2188_s0 + $0x220] sm:$0xff] }
  0x3c   :  { %v598_v29 = vadd.f32 %v470_v14, %v342_v19  ;;  %v599_v30 = vadd.f32 %v471_v15, %v343_v20  ;;  %851 = vst.msk [vmem:[#allocation2 + $0x190] sm:$0xff] %vm800_vm0, %v722_v23  ;;  %v344_v35 = vadd.f32 %v1015_v2, %v209_v26  ;;  %v211_v37 = vmul.f32 %v1010_v1, %v76_v21  ;;  %v480_v17 = vld [vmem:[%s2191_s3 + $0x200] sm:$0xff]  ;;  %v87_v19 = vld [vmem:[%s2188_s0 + $0x228] sm:$0xff]  ;;  %v89_v26 = vld [vmem:[%s2188_s0 + $0x238] sm:$0xff] }
  0x3d   :  { %852 = vst.msk [vmem:[#allocation2 + $0x198] sm:$0xff] %vm800_vm0, %v723_v24  ;;  %v725_v34 = vmax.f32 %v597_v25, 0.0  ;;  %v212_v38 = vmul.f32 %v1010_v1, %v77_v22  ;;  %853 = vst.msk [vmem:[#allocation2 + $0x1a0] sm:$0xff] %vm800_vm0, %v724_v28  ;;  %v345_v43 = vadd.f32 %v1015_v2, %v210_v32  ;;  %v213_v46 = vmul.f32 %v1010_v1, %v78_v27  ;;  %v481_v22 = vld [vmem:[%s2191_s3 + $0x208] sm:$0xff]  ;;  %v88_v25 = vld [vmem:[%s2188_s0 + $0x230] sm:$0xff] }
  0x3e   :  { %v726_v41 = vmax.f32 %v598_v29, 0.0  ;;  %v727_v42 = vmax.f32 %v599_v30, 0.0  ;;  %v600_v47 = vadd.f32 %v472_v31, %v344_v35  ;;  %v346_v48 = vadd.f32 %v1015_v2, %v211_v37  ;;  %v482_v30 = vld [vmem:[%s2191_s3 + $0x210] sm:$0xff]  ;;  %v483_v31 = vld [vmem:[%s2191_s3 + $0x218] sm:$0xff] }
  0x3f   :  { %854 = vst.msk [vmem:[#allocation2 + $0x1a8] sm:$0xff] %vm800_vm0, %v725_v34  ;;  %v347_v49 = vadd.f32 %v1015_v2, %v212_v38  ;;  %v214_v51 = vmul.f32 %v1010_v1, %v79_v33  ;;  %v601_v52 = vadd.f32 %v473_v36, %v345_v43  ;;  %v348_v53 = vadd.f32 %v1015_v2, %v213_v46  ;;  %v484_v36 = vld [vmem:[%s2191_s3 + $0x220] sm:$0xff] }
  0x40   :  { %855 = vst.msk [vmem:[#allocation2 + $0x1b0] sm:$0xff] %vm800_vm0, %v726_v41  ;;  %856 = vst.msk [vmem:[#allocation2 + $0x1b8] sm:$0xff] %vm800_vm0, %v727_v42  ;;  %v215_v55 = vmul.f32 %v1010_v1, %v80_v39  ;;  %v216_v56 = vmul.f32 %v1010_v1, %v81_v40  ;;  %v728_v58 = vmax.f32 %v600_v47, 0.0  ;;  %v602_v59 = vadd.f32 %v474_v44, %v346_v48  ;;  %v485_v40 = vld [vmem:[%s2191_s3 + $0x228] sm:$0xff]  ;;  %v90_v43 = vld [vmem:[%s2188_s0 + $0x240] sm:$0xff] }
  0x41   :  { %v603_v60 = vadd.f32 %v475_v45, %v347_v49  ;;  %v349_v61 = vadd.f32 %v1015_v2, %v214_v51  ;;  %v729_v3 = vmax.f32 %v601_v52, 0.0  ;;  %v604_v4 = vadd.f32 %v476_v50, %v348_v53  ;;  %v486_v48 = vld [vmem:[%s2191_s3 + $0x230] sm:$0xff]  ;;  %v487_v49 = vld [vmem:[%s2191_s3 + $0x238] sm:$0xff]  ;;  %v91_v50 = vld [vmem:[%s2188_s0 + $0x248] sm:$0xff] }
  0x42   :  { %v350_v5 = vadd.f32 %v1015_v2, %v215_v55  ;;  %v351_v6 = vadd.f32 %v1015_v2, %v216_v56  ;;  %857 = vst.msk [vmem:[#allocation2 + $0x1c0] sm:$0xff] %vm800_vm0, %v728_v58  ;;  %v730_v9 = vmax.f32 %v602_v59, 0.0  ;;  %v217_v12 = vmul.f32 %v1010_v1, %v82_v57  ;;  %v92_v55 = vld [vmem:[%s2188_s0 + $0x250] sm:$0xff]  ;;  %v93_v56 = vld [vmem:[%s2188_s0 + $0x258] sm:$0xff] }
  0x43   :  { %v731_v10 = vmax.f32 %v603_v60, 0.0  ;;  %v605_v11 = vadd.f32 %v477_v54, %v349_v61  ;;  %858 = vst.msk [vmem:[#allocation2 + $0x1c8] sm:$0xff] %vm800_vm0, %v729_v3  ;;  %v732_v14 = vmax.f32 %v604_v4, 0.0  ;;  %v218_v18 = vmul.f32 %v1010_v1, %v83_v0  ;;  %v94_v61 = vld [vmem:[%s2188_s0 + $0x260] sm:$0xff] }
  0x44   :  { %v606_v15 = vadd.f32 %v478_v62, %v350_v5  ;;  %v607_v16 = vadd.f32 %v479_v63, %v351_v6  ;;  %859 = vst.msk [vmem:[#allocation2 + $0x1d0] sm:$0xff] %vm800_vm0, %v730_v9  ;;  %v352_v21 = vadd.f32 %v1015_v2, %v217_v12  ;;  %v219_v23 = vmul.f32 %v1010_v1, %v84_v7  ;;  %v488_v3 = vld [vmem:[%s2191_s3 + $0x240] sm:$0xff]  ;;  %v95_v5 = vld [vmem:[%s2188_s0 + $0x268] sm:$0xff]  ;;  %v96_v12 = vld [vmem:[%s2188_s0 + $0x270] sm:$0xff] }
  0x45   :  { %860 = vst.msk [vmem:[#allocation2 + $0x1d8] sm:$0xff] %vm800_vm0, %v731_v10  ;;  %v733_v20 = vmax.f32 %v605_v11, 0.0  ;;  %v220_v24 = vmul.f32 %v1010_v1, %v85_v8  ;;  %861 = vst.msk [vmem:[#allocation2 + $0x1e0] sm:$0xff] %vm800_vm0, %v732_v14  ;;  %v353_v29 = vadd.f32 %v1015_v2, %v218_v18  ;;  %v221_v32 = vmul.f32 %v1010_v1, %v86_v13  ;;  %v489_v8 = vld [vmem:[%s2191_s3 + $0x248] sm:$0xff]  ;;  %v1689_v10 = vld [vmem:[%s2189_s1] ss:$0 sm:$0xff] }
  0x46   :  { %v734_v27 = vmax.f32 %v606_v15, 0.0  ;;  %v735_v28 = vmax.f32 %v607_v16, 0.0  ;;  %v608_v33 = vadd.f32 %v480_v17, %v352_v21  ;;  %v354_v34 = vadd.f32 %v1015_v2, %v219_v23  ;;  %v490_v16 = vld [vmem:[%s2191_s3 + $0x250] sm:$0xff]  ;;  %v491_v17 = vld [vmem:[%s2191_s3 + $0x258] sm:$0xff] }
  0x47   :  { %862 = vst.msk [vmem:[#allocation2 + $0x1e8] sm:$0xff] %vm800_vm0, %v733_v20  ;;  %v355_v35 = vadd.f32 %v1015_v2, %v220_v24  ;;  %v222_v37 = vmul.f32 %v1010_v1, %v87_v19  ;;  %v609_v38 = vadd.f32 %v481_v22, %v353_v29  ;;  %v356_v39 = vadd.f32 %v1015_v2, %v221_v32  ;;  %v492_v22 = vld [vmem:[%s2191_s3 + $0x260] sm:$0xff] }
  0x48   :  { %863 = vst.msk [vmem:[#allocation2 + $0x1f0] sm:$0xff] %vm800_vm0, %v734_v27  ;;  %864 = vst.msk [vmem:[#allocation2 + $0x1f8] sm:$0xff] %vm800_vm0, %v735_v28  ;;  %v223_v41 = vmul.f32 %v1010_v1, %v88_v25  ;;  %v224_v42 = vmul.f32 %v1010_v1, %v89_v26  ;;  %v736_v44 = vmax.f32 %v608_v33, 0.0  ;;  %v610_v45 = vadd.f32 %v482_v30, %v354_v34  ;;  %v493_v26 = vld [vmem:[%s2191_s3 + $0x268] sm:$0xff]  ;;  %v98_v29 = vld [vmem:[%s2188_s0 + $0x280] sm:$0xff] }
  0x49   :  { %v611_v46 = vadd.f32 %v483_v31, %v355_v35  ;;  %v357_v47 = vadd.f32 %v1015_v2, %v222_v37  ;;  %v737_v51 = vmax.f32 %v609_v38, 0.0  ;;  %v612_v52 = vadd.f32 %v484_v36, %v356_v39  ;;  %v494_v34 = vld [vmem:[%s2191_s3 + $0x270] sm:$0xff]  ;;  %v495_v35 = vld [vmem:[%s2191_s3 + $0x278] sm:$0xff]  ;;  %v99_v36 = vld [vmem:[%s2188_s0 + $0x288] sm:$0xff] }
  0x4a   :  { %v358_v53 = vadd.f32 %v1015_v2, %v223_v41  ;;  %v359_v54 = vadd.f32 %v1015_v2, %v224_v42  ;;  %865 = vst.msk [vmem:[#allocation2 + $0x200] sm:$0xff] %vm800_vm0, %v736_v44  ;;  %v738_v57 = vmax.f32 %v610_v45, 0.0  ;;  %v225_v60 = vmul.f32 %v1010_v1, %v90_v43  ;;  %v100_v41 = vld [vmem:[%s2188_s0 + $0x290] sm:$0xff]  ;;  %v101_v42 = vld [vmem:[%s2188_s0 + $0x298] sm:$0xff] }
  0x4b   :  { %v739_v58 = vmax.f32 %v611_v46, 0.0  ;;  %v613_v59 = vadd.f32 %v485_v40, %v357_v47  ;;  %866 = vst.msk [vmem:[#allocation2 + $0x208] sm:$0xff] %vm800_vm0, %v737_v51  ;;  %v740_v62 = vmax.f32 %v612_v52, 0.0  ;;  %v226_v4 = vmul.f32 %v1010_v1, %v91_v50  ;;  %v102_v47 = vld [vmem:[%s2188_s0 + $0x2a0] sm:$0xff] }
  0x4c   :  { %v614_v63 = vadd.f32 %v486_v48, %v358_v53  ;;  %v615_v0 = vadd.f32 %v487_v49, %v359_v54  ;;  %867 = vst.msk [vmem:[#allocation2 + $0x210] sm:$0xff] %vm800_vm0, %v738_v57  ;;  %v360_v7 = vadd.f32 %v1015_v2, %v225_v60  ;;  %v227_v9 = vmul.f32 %v1010_v1, %v92_v55  ;;  %v97_v2 = vld [vmem:[%s2188_s0 + $0x278] sm:$0xff]  ;;  %v1702_v1 = vld [vmem:[%s2190_s2] ss:$0 sm:$0xff]  ;;  %v103_v53 = vld [vmem:[%s2188_s0 + $0x2a8] sm:$0xff] }
  0x4d   :  { %868 = vst.msk [vmem:[#allocation2 + $0x218] sm:$0xff] %vm800_vm0, %v739_v58  ;;  %v741_v6 = vmax.f32 %v613_v59, 0.0  ;;  %v228_v11 = vmul.f32 %v1689_v10, %v93_v56  ;;  %869 = vst.msk [vmem:[#allocation2 + $0x220] sm:$0xff] %vm800_vm0, %v740_v62  ;;  %v361_v15 = vadd.f32 %v1702_v1, %v226_v4  ;;  %v229_v18 = vmul.f32 %v1689_v10, %v94_v61  ;;  %v496_v51 = vld [vmem:[%s2191_s3 + $0x280] sm:$0xff]  ;;  %v497_v56 = vld [vmem:[%s2191_s3 + $0x288] sm:$0xff] }
  0x4e   :  { %v742_v13 = vmax.f32 %v614_v63, 0.0  ;;  %v743_v14 = vmax.f32 %v615_v0, 0.0  ;;  %v616_v19 = vadd.f32 %v488_v3, %v360_v7  ;;  %v362_v20 = vadd.f32 %v1702_v1, %v227_v9  ;;  %v104_v59 = vld [vmem:[%s2188_s0 + $0x2b0] sm:$0xff]  ;;  %v105_v60 = vld [vmem:[%s2188_s0 + $0x2b8] sm:$0xff] }
  0x4f   :  { %870 = vst.msk [vmem:[#allocation2 + $0x228] sm:$0xff] %vm800_vm0, %v741_v6  ;;  %v363_v21 = vadd.f32 %v1702_v1, %v228_v11  ;;  %v230_v23 = vmul.f32 %v1689_v10, %v95_v5  ;;  %v617_v24 = vadd.f32 %v489_v8, %v361_v15  ;;  %v364_v25 = vadd.f32 %v1702_v1, %v229_v18  ;;  %v498_v0 = vld [vmem:[%s2191_s3 + $0x290] sm:$0xff]  ;;  %v499_v3 = vld [vmem:[%s2191_s3 + $0x298] sm:$0xff]  ;;  %v500_v8 = vld [vmem:[%s2191_s3 + $0x2a0] sm:$0xff] }
  0x50   :  { %871 = vst.msk [vmem:[#allocation2 + $0x230] sm:$0xff] %vm800_vm0, %v742_v13  ;;  %872 = vst.msk [vmem:[#allocation2 + $0x238] sm:$0xff] %vm800_vm0, %v743_v14  ;;  %v231_v27 = vmul.f32 %v1689_v10, %v96_v12  ;;  %v232_v28 = vmul.f32 %v1689_v10, %v97_v2  ;;  %v744_v30 = vmax.f32 %v616_v19, 0.0  ;;  %v618_v31 = vadd.f32 %v490_v16, %v362_v20  ;;  %v501_v2 = vld [vmem:[%s2191_s3 + $0x2a8] sm:$0xff]  ;;  %v106_v15 = vld [vmem:[%s2188_s0 + $0x2c0] sm:$0xff] }
  0x51   :  { %v619_v32 = vadd.f32 %v491_v17, %v363_v21  ;;  %v365_v33 = vadd.f32 %v1702_v1, %v230_v23  ;;  %v745_v37 = vmax.f32 %v617_v24, 0.0  ;;  %v620_v38 = vadd.f32 %v492_v22, %v364_v25 }
  0x52   :  { %v366_v39 = vadd.f32 %v1702_v1, %v231_v27  ;;  %v367_v40 = vadd.f32 %v1702_v1, %v232_v28  ;;  %873 = vst.msk [vmem:[#allocation2 + $0x240] sm:$0xff] %vm800_vm0, %v744_v30  ;;  %v746_v43 = vmax.f32 %v618_v31, 0.0  ;;  %v233_v46 = vmul.f32 %v1689_v10, %v98_v29 }
  0x53   :  { %v747_v44 = vmax.f32 %v619_v32, 0.0  ;;  %v621_v45 = vadd.f32 %v493_v26, %v365_v33  ;;  %874 = vst.msk [vmem:[#allocation2 + $0x248] sm:$0xff] %vm800_vm0, %v745_v37  ;;  %v748_v48 = vmax.f32 %v620_v38, 0.0  ;;  %v234_v52 = vmul.f32 %v1689_v10, %v99_v36 }
  0x54   :  { %v622_v49 = vadd.f32 %v494_v34, %v366_v39  ;;  %v623_v50 = vadd.f32 %v495_v35, %v367_v40  ;;  %875 = vst.msk [vmem:[#allocation2 + $0x250] sm:$0xff] %vm800_vm0, %v746_v43  ;;  %v368_v55 = vadd.f32 %v1702_v1, %v233_v46  ;;  %v235_v57 = vmul.f32 %v1689_v10, %v100_v41 }
  0x55   :  { %876 = vst.msk [vmem:[#allocation2 + $0x258] sm:$0xff] %vm800_vm0, %v747_v44  ;;  %v749_v54 = vmax.f32 %v621_v45, 0.0  ;;  %v236_v58 = vmul.f32 %v1689_v10, %v101_v42  ;;  %877 = vst.msk [vmem:[#allocation2 + $0x260] sm:$0xff] %vm800_vm0, %v748_v48  ;;  %v369_v63 = vadd.f32 %v1702_v1, %v234_v52  ;;  %v237_v4 = vmul.f32 %v1689_v10, %v102_v47 }
  0x56   :  { %v750_v61 = vmax.f32 %v622_v49, 0.0  ;;  %v751_v62 = vmax.f32 %v623_v50, 0.0  ;;  %v624_v5 = vadd.f32 %v496_v51, %v368_v55  ;;  %v370_v6 = vadd.f32 %v1702_v1, %v235_v57 }
  0x57   :  { %878 = vst.msk [vmem:[#allocation2 + $0x268] sm:$0xff] %vm800_vm0, %v749_v54  ;;  %v371_v7 = vadd.f32 %v1702_v1, %v236_v58  ;;  %v238_v9 = vmul.f32 %v1689_v10, %v103_v53  ;;  %v625_v11 = vadd.f32 %v497_v56, %v369_v63  ;;  %v372_v12 = vadd.f32 %v1702_v1, %v237_v4 }
  0x58   :  { %879 = vst.msk [vmem:[#allocation2 + $0x270] sm:$0xff] %vm800_vm0, %v750_v61  ;;  %880 = vst.msk [vmem:[#allocation2 + $0x278] sm:$0xff] %vm800_vm0, %v751_v62  ;;  %v239_v13 = vmul.f32 %v1689_v10, %v104_v59  ;;  %v240_v14 = vmul.f32 %v1689_v10, %v105_v60 }
  0x59   :  { %9 = vsyncpa [#allocation3], 0  ;;  %v752_v16 = vmax.f32 %v624_v5, 0.0  ;;  %v626_v17 = vadd.f32 %v498_v0, %v370_v6  ;;  %v627_v18 = vadd.f32 %v499_v3, %v371_v7  ;;  %v373_v19 = vadd.f32 %v1702_v1, %v238_v9  ;;  %v502_v20 = vld [vmem:[%s2191_s3 + $0x2b0] sm:$0xff]  ;;  %v503_v21 = vld [vmem:[%s2191_s3 + $0x2b8] sm:$0xff]  ;;  %s976_s24 = smov [#allocation2]  }
  0x5a   :  { %v107_v22 = vld [vmem:[%s2188_s0 + $0x2c8] sm:$0xff]  ;;  %v753_v23 = vmax.f32 %v625_v11, 0.0  ;;  %v628_v24 = vadd.f32 %v500_v8, %v372_v12  ;;  %v374_v25 = vadd.f32 %v1702_v1, %v239_v13  ;;  %v375_v26 = vadd.f32 %v1702_v1, %v240_v14  ;;  %v108_v27 = vld [vmem:[%s2188_s0 + $0x2d0] sm:$0xff]  ;;  %v109_v28 = vld [vmem:[%s2188_s0 + $0x2d8] sm:$0xff]  ;;  %s934_s25 = sshll.u32 %s976_s24, 4  ;;  %s935_s25 = int_to_ptr.vmem [resolvable:$true] %s934_s25 }
  0x5b   :  { %881 = vst.msk [vmem:[#allocation2 + $0x280] sm:$0xff] %vm800_vm0, %v752_v16  ;;  %v754_v29 = vmax.f32 %v626_v17, 0.0  ;;  %v755_v30 = vmax.f32 %v627_v18, 0.0  ;;  %v629_v31 = vadd.f32 %v501_v2, %v373_v19  ;;  %v241_v32 = vmul.f32 %v1689_v10, %v106_v15  ;;  %v110_v33 = vld [vmem:[%s2188_s0 + $0x2e0] sm:$0xff]  ;;  %v111_v39 = vld [vmem:[%s2188_s0 + $0x2e8] sm:$0xff]  ;;  %v112_v45 = vld [vmem:[%s2188_s0 + $0x2f0] sm:$0xff]  ;;  %p957_p1 = scmp.lt.s32.totalorder %s935_s25, %s935_s25 }
  0x5c   :  { %882 = vst.msk [vmem:[#allocation2 + $0x288] sm:$0xff] %vm800_vm0, %v753_v23  ;;  %v756_v34 = vmax.f32 %v628_v24, 0.0  ;;  %v630_v35 = vadd.f32 %v502_v20, %v374_v25  ;;  %v631_v36 = vadd.f32 %v503_v21, %v375_v26  ;;  %v504_v37 = vld [vmem:[%s2191_s3 + $0x2c0] sm:$0xff]  ;;  %v242_v38 = vmul.f32 %v1689_v10, %v107_v22  ;;  %v505_v42 = vld [vmem:[%s2191_s3 + $0x2c8] sm:$0xff]  ;;  %v113_v46 = vld [vmem:[%s2188_s0 + $0x2f8] sm:$0xff] }
  0x5d   :  { %883 = vst.msk [vmem:[#allocation2 + $0x290] sm:$0xff] %vm800_vm0, %v754_v29  ;;  %884 = vst.msk [vmem:[#allocation2 + $0x298] sm:$0xff] %vm800_vm0, %v755_v30  ;;  %v757_v40 = vmax.f32 %v629_v31, 0.0  ;;  %v376_v41 = vadd.f32 %v1702_v1, %v241_v32  ;;  %v243_v43 = vmul.f32 %v1689_v10, %v108_v27  ;;  %v244_v44 = vmul.f32 %v1689_v10, %v109_v28  ;;  %v506_v50 = vld [vmem:[%s2191_s3 + $0x2d0] sm:$0xff]  ;;  %v507_v51 = vld [vmem:[%s2191_s3 + $0x2d8] sm:$0xff] }
  0x5e   :  { %885 = vst.msk [vmem:[#allocation2 + $0x2a0] sm:$0xff] %vm800_vm0, %v756_v34  ;;  %v758_v47 = vmax.f32 %v630_v35, 0.0  ;;  %v759_v48 = vmax.f32 %v631_v36, 0.0  ;;  %v377_v49 = vadd.f32 %v1702_v1, %v242_v38  ;;  %v245_v52 = vmul.f32 %v1689_v10, %v110_v33  ;;  %v508_v56 = vld [vmem:[%s2191_s3 + $0x2e0] sm:$0xff]  ;;  %v509_v60 = vld [vmem:[%s2191_s3 + $0x2e8] sm:$0xff]  ;;  %v510_v6 = vld [vmem:[%s2191_s3 + $0x2f0] sm:$0xff] }
  0x5f   :  { %886 = vst.msk [vmem:[#allocation2 + $0x2a8] sm:$0xff] %vm800_vm0, %v757_v40  ;;  %v632_v53 = vadd.f32 %v504_v37, %v376_v41  ;;  %v378_v54 = vadd.f32 %v1702_v1, %v243_v43  ;;  %v379_v55 = vadd.f32 %v1702_v1, %v244_v44  ;;  %v246_v57 = vmul.f32 %v1689_v10, %v111_v39  ;;  %v114_v63 = vld [vmem:[%s2188_s0 + $0x300] sm:$0xff]  ;;  %v511_v7 = vld [vmem:[%s2191_s3 + $0x2f8] sm:$0xff]  ;;  %v115_v8 = vld [vmem:[%s2188_s0 + $0x308] sm:$0xff] }
  0x60   :  { %887 = vst.msk [vmem:[#allocation2 + $0x2b0] sm:$0xff] %vm800_vm0, %v758_v47  ;;  %888 = vst.msk [vmem:[#allocation2 + $0x2b8] sm:$0xff] %vm800_vm0, %v759_v48  ;;  %v633_v58 = vadd.f32 %v505_v42, %v377_v49  ;;  %v380_v59 = vadd.f32 %v1702_v1, %v245_v52  ;;  %v247_v61 = vmul.f32 %v1689_v10, %v112_v45  ;;  %v116_v13 = vld [vmem:[%s2188_s0 + $0x310] sm:$0xff]  ;;  %v117_v14 = vld [vmem:[%s2188_s0 + $0x318] sm:$0xff] }
  0x61   :  { %v248_v62 = vmul.f32 %v1689_v10, %v113_v46  ;;  %v760_v0 = vmax.f32 %v632_v53, 0.0  ;;  %v634_v3 = vadd.f32 %v506_v50, %v378_v54  ;;  %v635_v4 = vadd.f32 %v507_v51, %v379_v55  ;;  %v118_v19 = vld [vmem:[%s2188_s0 + $0x320] sm:$0xff]  ;;  %v119_v25 = vld [vmem:[%s2188_s0 + $0x328] sm:$0xff]  ;;  %v120_v31 = vld [vmem:[%s2188_s0 + $0x330] sm:$0xff] }
  0x62   :  { %v381_v5 = vadd.f32 %v1702_v1, %v246_v57  ;;  %v761_v9 = vmax.f32 %v633_v58, 0.0  ;;  %v636_v11 = vadd.f32 %v508_v56, %v380_v59  ;;  %v382_v12 = vadd.f32 %v1702_v1, %v247_v61  ;;  %v512_v23 = vld [vmem:[%s2191_s3 + $0x300] sm:$0xff]  ;;  %v513_v28 = vld [vmem:[%s2191_s3 + $0x308] sm:$0xff]  ;;  %v121_v32 = vld [vmem:[%s2188_s0 + $0x338] sm:$0xff] }
  0x63   :  { %v383_v2 = vadd.f32 %v1702_v1, %v248_v62  ;;  %889 = vst.msk [vmem:[#allocation2 + $0x2c0] sm:$0xff] %vm800_vm0, %v760_v0  ;;  %v762_v15 = vmax.f32 %v634_v3, 0.0  ;;  %v763_v16 = vmax.f32 %v635_v4, 0.0  ;;  %v249_v18 = vmul.f32 %v1689_v10, %v114_v63  ;;  %v514_v36 = vld [vmem:[%s2191_s3 + $0x310] sm:$0xff]  ;;  %v515_v37 = vld [vmem:[%s2191_s3 + $0x318] sm:$0xff]  ;;  %v516_v42 = vld [vmem:[%s2191_s3 + $0x320] sm:$0xff] }
  0x64   :  { %v637_v17 = vadd.f32 %v509_v60, %v381_v5  ;;  %890 = vst.msk [vmem:[#allocation2 + $0x2c8] sm:$0xff] %vm800_vm0, %v761_v9  ;;  %v764_v20 = vmax.f32 %v636_v11, 0.0  ;;  %v638_v21 = vadd.f32 %v510_v6, %v382_v12  ;;  %v250_v24 = vmul.f32 %v1689_v10, %v115_v8  ;;  %v517_v46 = vld [vmem:[%s2191_s3 + $0x328] sm:$0xff]  ;;  %v122_v49 = vld [vmem:[%s2188_s0 + $0x340] sm:$0xff]  ;;  %v518_v54 = vld [vmem:[%s2191_s3 + $0x330] sm:$0xff] }
  0x65   :  { %v639_v22 = vadd.f32 %v511_v7, %v383_v2  ;;  %891 = vst.msk [vmem:[#allocation2 + $0x2d0] sm:$0xff] %vm800_vm0, %v762_v15  ;;  %892 = vst.msk [vmem:[#allocation2 + $0x2d8] sm:$0xff] %vm800_vm0, %v763_v16  ;;  %v384_v27 = vadd.f32 %v1702_v1, %v249_v18  ;;  %v251_v29 = vmul.f32 %v1689_v10, %v116_v13  ;;  %v519_v55 = vld [vmem:[%s2191_s3 + $0x338] sm:$0xff]  ;;  %v123_v56 = vld [vmem:[%s2188_s0 + $0x348] sm:$0xff] }
  0x66   :  { %v765_v26 = vmax.f32 %v637_v17, 0.0  ;;  %v252_v30 = vmul.f32 %v1689_v10, %v117_v14  ;;  %893 = vst.msk [vmem:[#allocation2 + $0x2e0] sm:$0xff] %vm800_vm0, %v764_v20  ;;  %v766_v33 = vmax.f32 %v638_v21, 0.0  ;;  %v385_v35 = vadd.f32 %v1702_v1, %v250_v24  ;;  %v124_v61 = vld [vmem:[%s2188_s0 + $0x350] sm:$0xff]  ;;  %v125_v62 = vld [vmem:[%s2188_s0 + $0x358] sm:$0xff]  ;;  %v126_v5 = vld [vmem:[%s2188_s0 + $0x360] sm:$0xff] }
  0x67   :  { %v767_v34 = vmax.f32 %v639_v22, 0.0  ;;  %v253_v38 = vmul.f32 %v1689_v10, %v118_v19  ;;  %v640_v39 = vadd.f32 %v512_v23, %v384_v27  ;;  %v386_v40 = vadd.f32 %v1702_v1, %v251_v29  ;;  %v520_v9 = vld [vmem:[%s2191_s3 + $0x340] sm:$0xff]  ;;  %v127_v12 = vld [vmem:[%s2188_s0 + $0x368] sm:$0xff]  ;;  %v128_v17 = vld [vmem:[%s2188_s0 + $0x370] sm:$0xff] }
  0x68   :  { %894 = vst.msk [vmem:[#allocation2 + $0x2e8] sm:$0xff] %vm800_vm0, %v765_v26  ;;  %v387_v41 = vadd.f32 %v1702_v1, %v252_v30  ;;  %v254_v43 = vmul.f32 %v1689_v10, %v119_v25  ;;  %895 = vst.msk [vmem:[#allocation2 + $0x2f0] sm:$0xff] %vm800_vm0, %v766_v33  ;;  %v641_v44 = vadd.f32 %v513_v28, %v385_v35  ;;  %v521_v14 = vld [vmem:[%s2191_s3 + $0x348] sm:$0xff]  ;;  %v129_v18 = vld [vmem:[%s2188_s0 + $0x378] sm:$0xff] }
  0x69   :  { %896 = vst.msk [vmem:[#allocation2 + $0x2f8] sm:$0xff] %vm800_vm0, %v767_v34  ;;  %v388_v45 = vadd.f32 %v1702_v1, %v253_v38  ;;  %v255_v47 = vmul.f32 %v1689_v10, %v120_v31  ;;  %v256_v48 = vmul.f32 %v1689_v10, %v121_v32  ;;  %v768_v50 = vmax.f32 %v640_v39, 0.0  ;;  %v522_v22 = vld [vmem:[%s2191_s3 + $0x350] sm:$0xff]  ;;  %v523_v23 = vld [vmem:[%s2191_s3 + $0x358] sm:$0xff]  ;;  %v524_v28 = vld [vmem:[%s2191_s3 + $0x360] sm:$0xff] }
  0x6a   :  { %v642_v51 = vadd.f32 %v514_v36, %v386_v40  ;;  %v643_v52 = vadd.f32 %v515_v37, %v387_v41  ;;  %v389_v53 = vadd.f32 %v1702_v1, %v254_v43  ;;  %v769_v57 = vmax.f32 %v641_v44, 0.0  ;;  %v525_v32 = vld [vmem:[%s2191_s3 + $0x368] sm:$0xff]  ;;  %v130_v35 = vld [vmem:[%s2188_s0 + $0x380] sm:$0xff]  ;;  %v526_v40 = vld [vmem:[%s2191_s3 + $0x370] sm:$0xff] }
  0x6b   :  { %v644_v58 = vadd.f32 %v516_v42, %v388_v45  ;;  %v390_v59 = vadd.f32 %v1702_v1, %v255_v47  ;;  %v391_v60 = vadd.f32 %v1702_v1, %v256_v48  ;;  %897 = vst.msk [vmem:[#allocation2 + $0x300] sm:$0xff] %vm800_vm0, %v768_v50  ;;  %v257_v4 = vmul.f32 %v1689_v10, %v122_v49  ;;  %v527_v41 = vld [vmem:[%s2191_s3 + $0x378] sm:$0xff]  ;;  %v131_v42 = vld [vmem:[%s2188_s0 + $0x388] sm:$0xff]  ;;  %v132_v47 = vld [vmem:[%s2188_s0 + $0x390] sm:$0xff] }
  0x6c   :  { %v770_v63 = vmax.f32 %v642_v51, 0.0  ;;  %v771_v0 = vmax.f32 %v643_v52, 0.0  ;;  %v645_v3 = vadd.f32 %v517_v46, %v389_v53  ;;  %898 = vst.msk [vmem:[#allocation2 + $0x308] sm:$0xff] %vm800_vm0, %v769_v57  ;;  %v258_v11 = vmul.f32 %v1689_v10, %v123_v56  ;;  %v133_v48 = vld [vmem:[%s2188_s0 + $0x398] sm:$0xff]  ;;  %v134_v53 = vld [vmem:[%s2188_s0 + $0x3a0] sm:$0xff] }
  0x6d   :  { %v772_v6 = vmax.f32 %v644_v58, 0.0  ;;  %v646_v7 = vadd.f32 %v518_v54, %v390_v59  ;;  %v647_v8 = vadd.f32 %v519_v55, %v391_v60  ;;  %v392_v13 = vadd.f32 %v1702_v1, %v257_v4  ;;  %v528_v57 = vld [vmem:[%s2191_s3 + $0x380] sm:$0xff]  ;;  %v135_v59 = vld [vmem:[%s2188_s0 + $0x3a8] sm:$0xff]  ;;  %v137_v4 = vld [vmem:[%s2188_s0 + $0x3b8] sm:$0xff] }
  0x6e   :  { %899 = vst.msk [vmem:[#allocation2 + $0x310] sm:$0xff] %vm800_vm0, %v770_v63  ;;  %900 = vst.msk [vmem:[#allocation2 + $0x318] sm:$0xff] %vm800_vm0, %v771_v0  ;;  %v773_v2 = vmax.f32 %v645_v3, 0.0  ;;  %v259_v15 = vmul.f32 %v1689_v10, %v124_v61  ;;  %v260_v16 = vmul.f32 %v1689_v10, %v125_v62  ;;  %v393_v21 = vadd.f32 %v1702_v1, %v258_v11  ;;  %v529_v62 = vld [vmem:[%s2191_s3 + $0x388] sm:$0xff]  ;;  %v136_v3 = vld [vmem:[%s2188_s0 + $0x3b0] sm:$0xff] }
  0x6f   :  { %901 = vst.msk [vmem:[#allocation2 + $0x320] sm:$0xff] %vm800_vm0, %v772_v6  ;;  %v774_v19 = vmax.f32 %v646_v7, 0.0  ;;  %v775_v20 = vmax.f32 %v647_v8, 0.0  ;;  %v261_v24 = vmul.f32 %v1689_v10, %v126_v5  ;;  %v648_v25 = vadd.f32 %v520_v9, %v392_v13  ;;  %v530_v8 = vld [vmem:[%s2191_s3 + $0x390] sm:$0xff]  ;;  %v531_v9 = vld [vmem:[%s2191_s3 + $0x398] sm:$0xff] }
  0x70   :  { %902 = vst.msk [vmem:[#allocation2 + $0x328] sm:$0xff] %vm800_vm0, %v773_v2  ;;  %v394_v26 = vadd.f32 %v1702_v1, %v259_v15  ;;  %v395_v27 = vadd.f32 %v1702_v1, %v260_v16  ;;  %v262_v29 = vmul.f32 %v1689_v10, %v127_v12  ;;  %v649_v30 = vadd.f32 %v521_v14, %v393_v21  ;;  %v532_v14 = vld [vmem:[%s2191_s3 + $0x3a0] sm:$0xff] }
  0x71   :  { %903 = vst.msk [vmem:[#allocation2 + $0x330] sm:$0xff] %vm800_vm0, %v774_v19  ;;  %904 = vst.msk [vmem:[#allocation2 + $0x338] sm:$0xff] %vm800_vm0, %v775_v20  ;;  %v396_v31 = vadd.f32 %v1702_v1, %v261_v24  ;;  %v263_v33 = vmul.f32 %v1689_v10, %v128_v17  ;;  %v264_v34 = vmul.f32 %v1689_v10, %v129_v18  ;;  %v776_v36 = vmax.f32 %v648_v25, 0.0  ;;  %v533_v18 = vld [vmem:[%s2191_s3 + $0x3a8] sm:$0xff]  ;;  %v138_v21 = vld [vmem:[%s2188_s0 + $0x3c0] sm:$0xff] }
  0x72   :  { %v650_v37 = vadd.f32 %v522_v22, %v394_v26  ;;  %v651_v38 = vadd.f32 %v523_v23, %v395_v27  ;;  %v397_v39 = vadd.f32 %v1702_v1, %v262_v29  ;;  %v777_v43 = vmax.f32 %v649_v30, 0.0  ;;  %v534_v26 = vld [vmem:[%s2191_s3 + $0x3b0] sm:$0xff]  ;;  %v535_v27 = vld [vmem:[%s2191_s3 + $0x3b8] sm:$0xff] }
  0x73   :  { %v652_v44 = vadd.f32 %v524_v28, %v396_v31  ;;  %v398_v45 = vadd.f32 %v1702_v1, %v263_v33  ;;  %v399_v46 = vadd.f32 %v1702_v1, %v264_v34  ;;  %905 = vst.msk [vmem:[#allocation2 + $0x340] sm:$0xff] %vm800_vm0, %v776_v36  ;;  %v265_v52 = vmul.f32 %v1689_v10, %v130_v35  ;;  %v139_v28 = vld [vmem:[%s2188_s0 + $0x3c8] sm:$0xff]  ;;  %v140_v33 = vld [vmem:[%s2188_s0 + $0x3d0] sm:$0xff]  ;;  %v141_v34 = vld [vmem:[%s2188_s0 + $0x3d8] sm:$0xff] }
  0x74   :  { %v778_v49 = vmax.f32 %v650_v37, 0.0  ;;  %v779_v50 = vmax.f32 %v651_v38, 0.0  ;;  %v653_v51 = vadd.f32 %v525_v32, %v397_v39  ;;  %906 = vst.msk [vmem:[#allocation2 + $0x348] sm:$0xff] %vm800_vm0, %v777_v43  ;;  %v266_v58 = vmul.f32 %v1689_v10, %v131_v42  ;;  %v142_v39 = vld [vmem:[%s2188_s0 + $0x3e0] sm:$0xff] }
  0x75   :  { %v780_v54 = vmax.f32 %v652_v44, 0.0  ;;  %v654_v55 = vadd.f32 %v526_v40, %v398_v45  ;;  %v655_v56 = vadd.f32 %v527_v41, %v399_v46  ;;  %v400_v61 = vadd.f32 %v1702_v1, %v265_v52  ;;  %v536_v43 = vld [vmem:[%s2191_s3 + $0x3c0] sm:$0xff]  ;;  %v143_v45 = vld [vmem:[%s2188_s0 + $0x3e8] sm:$0xff]  ;;  %v145_v52 = vld [vmem:[%s2188_s0 + $0x3f8] sm:$0xff] }
  0x76   :  { %907 = vst.msk [vmem:[#allocation2 + $0x350] sm:$0xff] %vm800_vm0, %v778_v49  ;;  %908 = vst.msk [vmem:[#allocation2 + $0x358] sm:$0xff] %vm800_vm0, %v779_v50  ;;  %v781_v60 = vmax.f32 %v653_v51, 0.0  ;;  %v267_v63 = vmul.f32 %v1689_v10, %v132_v47  ;;  %v268_v0 = vmul.f32 %v1689_v10, %v133_v48  ;;  %v401_v7 = vadd.f32 %v1702_v1, %v266_v58  ;;  %v537_v48 = vld [vmem:[%s2191_s3 + $0x3c8] sm:$0xff]  ;;  %v144_v51 = vld [vmem:[%s2188_s0 + $0x3f0] sm:$0xff] }
  0x77   :  { %909 = vst.msk [vmem:[#allocation2 + $0x360] sm:$0xff] %vm800_vm0, %v780_v54  ;;  %v782_v5 = vmax.f32 %v654_v55, 0.0  ;;  %v783_v6 = vmax.f32 %v655_v56, 0.0  ;;  %v269_v11 = vmul.f32 %v1689_v10, %v134_v53  ;;  %v656_v12 = vadd.f32 %v528_v57, %v400_v61  ;;  %v538_v56 = vld [vmem:[%s2191_s3 + $0x3d0] sm:$0xff]  ;;  %v539_v57 = vld [vmem:[%s2191_s3 + $0x3d8] sm:$0xff] }
  0x78   :  { %910 = vst.msk [vmem:[#allocation2 + $0x368] sm:$0xff] %vm800_vm0, %v781_v60  ;;  %v402_v2 = vadd.f32 %v1702_v1, %v267_v63  ;;  %v403_v13 = vadd.f32 %v1702_v1, %v268_v0  ;;  %v270_v15 = vmul.f32 %v1689_v10, %v135_v59  ;;  %v657_v16 = vadd.f32 %v529_v62, %v401_v7  ;;  %v540_v62 = vld [vmem:[%s2191_s3 + $0x3e0] sm:$0xff] }
  0x79   :  { %911 = vst.msk [vmem:[#allocation2 + $0x370] sm:$0xff] %vm800_vm0, %v782_v5  ;;  %912 = vst.msk [vmem:[#allocation2 + $0x378] sm:$0xff] %vm800_vm0, %v783_v6  ;;  %v404_v17 = vadd.f32 %v1702_v1, %v269_v11  ;;  %v271_v19 = vmul.f32 %v1689_v10, %v136_v3  ;;  %v272_v20 = vmul.f32 %v1689_v10, %v137_v4  ;;  %v784_v22 = vmax.f32 %v656_v12, 0.0  ;;  %v541_v4 = vld [vmem:[%s2191_s3 + $0x3e8] sm:$0xff]  ;;  %v542_v12 = vld [vmem:[%s2191_s3 + $0x3f0] sm:$0xff] }
  0x7a   :  { %v658_v23 = vadd.f32 %v530_v8, %v402_v2  ;;  %v659_v24 = vadd.f32 %v531_v9, %v403_v13  ;;  %v405_v25 = vadd.f32 %v1702_v1, %v270_v15  ;;  %v785_v29 = vmax.f32 %v657_v16, 0.0  ;;  %v543_v2 = vld [vmem:[%s2191_s3 + $0x3f8] sm:$0xff]  ;;  %s952_s3 = scalar_lea.vmem %s935_s25, 16384 }
  0x7b   :  { %v660_v30 = vadd.f32 %v532_v14, %v404_v17  ;;  %v406_v31 = vadd.f32 %v1702_v1, %v271_v19  ;;  %v407_v32 = vadd.f32 %v1702_v1, %v272_v20  ;;  %913 = vst.msk [vmem:[#allocation2 + $0x380] sm:$0xff] %vm800_vm0, %v784_v22  ;;  %v273_v38 = vmul.f32 %v1689_v10, %v138_v21  ;;  %p953_p0 = scmp.ne.s32.totalorder %s935_s25, %s952_s3  ;;  %p958_p2 = scmp.lt.s32.totalorder %s952_s3, %s952_s3 }
  0x7c   :  { %v786_v35 = vmax.f32 %v658_v23, 0.0  ;;  %v787_v36 = vmax.f32 %v659_v24, 0.0  ;;  %v661_v37 = vadd.f32 %v533_v18, %v405_v25  ;;  %914 = vst.msk [vmem:[#allocation2 + $0x388] sm:$0xff] %vm800_vm0, %v785_v29  ;;  %v274_v44 = vmul.f32 %v1689_v10, %v139_v28 }
  0x7d   :  { %v788_v40 = vmax.f32 %v660_v30, 0.0  ;;  %v662_v41 = vadd.f32 %v534_v26, %v406_v31  ;;  %v663_v42 = vadd.f32 %v535_v27, %v407_v32  ;;  %v408_v47 = vadd.f32 %v1702_v1, %v273_v38  ;;  %p959_p3 = por %p958_p2, %p957_p1 }
  0x7e   :  { %915 = vst.msk [vmem:[#allocation2 + $0x390] sm:$0xff] %vm800_vm0, %v786_v35  ;;  %916 = vst.msk [vmem:[#allocation2 + $0x398] sm:$0xff] %vm800_vm0, %v787_v36  ;;  %v789_v46 = vmax.f32 %v661_v37, 0.0  ;;  %v275_v49 = vmul.f32 %v1689_v10, %v140_v33  ;;  %v276_v50 = vmul.f32 %v1689_v10, %v141_v34  ;;  %v409_v55 = vadd.f32 %v1702_v1, %v274_v44 }
  0x7f   :  { %917 = vst.msk [vmem:[#allocation2 + $0x3a0] sm:$0xff] %vm800_vm0, %v788_v40  ;;  %v790_v53 = vmax.f32 %v662_v41, 0.0  ;;  %v791_v54 = vmax.f32 %v663_v42, 0.0  ;;  %v277_v58 = vmul.f32 %v1689_v10, %v142_v39  ;;  %v664_v59 = vadd.f32 %v536_v43, %v408_v47  ;;  %p960_p4 = pnand %p959_p3, %p953_p0 }
  0x80   :  { %918 = vst.msk [vmem:[#allocation2 + $0x3a8] sm:$0xff] %vm800_vm0, %v789_v46  ;;  %v410_v60 = vadd.f32 %v1702_v1, %v275_v49  ;;  %v411_v61 = vadd.f32 %v1702_v1, %v276_v50  ;;  %v278_v63 = vmul.f32 %v1689_v10, %v143_v45  ;;  %v665_v0 = vadd.f32 %v537_v48, %v409_v55 }
  0x81   :  { %919 = vst.msk [vmem:[#allocation2 + $0x3b0] sm:$0xff] %vm800_vm0, %v790_v53  ;;  %920 = vst.msk [vmem:[#allocation2 + $0x3b8] sm:$0xff] %vm800_vm0, %v791_v54  ;;  %v412_v3 = vadd.f32 %v1702_v1, %v277_v58  ;;  %v279_v5 = vmul.f32 %v1689_v10, %v144_v51  ;;  %v280_v6 = vmul.f32 %v1689_v10, %v145_v52  ;;  %v792_v7 = vmax.f32 %v664_v59, 0.0 }
  0x82   :  { %v666_v8 = vadd.f32 %v538_v56, %v410_v60  ;;  %v667_v9 = vadd.f32 %v539_v57, %v411_v61  ;;  %v413_v11 = vadd.f32 %v1702_v1, %v278_v63  ;;  %v793_v13 = vmax.f32 %v665_v0, 0.0 }
  0x83   :  { %v668_v14 = vadd.f32 %v540_v62, %v412_v3  ;;  %v414_v15 = vadd.f32 %v1702_v1, %v279_v5  ;;  %v415_v16 = vadd.f32 %v1702_v1, %v280_v6  ;;  %921 = vst.msk [vmem:[#allocation2 + $0x3c0] sm:$0xff] %vm800_vm0, %v792_v7 }
  0x84   :  { %v794_v10 = vmax.f32 %v666_v8, 0.0  ;;  %v795_v17 = vmax.f32 %v667_v9, 0.0  ;;  %v669_v18 = vadd.f32 %v541_v4, %v413_v11  ;;  %922 = vst.msk [vmem:[#allocation2 + $0x3c8] sm:$0xff] %vm800_vm0, %v793_v13 }
  0x85   :  { %v796_v19 = vmax.f32 %v668_v14, 0.0  ;;  %v670_v20 = vadd.f32 %v542_v12, %v414_v15  ;;  %v671_v21 = vadd.f32 %v543_v2, %v415_v16 }
  0x86   :  { %923 = vst.msk [vmem:[#allocation2 + $0x3d0] sm:$0xff] %vm800_vm0, %v794_v10  ;;  %924 = vst.msk [vmem:[#allocation2 + $0x3d8] sm:$0xff] %vm800_vm0, %v795_v17  ;;  %v797_v22 = vmax.f32 %v669_v18, 0.0 }
  0x87   :  { %925 = vst.msk [vmem:[#allocation2 + $0x3e0] sm:$0xff] %vm800_vm0, %v796_v19  ;;  %v798_v1 = vmax.f32 %v670_v20, 0.0  ;;  %v799_v23 = vmax.f32 %v671_v21, 0.0 }
  0x88   :  { %926 = vst.msk [vmem:[#allocation2 + $0x3e8] sm:$0xff] %vm800_vm0, %v797_v22 }
  0x89   :  { %927 = vst.msk [vmem:[#allocation2 + $0x3f0] sm:$0xff] %vm800_vm0, %v798_v1  ;;  %928 = vst.msk [vmem:[#allocation2 + $0x3f8] sm:$0xff] %vm800_vm0, %v799_v23 }
  0x8a   :  { %963 = shalt.err (!%p960_p4)
}
  0x8b   :  { %s964_s28 = scalar_lea.hbm %s2192_s4, 16384 }
  0x8c   :  { %p965_p5 = scmp.ne.s32.totalorder %s2192_s4, %s964_s28  ;;  %p968_p6 = scmp.lt.u32.totalorder %s964_s28, %s2192_s4 }
  0x8e   :  { %p970_p7 = pnand %p968_p6, %p965_p5 }
  0x90   :  { %973 = shalt.err (!%p970_p7)
}
  0x91   :  { %s977_s7 = smov 128   ;;  %s978_s8 = smov 8  }
  0x92   :  { %940 = dma.vmem_to_hbm [thread:$0]  %s935_s25, 16384, %s2192_s4, [#allocation3], %s977_s7, %s977_s7, %s978_s8  }
  0x93   :  { %974 = dma.done.wait [#allocation3], 16384  }
  0x94   :  { %975 = vsyncadd [#allocation3], 4294950912 }
  0x95   :  { %944 = vsyncpa [#allocation3], 1 }

</bundles_post_ra>
